<compile_context>
chip_gen: v7x
topology: tpu7x:2x2x1
jax: 0.10.0
libtpu: 0.0.40
codegen_flags: <defaults>
</compile_context>

<pallas_src>
import jax
import jax.numpy as jnp
from jax.experimental import pallas as pl
from jax.experimental.pallas import tpu as pltpu


LATENT = 256
HIDDEN = 1024
NUM_CLASSES = 1


def _disc_kernel(x_ref, w1_ref, b1_ref, w2_ref, b2_ref, w3_ref, b3_ref, o_ref):
    # ----- Layer 1: Linear(LATENT, HIDDEN) + ReLU --------------------------
    # bf16 x bf16 MXU matmul, f32 accumulation; epilogue in f32.
    x16 = x_ref[...].astype(jnp.bfloat16)
    h1 = jnp.dot(x16, w1_ref[...], preferred_element_type=jnp.float32)
    h1 = jnp.maximum(h1 + b1_ref[...], 0.0)

    # ----- Layer 2: Linear(HIDDEN, HIDDEN) + ReLU --------------------------
    h2 = jnp.dot(h1.astype(jnp.bfloat16), w2_ref[...],
                 preferred_element_type=jnp.float32)
    # Fuse the w3 scale into the ReLU epilogue so h2 is consumed while live
    # in vregs (no extra VMEM round-trip for the (tb, HIDDEN) f32 temp).
    h2w = jnp.maximum(h2 + b2_ref[...], 0.0) * w3_ref[...]

    # ----- Layer 3: Linear(HIDDEN, 1) + Sigmoid ----------------------------
    # N=1 matmul wastes the MXU: VPU multiply (above) + XLU lane reduction.
    logits = jnp.sum(h2w, axis=-1, keepdims=True) + b3_ref[...]
    # exp and approx reciprocal both run on the otherwise-idle EUP slot.
    sig = pl.reciprocal(1.0 + jnp.exp(-logits), approx=True)
    o_ref[...] = sig.astype(o_ref.dtype)


def _pick_block_b(batch):
    """Largest comfortable batch tile.

    tb=1024 keeps total VMEM (resident weights + pipelined x/out tiles + f32
    intermediates) around ~20 MiB, within the 48 MiB limit we request below.
    For B >= 512 cap at B // 2 so the 1-D "parallel" grid has >= 2 steps and
    v7x's second TensorCore is not idle (no effect on v5e/v6e).
    """
    limit = batch // 2 if batch >= 512 else batch
    for cand in (1024, 512, 256, 128, 64, 32, 16, 8):
        if cand <= limit and batch % cand == 0:
            return cand
    return batch


def discriminator_forward(h, params, *, block_b=None):
    """h: (B, LATENT) float32. Returns (B, NUM_CLASSES) float32."""
    w1, b1, w2, b2, w3, b3 = params
    B = h.shape[0]
    tb = _pick_block_b(B) if block_b is None else block_b
    grid = (pl.cdiv(B, tb),)

    def build(single_buffer_weights):
        # Constant index_map => block never changes => weights stay
        # VMEM-resident across all batch tiles (fetched once per core).
        if single_buffer_weights and hasattr(pl, "Buffered"):
            wkw = dict(pipeline_mode=pl.Buffered(1))   # no 2x buffering needed
        else:
            wkw = {}
        const = lambda shape: pl.BlockSpec(shape, lambda i: (0, 0), **wkw)

        return pl.pallas_call(
            _disc_kernel,
            out_shape=jax.ShapeDtypeStruct((B, NUM_CLASSES), jnp.float32),
            grid_spec=pltpu.PrefetchScalarGridSpec(
                num_scalar_prefetch=0,
                grid=grid,
                in_specs=[
                    pl.BlockSpec((tb, LATENT), lambda i: (i, 0)),   # x tiles
                    const(w1.shape), const(b1.shape),               # resident
                    const(w2.shape), const(b2.shape),
                    const(w3.shape), const(b3.shape),
                ],
                out_specs=pl.BlockSpec((tb, NUM_CLASSES), lambda i: (i, 0)),
            ),
            compiler_params=pltpu.CompilerParams(
                dimension_semantics=("parallel",),      # megacore-shard tiles
                vmem_limit_bytes=48 * 1024 * 1024,
            ),
        )

    try:
        return build(True)(h, w1, b1, w2, b2, w3, b3)
    except Exception:
        # Some Pallas versions reject single-buffered resident blocks; the
        # default double-buffered path is functionally identical.
        return build(False)(h, w1, b1, w2, b2, w3, b3)


def init_params(key):
    """Deterministic init mimicking PyTorch nn.Linear default
    (uniform(-1/sqrt(fan_in), 1/sqrt(fan_in)))."""
    def linear(key, fan_in, fan_out):
        kw, kb = jax.random.split(key)
        bound = 1.0 / jnp.sqrt(fan_in)
        w = jax.random.uniform(kw, (fan_in, fan_out), jnp.float32, -bound, bound)
        b = jax.random.uniform(kb, (1, fan_out), jnp.float32, -bound, bound)
        return w, b

    k1, k2, k3 = jax.random.split(key, 3)
    w1, b1 = linear(k1, LATENT, HIDDEN)
    w2, b2 = linear(k2, HIDDEN, HIDDEN)
    w3, b3 = linear(k3, HIDDEN, NUM_CLASSES)

    # Big matrices shipped as bf16 (halves weight HBM traffic and matches the
    # bf16 MXU path); biases and the tiny w3 row stay f32 (VPU path).
    w1 = w1.astype(jnp.bfloat16)
    w2 = w2.astype(jnp.bfloat16)
    w3_row = w3.T                      # (1, HIDDEN), f32, applied on the VPU
    return (w1, b1, w2, b2, w3_row, b3)


def reference_forward(h, params):
    """Pure-JAX reference using the SAME bf16 quantization of the MXU inputs
    as the kernel (isolates kernel-vs-reference to accumulation order and the
    EUP approx reciprocal)."""
    w1, b1, w2, b2, w3_row, b3 = params
    h1 = jnp.maximum(
        jnp.dot(h.astype(jnp.bfloat16), w1, preferred_element_type=jnp.float32)
        + b1, 0.0)
    h2 = jnp.maximum(
        jnp.dot(h1.astype(jnp.bfloat16), w2, preferred_element_type=jnp.float32)
        + b2, 0.0)
    logits = jnp.sum(h2 * w3_row, axis=-1, keepdims=True) + b3
    return 1.0 / (1.0 + jnp.exp(-logits))


def reference_forward_f32(h, params):
    """Full-f32 reference of the original PyTorch module semantics."""
    w1, b1, w2, b2, w3_row, b3 = params
    x = jnp.maximum(h @ w1.astype(jnp.float32) + b1, 0.0)
    x = jnp.maximum(x @ w2.astype(jnp.float32) + b2, 0.0)
    logits = x @ w3_row.T + b3
    return 1.0 / (1.0 + jnp.exp(-logits))


if __name__ == "__main__":
    key = jax.random.PRNGKey(0)
    k_params, k_x = jax.random.split(key)

    params = init_params(k_params)
    B = 8
    h = jax.random.normal(k_x, (B, LATENT), jnp.float32)

    y = discriminator_forward(h, params)
    jax.block_until_ready(y)
    assert y.shape == (B, NUM_CLASSES)

    # Tight check vs. the quantization-matched reference.
    y_ref = reference_forward(h, params)
    assert jnp.allclose(y, y_ref, atol=5e-3, rtol=5e-3), float(
        jnp.max(jnp.abs(y - y_ref)))

    # Loose sanity check vs. the original full-f32 module semantics
    # (difference = intentional bf16 MXU quantization + approx reciprocal).
    y_f32 = reference_forward_f32(h, params)
    assert jnp.allclose(y, y_f32, atol=3e-2, rtol=3e-2), float(
        jnp.max(jnp.abs(y - y_f32)))

    print("KERNEL_OK")
</pallas_src>

<mosaic_0001>
module attributes {stable_mosaic.version = 11 : i64} {
  func.func @_disc_kernel(%arg0: i32, %arg1: memref<8x256xf32, #tpu.memory_space<vmem>>, %arg2: memref<256x1024xbf16, #tpu.memory_space<vmem>>, %arg3: memref<1x1024xf32, #tpu.memory_space<vmem>>, %arg4: memref<1024x1024xbf16, #tpu.memory_space<vmem>>, %arg5: memref<1x1024xf32, #tpu.memory_space<vmem>>, %arg6: memref<1x1024xf32, #tpu.memory_space<vmem>>, %arg7: memref<1x1xf32, #tpu.memory_space<vmem>>, %arg8: memref<8x1xf32, #tpu.memory_space<vmem>>) attributes {dimension_semantics = [#tpu.dimension_semantics<parallel>], iteration_bounds = array<i64: 1>, scalar_prefetch = 0 : i64, scratch_operands = 0 : i64, tpu.core_type = #tpu.core_type<tc>, window_params = [{transform_indices = @transform_0, window_bounds = array<i64: 8, 256>}, {pipeline_mode = #tpu.pipeline_mode<synchronous>, transform_indices = @transform_1, window_bounds = array<i64: 256, 1024>}, {pipeline_mode = #tpu.pipeline_mode<synchronous>, transform_indices = @transform_2, window_bounds = array<i64: 1, 1024>}, {pipeline_mode = #tpu.pipeline_mode<synchronous>, transform_indices = @transform_3, window_bounds = array<i64: 1024, 1024>}, {pipeline_mode = #tpu.pipeline_mode<synchronous>, transform_indices = @transform_4, window_bounds = array<i64: 1, 1024>}, {pipeline_mode = #tpu.pipeline_mode<synchronous>, transform_indices = @transform_5, window_bounds = array<i64: 1, 1024>}, {pipeline_mode = #tpu.pipeline_mode<synchronous>, transform_indices = @transform_6, window_bounds = array<i64: 1, 1>}, {transform_indices = @transform_7, window_bounds = array<i64: 8, 1>}]} {
    %c0 = arith.constant 0 : index
    %c0_0 = arith.constant 0 : index
    %0 = vector.load %arg1[%c0, %c0_0] : memref<8x256xf32, #tpu.memory_space<vmem>>, vector<8x256xf32>
    %1 = arith.truncf %0 : vector<8x256xf32> to vector<8x256xbf16>
    %c0_1 = arith.constant 0 : index
    %c0_2 = arith.constant 0 : index
    %2 = vector.load %arg2[%c0_1, %c0_2] : memref<256x1024xbf16, #tpu.memory_space<vmem>>, vector<256x1024xbf16>
    %cst = arith.constant dense<0.000000e+00> : vector<8x1024xf32>
    %3 = tpu.matmul %1, %2, %cst {dimension_numbers = #tpu.dot_dimension_numbers<[1], [0], [0], [1], [0, 0, 1, 1], [], []>} : vector<8x256xbf16>, vector<256x1024xbf16>, vector<8x1024xf32> -> vector<8x1024xf32>
    %c0_3 = arith.constant 0 : index
    %c0_4 = arith.constant 0 : index
    %4 = vector.load %arg3[%c0_3, %c0_4] : memref<1x1024xf32, #tpu.memory_space<vmem>>, vector<1x1024xf32>
    %5 = vector.broadcast %4 : vector<1x1024xf32> to vector<8x1024xf32>
    %6 = arith.addf %3, %5 : vector<8x1024xf32>
    %cst_5 = arith.constant 0.000000e+00 : f32
    %7 = vector.broadcast %cst_5 : f32 to vector<8x1024xf32>
    %8 = arith.maximumf %6, %7 : vector<8x1024xf32>
    %9 = arith.truncf %8 : vector<8x1024xf32> to vector<8x1024xbf16>
    %c0_6 = arith.constant 0 : index
    %c0_7 = arith.constant 0 : index
    %10 = vector.load %arg4[%c0_6, %c0_7] : memref<1024x1024xbf16, #tpu.memory_space<vmem>>, vector<1024x1024xbf16>
    %cst_8 = arith.constant dense<0.000000e+00> : vector<8x1024xf32>
    %11 = tpu.matmul %9, %10, %cst_8 {dimension_numbers = #tpu.dot_dimension_numbers<[1], [0], [0], [1], [0, 0, 1, 1], [], []>} : vector<8x1024xbf16>, vector<1024x1024xbf16>, vector<8x1024xf32> -> vector<8x1024xf32>
    %c0_9 = arith.constant 0 : index
    %c0_10 = arith.constant 0 : index
    %12 = vector.load %arg5[%c0_9, %c0_10] : memref<1x1024xf32, #tpu.memory_space<vmem>>, vector<1x1024xf32>
    %13 = vector.broadcast %12 : vector<1x1024xf32> to vector<8x1024xf32>
    %14 = arith.addf %11, %13 : vector<8x1024xf32>
    %cst_11 = arith.constant 0.000000e+00 : f32
    %15 = vector.broadcast %cst_11 : f32 to vector<8x1024xf32>
    %16 = arith.maximumf %14, %15 : vector<8x1024xf32>
    %c0_12 = arith.constant 0 : index
    %c0_13 = arith.constant 0 : index
    %17 = vector.load %arg6[%c0_12, %c0_13] : memref<1x1024xf32, #tpu.memory_space<vmem>>, vector<1x1024xf32>
    %18 = vector.broadcast %17 : vector<1x1024xf32> to vector<8x1024xf32>
    %19 = arith.mulf %16, %18 : vector<8x1024xf32>
    %cst_14 = arith.constant dense<0.000000e+00> : vector<8xf32>
    %20 = vector.multi_reduction <add>, %19, %cst_14 [1] : vector<8x1024xf32> to vector<8xf32>
    %21 = vector.shape_cast %20 : vector<8xf32> to vector<8x1xf32>
    %c0_15 = arith.constant 0 : index
    %c0_16 = arith.constant 0 : index
    %22 = vector.load %arg7[%c0_15, %c0_16] : memref<1x1xf32, #tpu.memory_space<vmem>>, vector<1x1xf32>
    %23 = vector.broadcast %22 : vector<1x1xf32> to vector<8x1xf32>
    %24 = arith.addf %21, %23 : vector<8x1xf32>
    %cst_17 = arith.constant 0.000000e+00 : f32
    %25 = vector.broadcast %cst_17 : f32 to vector<8x1xf32>
    %26 = arith.subf %25, %24 : vector<8x1xf32>
    %27 = math.exp %26 : vector<8x1xf32>
    %cst_18 = arith.constant 1.000000e+00 : f32
    %28 = vector.broadcast %cst_18 : f32 to vector<8x1xf32>
    %29 = arith.addf %28, %27 : vector<8x1xf32>
    %30 = tpu.reciprocal %29 {approx = true} : vector<8x1xf32> -> vector<8x1xf32>
    %c0_19 = arith.constant 0 : index
    %c0_20 = arith.constant 0 : index
    %31 = vector.load %arg8[%c0_19, %c0_20] : memref<8x1xf32, #tpu.memory_space<vmem>>, vector<8x1xf32>
    tpu.vector_store %arg8[%c0_19, %c0_20], %30 {strides = array<i32>} : memref<8x1xf32, #tpu.memory_space<vmem>>, vector<8x1xf32>,
    return
  }
  func.func @transform_0(%arg0: i32) -> (i32, i32) {
    %c0_i32 = arith.constant 0 : i32
    %c0_i32_0 = arith.constant 0 : i32
    return %arg0, %c0_i32 : i32, i32
  }
  func.func @transform_1(%arg0: i32) -> (i32, i32) {
    %c0_i32 = arith.constant 0 : i32
    %c0_i32_0 = arith.constant 0 : i32
    %c0_i32_1 = arith.constant 0 : i32
    return %c0_i32, %c0_i32_0 : i32, i32
  }
  func.func @transform_2(%arg0: i32) -> (i32, i32) {
    %c0_i32 = arith.constant 0 : i32
    %c0_i32_0 = arith.constant 0 : i32
    %c0_i32_1 = arith.constant 0 : i32
    return %c0_i32, %c0_i32_0 : i32, i32
  }
  func.func @transform_3(%arg0: i32) -> (i32, i32) {
    %c0_i32 = arith.constant 0 : i32
    %c0_i32_0 = arith.constant 0 : i32
    %c0_i32_1 = arith.constant 0 : i32
    return %c0_i32, %c0_i32_0 : i32, i32
  }
  func.func @transform_4(%arg0: i32) -> (i32, i32) {
    %c0_i32 = arith.constant 0 : i32
    %c0_i32_0 = arith.constant 0 : i32
    %c0_i32_1 = arith.constant 0 : i32
    return %c0_i32, %c0_i32_0 : i32, i32
  }
  func.func @transform_5(%arg0: i32) -> (i32, i32) {
    %c0_i32 = arith.constant 0 : i32
    %c0_i32_0 = arith.constant 0 : i32
    %c0_i32_1 = arith.constant 0 : i32
    return %c0_i32, %c0_i32_0 : i32, i32
  }
  func.func @transform_6(%arg0: i32) -> (i32, i32) {
    %c0_i32 = arith.constant 0 : i32
    %c0_i32_0 = arith.constant 0 : i32
    %c0_i32_1 = arith.constant 0 : i32
    return %c0_i32, %c0_i32_0 : i32, i32
  }
  func.func @transform_7(%arg0: i32) -> (i32, i32) {
    %c0_i32 = arith.constant 0 : i32
    %c0_i32_0 = arith.constant 0 : i32
    return %arg0, %c0_i32 : i32, i32
  }
}

module attributes {stable_mosaic.version = 11 : i64} {
  func.func @_disc_kernel(%arg0: i32, %arg1: memref<8x256xf32, #tpu.memory_space<vmem>>, %arg2: memref<256x1024xbf16, #tpu.memory_space<vmem>>, %arg3: memref<1x1024xf32, #tpu.memory_space<vmem>>, %arg4: memref<1024x1024xbf16, #tpu.memory_space<vmem>>, %arg5: memref<1x1024xf32, #tpu.memory_space<vmem>>, %arg6: memref<1x1024xf32, #tpu.memory_space<vmem>>, %arg7: memref<1x1xf32, #tpu.memory_space<vmem>>, %arg8: memref<8x1xf32, #tpu.memory_space<vmem>>) attributes {dimension_semantics = [#tpu.dimension_semantics<parallel>], iteration_bounds = array<i64: 1>, scalar_prefetch = 0 : i64, scratch_operands = 0 : i64, tpu.core_type = #tpu.core_type<tc>, window_params = [{transform_indices = @transform_0, window_bounds = array<i64: 8, 256>}, {pipeline_mode = #tpu.pipeline_mode<synchronous>, transform_indices = @transform_1, window_bounds = array<i64: 256, 1024>}, {pipeline_mode = #tpu.pipeline_mode<synchronous>, transform_indices = @transform_2, window_bounds = array<i64: 1, 1024>}, {pipeline_mode = #tpu.pipeline_mode<synchronous>, transform_indices = @transform_3, window_bounds = array<i64: 1024, 1024>}, {pipeline_mode = #tpu.pipeline_mode<synchronous>, transform_indices = @transform_4, window_bounds = array<i64: 1, 1024>}, {pipeline_mode = #tpu.pipeline_mode<synchronous>, transform_indices = @transform_5, window_bounds = array<i64: 1, 1024>}, {pipeline_mode = #tpu.pipeline_mode<synchronous>, transform_indices = @transform_6, window_bounds = array<i64: 1, 1>}, {transform_indices = @transform_7, window_bounds = array<i64: 8, 1>}]} {
    %c0 = arith.constant 0 : index
    %c0_0 = arith.constant 0 : index
    %0 = vector.load %arg1[%c0, %c0_0] : memref<8x256xf32, #tpu.memory_space<vmem>>, vector<8x256xf32>
    %1 = arith.truncf %0 : vector<8x256xf32> to vector<8x256xbf16>
    %c0_1 = arith.constant 0 : index
    %c0_2 = arith.constant 0 : index
    %2 = vector.load %arg2[%c0_1, %c0_2] : memref<256x1024xbf16, #tpu.memory_space<vmem>>, vector<256x1024xbf16>
    %cst = arith.constant dense<0.000000e+00> : vector<8x1024xf32>
    %3 = tpu.matmul %1, %2, %cst {dimension_numbers = #tpu.dot_dimension_numbers<[1], [0], [0], [1], [0, 0, 1, 1], [], []>} : vector<8x256xbf16>, vector<256x1024xbf16>, vector<8x1024xf32> -> vector<8x1024xf32>
    %c0_3 = arith.constant 0 : index
    %c0_4 = arith.constant 0 : index
    %4 = vector.load %arg3[%c0_3, %c0_4] : memref<1x1024xf32, #tpu.memory_space<vmem>>, vector<1x1024xf32>
    %5 = vector.broadcast %4 : vector<1x1024xf32> to vector<8x1024xf32>
    %6 = arith.addf %3, %5 : vector<8x1024xf32>
    %cst_5 = arith.constant 0.000000e+00 : f32
    %7 = vector.broadcast %cst_5 : f32 to vector<8x1024xf32>
    %8 = arith.maximumf %6, %7 : vector<8x1024xf32>
    %9 = arith.truncf %8 : vector<8x1024xf32> to vector<8x1024xbf16>
    %c0_6 = arith.constant 0 : index
    %c0_7 = arith.constant 0 : index
    %10 = vector.load %arg4[%c0_6, %c0_7] : memref<1024x1024xbf16, #tpu.memory_space<vmem>>, vector<1024x1024xbf16>
    %cst_8 = arith.constant dense<0.000000e+00> : vector<8x1024xf32>
    %11 = tpu.matmul %9, %10, %cst_8 {dimension_numbers = #tpu.dot_dimension_numbers<[1], [0], [0], [1], [0, 0, 1, 1], [], []>} : vector<8x1024xbf16>, vector<1024x1024xbf16>, vector<8x1024xf32> -> vector<8x1024xf32>
    %c0_9 = arith.constant 0 : index
    %c0_10 = arith.constant 0 : index
    %12 = vector.load %arg5[%c0_9, %c0_10] : memref<1x1024xf32, #tpu.memory_space<vmem>>, vector<1x1024xf32>
    %13 = vector.broadcast %12 : vector<1x1024xf32> to vector<8x1024xf32>
    %14 = arith.addf %11, %13 : vector<8x1024xf32>
    %cst_11 = arith.constant 0.000000e+00 : f32
    %15 = vector.broadcast %cst_11 : f32 to vector<8x1024xf32>
    %16 = arith.maximumf %14, %15 : vector<8x1024xf32>
    %c0_12 = arith.constant 0 : index
    %c0_13 = arith.constant 0 : index
    %17 = vector.load %arg6[%c0_12, %c0_13] : memref<1x1024xf32, #tpu.memory_space<vmem>>, vector<1x1024xf32>
    %18 = vector.broadcast %17 : vector<1x1024xf32> to vector<8x1024xf32>
    %19 = arith.mulf %16, %18 : vector<8x1024xf32>
    %cst_14 = arith.constant dense<0.000000e+00> : vector<8xf32>
    %20 = vector.multi_reduction <add>, %19, %cst_14 [1] : vector<8x1024xf32> to vector<8xf32>
    %21 = vector.shape_cast %20 : vector<8xf32> to vector<8x1xf32>
    %c0_15 = arith.constant 0 : index
    %c0_16 = arith.constant 0 : index
    %22 = vector.load %arg7[%c0_15, %c0_16] : memref<1x1xf32, #tpu.memory_space<vmem>>, vector<1x1xf32>
    %23 = vector.broadcast %22 : vector<1x1xf32> to vector<8x1xf32>
    %24 = arith.addf %21, %23 : vector<8x1xf32>
    %cst_17 = arith.constant 0.000000e+00 : f32
    %25 = vector.broadcast %cst_17 : f32 to vector<8x1xf32>
    %26 = arith.subf %25, %24 : vector<8x1xf32>
    %27 = math.exp %26 : vector<8x1xf32>
    %cst_18 = arith.constant 1.000000e+00 : f32
    %28 = vector.broadcast %cst_18 : f32 to vector<8x1xf32>
    %29 = arith.addf %28, %27 : vector<8x1xf32>
    %30 = tpu.reciprocal %29 {approx = true} : vector<8x1xf32> -> vector<8x1xf32>
    %c0_19 = arith.constant 0 : index
    %c0_20 = arith.constant 0 : index
    %31 = vector.load %arg8[%c0_19, %c0_20] : memref<8x1xf32, #tpu.memory_space<vmem>>, vector<8x1xf32>
    tpu.vector_store %arg8[%c0_19, %c0_20], %30 {strides = array<i32>} : memref<8x1xf32, #tpu.memory_space<vmem>>, vector<8x1xf32>,
    return
  }
  func.func @transform_0(%arg0: i32) -> (i32, i32) {
    %c0_i32 = arith.constant 0 : i32
    %c0_i32_0 = arith.constant 0 : i32
    return %arg0, %c0_i32 : i32, i32
  }
  func.func @transform_1(%arg0: i32) -> (i32, i32) {
    %c0_i32 = arith.constant 0 : i32
    %c0_i32_0 = arith.constant 0 : i32
    %c0_i32_1 = arith.constant 0 : i32
    return %c0_i32, %c0_i32_0 : i32, i32
  }
  func.func @transform_2(%arg0: i32) -> (i32, i32) {
    %c0_i32 = arith.constant 0 : i32
    %c0_i32_0 = arith.constant 0 : i32
    %c0_i32_1 = arith.constant 0 : i32
    return %c0_i32, %c0_i32_0 : i32, i32
  }
  func.func @transform_3(%arg0: i32) -> (i32, i32) {
    %c0_i32 = arith.constant 0 : i32
    %c0_i32_0 = arith.constant 0 : i32
    %c0_i32_1 = arith.constant 0 : i32
    return %c0_i32, %c0_i32_0 : i32, i32
  }
  func.func @transform_4(%arg0: i32) -> (i32, i32) {
    %c0_i32 = arith.constant 0 : i32
    %c0_i32_0 = arith.constant 0 : i32
    %c0_i32_1 = arith.constant 0 : i32
    return %c0_i32, %c0_i32_0 : i32, i32
  }
  func.func @transform_5(%arg0: i32) -> (i32, i32) {
    %c0_i32 = arith.constant 0 : i32
    %c0_i32_0 = arith.constant 0 : i32
    %c0_i32_1 = arith.constant 0 : i32
    return %c0_i32, %c0_i32_0 : i32, i32
  }
  func.func @transform_6(%arg0: i32) -> (i32, i32) {
    %c0_i32 = arith.constant 0 : i32
    %c0_i32_0 = arith.constant 0 : i32
    %c0_i32_1 = arith.constant 0 : i32
    return %c0_i32, %c0_i32_0 : i32, i32
  }
  func.func @transform_7(%arg0: i32) -> (i32, i32) {
    %c0_i32 = arith.constant 0 : i32
    %c0_i32_0 = arith.constant 0 : i32
    return %arg0, %c0_i32 : i32, i32
  }
}

</mosaic_0001>

<bundles_post_ra>
// kernel: tpu_custom_call.1
= control target key start
LH: loop header
LB: loop body
LE: loop exit
PB: predicated region body
PF: predicated region fallthrough
CT: control target
= control target key end

     0   :  { %s6108_s0 = inlined_call_operand.hbm [shape: f32[8,256], index: 0, kind: input, shape index: {}]   ;;  %s6109_s1 = inlined_call_operand.hbm [shape: bf16[256,1024], index: 1, kind: input, shape index: {}]   ;;  %s6110_s2 = inlined_call_operand.hbm [shape: f32[1,1024], index: 2, kind: input, shape index: {}]   ;;  %s6111_s3 = inlined_call_operand.hbm [shape: bf16[1024,1024], index: 3, kind: input, shape index: {}]   ;;  %s6112_s4 = inlined_call_operand.hbm [shape: f32[1,1024], index: 4, kind: input, shape index: {}]   ;;  %s6113_s5 = inlined_call_operand.hbm [shape: f32[1,1024], index: 5, kind: input, shape index: {}]   ;;  %s6114_s6 = inlined_call_operand.<no memory space> [shape: f32[1,1], index: 6, kind: input, shape index: {}]   ;;  %s6115_s7 = inlined_call_operand.vmem [shape: f32[8,1], index: 7, kind: output, shape index: {}]  }
   0x1   :  { %v12_v0 = vstv %s6114_s6 }
   0x2   :  { %13 = vst [vmem:[#allocation2] sm:$0x1] %v12_v0 }
   0x3   :  { %14 = vsyncpa [#allocation4], 0 }
   0x4   :  { %15 = vsyncpa [#allocation6], 0 }
   0x5   :  { %16 = vsyncpa [#allocation9], 0 }
   0x6   :  { %17 = vsyncpa [#allocation12], 0  ;;  %s5806_s26 = smov [#allocation5]   ;;  %s5666_s30 = scalar_lea.hbm %s6109_s1, 16384 }
   0x7   :  { %s33_s27 = sshll.u32 %s5806_s26, 4  ;;  %p5667_p0 = scmp.ne.s32.totalorder %s6109_s1, %s5666_s30  ;;  %s34_s27 = int_to_ptr.vmem [resolvable:$true] %s33_s27 }
   0x8   :  { %p5670_p1 = scmp.lt.u32.totalorder %s5666_s30, %s6109_s1 }
   0xa   :  { %p5672_p2 = pnand %p5670_p1, %p5667_p0 }
   0xc   :  { %5675 = shalt.err (!%p5672_p2)
}
   0xd   :  { %s5676_s6 = scalar_lea.vmem %s34_s27, 16384  ;;  %p5681_p4 = scmp.lt.s32.totalorder %s34_s27, %s34_s27 }
   0xe   :  { %p5677_p3 = scmp.ne.s32.totalorder %s34_s27, %s5676_s6  ;;  %p5682_p5 = scmp.lt.s32.totalorder %s5676_s6, %s5676_s6 }
  0x10   :  { %p5683_p6 = por %p5682_p5, %p5681_p4 }
  0x12   :  { %p5684_p7 = pnand %p5683_p6, %p5677_p3 }
  0x14   :  { %5687 = shalt.err (!%p5684_p7)
}
  0x15   :  { %s5807_s12 = smov 512   ;;  %s5808_s13 = smov 32  }
  0x16   :  { %39 = dma.hbm_to_vmem [thread:$0]  %s6109_s1, 16384, %s34_s27, [#allocation6], %s5807_s12, %s5807_s12, %s5808_s13  }
  0x17   :  { %s5809_s16 = smov [#allocation8]   ;;  %s5810_s18 = smov [#allocation3]  }
  0x18   :  { %s55_s17 = sshll.u32 %s5809_s16, 4  ;;  %s24_s19 = sshll.u32 %s5810_s18, 4  ;;  %s56_s17 = int_to_ptr.vmem [resolvable:$true] %s55_s17  ;;  %s25_s19 = int_to_ptr.vmem [resolvable:$true] %s24_s19 }
  0x19   :  { %s5688_s22 = scalar_lea.hbm %s6111_s3, 65536 }
  0x1a   :  { %p5689_p8 = scmp.ne.s32.totalorder %s6111_s3, %s5688_s22  ;;  %p5692_p9 = scmp.lt.u32.totalorder %s5688_s22, %s6111_s3 }
  0x1c   :  { %p5694_p10 = pnand %p5692_p9, %p5689_p8 }
  0x1e   :  { %5697 = shalt.err (!%p5694_p10)
}
  0x1f   :  { %s5698_s1 = scalar_lea.vmem %s56_s17, 65536  ;;  %p5703_p12 = scmp.lt.s32.totalorder %s56_s17, %s56_s17 }
  0x20   :  { %p5699_p11 = scmp.ne.s32.totalorder %s56_s17, %s5698_s1  ;;  %p5704_p13 = scmp.lt.s32.totalorder %s5698_s1, %s5698_s1 }
  0x22   :  { %p5705_p0 = por %p5704_p13, %p5703_p12 }
  0x24   :  { %p5706_p1 = pnand %p5705_p0, %p5699_p11 }
  0x26   :  { %5709 = shalt.err (!%p5706_p1)
}
  0x27   :  { %61 = dma.hbm_to_vmem [thread:$0]  %s6111_s3, 65536, %s56_s17, [#allocation9], %s5807_s12, %s5807_s12, %s5808_s13  }
  0x28   :  { %s5710_s8 = scalar_lea.hbm %s6108_s0, 256 }
  0x29   :  { %p5711_p2 = scmp.ne.s32.totalorder %s6108_s0, %s5710_s8  ;;  %p5714_p3 = scmp.lt.u32.totalorder %s5710_s8, %s6108_s0 }
  0x2b   :  { %p5716_p4 = pnand %p5714_p3, %p5711_p2 }
  0x2d   :  { %5719 = shalt.err (!%p5716_p4)
}
  0x2e   :  { %s5720_s14 = scalar_lea.vmem %s25_s19, 256  ;;  %p5725_p6 = scmp.lt.s32.totalorder %s25_s19, %s25_s19 }
  0x2f   :  { %p5721_p5 = scmp.ne.s32.totalorder %s25_s19, %s5720_s14  ;;  %p5726_p7 = scmp.lt.s32.totalorder %s5720_s14, %s5720_s14 }
  0x31   :  { %p5727_p8 = por %p5726_p7, %p5725_p6 }
  0x33   :  { %p5728_p9 = pnand %p5727_p8, %p5721_p5 }
  0x35   :  { %5731 = shalt.err (!%p5728_p9)
}
  0x36   :  { %27 = dma.hbm_to_vmem [thread:$0]  %s6108_s0, 256, %s25_s19, [#allocation4]  }
  0x37   :  { %s5811_s13 = smov [#allocation7]   ;;  %s5812_s16 = smov [#allocation10]  }
  0x38   :  { %s46_s15 = sshll.u32 %s5811_s13, 4  ;;  %s68_s17 = sshll.u32 %s5812_s16, 4  ;;  %s47_s15 = int_to_ptr.vmem [resolvable:$true] %s46_s15  ;;  %s69_s17 = int_to_ptr.vmem [resolvable:$true] %s68_s17 }
  0x39   :  { %s5732_s21 = scalar_lea.hbm %s6110_s2, 128 }
  0x3a   :  { %p5733_p10 = scmp.ne.s32.totalorder %s6110_s2, %s5732_s21  ;;  %p5736_p11 = scmp.lt.u32.totalorder %s5732_s21, %s6110_s2 }
  0x3c   :  { %p5738_p12 = pnand %p5736_p11, %p5733_p10 }
  0x3e   :  { %5741 = shalt.err (!%p5738_p12)
}
  0x3f   :  { %s5742_s0 = scalar_lea.vmem %s47_s15, 128  ;;  %p5747_p0 = scmp.lt.s32.totalorder %s47_s15, %s47_s15 }
  0x40   :  { %p5743_p13 = scmp.ne.s32.totalorder %s47_s15, %s5742_s0  ;;  %p5748_p1 = scmp.lt.s32.totalorder %s5742_s0, %s5742_s0 }
  0x42   :  { %p5749_p2 = por %p5748_p1, %p5747_p0 }
  0x44   :  { %p5750_p3 = pnand %p5749_p2, %p5743_p13 }
  0x46   :  { %5753 = shalt.err (!%p5750_p3)
}
  0x47   :  { %49 = dma.hbm_to_vmem [thread:$0]  %s6110_s2, 128, %s47_s15, [#allocation6]  }
  0x48   :  { %s5754_s28 = scalar_lea.hbm %s6112_s4, 128 }
  0x49   :  { %p5755_p4 = scmp.ne.s32.totalorder %s6112_s4, %s5754_s28  ;;  %p5758_p5 = scmp.lt.u32.totalorder %s5754_s28, %s6112_s4 }
  0x4b   :  { %p5760_p6 = pnand %p5758_p5, %p5755_p4 }
  0x4d   :  { %5763 = shalt.err (!%p5760_p6)
}
  0x4e   :  { %s5764_s10 = scalar_lea.vmem %s69_s17, 128  ;;  %p5769_p8 = scmp.lt.s32.totalorder %s69_s17, %s69_s17 }
  0x4f   :  { %p5765_p7 = scmp.ne.s32.totalorder %s69_s17, %s5764_s10  ;;  %p5770_p9 = scmp.lt.s32.totalorder %s5764_s10, %s5764_s10 }
  0x51   :  { %p5771_p10 = por %p5770_p9, %p5769_p8 }
  0x53   :  { %p5772_p11 = pnand %p5771_p10, %p5765_p7 }
  0x55   :  { %5775 = shalt.err (!%p5772_p11)
}
  0x56   :  { %71 = dma.hbm_to_vmem [thread:$0]  %s6112_s4, 128, %s69_s17, [#allocation9]  }
  0x57   :  { %s5813_s6 = smov [#allocation11]   ;;  %s5776_s13 = scalar_lea.hbm %s6113_s5, 128 }
  0x58   :  { %s78_s14 = sshll.u32 %s5813_s6, 4  ;;  %p5777_p12 = scmp.ne.s32.totalorder %s6113_s5, %s5776_s13  ;;  %s79_s14 = int_to_ptr.vmem [resolvable:$true] %s78_s14 }
  0x59   :  { %p5780_p13 = scmp.lt.u32.totalorder %s5776_s13, %s6113_s5 }
  0x5b   :  { %p5782_p0 = pnand %p5780_p13, %p5777_p12 }
  0x5d   :  { %5785 = shalt.err (!%p5782_p0)
}
  0x5e   :  { %s5786_s21 = scalar_lea.vmem %s79_s14, 128  ;;  %p5791_p2 = scmp.lt.s32.totalorder %s79_s14, %s79_s14 }
  0x5f   :  { %p5787_p1 = scmp.ne.s32.totalorder %s79_s14, %s5786_s21  ;;  %p5792_p3 = scmp.lt.s32.totalorder %s5786_s21, %s5786_s21 }
  0x61   :  { %p5793_p4 = por %p5792_p3, %p5791_p2 }
  0x63   :  { %p5794_p5 = pnand %p5793_p4, %p5787_p1 }
  0x65   :  { %5797 = shalt.err (!%p5794_p5)
}
  0x66   :  { %81 = dma.hbm_to_vmem [thread:$0]  %s6113_s5, 128, %s79_s14, [#allocation12]  }
  0x67   :  { %5798 = dma.done.wait [#allocation4], 256  }
  0x68   :  { %5799 = vsyncadd [#allocation4], 4294967040 }
  0x69   :  { %5800 = dma.done.wait [#allocation6], 16512  }
  0x6a   :  { %5801 = vsyncadd [#allocation6], 4294950784 }
  0x6b   :  { %5802 = dma.done.wait [#allocation9], 65664  }
  0x6c   :  { %5803 = vsyncadd [#allocation9], 4294901632 }
  0x6d   :  { %5804 = dma.done.wait [#allocation12], 128  }
  0x6e   :  { %5805 = vsyncadd [#allocation12], 4294967168  ;;  %v106_v1 = vld [vmem:[#allocation5] sm:$0xff]  ;;  %v107_v18 = vld [vmem:[#allocation5 + $0x8] sm:$0xff]  ;;  %vm4946_vm0 = vcmask 7168  }
  0x6f   :  { %v110_v2 = vld [vmem:[#allocation5 + $0x20] sm:$0xff]  ;;  %v111_v19 = vld [vmem:[#allocation5 + $0x28] sm:$0xff]  ;;  %v103_v20 = vld [vmem:[#allocation3 + $0x8] sm:$0xff] }
  0x70   :  { %v114_v3 = vld [vmem:[#allocation5 + $0x40] sm:$0xff]  ;;  %v4957_v4 = vcombine.high %v106_v1, %v110_v2  ;;  %v4956_v5 = vcombine.low %v106_v1, %v110_v2  ;;  %v4959_v22 = vcombine.high %v107_v18, %v111_v19  ;;  %v4958_v23 = vcombine.low %v107_v18, %v111_v19  ;;  %v115_v25 = vld [vmem:[#allocation5 + $0x48] sm:$0xff] }
  0x71   :  { %v118_v6 = vld [vmem:[#allocation5 + $0x60] sm:$0xff]  ;;  %v5929_v24 = vpack.c.bf16 %v103_v20, %v103_v20  ;;  %v119_v26 = vld [vmem:[#allocation5 + $0x68] sm:$0xff] }
  0x72   :  { %v4965_v7 = vcombine.high %v114_v3, %v118_v6  ;;  %v122_v8 = vld [vmem:[#allocation5 + $0x80] sm:$0xff]  ;;  %916 = vmatprep.subr.bf16.mxu0 %v4957_v4  ;;  %v4964_v10 = vcombine.low %v114_v3, %v118_v6  ;;  %v4967_v28 = vcombine.high %v115_v25, %v119_v26  ;;  %v123_v29 = vld [vmem:[#allocation5 + $0x88] sm:$0xff]  ;;  %957 = vmatprep.subr.bf16.mxu1 %v4959_v22 }
  0x73   :  { %v126_v9 = vld [vmem:[#allocation5 + $0xa0] sm:$0xff]  ;;  %917 = vmatpush1.bf16.msra.mxu0 %v4956_v5  ;;  %v127_v30 = vld [vmem:[#allocation5 + $0xa8] sm:$0xff]  ;;  %948 = vmatprep.mubr.bf16.mxu0 %v5929_v24  ;;  %v4966_v33 = vcombine.low %v115_v25, %v119_v26 }
  0x74   :  { %918 = vmatprep.subr.bf16.mxu0 %v4965_v7  ;;  %v4973_v11 = vcombine.high %v122_v8, %v126_v9  ;;  %v130_v12 = vld [vmem:[#allocation5 + $0xc0] sm:$0xff]  ;;  %v4972_v14 = vcombine.low %v122_v8, %v126_v9  ;;  %958 = vmatpush1.bf16.msra.mxu1 %v4958_v23  ;;  %v4975_v35 = vcombine.high %v123_v29, %v127_v30  ;;  %v131_v37 = vld [vmem:[#allocation5 + $0xc8] sm:$0xff] }
  0x75   :  { %v134_v13 = vld [vmem:[#allocation5 + $0xe0] sm:$0xff]  ;;  %989 = vmatprep.mubr.bf16.mxu1 %v5929_v24  ;;  %959 = vmatprep.subr.bf16.mxu1 %v4967_v28  ;;  %v135_v38 = vld [vmem:[#allocation5 + $0xe8] sm:$0xff]  ;;  %v4974_v41 = vcombine.low %v123_v29, %v127_v30 }
  0x76   :  { %v4981_v15 = vcombine.high %v130_v12, %v134_v13  ;;  %v138_v16 = vld [vmem:[#allocation5 + $0x100] sm:$0xff]  ;;  %v4980_v21 = vcombine.low %v130_v12, %v134_v13  ;;  %v4983_v43 = vcombine.high %v131_v37, %v135_v38  ;;  %v139_v45 = vld [vmem:[#allocation5 + $0x108] sm:$0xff]  ;;  %v4982_v49 = vcombine.low %v131_v37, %v135_v38 }
  0x77   :  { %919 = vmatpush1.bf16.msra.mxu0 %v4964_v10  ;;  %v142_v17 = vld [vmem:[#allocation5 + $0x120] sm:$0xff]  ;;  %v143_v46 = vld [vmem:[#allocation5 + $0x128] sm:$0xff] }
  0x78   :  { %920 = vmatprep.subr.bf16.mxu0 %v4973_v11  ;;  %v4989_v27 = vcombine.high %v138_v16, %v142_v17  ;;  %v146_v31 = vld [vmem:[#allocation5 + $0x140] sm:$0xff]  ;;  %v4988_v34 = vcombine.low %v138_v16, %v142_v17  ;;  %960 = vmatpush1.bf16.msra.mxu1 %v4966_v33  ;;  %v4991_v51 = vcombine.high %v139_v45, %v143_v46  ;;  %v147_v53 = vld [vmem:[#allocation5 + $0x148] sm:$0xff] }
  0x79   :  { %v150_v32 = vld [vmem:[#allocation5 + $0x160] sm:$0xff]  ;;  %961 = vmatprep.subr.bf16.mxu1 %v4975_v35  ;;  %v151_v54 = vld [vmem:[#allocation5 + $0x168] sm:$0xff]  ;;  %v4990_v57 = vcombine.low %v139_v45, %v143_v46 }
  0x7a   :  { %v4997_v36 = vcombine.high %v146_v31, %v150_v32  ;;  %v154_v39 = vld [vmem:[#allocation5 + $0x180] sm:$0xff]  ;;  %v4996_v42 = vcombine.low %v146_v31, %v150_v32  ;;  %v4999_v59 = vcombine.high %v147_v53, %v151_v54  ;;  %v155_v61 = vld [vmem:[#allocation5 + $0x188] sm:$0xff]  ;;  %v4998_v1 = vcombine.low %v147_v53, %v151_v54 }
  0x7b   :  { %921 = vmatpush1.bf16.msra.mxu0 %v4972_v14  ;;  %v158_v40 = vld [vmem:[#allocation5 + $0x1a0] sm:$0xff]  ;;  %v159_v62 = vld [vmem:[#allocation5 + $0x1a8] sm:$0xff] }
  0x7c   :  { %922 = vmatprep.subr.bf16.mxu0 %v4981_v15  ;;  %v5005_v44 = vcombine.high %v154_v39, %v158_v40  ;;  %v162_v47 = vld [vmem:[#allocation5 + $0x1c0] sm:$0xff]  ;;  %962 = vmatpush1.bf16.msra.mxu1 %v4974_v41  ;;  %v5004_v50 = vcombine.low %v154_v39, %v158_v40  ;;  %v5007_v3 = vcombine.high %v155_v61, %v159_v62  ;;  %v163_v5 = vld [vmem:[#allocation5 + $0x1c8] sm:$0xff] }
  0x7d   :  { %v166_v48 = vld [vmem:[#allocation5 + $0x1e0] sm:$0xff]  ;;  %963 = vmatprep.subr.bf16.mxu1 %v4983_v43  ;;  %v167_v6 = vld [vmem:[#allocation5 + $0x1e8] sm:$0xff]  ;;  %v5006_v9 = vcombine.low %v155_v61, %v159_v62 }
  0x7e   :  { %v5013_v52 = vcombine.high %v162_v47, %v166_v48  ;;  %v170_v55 = vld [vmem:[#allocation5 + $0x200] sm:$0xff]  ;;  %v5012_v58 = vcombine.low %v162_v47, %v166_v48  ;;  %v5015_v11 = vcombine.high %v163_v5, %v167_v6  ;;  %v171_v13 = vld [vmem:[#allocation5 + $0x208] sm:$0xff]  ;;  %v5014_v17 = vcombine.low %v163_v5, %v167_v6 }
  0x7f   :  { %923 = vmatpush1.bf16.msra.mxu0 %v4980_v21  ;;  %v174_v56 = vld [vmem:[#allocation5 + $0x220] sm:$0xff]  ;;  %v175_v14 = vld [vmem:[#allocation5 + $0x228] sm:$0xff] }
  0x80   :  { %924 = vmatprep.subr.bf16.mxu0 %v4989_v27  ;;  %964 = vmatpush1.bf16.msra.mxu1 %v4982_v49  ;;  %v5021_v60 = vcombine.high %v170_v55, %v174_v56  ;;  %v178_v63 = vld [vmem:[#allocation5 + $0x240] sm:$0xff]  ;;  %v5020_v2 = vcombine.low %v170_v55, %v174_v56  ;;  %v5023_v19 = vcombine.high %v171_v13, %v175_v14  ;;  %v179_v21 = vld [vmem:[#allocation5 + $0x248] sm:$0xff]  ;;  %v108_v56 = vld [vmem:[#allocation5 + $0x10] sm:$0xff] }
  0x81   :  { %965 = vmatprep.subr.bf16.mxu1 %v4991_v51  ;;  %v182_v0 = vld [vmem:[#allocation5 + $0x260] sm:$0xff]  ;;  %v183_v22 = vld [vmem:[#allocation5 + $0x268] sm:$0xff]  ;;  %v5022_v26 = vcombine.low %v171_v13, %v175_v14 }
  0x82   :  { %v5029_v4 = vcombine.high %v178_v63, %v182_v0  ;;  %v186_v7 = vld [vmem:[#allocation5 + $0x280] sm:$0xff]  ;;  %v5028_v10 = vcombine.low %v178_v63, %v182_v0  ;;  %v5031_v28 = vcombine.high %v179_v21, %v183_v22  ;;  %v187_v30 = vld [vmem:[#allocation5 + $0x288] sm:$0xff] }
  0x83   :  { %925 = vmatpush1.bf16.msra.mxu0 %v4988_v34  ;;  %v190_v8 = vld [vmem:[#allocation5 + $0x2a0] sm:$0xff]  ;;  %v191_v31 = vld [vmem:[#allocation5 + $0x2a8] sm:$0xff]  ;;  %v5030_v34 = vcombine.low %v179_v21, %v183_v22 }
  0x84   :  { %926 = vmatprep.subr.bf16.mxu0 %v4997_v36  ;;  %966 = vmatpush1.bf16.msra.mxu1 %v4990_v57  ;;  %v5037_v12 = vcombine.high %v186_v7, %v190_v8  ;;  %v194_v15 = vld [vmem:[#allocation5 + $0x2c0] sm:$0xff]  ;;  %v5036_v18 = vcombine.low %v186_v7, %v190_v8  ;;  %v5039_v36 = vcombine.high %v187_v30, %v191_v31  ;;  %v195_v38 = vld [vmem:[#allocation5 + $0x2c8] sm:$0xff]  ;;  %v112_v57 = vld [vmem:[#allocation5 + $0x30] sm:$0xff] }
  0x85   :  { %967 = vmatprep.subr.bf16.mxu1 %v4999_v59  ;;  %v198_v16 = vld [vmem:[#allocation5 + $0x2e0] sm:$0xff]  ;;  %v199_v39 = vld [vmem:[#allocation5 + $0x2e8] sm:$0xff]  ;;  %v4961_v0 = vcombine.high %v108_v56, %v112_v57  ;;  %v4960_v6 = vcombine.low %v108_v56, %v112_v57  ;;  %v149_v56 = vld [vmem:[#allocation5 + $0x158] sm:$0xff] }
  0x86   :  { %v5045_v20 = vcombine.high %v194_v15, %v198_v16  ;;  %v202_v23 = vld [vmem:[#allocation5 + $0x300] sm:$0xff]  ;;  %v5044_v27 = vcombine.low %v194_v15, %v198_v16  ;;  %v203_v46 = vld [vmem:[#allocation5 + $0x308] sm:$0xff]  ;;  %v109_v16 = vld [vmem:[#allocation5 + $0x18] sm:$0xff] }
  0x87   :  { %927 = vmatpush1.bf16.msra.mxu0 %v4996_v42  ;;  %v206_v25 = vld [vmem:[#allocation5 + $0x320] sm:$0xff]  ;;  %v5038_v42 = vcombine.low %v187_v30, %v191_v31  ;;  %v207_v47 = vld [vmem:[#allocation5 + $0x328] sm:$0xff]  ;;  %v153_v57 = vld [vmem:[#allocation5 + $0x178] sm:$0xff] }
  0x88   :  { %928 = vmatprep.subr.bf16.mxu0 %v5005_v44  ;;  %968 = vmatpush1.bf16.msra.mxu1 %v4998_v1  ;;  %v5053_v29 = vcombine.high %v202_v23, %v206_v25  ;;  %v210_v32 = vld [vmem:[#allocation5 + $0x340] sm:$0xff]  ;;  %v5052_v35 = vcombine.low %v202_v23, %v206_v25  ;;  %v5047_v44 = vcombine.high %v195_v38, %v199_v39  ;;  %v211_v54 = vld [vmem:[#allocation5 + $0x348] sm:$0xff]  ;;  %v116_v1 = vld [vmem:[#allocation5 + $0x50] sm:$0xff] }
  0x89   :  { %969 = vmatprep.subr.bf16.mxu1 %v5007_v3  ;;  %v214_v33 = vld [vmem:[#allocation5 + $0x360] sm:$0xff]  ;;  %v215_v55 = vld [vmem:[#allocation5 + $0x368] sm:$0xff]  ;;  %v117_v25 = vld [vmem:[#allocation5 + $0x58] sm:$0xff] }
  0x8a   :  { %v5061_v37 = vcombine.high %v210_v32, %v214_v33  ;;  %v218_v40 = vld [vmem:[#allocation5 + $0x380] sm:$0xff]  ;;  %v5060_v43 = vcombine.low %v210_v32, %v214_v33  ;;  %v5063_v61 = vcombine.high %v211_v54, %v215_v55  ;;  %v219_v62 = vld [vmem:[#allocation5 + $0x388] sm:$0xff]  ;;  %v125_v33 = vld [vmem:[#allocation5 + $0x98] sm:$0xff] }
  0x8b   :  { %929 = vmatpush1.bf16.msra.mxu0 %v5004_v50  ;;  %v222_v41 = vld [vmem:[#allocation5 + $0x3a0] sm:$0xff]  ;;  %v5046_v50 = vcombine.low %v195_v38, %v199_v39  ;;  %v223_v63 = vld [vmem:[#allocation5 + $0x3a8] sm:$0xff] }
  0x8c   :  { %930 = vmatprep.subr.bf16.mxu0 %v5013_v52  ;;  %970 = vmatpush1.bf16.msra.mxu1 %v5006_v9  ;;  %v5069_v45 = vcombine.high %v218_v40, %v222_v41  ;;  %v226_v48 = vld [vmem:[#allocation5 + $0x3c0] sm:$0xff]  ;;  %v5068_v51 = vcombine.low %v218_v40, %v222_v41  ;;  %v5055_v52 = vcombine.high %v203_v46, %v207_v47  ;;  %v227_v7 = vld [vmem:[#allocation5 + $0x3c8] sm:$0xff]  ;;  %v133_v41 = vld [vmem:[#allocation5 + $0xd8] sm:$0xff] }
  0x8d   :  { %971 = vmatprep.subr.bf16.mxu1 %v5015_v11  ;;  %v230_v49 = vld [vmem:[#allocation5 + $0x3e0] sm:$0xff]  ;;  %v5071_v5 = vcombine.high %v219_v62, %v223_v63  ;;  %v231_v8 = vld [vmem:[#allocation5 + $0x3e8] sm:$0xff]  ;;  %v128_v11 = vld [vmem:[#allocation5 + $0xb0] sm:$0xff] }
  0x8e   :  { %v5077_v53 = vcombine.high %v226_v48, %v230_v49  ;;  %v5076_v59 = vcombine.low %v226_v48, %v230_v49  ;;  %v5079_v13 = vcombine.high %v227_v7, %v231_v8  ;;  %v141_v49 = vld [vmem:[#allocation5 + $0x118] sm:$0xff] }
  0x8f   :  { %931 = vmatpush1.bf16.msra.mxu0 %v5012_v58  ;;  %v5054_v58 = vcombine.low %v203_v46, %v207_v47 }
  0x90   :  { %932 = vmatprep.subr.bf16.mxu0 %v5021_v60  ;;  %972 = vmatpush1.bf16.msra.mxu1 %v5014_v17  ;;  %v102_v60 = vld [vmem:[#allocation3] sm:$0xff]  ;;  %v113_v17 = vld [vmem:[#allocation5 + $0x38] sm:$0xff] }
  0x91   :  { %973 = vmatprep.subr.bf16.mxu1 %v5023_v19  ;;  %v5933_v3 = vpack.c.bf16 %v102_v60, %v102_v60  ;;  %v136_v19 = vld [vmem:[#allocation5 + $0xf0] sm:$0xff]  ;;  %v4963_v22 = vcombine.high %v109_v16, %v113_v17 }
  0x93   :  { %933 = vmatpush1.bf16.msra.mxu0 %v5020_v2  ;;  %v120_v2 = vld [vmem:[#allocation5 + $0x70] sm:$0xff] }
  0x94   :  { %934 = vmatprep.subr.bf16.mxu0 %v5029_v4  ;;  %974 = vmatpush1.bf16.msra.mxu1 %v5022_v26  ;;  %v5062_v4 = vcombine.low %v211_v54, %v215_v55  ;;  %v4969_v9 = vcombine.high %v116_v1, %v120_v2  ;;  %v4968_v14 = vcombine.low %v116_v1, %v120_v2  ;;  %v121_v26 = vld [vmem:[#allocation5 + $0x78] sm:$0xff]  ;;  %v180_v2 = vld [vmem:[#allocation5 + $0x250] sm:$0xff] }
  0x95   :  { %975 = vmatprep.subr.bf16.mxu1 %v5031_v28  ;;  %v144_v28 = vld [vmem:[#allocation5 + $0x130] sm:$0xff]  ;;  %v4971_v31 = vcombine.high %v117_v25, %v121_v26  ;;  %v161_v1 = vld [vmem:[#allocation5 + $0x1b8] sm:$0xff] }
  0x97   :  { %935 = vmatpush1.bf16.msra.mxu0 %v5028_v10  ;;  %v124_v10 = vld [vmem:[#allocation5 + $0x90] sm:$0xff] }
  0x98   :  { %936 = vmatprep.subr.bf16.mxu0 %v5037_v12  ;;  %976 = vmatpush1.bf16.msra.mxu1 %v5030_v34  ;;  %v5070_v12 = vcombine.low %v219_v62, %v223_v63  ;;  %v4977_v15 = vcombine.high %v124_v10, %v128_v11  ;;  %v4976_v21 = vcombine.low %v124_v10, %v128_v11  ;;  %v129_v34 = vld [vmem:[#allocation5 + $0xb8] sm:$0xff]  ;;  %v188_v11 = vld [vmem:[#allocation5 + $0x290] sm:$0xff] }
  0x99   :  { %977 = vmatprep.subr.bf16.mxu1 %v5039_v36  ;;  %v152_v36 = vld [vmem:[#allocation5 + $0x170] sm:$0xff]  ;;  %v4979_v39 = vcombine.high %v125_v33, %v129_v34  ;;  %v5003_v62 = vcombine.high %v149_v56, %v153_v57  ;;  %v169_v10 = vld [vmem:[#allocation5 + $0x1f8] sm:$0xff] }
  0x9b   :  { %937 = vmatpush1.bf16.msra.mxu0 %v5036_v18  ;;  %v132_v18 = vld [vmem:[#allocation5 + $0xd0] sm:$0xff] }
  0x9c   :  { %938 = vmatprep.subr.bf16.mxu0 %v5045_v20  ;;  %978 = vmatpush1.bf16.msra.mxu1 %v5038_v42  ;;  %v5078_v20 = vcombine.low %v227_v7, %v231_v8  ;;  %v4985_v23 = vcombine.high %v132_v18, %v136_v19  ;;  %v4984_v30 = vcombine.low %v132_v18, %v136_v19  ;;  %v137_v42 = vld [vmem:[#allocation5 + $0xf8] sm:$0xff]  ;;  %v196_v19 = vld [vmem:[#allocation5 + $0x2d0] sm:$0xff] }
  0x9d   :  { %979 = vmatprep.subr.bf16.mxu1 %v5047_v44  ;;  %v160_v44 = vld [vmem:[#allocation5 + $0x1b0] sm:$0xff]  ;;  %v4987_v47 = vcombine.high %v133_v41, %v137_v42  ;;  %v177_v18 = vld [vmem:[#allocation5 + $0x238] sm:$0xff] }
  0x9f   :  { %939 = vmatpush1.bf16.msra.mxu0 %v5044_v27  ;;  %v140_v27 = vld [vmem:[#allocation5 + $0x110] sm:$0xff] }
  0xa0   :  { %940 = vmatprep.subr.bf16.mxu0 %v5053_v29  ;;  %980 = vmatpush1.bf16.msra.mxu1 %v5046_v50  ;;  %v4962_v29 = vcombine.low %v109_v16, %v113_v17  ;;  %v4993_v32 = vcombine.high %v140_v27, %v144_v28  ;;  %v4992_v38 = vcombine.low %v140_v27, %v144_v28  ;;  %v164_v50 = vld [vmem:[#allocation5 + $0x1d0] sm:$0xff]  ;;  %v173_v17 = vld [vmem:[#allocation5 + $0x218] sm:$0xff] }
  0xa1   :  { %981 = vmatprep.subr.bf16.mxu1 %v5055_v52  ;;  %v4986_v52 = vcombine.low %v133_v41, %v137_v42  ;;  %v185_v27 = vld [vmem:[#allocation5 + $0x278] sm:$0xff]  ;;  %v204_v28 = vld [vmem:[#allocation5 + $0x310] sm:$0xff] }
  0xa2   :  { %v197_v42 = vld [vmem:[#allocation5 + $0x2d8] sm:$0xff] }
  0xa3   :  { %941 = vmatpush1.bf16.msra.mxu0 %v5052_v35  ;;  %v148_v35 = vld [vmem:[#allocation5 + $0x150] sm:$0xff] }
  0xa4   :  { %942 = vmatprep.subr.bf16.mxu0 %v5061_v37  ;;  %982 = vmatpush1.bf16.msra.mxu1 %v5054_v58  ;;  %v4970_v37 = vcombine.low %v117_v25, %v121_v26  ;;  %v5001_v40 = vcombine.high %v148_v35, %v152_v36  ;;  %v5000_v46 = vcombine.low %v148_v35, %v152_v36  ;;  %v172_v58 = vld [vmem:[#allocation5 + $0x210] sm:$0xff]  ;;  %v181_v26 = vld [vmem:[#allocation5 + $0x258] sm:$0xff] }
  0xa5   :  { %983 = vmatprep.subr.bf16.mxu1 %v5063_v61  ;;  %v193_v35 = vld [vmem:[#allocation5 + $0x2b8] sm:$0xff]  ;;  %v212_v36 = vld [vmem:[#allocation5 + $0x350] sm:$0xff] }
  0xa7   :  { %943 = vmatpush1.bf16.msra.mxu0 %v5060_v43  ;;  %v156_v43 = vld [vmem:[#allocation5 + $0x190] sm:$0xff] }
  0xa8   :  { %944 = vmatprep.subr.bf16.mxu0 %v5069_v45  ;;  %984 = vmatpush1.bf16.msra.mxu1 %v5062_v4  ;;  %v4978_v45 = vcombine.low %v125_v33, %v129_v34  ;;  %v5009_v48 = vcombine.high %v156_v43, %v160_v44  ;;  %v184_v4 = vld [vmem:[#allocation5 + $0x270] sm:$0xff]  ;;  %v189_v34 = vld [vmem:[#allocation5 + $0x298] sm:$0xff] }
  0xa9   :  { %985 = vmatprep.subr.bf16.mxu1 %v5071_v5  ;;  %v5002_v5 = vcombine.low %v149_v56, %v153_v57  ;;  %v5033_v8 = vcombine.high %v180_v2, %v184_v4  ;;  %v213_v57 = vld [vmem:[#allocation5 + $0x358] sm:$0xff] }
  0xab   :  { %945 = vmatpush1.bf16.msra.mxu0 %v5068_v51  ;;  %v168_v51 = vld [vmem:[#allocation5 + $0x1f0] sm:$0xff] }
  0xac   :  { %946 = vmatprep.subr.bf16.mxu0 %v5077_v53  ;;  %986 = vmatpush1.bf16.msra.mxu1 %v5070_v12  ;;  %v5008_v53 = vcombine.low %v156_v43, %v160_v44  ;;  %v5017_v55 = vcombine.high %v164_v50, %v168_v51  ;;  %v5016_v61 = vcombine.low %v164_v50, %v168_v51  ;;  %v192_v12 = vld [vmem:[#allocation5 + $0x2b0] sm:$0xff]  ;;  %v201_v43 = vld [vmem:[#allocation5 + $0x2f8] sm:$0xff] }
  0xad   :  { %987 = vmatprep.subr.bf16.mxu1 %v5079_v13  ;;  %v5041_v16 = vcombine.high %v188_v11, %v192_v12  ;;  %v220_v44 = vld [vmem:[#allocation5 + $0x390] sm:$0xff]  ;;  %v209_v50 = vld [vmem:[#allocation5 + $0x338] sm:$0xff] }
  0xae   :  { %v228_v51 = vld [vmem:[#allocation5 + $0x3d0] sm:$0xff] }
  0xaf   :  { %947 = vmatpush1.bf16.msra.mxu0 %v5076_v59  ;;  %v176_v59 = vld [vmem:[#allocation5 + $0x230] sm:$0xff] }
  0xb0   :  { %998 = vmatprep.subr.bf16.mxu0 %v4961_v0  ;;  %988 = vmatpush1.bf16.msra.mxu1 %v5078_v20  ;;  %v5025_v63 = vcombine.high %v172_v58, %v176_v59  ;;  %v157_v0 = vld [vmem:[#allocation5 + $0x198] sm:$0xff]  ;;  %v200_v20 = vld [vmem:[#allocation5 + $0x2f0] sm:$0xff] }
  0xb1   :  { %1039 = vmatprep.subr.bf16.mxu1 %v4963_v22  ;;  %v5011_v7 = vcombine.high %v157_v0, %v161_v1  ;;  %v5010_v13 = vcombine.low %v157_v0, %v161_v1  ;;  %v5040_v22 = vcombine.low %v188_v11, %v192_v12  ;;  %v5049_v25 = vcombine.high %v196_v19, %v200_v20  ;;  %v221_v0 = vld [vmem:[#allocation5 + $0x398] sm:$0xff]  ;;  %v1112_v12 = vld [vmem:[#allocation8 + $0x80] sm:$0xff] }
  0xb2   :  { %949 = vmatmul.mubr.bf16.vlgmr.msra.gmra.mrb[0].mxu0 %v5933_v3  ;;  %v225_v1 = vld [vmem:[#allocation5 + $0x3b8] sm:$0xff] }
  0xb3   :  { %999 = vmatpush1.bf16.msra.mxu0 %v4960_v6  ;;  %1030 = vmatprep.mubr.bf16.mxu0 %v5929_v24  ;;  %v5024_v6 = vcombine.low %v172_v58, %v176_v59  ;;  %v217_v58 = vld [vmem:[#allocation5 + $0x378] sm:$0xff]  ;;  %v1096_v59 = vld [vmem:[#allocation8] sm:$0xff] }
  0xb4   :  { %1000 = vmatprep.subr.bf16.mxu0 %v4969_v9  ;;  %990 = vmatmul.mubr.bf16.vlgmr.msra.gmra.mrb[0].mxu1 %v5933_v3  ;;  %v165_v9 = vld [vmem:[#allocation5 + $0x1d8] sm:$0xff] }
  0xb5   :  { %1040 = vmatpush1.bf16.msra.mxu1 %v4962_v29  ;;  %1071 = vmatprep.mubr.bf16.mxu1 %v5929_v24  ;;  %v145_v24 = vld [vmem:[#allocation5 + $0x138] sm:$0xff]  ;;  %v208_v29 = vld [vmem:[#allocation5 + $0x330] sm:$0xff] }
  0xb6   :  { %1041 = vmatprep.subr.bf16.mxu1 %v4971_v31  ;;  %v4995_v54 = vcombine.high %v141_v49, %v145_v24  ;;  %v4994_v60 = vcombine.low %v141_v49, %v145_v24  ;;  %v5048_v31 = vcombine.low %v196_v19, %v200_v20  ;;  %v5057_v33 = vcombine.high %v204_v28, %v208_v29  ;;  %v205_v24 = vld [vmem:[#allocation5 + $0x318] sm:$0xff]  ;;  %v1120_v20 = vld [vmem:[#allocation8 + $0xc0] sm:$0xff] }
  0xb7   :  { %1001 = vmatpush1.bf16.msra.mxu0 %v4968_v14  ;;  %v5032_v14 = vcombine.low %v180_v2, %v184_v4  ;;  %v1104_v4 = vld [vmem:[#allocation8 + $0x40] sm:$0xff] }
  0xb8   :  { %1002 = vmatprep.subr.bf16.mxu0 %v4977_v15  ;;  %v5019_v15 = vcombine.high %v165_v9, %v169_v10 }
  0xb9   :  { %1042 = vmatpush1.bf16.msra.mxu1 %v4970_v37  ;;  %v216_v37 = vld [vmem:[#allocation5 + $0x370] sm:$0xff] }
  0xba   :  { %1043 = vmatprep.subr.bf16.mxu1 %v4979_v39  ;;  %v5056_v39 = vcombine.low %v204_v28, %v208_v29  ;;  %v5065_v41 = vcombine.high %v212_v36, %v216_v37  ;;  %v1128_v29 = vld [vmem:[#allocation8 + $0x100] sm:$0xff] }
  0xbb   :  { %1003 = vmatpush1.bf16.msra.mxu0 %v4976_v21  ;;  %v5018_v21 = vcombine.low %v165_v9, %v169_v10  ;;  %v229_v9 = vld [vmem:[#allocation5 + $0x3d8] sm:$0xff] }
  0xbc   :  { %1004 = vmatprep.subr.bf16.mxu0 %v4985_v23  ;;  %v5027_v23 = vcombine.high %v173_v17, %v177_v18  ;;  %v233_v10 = vld [vmem:[#allocation5 + $0x3f8] sm:$0xff] }
  0xbd   :  { %1044 = vmatpush1.bf16.msra.mxu1 %v4978_v45  ;;  %v224_v45 = vld [vmem:[#allocation5 + $0x3b0] sm:$0xff] }
  0xbe   :  { %1045 = vmatprep.subr.bf16.mxu1 %v4987_v47  ;;  %v5064_v47 = vcombine.low %v212_v36, %v216_v37  ;;  %v5073_v49 = vcombine.high %v220_v44, %v224_v45  ;;  %v1136_v37 = vld [vmem:[#allocation8 + $0x140] sm:$0xff] }
  0xbf   :  { %1005 = vmatpush1.bf16.msra.mxu0 %v4984_v30  ;;  %v5026_v30 = vcombine.low %v173_v17, %v177_v18  ;;  %v1097_v17 = vld [vmem:[#allocation8 + $0x8] sm:$0xff] }
  0xc0   :  { %1006 = vmatprep.subr.bf16.mxu0 %v4993_v32  ;;  %v5035_v32 = vcombine.high %v181_v26, %v185_v27  ;;  %v1101_v18 = vld [vmem:[#allocation8 + $0x28] sm:$0xff] }
  0xc1   :  { %1046 = vmatpush1.bf16.msra.mxu1 %v4986_v52  ;;  %v232_v52 = vld [vmem:[#allocation5 + $0x3f0] sm:$0xff] }
  0xc2   :  { %1047 = vmatprep.subr.bf16.mxu1 %v4995_v54  ;;  %v5072_v54 = vcombine.low %v220_v44, %v224_v45  ;;  %v5081_v56 = vcombine.high %v228_v51, %v232_v52  ;;  %v1144_v45 = vld [vmem:[#allocation8 + $0x180] sm:$0xff] }
  0xc3   :  { %1007 = vmatpush1.bf16.msra.mxu0 %v4992_v38  ;;  %v5034_v38 = vcombine.low %v181_v26, %v185_v27  ;;  %v1105_v26 = vld [vmem:[#allocation8 + $0x48] sm:$0xff] }
  0xc4   :  { %1008 = vmatprep.subr.bf16.mxu0 %v5001_v40  ;;  %v5043_v40 = vcombine.high %v189_v34, %v193_v35  ;;  %v1109_v27 = vld [vmem:[#allocation8 + $0x68] sm:$0xff] }
  0xc5   :  { %1048 = vmatpush1.bf16.msra.mxu1 %v4994_v60  ;;  %v1100_v60 = vld [vmem:[#allocation8 + $0x20] sm:$0xff] }
  0xc6   :  { %1049 = vmatprep.subr.bf16.mxu1 %v5003_v62  ;;  %v5080_v62 = vcombine.low %v228_v51, %v232_v52  ;;  %v5085_v2 = vcombine.high %v1096_v59, %v1100_v60  ;;  %v1152_v51 = vld [vmem:[#allocation8 + $0x1c0] sm:$0xff] }
  0xc7   :  { %1009 = vmatpush1.bf16.msra.mxu0 %v5000_v46  ;;  %v5042_v46 = vcombine.low %v189_v34, %v193_v35  ;;  %v1113_v34 = vld [vmem:[#allocation8 + $0x88] sm:$0xff]  ;;  %v1156_v52 = vld [vmem:[#allocation8 + $0x1e0] sm:$0xff] }
  0xc8   :  { %1010 = vmatprep.subr.bf16.mxu0 %v5009_v48  ;;  %v5051_v48 = vcombine.high %v197_v42, %v201_v43  ;;  %v1117_v35 = vld [vmem:[#allocation8 + $0xa8] sm:$0xff] }
  0xc9   :  { %1050 = vmatpush1.bf16.msra.mxu1 %v5002_v5  ;;  %v1108_v5 = vld [vmem:[#allocation8 + $0x60] sm:$0xff] }
  0xca   :  { %1051 = vmatprep.subr.bf16.mxu1 %v5011_v7  ;;  %v5075_v7 = vcombine.high %v221_v0, %v225_v1  ;;  %v5093_v11 = vcombine.high %v1104_v4, %v1108_v5 }
  0xcb   :  { %1011 = vmatpush1.bf16.msra.mxu0 %v5008_v53  ;;  %v5050_v53 = vcombine.low %v197_v42, %v201_v43  ;;  %v1121_v42 = vld [vmem:[#allocation8 + $0xc8] sm:$0xff] }
  0xcc   :  { %1012 = vmatprep.subr.bf16.mxu0 %v5017_v55  ;;  %v5059_v55 = vcombine.high %v205_v24, %v209_v50  ;;  %v1125_v43 = vld [vmem:[#allocation8 + $0xe8] sm:$0xff] }
  0xcd   :  { %1052 = vmatpush1.bf16.msra.mxu1 %v5010_v13  ;;  %v1116_v13 = vld [vmem:[#allocation8 + $0xa0] sm:$0xff] }
  0xce   :  { %1053 = vmatprep.subr.bf16.mxu1 %v5019_v15  ;;  %v5083_v15 = vcombine.high %v229_v9, %v233_v10  ;;  %v5101_v19 = vcombine.high %v1112_v12, %v1116_v13 }
  0xcf   :  { %1013 = vmatpush1.bf16.msra.mxu0 %v5016_v61  ;;  %v5058_v61 = vcombine.low %v205_v24, %v209_v50  ;;  %v1133_v24 = vld [vmem:[#allocation8 + $0x128] sm:$0xff] }
  0xd0   :  { %1014 = vmatprep.subr.bf16.mxu0 %v5025_v63  ;;  %v5067_v63 = vcombine.high %v213_v57, %v217_v58 }
  0xd1   :  { %1054 = vmatpush1.bf16.msra.mxu1 %v5018_v21  ;;  %v1124_v21 = vld [vmem:[#allocation8 + $0xe0] sm:$0xff] }
  0xd2   :  { %1055 = vmatprep.subr.bf16.mxu1 %v5027_v23  ;;  %v5087_v23 = vcombine.high %v1097_v17, %v1101_v18  ;;  %v5109_v28 = vcombine.high %v1120_v20, %v1124_v21 }
  0xd3   :  { %1015 = vmatpush1.bf16.msra.mxu0 %v5024_v6  ;;  %v5066_v6 = vcombine.low %v213_v57, %v217_v58  ;;  %v1141_v57 = vld [vmem:[#allocation8 + $0x168] sm:$0xff]  ;;  %v5141_v58 = vcombine.high %v1152_v51, %v1156_v52 }
  0xd4   :  { %1016 = vmatprep.subr.bf16.mxu0 %v5033_v8  ;;  %v5084_v8 = vcombine.low %v1096_v59, %v1100_v60  ;;  %v1160_v59 = vld [vmem:[#allocation8 + $0x200] sm:$0xff] }
  0xd5   :  { %1056 = vmatpush1.bf16.msra.mxu1 %v5026_v30  ;;  %v1132_v30 = vld [vmem:[#allocation8 + $0x120] sm:$0xff] }
  0xd6   :  { %1057 = vmatprep.subr.bf16.mxu1 %v5035_v32  ;;  %v5095_v32 = vcombine.high %v1105_v26, %v1109_v27  ;;  %v5117_v36 = vcombine.high %v1128_v29, %v1132_v30  ;;  %v1164_v60 = vld [vmem:[#allocation8 + $0x220] sm:$0xff] }
  0xd7   :  { %1017 = vmatpush1.bf16.msra.mxu0 %v5032_v14  ;;  %v5074_v14 = vcombine.low %v221_v0, %v225_v1  ;;  %v5945_v0 = vld [vmem:[#allocation8 + $0x408] sm:$0xff] }
  0xd8   :  { %1018 = vmatprep.subr.bf16.mxu0 %v5041_v16  ;;  %v5092_v16 = vcombine.low %v1104_v4, %v1108_v5  ;;  %v5947_v4 = vld [vmem:[#allocation8 + $0x428] sm:$0xff] }
  0xd9   :  { %1058 = vmatpush1.bf16.msra.mxu1 %v5034_v38  ;;  %v1140_v38 = vld [vmem:[#allocation8 + $0x160] sm:$0xff]  ;;  %v1145_v5 = vld [vmem:[#allocation8 + $0x188] sm:$0xff] }
  0xda   :  { %1059 = vmatprep.subr.bf16.mxu1 %v5043_v40  ;;  %v5103_v40 = vcombine.high %v1113_v34, %v1117_v35  ;;  %v5125_v44 = vcombine.high %v1136_v37, %v1140_v38 }
  0xdb   :  { %1019 = vmatpush1.bf16.msra.mxu0 %v5040_v22  ;;  %v5082_v22 = vcombine.low %v229_v9, %v233_v10  ;;  %v5214_v9 = vcombine.low %v5945_v0, %v5947_v4  ;;  %v1168_v10 = vld [vmem:[#allocation8 + $0x240] sm:$0xff] }
  0xdc   :  { %1020 = vmatprep.subr.bf16.mxu0 %v5049_v25  ;;  %v5100_v25 = vcombine.low %v1112_v12, %v1116_v13 }
  0xdd   :  { %1060 = vmatpush1.bf16.msra.mxu1 %v5042_v46  ;;  %v1148_v46 = vld [vmem:[#allocation8 + $0x1a0] sm:$0xff] }
  0xde   :  { %1061 = vmatprep.subr.bf16.mxu1 %v5051_v48  ;;  %v5111_v48 = vcombine.high %v1121_v42, %v1125_v43  ;;  %v5133_v50 = vcombine.high %v1144_v45, %v1148_v46 }
  0xdf   :  { %1021 = vmatpush1.bf16.msra.mxu0 %v5048_v31  ;;  %v5086_v31 = vcombine.low %v1097_v17, %v1101_v18  ;;  %v1176_v18 = vld [vmem:[#allocation8 + $0x280] sm:$0xff] }
  0xe0   :  { %1022 = vmatprep.subr.bf16.mxu0 %v5057_v33  ;;  %v5108_v33 = vcombine.low %v1120_v20, %v1124_v21 }
  0xe1   :  { %1062 = vmatpush1.bf16.msra.mxu1 %v5050_v53  ;;  %v5110_v53 = vcombine.low %v1121_v42, %v1125_v43  ;;  %v1200_v43 = vld [vmem:[#allocation8 + $0x340] sm:$0xff] }
  0xe2   :  { %1063 = vmatprep.subr.bf16.mxu1 %v5059_v55  ;;  %v5132_v55 = vcombine.low %v1144_v45, %v1148_v46 }
  0xe3   :  { %1023 = vmatpush1.bf16.msra.mxu0 %v5056_v39  ;;  %v5094_v39 = vcombine.low %v1105_v26, %v1109_v27  ;;  %v1184_v27 = vld [vmem:[#allocation8 + $0x2c0] sm:$0xff] }
  0xe4   :  { %1024 = vmatprep.subr.bf16.mxu0 %v5065_v41  ;;  %v5116_v41 = vcombine.low %v1128_v29, %v1132_v30 }
  0xe5   :  { %1064 = vmatpush1.bf16.msra.mxu1 %v5058_v61 }
  0xe6   :  { %1065 = vmatprep.subr.bf16.mxu1 %v5067_v63  ;;  %v5943_v63 = vld [vmem:[#allocation8 + $0x420] sm:$0xff] }
  0xe7   :  { %1025 = vmatpush1.bf16.msra.mxu0 %v5064_v47  ;;  %v5102_v47 = vcombine.low %v1113_v34, %v1117_v35  ;;  %v1192_v35 = vld [vmem:[#allocation8 + $0x300] sm:$0xff] }
  0xe8   :  { %1026 = vmatprep.subr.bf16.mxu0 %v5073_v49  ;;  %v1129_v49 = vld [vmem:[#allocation8 + $0x108] sm:$0xff] }
  0xe9   :  { %1066 = vmatpush1.bf16.msra.mxu1 %v5066_v6  ;;  %v5118_v61 = vcombine.low %v1129_v49, %v1133_v24  ;;  %v1149_v6 = vld [vmem:[#allocation8 + $0x1a8] sm:$0xff] }
  0xea   :  { %1067 = vmatprep.subr.bf16.mxu1 %v5075_v7  ;;  %v5149_v7 = vcombine.high %v1160_v59, %v1164_v60  ;;  %v5135_v13 = vcombine.high %v1145_v5, %v1149_v6  ;;  %v5134_v20 = vcombine.low %v1145_v5, %v1149_v6 }
  0xeb   :  { %1027 = vmatpush1.bf16.msra.mxu0 %v5072_v54  ;;  %v5119_v54 = vcombine.high %v1129_v49, %v1133_v24  ;;  %v1208_v24 = vld [vmem:[#allocation8 + $0x380] sm:$0xff] }
  0xec   :  { %1028 = vmatprep.subr.bf16.mxu0 %v5081_v56  ;;  %v1137_v56 = vld [vmem:[#allocation8 + $0x148] sm:$0xff] }
  0xed   :  { %1068 = vmatpush1.bf16.msra.mxu1 %v5074_v14  ;;  %v5127_v1 = vcombine.high %v1137_v56, %v1141_v57  ;;  %v5126_v12 = vcombine.low %v1137_v56, %v1141_v57  ;;  %v5148_v14 = vcombine.low %v1160_v59, %v1164_v60  ;;  %v1216_v57 = vld [vmem:[#allocation8 + $0x3c0] sm:$0xff] }
  0xee   :  { %1069 = vmatprep.subr.bf16.mxu1 %v5083_v15  ;;  %v1153_v15 = vld [vmem:[#allocation8 + $0x1c8] sm:$0xff] }
  0xef   :  { %1029 = vmatpush1.bf16.msra.mxu0 %v5080_v62  ;;  %v5941_v62 = vld [vmem:[#allocation8 + $0x400] sm:$0xff] }
  0xf0   :  { %4210 = vmatprep.subr.bf16.mxu0 %v5085_v2  ;;  %v5140_v2 = vcombine.low %v1152_v51, %v1156_v52 }
  0xf1   :  { %1070 = vmatpush1.bf16.msra.mxu1 %v5082_v22 }
  0xf2   :  { %1031 = vmatmul.mubr.bf16.vlgmr.msra.gmra.mrb[4].mxu0 %v5933_v3  ;;  %4374 = vmatprep.subr.bf16.mxu1 %v5087_v23  ;;  %v1161_v23 = vld [vmem:[#allocation8 + $0x208] sm:$0xff] }
  0xf3   :  { %4211 = vmatpush1.bf16.msra.mxu0 %v5084_v8  ;;  %v5212_v8 = vcombine.low %v5941_v62, %v5943_v63 }
  0xf4   :  { %4212 = vmatprep.subr.bf16.mxu0 %v5093_v11  ;;  %1072 = vmatmul.mubr.bf16.vlgmr.msra.gmra.mrb[4].mxu1 %v5933_v3  ;;  %v5124_v3 = vcombine.low %v1136_v37, %v1140_v38  ;;  %v1172_v11 = vld [vmem:[#allocation8 + $0x260] sm:$0xff] }
  0xf5   :  { %4375 = vmatpush1.bf16.msra.mxu1 %v5086_v31  ;;  %v5157_v17 = vcombine.high %v1168_v10, %v1172_v11  ;;  %v5156_v22 = vcombine.low %v1168_v10, %v1172_v11  ;;  %v1209_v11 = vld [vmem:[#allocation8 + $0x388] sm:$0xff] }
  0xf6   :  { %4376 = vmatprep.subr.bf16.mxu1 %v5095_v32  ;;  %v1169_v32 = vld [vmem:[#allocation8 + $0x248] sm:$0xff] }
  0xf7   :  { %4213 = vmatpush1.bf16.msra.mxu0 %v5092_v16  ;;  %v1157_v16 = vld [vmem:[#allocation8 + $0x1e8] sm:$0xff] }
  0xf8   :  { %4214 = vmatprep.subr.bf16.mxu0 %v5101_v19  ;;  %v1180_v19 = vld [vmem:[#allocation8 + $0x2a0] sm:$0xff]  ;;  %v5143_v21 = vcombine.high %v1153_v15, %v1157_v16  ;;  %v5142_v29 = vcombine.low %v1153_v15, %v1157_v16  ;;  %v1217_v16 = vld [vmem:[#allocation8 + $0x3c8] sm:$0xff] }
  0xf9   :  { %4377 = vmatpush1.bf16.msra.mxu1 %v5094_v39  ;;  %v5165_v26 = vcombine.high %v1176_v18, %v1180_v19  ;;  %v5164_v31 = vcombine.low %v1176_v18, %v1180_v19 }
  0xfa   :  { %4378 = vmatprep.subr.bf16.mxu1 %v5103_v40  ;;  %v1177_v40 = vld [vmem:[#allocation8 + $0x288] sm:$0xff] }
  0xfb   :  { %4215 = vmatpush1.bf16.msra.mxu0 %v5100_v25  ;;  %v1165_v25 = vld [vmem:[#allocation8 + $0x228] sm:$0xff] }
  0xfc   :  { %4216 = vmatprep.subr.bf16.mxu0 %v5109_v28  ;;  %v1188_v28 = vld [vmem:[#allocation8 + $0x2e0] sm:$0xff]  ;;  %v5151_v30 = vcombine.high %v1161_v23, %v1165_v25  ;;  %v5150_v37 = vcombine.low %v1161_v23, %v1165_v25 }
  0xfd   :  { %4379 = vmatpush1.bf16.msra.mxu1 %v5102_v47  ;;  %v5173_v34 = vcombine.high %v1184_v27, %v1188_v28  ;;  %v5172_v39 = vcombine.low %v1184_v27, %v1188_v28 }
  0xfe   :  { %4380 = vmatprep.subr.bf16.mxu1 %v5111_v48  ;;  %v1185_v48 = vld [vmem:[#allocation8 + $0x2c8] sm:$0xff] }
  0xff   :  { %4217 = vmatpush1.bf16.msra.mxu0 %v5108_v33  ;;  %v1173_v33 = vld [vmem:[#allocation8 + $0x268] sm:$0xff] }
 0x100   :  { %4218 = vmatprep.subr.bf16.mxu0 %v5117_v36  ;;  %v1196_v36 = vld [vmem:[#allocation8 + $0x320] sm:$0xff]  ;;  %v5159_v38 = vcombine.high %v1169_v32, %v1173_v33  ;;  %v5158_v45 = vcombine.low %v1169_v32, %v1173_v33 }
 0x101   :  { %4381 = vmatpush1.bf16.msra.mxu1 %v5110_v53  ;;  %v5181_v42 = vcombine.high %v1192_v35, %v1196_v36  ;;  %v5180_v47 = vcombine.low %v1192_v35, %v1196_v36 }
 0x102   :  { %4382 = vmatprep.subr.bf16.mxu1 %v5119_v54  ;;  %v1193_v54 = vld [vmem:[#allocation8 + $0x308] sm:$0xff] }
 0x103   :  { %4219 = vmatpush1.bf16.msra.mxu0 %v5116_v41  ;;  %v1181_v41 = vld [vmem:[#allocation8 + $0x2a8] sm:$0xff] }
 0x104   :  { %4220 = vmatprep.subr.bf16.mxu0 %v5125_v44  ;;  %v1204_v44 = vld [vmem:[#allocation8 + $0x360] sm:$0xff]  ;;  %v5167_v46 = vcombine.high %v1177_v40, %v1181_v41  ;;  %v5166_v51 = vcombine.low %v1177_v40, %v1181_v41  ;;  %v1233_v40 = vld [vmem:[#allocation8 + $0x448] sm:$0xff] }
 0x105   :  { %4383 = vmatpush1.bf16.msra.mxu1 %v5118_v61  ;;  %v5189_v49 = vcombine.high %v1200_v43, %v1204_v44  ;;  %v5188_v53 = vcombine.low %v1200_v43, %v1204_v44  ;;  %v1237_v41 = vld [vmem:[#allocation8 + $0x468] sm:$0xff] }
 0x106   :  { %4384 = vmatprep.subr.bf16.mxu1 %v5127_v1  ;;  %v1201_v1 = vld [vmem:[#allocation8 + $0x348] sm:$0xff] }
 0x107   :  { %4221 = vmatpush1.bf16.msra.mxu0 %v5124_v3  ;;  %v1189_v3 = vld [vmem:[#allocation8 + $0x2e8] sm:$0xff] }
 0x108   :  { %4222 = vmatprep.subr.bf16.mxu0 %v5133_v50  ;;  %v1212_v50 = vld [vmem:[#allocation8 + $0x3a0] sm:$0xff]  ;;  %v5175_v52 = vcombine.high %v1185_v48, %v1189_v3  ;;  %v5174_v59 = vcombine.low %v1185_v48, %v1189_v3  ;;  %v1241_v3 = vld [vmem:[#allocation8 + $0x488] sm:$0xff] }
 0x109   :  { %4385 = vmatpush1.bf16.msra.mxu1 %v5126_v12  ;;  %v5197_v56 = vcombine.high %v1208_v24, %v1212_v50  ;;  %v5196_v61 = vcombine.low %v1208_v24, %v1212_v50  ;;  %v1213_v12 = vld [vmem:[#allocation8 + $0x3a8] sm:$0xff]  ;;  %v1244_v48 = vld [vmem:[#allocation8 + $0x4a0] sm:$0xff] }
 0x10a   :  { %4386 = vmatprep.subr.bf16.mxu1 %v5135_v13  ;;  %v5213_v13 = vcombine.high %v5941_v62, %v5943_v63  ;;  %v5199_v15 = vcombine.high %v1209_v11, %v1213_v12  ;;  %v5198_v18 = vcombine.low %v1209_v11, %v1213_v12 }
 0x10b   :  { %4223 = vmatpush1.bf16.msra.mxu0 %v5132_v55  ;;  %v1197_v55 = vld [vmem:[#allocation8 + $0x328] sm:$0xff] }
 0x10c   :  { %4224 = vmatprep.subr.bf16.mxu0 %v5141_v58  ;;  %v1220_v58 = vld [vmem:[#allocation8 + $0x3e0] sm:$0xff]  ;;  %v5183_v60 = vcombine.high %v1193_v54, %v1197_v55  ;;  %v5182_v6 = vcombine.low %v1193_v54, %v1197_v55 }
 0x10d   :  { %4387 = vmatpush1.bf16.msra.mxu1 %v5134_v20  ;;  %v5205_v5 = vcombine.high %v1216_v57, %v1220_v58  ;;  %v5204_v10 = vcombine.low %v1216_v57, %v1220_v58  ;;  %v1248_v54 = vld [vmem:[#allocation8 + $0x4c0] sm:$0xff]  ;;  %v1249_v57 = vld [vmem:[#allocation8 + $0x4c8] sm:$0xff] }
 0x10e   :  { %4388 = vmatprep.subr.bf16.mxu1 %v5143_v21  ;;  %v5215_v21 = vcombine.high %v5945_v0, %v5947_v4  ;;  %v1253_v58 = vld [vmem:[#allocation8 + $0x4e8] sm:$0xff] }
 0x10f   :  { %4225 = vmatpush1.bf16.msra.mxu0 %v5140_v2  ;;  %v1205_v2 = vld [vmem:[#allocation8 + $0x368] sm:$0xff]  ;;  %v5238_v11 = vcombine.low %v1249_v57, %v1253_v58 }
 0x110   :  { %4226 = vmatprep.subr.bf16.mxu0 %v5149_v7  ;;  %v5191_v7 = vcombine.high %v1201_v1, %v1205_v2 }
 0x111   :  { %4389 = vmatpush1.bf16.msra.mxu1 %v5142_v29 }
 0x112   :  { %4390 = vmatprep.subr.bf16.mxu1 %v5151_v30 }
 0x113   :  { %4227 = vmatpush1.bf16.msra.mxu0 %v5148_v14  ;;  %v5190_v14 = vcombine.low %v1201_v1, %v1205_v2  ;;  %v1260_v2 = vld [vmem:[#allocation8 + $0x520] sm:$0xff] }
 0x114   :  { %4228 = vmatprep.subr.bf16.mxu0 %v5157_v17  ;;  %v1221_v17 = vld [vmem:[#allocation8 + $0x3e8] sm:$0xff] }
 0x115   :  { %4391 = vmatpush1.bf16.msra.mxu1 %v5150_v37  ;;  %v5207_v19 = vcombine.high %v1217_v16, %v1221_v17  ;;  %v5206_v20 = vcombine.low %v1217_v16, %v1221_v17  ;;  %v1232_v37 = vld [vmem:[#allocation8 + $0x440] sm:$0xff]  ;;  %v1265_v16 = vld [vmem:[#allocation8 + $0x548] sm:$0xff] }
 0x116   :  { %4392 = vmatprep.subr.bf16.mxu1 %v5159_v38  ;;  %v1269_v17 = vld [vmem:[#allocation8 + $0x568] sm:$0xff] }
 0x117   :  { %4229 = vmatpush1.bf16.msra.mxu0 %v5156_v22  ;;  %v236_v22 = vlaneseq }
 0x118   :  { %4230 = vmatprep.subr.bf16.mxu0 %v5165_v26  ;;  %v5962_v26 = vld [vmem:[#allocation7] sm:$0xff] }
 0x119   :  { %4393 = vmatpush1.bf16.msra.mxu1 %v5158_v45  ;;  %v5957_v23 = vshrl.u32 %v236_v22, 7  ;;  %v1272_v22 = vld [vmem:[#allocation8 + $0x580] sm:$0xff] }
 0x11a   :  { %4394 = vmatprep.subr.bf16.mxu1 %v5167_v46  ;;  %v5223_v46 = vcombine.high %v1233_v40, %v1237_v41 }
 0x11b   :  { %4231 = vmatpush1.bf16.msra.mxu0 %v5164_v31  ;;  %v5960_v25 = vsub.s32 0, %v5957_v23  ;;  %v5965_v27 = vsub.s32 1, %v5957_v23 }
 0x11c   :  { %4232 = vmatprep.subr.bf16.mxu0 %v5173_v34 }
 0x11d   :  { %4395 = vmatpush1.bf16.msra.mxu1 %v5166_v51  ;;  %v239_v28 = vrot.slane %v5962_v26, %v5960_v25  ;;  %v243_v29 = vrot.slane %v5962_v26, %v5965_v27  ;;  %v5222_v51 = vcombine.low %v1233_v40, %v1237_v41 }
 0x11e   :  { %4396 = vmatprep.subr.bf16.mxu1 %v5175_v52 }
 0x11f   :  { %4233 = vmatpush1.bf16.msra.mxu0 %v5172_v39  ;;  %v1236_v39 = vld [vmem:[#allocation8 + $0x460] sm:$0xff] }
 0x120   :  { %4234 = vmatprep.subr.bf16.mxu0 %v5181_v42  ;;  %v5972_v42 = vsub.s32 3, %v5957_v23  ;;  %v5221_v45 = vcombine.high %v1232_v37, %v1236_v39  ;;  %v5220_v50 = vcombine.low %v1232_v37, %v1236_v39  ;;  %v1281_v37 = vld [vmem:[#allocation8 + $0x5c8] sm:$0xff] }
 0x121   :  { %4397 = vmatpush1.bf16.msra.mxu1 %v5174_v59 }
 0x122   :  { %4398 = vmatprep.subr.bf16.mxu1 %v5183_v60  ;;  %v251_v24 = vrot.slane %v5962_v26, %v5972_v42 }
 0x123   :  { %4235 = vmatpush1.bf16.msra.mxu0 %v5180_v47  ;;  %v1240_v47 = vld [vmem:[#allocation8 + $0x480] sm:$0xff] }
 0x124   :  { %4236 = vmatprep.subr.bf16.mxu0 %v5189_v49  ;;  %v1245_v49 = vld [vmem:[#allocation8 + $0x4a8] sm:$0xff]  ;;  %v5229_v52 = vcombine.high %v1240_v47, %v1244_v48  ;;  %v5228_v63 = vcombine.low %v1240_v47, %v1244_v48  ;;  %v1292_v47 = vld [vmem:[#allocation8 + $0x620] sm:$0xff] }
 0x125   :  { %4399 = vmatpush1.bf16.msra.mxu1 %v5182_v6  ;;  %v5230_v0 = vcombine.low %v1241_v3, %v1245_v49  ;;  %v1261_v6 = vld [vmem:[#allocation8 + $0x528] sm:$0xff] }
 0x126   :  { %4400 = vmatprep.subr.bf16.mxu1 %v5191_v7  ;;  %v1289_v48 = vld [vmem:[#allocation8 + $0x608] sm:$0xff] }
 0x127   :  { %4237 = vmatpush1.bf16.msra.mxu0 %v5188_v53  ;;  %v5231_v53 = vcombine.high %v1241_v3, %v1245_v49  ;;  %v1293_v3 = vld [vmem:[#allocation8 + $0x628] sm:$0xff] }
 0x128   :  { %4238 = vmatprep.subr.bf16.mxu0 %v5197_v56  ;;  %v1252_v56 = vld [vmem:[#allocation8 + $0x4e0] sm:$0xff] }
 0x129   :  { %4401 = vmatpush1.bf16.msra.mxu1 %v5190_v14  ;;  %v1264_v14 = vld [vmem:[#allocation8 + $0x540] sm:$0xff] }
 0x12a   :  { %4402 = vmatprep.subr.bf16.mxu1 %v5199_v15  ;;  %v1268_v15 = vld [vmem:[#allocation8 + $0x560] sm:$0xff] }
 0x12b   :  { %4239 = vmatpush1.bf16.msra.mxu0 %v5196_v61  ;;  %v1256_v61 = vld [vmem:[#allocation8 + $0x500] sm:$0xff] }
 0x12c   :  { %4240 = vmatprep.subr.bf16.mxu0 %v5205_v5  ;;  %v1257_v5 = vld [vmem:[#allocation8 + $0x508] sm:$0xff]  ;;  %v5245_v12 = vcombine.high %v1256_v61, %v1260_v2 }
 0x12d   :  { %4403 = vmatpush1.bf16.msra.mxu1 %v5198_v18  ;;  %v5244_v18 = vcombine.low %v1256_v61, %v1260_v2  ;;  %v1312_v2 = vld [vmem:[#allocation8 + $0x6c0] sm:$0xff] }
 0x12e   :  { %4404 = vmatprep.subr.bf16.mxu1 %v5207_v19  ;;  %v5246_v19 = vcombine.low %v1257_v5, %v1261_v6 }
 0x12f   :  { %4241 = vmatpush1.bf16.msra.mxu0 %v5204_v10  ;;  %v5236_v10 = vcombine.low %v1248_v54, %v1252_v56 }
 0x130   :  { %4251 = vmatprep.subr.bf16.mxu0 %v5213_v13  ;;  %v5247_v13 = vcombine.high %v1257_v5, %v1261_v6  ;;  %v1316_v5 = vld [vmem:[#allocation8 + $0x6e0] sm:$0xff]  ;;  %v1313_v6 = vld [vmem:[#allocation8 + $0x6c8] sm:$0xff] }
 0x131   :  { %4405 = vmatpush1.bf16.msra.mxu1 %v5206_v20  ;;  %v5253_v20 = vcombine.high %v1264_v14, %v1268_v15 }
 0x132   :  { %4415 = vmatprep.subr.bf16.mxu1 %v5215_v21  ;;  %v5255_v21 = vcombine.high %v1265_v16, %v1269_v17 }
 0x185   :  { %v950_v30 = vpop.f32.mrb[0].mxu0 }
 0x186   :  { %v951_v31 = vadd.f32 %v950_v30, %v239_v28  ;;  %v952_v32 = vpop.f32.mrb[1].mxu0  ;;  %v1276_v28 = vld [vmem:[#allocation8 + $0x5a0] sm:$0xff]  ;;  %v1277_v30 = vld [vmem:[#allocation8 + $0x5a8] sm:$0xff] }
 0x187   :  { %v953_v33 = vadd.f32 %v952_v32, %v243_v29  ;;  %v954_v34 = vpop.f32.mrb[2].mxu0  ;;  %v5990_v55 = vpop.f32.mrb[0].mxu1  ;;  %v1273_v29 = vld [vmem:[#allocation8 + $0x588] sm:$0xff]  ;;  %v5254_v32 = vcombine.low %v1265_v16, %v1269_v17  ;;  %v5260_v39 = vcombine.low %v1272_v22, %v1276_v28  ;;  %v1324_v16 = vld [vmem:[#allocation8 + $0x720] sm:$0xff] }
 0x188   :  { %v1080_v35 = vmax.f32 %v951_v31, 0.0  ;;  %v955_v36 = vpop.f32.mrb[3].mxu0  ;;  %v993_v59 = vpop.f32.mrb[1].mxu1  ;;  %v5252_v31 = vcombine.low %v1264_v14, %v1268_v15  ;;  %v5263_v34 = vcombine.high %v1273_v29, %v1277_v30  ;;  %v5262_v40 = vcombine.low %v1273_v29, %v1277_v30  ;;  %v1320_v15 = vld [vmem:[#allocation8 + $0x700] sm:$0xff]  ;;  %v1321_v17 = vld [vmem:[#allocation8 + $0x708] sm:$0xff] }
 0x189   :  { %v1081_v38 = vmax.f32 %v953_v33, 0.0  ;;  %v994_v60 = vadd.f32 %v993_v59, %v251_v24  ;;  %v995_v62 = vpop.f32.mrb[2].mxu1  ;;  %v5261_v33 = vcombine.high %v1272_v22, %v1276_v28  ;;  %v1284_v36 = vld [vmem:[#allocation8 + $0x5e0] sm:$0xff]  ;;  %v1329_v30 = vld [vmem:[#allocation8 + $0x748] sm:$0xff] }
 0x18a   :  { %v5976_v44 = vpack.c.bf16 %v1080_v35, %v1080_v35  ;;  %v996_v4 = vpop.f32.mrb[3].mxu1  ;;  %v1280_v35 = vld [vmem:[#allocation8 + $0x5c0] sm:$0xff] }
 0x18b   :  { %v5974_v43 = vpack.c.bf16 %v1081_v38, %v1081_v38  ;;  %v1083_v1 = vmax.f32 %v994_v60, 0.0  ;;  %v1285_v38 = vld [vmem:[#allocation8 + $0x5e8] sm:$0xff]  ;;  %v5269_v41 = vcombine.high %v1280_v35, %v1284_v36  ;;  %v5268_v49 = vcombine.low %v1280_v35, %v1284_v36  ;;  %v1304_v62 = vld [vmem:[#allocation8 + $0x680] sm:$0xff] }
 0x18c   :  { %v5270_v24 = vcombine.low %v1281_v37, %v1285_v38  ;;  %v1309_v4 = vld [vmem:[#allocation8 + $0x6a8] sm:$0xff]  ;;  %v1328_v28 = vld [vmem:[#allocation8 + $0x740] sm:$0xff] }
 0x18d   :  { %4242 = vmatprep.mubr.bf16.mxu0 %v5974_v43  ;;  %4406 = vmatprep.mubr.bf16.mxu1 %v5974_v43  ;;  %v5992_v7 = vpack.c.bf16 %v1083_v1, %v1083_v1  ;;  %v1332_v29 = vld [vmem:[#allocation8 + $0x760] sm:$0xff] }
 0x18e   :  { %4243 = vmatmul.mubr.bf16.vlgmr.msra.gmra.mrb[8].mxu0 %v5976_v44  ;;  %4407 = vmatmul.mubr.bf16.vlgmr.msra.gmra.mrb[8].mxu1 %v5976_v44  ;;  %v5317_v35 = vcombine.high %v1328_v28, %v1332_v29 }
 0x18f   :  { %4252 = vmatpush1.bf16.msra.mxu0 %v5212_v8  ;;  %4416 = vmatpush1.bf16.msra.mxu1 %v5214_v9  ;;  %v5237_v8 = vcombine.high %v1248_v54, %v1252_v56  ;;  %v5239_v9 = vcombine.high %v1249_v57, %v1253_v58  ;;  %v1297_v54 = vld [vmem:[#allocation8 + $0x648] sm:$0xff]  ;;  %v5278_v58 = vcombine.low %v1289_v48, %v1293_v3 }
 0x190   :  { %4253 = vmatprep.subr.bf16.mxu0 %v5221_v45  ;;  %4417 = vmatprep.subr.bf16.mxu1 %v5223_v46  ;;  %v5271_v45 = vcombine.high %v1281_v37, %v1285_v38  ;;  %v1288_v46 = vld [vmem:[#allocation8 + $0x600] sm:$0xff]  ;;  %v1301_v56 = vld [vmem:[#allocation8 + $0x668] sm:$0xff] }
 0x191   :  { %4283 = vmatprep.mubr.bf16.mxu0 %v5992_v7  ;;  %4447 = vmatprep.mubr.bf16.mxu1 %v5992_v7  ;;  %v5276_v57 = vcombine.low %v1288_v46, %v1292_v47  ;;  %v5287_v60 = vcombine.high %v1297_v54, %v1301_v56  ;;  %v1336_v37 = vld [vmem:[#allocation8 + $0x780] sm:$0xff] }
 0x192   :  { %v1340_v38 = vld [vmem:[#allocation8 + $0x7a0] sm:$0xff] }
 0x193   :  { %4254 = vmatpush1.bf16.msra.mxu0 %v5220_v50  ;;  %4418 = vmatpush1.bf16.msra.mxu1 %v5222_v51  ;;  %v5277_v50 = vcombine.high %v1288_v46, %v1292_v47  ;;  %v5279_v51 = vcombine.high %v1289_v48, %v1293_v3  ;;  %v6002_v47 = vsub.s32 5, %v5957_v23  ;;  %v5325_v48 = vcombine.high %v1336_v37, %v1340_v38 }
 0x194   :  { %4255 = vmatprep.subr.bf16.mxu0 %v5229_v52  ;;  %4419 = vmatprep.subr.bf16.mxu1 %v5231_v53  ;;  %v1296_v52 = vld [vmem:[#allocation8 + $0x640] sm:$0xff] }
 0x195   :  { %v1300_v53 = vld [vmem:[#allocation8 + $0x660] sm:$0xff] }
 0x196   :  { %v5285_v59 = vcombine.high %v1296_v52, %v1300_v53 }
 0x197   :  { %4256 = vmatpush1.bf16.msra.mxu0 %v5228_v63  ;;  %4420 = vmatpush1.bf16.msra.mxu1 %v5230_v0  ;;  %v1308_v63 = vld [vmem:[#allocation8 + $0x6a0] sm:$0xff]  ;;  %v1305_v0 = vld [vmem:[#allocation8 + $0x688] sm:$0xff] }
 0x198   :  { %4257 = vmatprep.subr.bf16.mxu0 %v5237_v8  ;;  %4421 = vmatprep.subr.bf16.mxu1 %v5239_v9  ;;  %v5284_v8 = vcombine.low %v1296_v52, %v1300_v53  ;;  %v5286_v9 = vcombine.low %v1297_v54, %v1301_v56  ;;  %v5293_v61 = vcombine.high %v1304_v62, %v1308_v63 }
 0x199   :  { %v5295_v1 = vcombine.high %v1305_v0, %v1309_v4  ;;  %v5324_v53 = vcombine.low %v1336_v37, %v1340_v38  ;;  %v259_v56 = vrot.slane %v5962_v26, %v6002_v47  ;;  %v1380_v37 = vld [vmem:[#allocation8 + $0x8e0] sm:$0xff]  ;;  %v1377_v38 = vld [vmem:[#allocation8 + $0x8c8] sm:$0xff] }
 0x19b   :  { %4258 = vmatpush1.bf16.msra.mxu0 %v5236_v10  ;;  %4422 = vmatpush1.bf16.msra.mxu1 %v5238_v11  ;;  %v1317_v10 = vld [vmem:[#allocation8 + $0x6e8] sm:$0xff]  ;;  %v5292_v11 = vcombine.low %v1304_v62, %v1308_v63 }
 0x19c   :  { %4259 = vmatprep.subr.bf16.mxu0 %v5245_v12  ;;  %4423 = vmatprep.subr.bf16.mxu1 %v5247_v13  ;;  %v5294_v12 = vcombine.low %v1305_v0, %v1309_v4  ;;  %v5301_v13 = vcombine.high %v1312_v2, %v1316_v5  ;;  %v5303_v14 = vcombine.high %v1313_v6, %v1317_v10  ;;  %v1353_v62 = vld [vmem:[#allocation8 + $0x808] sm:$0xff] }
 0x19d   :  { %v1357_v63 = vld [vmem:[#allocation8 + $0x828] sm:$0xff] }
 0x19f   :  { %4260 = vmatpush1.bf16.msra.mxu0 %v5244_v18  ;;  %4424 = vmatpush1.bf16.msra.mxu1 %v5246_v19  ;;  %v1325_v18 = vld [vmem:[#allocation8 + $0x728] sm:$0xff]  ;;  %v5300_v19 = vcombine.low %v1312_v2, %v1316_v5  ;;  %v5343_v5 = vcombine.high %v1353_v62, %v1357_v63 }
 0x1a0   :  { %4261 = vmatprep.subr.bf16.mxu0 %v5253_v20  ;;  %4425 = vmatprep.subr.bf16.mxu1 %v5255_v21  ;;  %v5302_v20 = vcombine.low %v1313_v6, %v1317_v10  ;;  %v5309_v21 = vcombine.high %v1320_v15, %v1324_v16  ;;  %v5311_v22 = vcombine.high %v1321_v17, %v1325_v18  ;;  %v1360_v6 = vld [vmem:[#allocation8 + $0x840] sm:$0xff] }
 0x1a3   :  { %4262 = vmatpush1.bf16.msra.mxu0 %v5252_v31  ;;  %4426 = vmatpush1.bf16.msra.mxu1 %v5254_v32  ;;  %v1333_v31 = vld [vmem:[#allocation8 + $0x768] sm:$0xff]  ;;  %v5997_v32 = vsub.s32 2, %v5957_v23 }
 0x1a4   :  { %4263 = vmatprep.subr.bf16.mxu0 %v5261_v33  ;;  %4427 = vmatprep.subr.bf16.mxu1 %v5263_v34  ;;  %v5308_v33 = vcombine.low %v1320_v15, %v1324_v16  ;;  %v5310_v34 = vcombine.low %v1321_v17, %v1325_v18  ;;  %v5319_v36 = vcombine.high %v1329_v30, %v1333_v31 }
 0x1a5   :  { %v5318_v46 = vcombine.low %v1329_v30, %v1333_v31  ;;  %v5342_v17 = vcombine.low %v1353_v62, %v1357_v63  ;;  %v1397_v62 = vld [vmem:[#allocation8 + $0x968] sm:$0xff] }
 0x1a7   :  { %4264 = vmatpush1.bf16.msra.mxu0 %v5260_v39  ;;  %4428 = vmatpush1.bf16.msra.mxu1 %v5262_v40  ;;  %v1337_v39 = vld [vmem:[#allocation8 + $0x788] sm:$0xff] }
 0x1a8   :  { %4265 = vmatprep.subr.bf16.mxu0 %v5269_v41  ;;  %4429 = vmatprep.subr.bf16.mxu1 %v5271_v45  ;;  %v1341_v40 = vld [vmem:[#allocation8 + $0x7a8] sm:$0xff]  ;;  %v247_v41 = vrot.slane %v5962_v26, %v5997_v32  ;;  %v5316_v45 = vcombine.low %v1328_v28, %v1332_v29 }
 0x1a9   :  { %v5327_v3 = vcombine.high %v1337_v39, %v1341_v40  ;;  %v5326_v54 = vcombine.low %v1337_v39, %v1341_v40  ;;  %v1373_v28 = vld [vmem:[#allocation8 + $0x8a8] sm:$0xff] }
 0x1aa   :  { %v992_v52 = vadd.f32 %v5990_v55, %v247_v41  ;;  %v1381_v39 = vld [vmem:[#allocation8 + $0x8e8] sm:$0xff] }
 0x1ab   :  { %4266 = vmatpush1.bf16.msra.mxu0 %v5268_v49  ;;  %4430 = vmatpush1.bf16.msra.mxu1 %v5270_v24  ;;  %v1344_v49 = vld [vmem:[#allocation8 + $0x7c0] sm:$0xff] }
 0x1ac   :  { %4267 = vmatprep.subr.bf16.mxu0 %v5277_v50  ;;  %4431 = vmatprep.subr.bf16.mxu1 %v5279_v51  ;;  %v1348_v24 = vld [vmem:[#allocation8 + $0x7e0] sm:$0xff]  ;;  %v1345_v50 = vld [vmem:[#allocation8 + $0x7c8] sm:$0xff]  ;;  %v1082_v4 = vmax.f32 %v992_v52, 0.0 }
 0x1ad   :  { %v1349_v51 = vld [vmem:[#allocation8 + $0x7e8] sm:$0xff]  ;;  %v5332_v55 = vcombine.low %v1344_v49, %v1348_v24 }
 0x1ae   :  { %v6009_v15 = vpack.c.bf16 %v1082_v4, %v1082_v4  ;;  %v1389_v52 = vld [vmem:[#allocation8 + $0x928] sm:$0xff] }
 0x1af   :  { %4268 = vmatpush1.bf16.msra.mxu0 %v5276_v57  ;;  %4432 = vmatpush1.bf16.msra.mxu1 %v5278_v58  ;;  %v5333_v57 = vcombine.high %v1344_v49, %v1348_v24  ;;  %v5335_v58 = vcombine.high %v1345_v50, %v1349_v51  ;;  %v5367_v49 = vcombine.high %v1377_v38, %v1381_v39  ;;  %v1384_v24 = vld [vmem:[#allocation8 + $0x900] sm:$0xff] }
 0x1b0   :  { %4269 = vmatprep.subr.bf16.mxu0 %v5285_v59  ;;  %4433 = vmatprep.subr.bf16.mxu1 %v5287_v60  ;;  %v1352_v59 = vld [vmem:[#allocation8 + $0x800] sm:$0xff] }
 0x1b1   :  { %v1356_v60 = vld [vmem:[#allocation8 + $0x820] sm:$0xff] }
 0x1b2   :  { %v5341_v2 = vcombine.high %v1352_v59, %v1356_v60  ;;  %v5340_v16 = vcombine.low %v1352_v59, %v1356_v60  ;;  %v1396_v59 = vld [vmem:[#allocation8 + $0x960] sm:$0xff]  ;;  %v1393_v60 = vld [vmem:[#allocation8 + $0x948] sm:$0xff] }
 0x1b3   :  { %4270 = vmatpush1.bf16.msra.mxu0 %v5284_v8  ;;  %4434 = vmatpush1.bf16.msra.mxu1 %v5286_v9  ;;  %v5334_v9 = vcombine.low %v1345_v50, %v1349_v51  ;;  %v1388_v50 = vld [vmem:[#allocation8 + $0x920] sm:$0xff]  ;;  %v1385_v51 = vld [vmem:[#allocation8 + $0x908] sm:$0xff] }
 0x1b4   :  { %4271 = vmatprep.subr.bf16.mxu0 %v5293_v61  ;;  %4435 = vmatprep.subr.bf16.mxu1 %v5295_v1  ;;  %v5372_v63 = vcombine.low %v1384_v24, %v1388_v50  ;;  %v5374_v4 = vcombine.low %v1385_v51, %v1389_v52 }
 0x1b7   :  { %4272 = vmatpush1.bf16.msra.mxu0 %v5292_v11  ;;  %4436 = vmatpush1.bf16.msra.mxu1 %v5294_v12  ;;  %v1364_v11 = vld [vmem:[#allocation8 + $0x860] sm:$0xff]  ;;  %v1361_v12 = vld [vmem:[#allocation8 + $0x848] sm:$0xff] }
 0x1b8   :  { %4273 = vmatprep.subr.bf16.mxu0 %v5301_v13  ;;  %4437 = vmatprep.subr.bf16.mxu1 %v5303_v14  ;;  %v1365_v13 = vld [vmem:[#allocation8 + $0x868] sm:$0xff]  ;;  %v5349_v18 = vcombine.high %v1360_v6, %v1364_v11  ;;  %v5348_v30 = vcombine.low %v1360_v6, %v1364_v11  ;;  %v5382_v6 = vcombine.low %v1393_v60, %v1397_v62 }
 0x1b9   :  { %v5350_v31 = vcombine.low %v1361_v12, %v1365_v13 }
 0x1bb   :  { %4274 = vmatpush1.bf16.msra.mxu0 %v5300_v19  ;;  %4438 = vmatpush1.bf16.msra.mxu1 %v5302_v20  ;;  %v5351_v19 = vcombine.high %v1361_v12, %v1365_v13  ;;  %v1368_v20 = vld [vmem:[#allocation8 + $0x880] sm:$0xff] }
 0x1bc   :  { %4275 = vmatprep.subr.bf16.mxu0 %v5309_v21  ;;  %4439 = vmatprep.subr.bf16.mxu1 %v5311_v22  ;;  %v1372_v21 = vld [vmem:[#allocation8 + $0x8a0] sm:$0xff]  ;;  %v1369_v22 = vld [vmem:[#allocation8 + $0x888] sm:$0xff] }
 0x1bd   :  { %v1408_v12 = vld [vmem:[#allocation8 + $0x9c0] sm:$0xff] }
 0x1be   :  { %v1412_v13 = vld [vmem:[#allocation8 + $0x9e0] sm:$0xff] }
 0x1bf   :  { %4276 = vmatpush1.bf16.msra.mxu0 %v5308_v33  ;;  %4440 = vmatpush1.bf16.msra.mxu1 %v5310_v34  ;;  %v5357_v33 = vcombine.high %v1368_v20, %v1372_v21  ;;  %v5359_v34 = vcombine.high %v1369_v22, %v1373_v28 }
 0x1c0   :  { %4277 = vmatprep.subr.bf16.mxu0 %v5317_v35  ;;  %4441 = vmatprep.subr.bf16.mxu1 %v5319_v36  ;;  %v1376_v35 = vld [vmem:[#allocation8 + $0x8c0] sm:$0xff] }
 0x1c3   :  { %4278 = vmatpush1.bf16.msra.mxu0 %v5316_v45  ;;  %4442 = vmatpush1.bf16.msra.mxu1 %v5318_v46  ;;  %v5356_v45 = vcombine.low %v1368_v20, %v1372_v21  ;;  %v5358_v46 = vcombine.low %v1369_v22, %v1373_v28  ;;  %v1416_v21 = vld [vmem:[#allocation8 + $0xa00] sm:$0xff]  ;;  %v1417_v28 = vld [vmem:[#allocation8 + $0xa08] sm:$0xff] }
 0x1c4   :  { %4279 = vmatprep.subr.bf16.mxu0 %v5325_v48  ;;  %4443 = vmatprep.subr.bf16.mxu1 %v5327_v3  ;;  %v5365_v3 = vcombine.high %v1376_v35, %v1380_v37  ;;  %v1420_v22 = vld [vmem:[#allocation8 + $0xa20] sm:$0xff] }
 0x1c5   :  { %v6007_v0 = vpop.f32.mrb[4].mxu0 }
 0x1c6   :  { %v1034_v8 = vpop.f32.mrb[5].mxu0 }
 0x1c7   :  { %4280 = vmatpush1.bf16.msra.mxu0 %v5324_v53  ;;  %4444 = vmatpush1.bf16.msra.mxu1 %v5326_v54  ;;  %v1035_v61 = vadd.f32 %v1034_v8, %v259_v56  ;;  %v1036_v1 = vpop.f32.mrb[6].mxu0  ;;  %v6015_v36 = vpop.f32.mrb[4].mxu1  ;;  %v5364_v53 = vcombine.low %v1376_v35, %v1380_v37  ;;  %v5366_v54 = vcombine.low %v1377_v38, %v1381_v39  ;;  %v1424_v37 = vld [vmem:[#allocation8 + $0xa40] sm:$0xff]  ;;  %v1425_v39 = vld [vmem:[#allocation8 + $0xa48] sm:$0xff] }
 0x1c8   :  { %4281 = vmatprep.subr.bf16.mxu0 %v5333_v57  ;;  %4445 = vmatprep.subr.bf16.mxu1 %v5335_v58  ;;  %v1037_v10 = vpop.f32.mrb[7].mxu0  ;;  %v6019_v40 = vpop.f32.mrb[5].mxu1  ;;  %v5373_v56 = vcombine.high %v1384_v24, %v1388_v50  ;;  %v5375_v57 = vcombine.high %v1385_v51, %v1389_v52  ;;  %v1392_v58 = vld [vmem:[#allocation8 + $0x940] sm:$0xff]  ;;  %v1401_v1 = vld [vmem:[#allocation8 + $0x988] sm:$0xff] }
 0x1c9   :  { %v1085_v14 = vmax.f32 %v1035_v61, 0.0  ;;  %v1077_v41 = vpop.f32.mrb[6].mxu1  ;;  %v5381_v8 = vcombine.high %v1392_v58, %v1396_v59  ;;  %v1404_v61 = vld [vmem:[#allocation8 + $0x9a0] sm:$0xff]  ;;  %v1433_v50 = vld [vmem:[#allocation8 + $0xa88] sm:$0xff] }
 0x1ca   :  { %v1078_v48 = vpop.f32.mrb[7].mxu1  ;;  %v1428_v38 = vld [vmem:[#allocation8 + $0xa60] sm:$0xff]  ;;  %v1429_v41 = vld [vmem:[#allocation8 + $0xa68] sm:$0xff] }
 0x1cb   :  { %4282 = vmatpush1.bf16.msra.mxu0 %v5332_v55  ;;  %4446 = vmatpush1.bf16.msra.mxu1 %v5334_v9  ;;  %v6011_v29 = vpack.c.bf16 %v1085_v14, %v1085_v14  ;;  %v5383_v55 = vcombine.high %v1393_v60, %v1397_v62  ;;  %v1400_v9 = vld [vmem:[#allocation8 + $0x980] sm:$0xff]  ;;  %v1409_v14 = vld [vmem:[#allocation8 + $0x9c8] sm:$0xff]  ;;  %v5413_v48 = vcombine.high %v1424_v37, %v1428_v38 }
 0x1cc   :  { %4292 = vmatprep.subr.bf16.mxu0 %v5341_v2  ;;  %4456 = vmatprep.subr.bf16.mxu1 %v5343_v5  ;;  %v1405_v2 = vld [vmem:[#allocation8 + $0x9a8] sm:$0xff]  ;;  %v5380_v5 = vcombine.low %v1392_v58, %v1396_v59  ;;  %v5389_v10 = vcombine.high %v1400_v9, %v1404_v61  ;;  %v1436_v24 = vld [vmem:[#allocation8 + $0xaa0] sm:$0xff]  ;;  %v5412_v52 = vcombine.low %v1424_v37, %v1428_v38 }
 0x1cd   :  { %v5391_v11 = vcombine.high %v1401_v1, %v1405_v2  ;;  %v1437_v51 = vld [vmem:[#allocation8 + $0xaa8] sm:$0xff]  ;;  %v1444_v58 = vld [vmem:[#allocation8 + $0xae0] sm:$0xff] }
 0x1ce   :  { %4284 = vmatmul.mubr.bf16.vlgmr.msra.gmra.mrb[8].mxu0 %v6009_v15  ;;  %4448 = vmatmul.mubr.bf16.vlgmr.msra.gmra.mrb[8].mxu1 %v6009_v15  ;;  %v1441_v59 = vld [vmem:[#allocation8 + $0xac8] sm:$0xff] }
 0x1cf   :  { %4293 = vmatpush1.bf16.msra.mxu0 %v5340_v16  ;;  %4457 = vmatpush1.bf16.msra.mxu1 %v5342_v17  ;;  %v1413_v16 = vld [vmem:[#allocation8 + $0x9e8] sm:$0xff]  ;;  %v5388_v17 = vcombine.low %v1400_v9, %v1404_v61  ;;  %v1452_v9 = vld [vmem:[#allocation8 + $0xb20] sm:$0xff] }
 0x1d0   :  { %4294 = vmatprep.subr.bf16.mxu0 %v5349_v18  ;;  %4458 = vmatprep.subr.bf16.mxu1 %v5351_v19  ;;  %v5390_v18 = vcombine.low %v1401_v1, %v1405_v2  ;;  %v5397_v19 = vcombine.high %v1408_v12, %v1412_v13  ;;  %v5399_v20 = vcombine.high %v1409_v14, %v1413_v16  ;;  %v1445_v60 = vld [vmem:[#allocation8 + $0xae8] sm:$0xff] }
 0x1d1   :  { %4324 = vmatprep.mubr.bf16.mxu0 %v6011_v29  ;;  %4488 = vmatprep.mubr.bf16.mxu1 %v6011_v29  ;;  %v1449_v61 = vld [vmem:[#allocation8 + $0xb08] sm:$0xff] }
 0x1d2   :  { %v1453_v1 = vld [vmem:[#allocation8 + $0xb28] sm:$0xff] }
 0x1d3   :  { %4295 = vmatpush1.bf16.msra.mxu0 %v5348_v30  ;;  %4459 = vmatpush1.bf16.msra.mxu1 %v5350_v31  ;;  %v1421_v30 = vld [vmem:[#allocation8 + $0xa28] sm:$0xff]  ;;  %v5396_v31 = vcombine.low %v1408_v12, %v1412_v13  ;;  %v1460_v12 = vld [vmem:[#allocation8 + $0xb60] sm:$0xff] }
 0x1d4   :  { %4296 = vmatprep.subr.bf16.mxu0 %v5357_v33  ;;  %4460 = vmatprep.subr.bf16.mxu1 %v5359_v34  ;;  %v5398_v33 = vcombine.low %v1409_v14, %v1413_v16  ;;  %v5405_v34 = vcombine.high %v1416_v21, %v1420_v22  ;;  %v5407_v35 = vcombine.high %v1417_v28, %v1421_v30  ;;  %v1457_v13 = vld [vmem:[#allocation8 + $0xb48] sm:$0xff]  ;;  %v6022_v16 = vsub.s32 4, %v5957_v23 }
 0x1d5   :  { %v1461_v14 = vld [vmem:[#allocation8 + $0xb68] sm:$0xff] }
 0x1d7   :  { %4297 = vmatpush1.bf16.msra.mxu0 %v5356_v45  ;;  %4461 = vmatpush1.bf16.msra.mxu1 %v5358_v46  ;;  %v5404_v45 = vcombine.low %v1416_v21, %v1420_v22  ;;  %v5406_v46 = vcombine.low %v1417_v28, %v1421_v30  ;;  %v1464_v21 = vld [vmem:[#allocation8 + $0xb80] sm:$0xff]  ;;  %v1465_v28 = vld [vmem:[#allocation8 + $0xb88] sm:$0xff] }
 0x1d8   :  { %4298 = vmatprep.subr.bf16.mxu0 %v5365_v3  ;;  %4462 = vmatprep.subr.bf16.mxu1 %v5367_v49  ;;  %v5415_v3 = vcombine.high %v1425_v39, %v1429_v41  ;;  %v1432_v49 = vld [vmem:[#allocation8 + $0xa80] sm:$0xff]  ;;  %v1469_v30 = vld [vmem:[#allocation8 + $0xba8] sm:$0xff] }
 0x1d9   :  { %v5420_v62 = vcombine.low %v1432_v49, %v1436_v24  ;;  %v1468_v22 = vld [vmem:[#allocation8 + $0xba0] sm:$0xff]  ;;  %v5455_v38 = vcombine.high %v1465_v28, %v1469_v30 }
 0x1da   :  { %v5453_v37 = vcombine.high %v1464_v21, %v1468_v22 }
 0x1db   :  { %4299 = vmatpush1.bf16.msra.mxu0 %v5364_v53  ;;  %4463 = vmatpush1.bf16.msra.mxu1 %v5366_v54  ;;  %v5414_v53 = vcombine.low %v1425_v39, %v1429_v41  ;;  %v5421_v54 = vcombine.high %v1432_v49, %v1436_v24  ;;  %v1472_v39 = vld [vmem:[#allocation8 + $0xbc0] sm:$0xff]  ;;  %v5452_v49 = vcombine.low %v1464_v21, %v1468_v22  ;;  %v1505_v21 = vld [vmem:[#allocation8 + $0xcc8] sm:$0xff] }
 0x1dc   :  { %4300 = vmatprep.subr.bf16.mxu0 %v5373_v56  ;;  %4464 = vmatprep.subr.bf16.mxu1 %v5375_v57  ;;  %v5423_v56 = vcombine.high %v1433_v50, %v1437_v51  ;;  %v1440_v57 = vld [vmem:[#allocation8 + $0xac0] sm:$0xff]  ;;  %v5454_v24 = vcombine.low %v1465_v28, %v1469_v30  ;;  %v1509_v22 = vld [vmem:[#allocation8 + $0xce8] sm:$0xff] }
 0x1dd   :  { %v5428_v2 = vcombine.low %v1440_v57, %v1444_v58  ;;  %v1476_v41 = vld [vmem:[#allocation8 + $0xbe0] sm:$0xff] }
 0x1df   :  { %4301 = vmatpush1.bf16.msra.mxu0 %v5372_v63  ;;  %4465 = vmatpush1.bf16.msra.mxu1 %v5374_v4  ;;  %v5422_v63 = vcombine.low %v1433_v50, %v1437_v51  ;;  %v5429_v4 = vcombine.high %v1440_v57, %v1444_v58  ;;  %v5461_v50 = vcombine.high %v1472_v39, %v1476_v41 }
 0x1e0   :  { %4302 = vmatprep.subr.bf16.mxu0 %v5381_v8  ;;  %4466 = vmatprep.subr.bf16.mxu1 %v5383_v55  ;;  %v5431_v8 = vcombine.high %v1441_v59, %v1445_v60  ;;  %v1448_v55 = vld [vmem:[#allocation8 + $0xb00] sm:$0xff] }
 0x1e3   :  { %4303 = vmatpush1.bf16.msra.mxu0 %v5380_v5  ;;  %4467 = vmatpush1.bf16.msra.mxu1 %v5382_v6  ;;  %v5430_v5 = vcombine.low %v1441_v59, %v1445_v60  ;;  %v5437_v6 = vcombine.high %v1448_v55, %v1452_v9 }
 0x1e4   :  { %4304 = vmatprep.subr.bf16.mxu0 %v5389_v10  ;;  %4468 = vmatprep.subr.bf16.mxu1 %v5391_v11  ;;  %v5439_v10 = vcombine.high %v1449_v61, %v1453_v1  ;;  %v1456_v11 = vld [vmem:[#allocation8 + $0xb40] sm:$0xff] }
 0x1e7   :  { %4305 = vmatpush1.bf16.msra.mxu0 %v5388_v17  ;;  %4469 = vmatpush1.bf16.msra.mxu1 %v5390_v18  ;;  %v5436_v17 = vcombine.low %v1448_v55, %v1452_v9  ;;  %v5438_v18 = vcombine.low %v1449_v61, %v1453_v1 }
 0x1e8   :  { %4306 = vmatprep.subr.bf16.mxu0 %v5397_v19  ;;  %4470 = vmatprep.subr.bf16.mxu1 %v5399_v20  ;;  %v5445_v19 = vcombine.high %v1456_v11, %v1460_v12  ;;  %v5447_v20 = vcombine.high %v1457_v13, %v1461_v14 }
 0x1eb   :  { %4307 = vmatpush1.bf16.msra.mxu0 %v5396_v31  ;;  %4471 = vmatpush1.bf16.msra.mxu1 %v5398_v33  ;;  %v6025_v31 = vsub.s32 7, %v5957_v23  ;;  %v255_v33 = vrot.slane %v5962_v26, %v6022_v16 }
 0x1ec   :  { %4308 = vmatprep.subr.bf16.mxu0 %v5405_v34  ;;  %4472 = vmatprep.subr.bf16.mxu1 %v5407_v35  ;;  %v5444_v34 = vcombine.low %v1456_v11, %v1460_v12  ;;  %v5446_v35 = vcombine.low %v1457_v13, %v1461_v14  ;;  %v1501_v11 = vld [vmem:[#allocation8 + $0xca8] sm:$0xff] }
 0x1ef   :  { %4309 = vmatpush1.bf16.msra.mxu0 %v5404_v45  ;;  %4473 = vmatpush1.bf16.msra.mxu1 %v5406_v46  ;;  %v1473_v45 = vld [vmem:[#allocation8 + $0xbc8] sm:$0xff] }
 0x1f0   :  { %4310 = vmatprep.subr.bf16.mxu0 %v5413_v48  ;;  %4474 = vmatprep.subr.bf16.mxu1 %v5415_v3  ;;  %v1477_v46 = vld [vmem:[#allocation8 + $0xbe8] sm:$0xff]  ;;  %v267_v48 = vrot.slane %v5962_v26, %v6025_v31  ;;  %v1033_v3 = vadd.f32 %v6007_v0, %v255_v33  ;;  %v5460_v26 = vcombine.low %v1472_v39, %v1476_v41 }
 0x1f1   :  { %v5463_v51 = vcombine.high %v1473_v45, %v1477_v46  ;;  %v5462_v59 = vcombine.low %v1473_v45, %v1477_v46  ;;  %v1517_v39 = vld [vmem:[#allocation8 + $0xd28] sm:$0xff]  ;;  %v5494_v45 = vcombine.low %v1505_v21, %v1509_v22 }
 0x1f2   :  { %v1076_v57 = vadd.f32 %v6019_v40, %v267_v48  ;;  %v1084_v58 = vmax.f32 %v1033_v3, 0.0  ;;  %v1520_v3 = vld [vmem:[#allocation8 + $0xd40] sm:$0xff] }
 0x1f3   :  { %4311 = vmatpush1.bf16.msra.mxu0 %v5412_v52  ;;  %4475 = vmatpush1.bf16.msra.mxu1 %v5414_v53  ;;  %v1480_v52 = vld [vmem:[#allocation8 + $0xc00] sm:$0xff] }
 0x1f4   :  { %4312 = vmatprep.subr.bf16.mxu0 %v5421_v54  ;;  %4476 = vmatprep.subr.bf16.mxu1 %v5423_v56  ;;  %v1484_v53 = vld [vmem:[#allocation8 + $0xc20] sm:$0xff]  ;;  %v1481_v54 = vld [vmem:[#allocation8 + $0xc08] sm:$0xff]  ;;  %v1087_v55 = vmax.f32 %v1076_v57, 0.0  ;;  %v6033_v9 = vpack.c.bf16 %v1084_v58, %v1084_v58 }
 0x1f5   :  { %v1485_v56 = vld [vmem:[#allocation8 + $0xc28] sm:$0xff]  ;;  %v5469_v0 = vcombine.high %v1480_v52, %v1484_v53  ;;  %v5468_v61 = vcombine.low %v1480_v52, %v1484_v53  ;;  %v1532_v57 = vld [vmem:[#allocation8 + $0xda0] sm:$0xff] }
 0x1f6   :  { %v5471_v60 = vcombine.high %v1481_v54, %v1485_v56  ;;  %v5470_v40 = vcombine.low %v1481_v54, %v1485_v56  ;;  %v6035_v12 = vpack.c.bf16 %v1087_v55, %v1087_v55  ;;  %v1528_v56 = vld [vmem:[#allocation8 + $0xd80] sm:$0xff]  ;;  %v1529_v58 = vld [vmem:[#allocation8 + $0xd88] sm:$0xff] }
 0x1f7   :  { %4313 = vmatpush1.bf16.msra.mxu0 %v5420_v62  ;;  %4477 = vmatpush1.bf16.msra.mxu1 %v5422_v63  ;;  %v1488_v62 = vld [vmem:[#allocation8 + $0xc40] sm:$0xff]  ;;  %v1541_v55 = vld [vmem:[#allocation8 + $0xde8] sm:$0xff] }
 0x1f8   :  { %4314 = vmatprep.subr.bf16.mxu0 %v5429_v4  ;;  %4478 = vmatprep.subr.bf16.mxu1 %v5431_v8  ;;  %v1492_v63 = vld [vmem:[#allocation8 + $0xc60] sm:$0xff]  ;;  %v1489_v4 = vld [vmem:[#allocation8 + $0xc48] sm:$0xff] }
 0x1f9   :  { %v1493_v8 = vld [vmem:[#allocation8 + $0xc68] sm:$0xff]  ;;  %v5477_v1 = vcombine.high %v1488_v62, %v1492_v63  ;;  %v5476_v13 = vcombine.low %v1488_v62, %v1492_v63  ;;  %v1536_v63 = vld [vmem:[#allocation8 + $0xdc0] sm:$0xff] }
 0x1fa   :  { %v5478_v14 = vcombine.low %v1489_v4, %v1493_v8 }
 0x1fb   :  { %4315 = vmatpush1.bf16.msra.mxu0 %v5428_v2  ;;  %4479 = vmatpush1.bf16.msra.mxu1 %v5430_v5  ;;  %v5479_v2 = vcombine.high %v1489_v4, %v1493_v8  ;;  %v1496_v5 = vld [vmem:[#allocation8 + $0xc80] sm:$0xff]  ;;  %v1537_v8 = vld [vmem:[#allocation8 + $0xdc8] sm:$0xff] }
 0x1fc   :  { %4316 = vmatprep.subr.bf16.mxu0 %v5437_v6  ;;  %4480 = vmatprep.subr.bf16.mxu1 %v5439_v10  ;;  %v1500_v6 = vld [vmem:[#allocation8 + $0xca0] sm:$0xff]  ;;  %v1497_v10 = vld [vmem:[#allocation8 + $0xc88] sm:$0xff] }
 0x1fd   :  { %v5484_v28 = vcombine.low %v1496_v5, %v1500_v6  ;;  %v5486_v30 = vcombine.low %v1497_v10, %v1501_v11  ;;  %v1540_v4 = vld [vmem:[#allocation8 + $0xde0] sm:$0xff] }
 0x1ff   :  { %4317 = vmatpush1.bf16.msra.mxu0 %v5436_v17  ;;  %4481 = vmatpush1.bf16.msra.mxu1 %v5438_v18  ;;  %v5485_v17 = vcombine.high %v1496_v5, %v1500_v6  ;;  %v5487_v18 = vcombine.high %v1497_v10, %v1501_v11  ;;  %v1544_v5 = vld [vmem:[#allocation8 + $0xe00] sm:$0xff]  ;;  %v1545_v10 = vld [vmem:[#allocation8 + $0xe08] sm:$0xff] }
 0x200   :  { %4318 = vmatprep.subr.bf16.mxu0 %v5445_v19  ;;  %4482 = vmatprep.subr.bf16.mxu1 %v5447_v20  ;;  %v1504_v19 = vld [vmem:[#allocation8 + $0xcc0] sm:$0xff]  ;;  %v1549_v11 = vld [vmem:[#allocation8 + $0xe28] sm:$0xff] }
 0x201   :  { %v1508_v20 = vld [vmem:[#allocation8 + $0xce0] sm:$0xff] }
 0x202   :  { %v5493_v33 = vcombine.high %v1504_v19, %v1508_v20  ;;  %v5492_v41 = vcombine.low %v1504_v19, %v1508_v20  ;;  %v1548_v6 = vld [vmem:[#allocation8 + $0xe20] sm:$0xff] }
 0x203   :  { %4319 = vmatpush1.bf16.msra.mxu0 %v5444_v34  ;;  %4483 = vmatpush1.bf16.msra.mxu1 %v5446_v35  ;;  %v5495_v34 = vcombine.high %v1505_v21, %v1509_v22  ;;  %v1512_v35 = vld [vmem:[#allocation8 + $0xd00] sm:$0xff]  ;;  %v1553_v21 = vld [vmem:[#allocation8 + $0xe48] sm:$0xff] }
 0x204   :  { %4320 = vmatprep.subr.bf16.mxu0 %v5453_v37  ;;  %4484 = vmatprep.subr.bf16.mxu1 %v5455_v38  ;;  %v1516_v37 = vld [vmem:[#allocation8 + $0xd20] sm:$0xff]  ;;  %v1513_v38 = vld [vmem:[#allocation8 + $0xd08] sm:$0xff] }
 0x205   :  { %v5501_v46 = vcombine.high %v1512_v35, %v1516_v37  ;;  %v5503_v48 = vcombine.high %v1513_v38, %v1517_v39  ;;  %v5502_v52 = vcombine.low %v1513_v38, %v1517_v39  ;;  %v1552_v19 = vld [vmem:[#allocation8 + $0xe40] sm:$0xff]  ;;  %v1557_v22 = vld [vmem:[#allocation8 + $0xe68] sm:$0xff] }
 0x206   :  { %v1556_v20 = vld [vmem:[#allocation8 + $0xe60] sm:$0xff]  ;;  %v1561_v38 = vld [vmem:[#allocation8 + $0xe88] sm:$0xff] }
 0x207   :  { %4321 = vmatpush1.bf16.msra.mxu0 %v5452_v49  ;;  %4485 = vmatpush1.bf16.msra.mxu1 %v5454_v24  ;;  %v1524_v49 = vld [vmem:[#allocation8 + $0xd60] sm:$0xff]  ;;  %v1521_v24 = vld [vmem:[#allocation8 + $0xd48] sm:$0xff] }
 0x208   :  { %4322 = vmatprep.subr.bf16.mxu0 %v5461_v50  ;;  %4486 = vmatprep.subr.bf16.mxu1 %v5463_v51  ;;  %v1525_v50 = vld [vmem:[#allocation8 + $0xd68] sm:$0xff]  ;;  %v5500_v51 = vcombine.low %v1512_v35, %v1516_v37  ;;  %v5509_v53 = vcombine.high %v1520_v3, %v1524_v49  ;;  %v1560_v35 = vld [vmem:[#allocation8 + $0xe80] sm:$0xff] }
 0x209   :  { %v5511_v54 = vcombine.high %v1521_v24, %v1525_v50  ;;  %v1564_v37 = vld [vmem:[#allocation8 + $0xea0] sm:$0xff]  ;;  %v1565_v39 = vld [vmem:[#allocation8 + $0xea8] sm:$0xff] }
 0x20b   :  { %4323 = vmatpush1.bf16.msra.mxu0 %v5460_v26  ;;  %4487 = vmatpush1.bf16.msra.mxu1 %v5462_v59  ;;  %v1533_v26 = vld [vmem:[#allocation8 + $0xda8] sm:$0xff]  ;;  %v5508_v59 = vcombine.low %v1520_v3, %v1524_v49  ;;  %v1568_v3 = vld [vmem:[#allocation8 + $0xec0] sm:$0xff] }
 0x20c   :  { %4333 = vmatprep.subr.bf16.mxu0 %v5469_v0  ;;  %4497 = vmatprep.subr.bf16.mxu1 %v5471_v60  ;;  %v5510_v0 = vcombine.low %v1521_v24, %v1525_v50  ;;  %v5517_v60 = vcombine.high %v1528_v56, %v1532_v57  ;;  %v5519_v62 = vcombine.high %v1529_v58, %v1533_v26  ;;  %v1572_v49 = vld [vmem:[#allocation8 + $0xee0] sm:$0xff]  ;;  %v1569_v24 = vld [vmem:[#allocation8 + $0xec8] sm:$0xff] }
 0x20d   :  { %v1573_v50 = vld [vmem:[#allocation8 + $0xee8] sm:$0xff] }
 0x20e   :  { %4325 = vmatmul.mubr.bf16.vlgmr.msra.gmra.mrb[8].mxu0 %v6033_v9  ;;  %4489 = vmatmul.mubr.bf16.vlgmr.msra.gmra.mrb[8].mxu1 %v6033_v9 }
 0x20f   :  { %4334 = vmatpush1.bf16.msra.mxu0 %v5468_v61  ;;  %4498 = vmatpush1.bf16.msra.mxu1 %v5470_v40  ;;  %v5516_v61 = vcombine.low %v1528_v56, %v1532_v57  ;;  %v5518_v40 = vcombine.low %v1529_v58, %v1533_v26  ;;  %v1576_v56 = vld [vmem:[#allocation8 + $0xf00] sm:$0xff]  ;;  %v1577_v58 = vld [vmem:[#allocation8 + $0xf08] sm:$0xff] }
 0x210   :  { %4335 = vmatprep.subr.bf16.mxu0 %v5477_v1  ;;  %4499 = vmatprep.subr.bf16.mxu1 %v5479_v2  ;;  %v5525_v1 = vcombine.high %v1536_v63, %v1540_v4  ;;  %v5527_v2 = vcombine.high %v1537_v8, %v1541_v55  ;;  %v1580_v57 = vld [vmem:[#allocation8 + $0xf20] sm:$0xff]  ;;  %v1581_v26 = vld [vmem:[#allocation8 + $0xf28] sm:$0xff] }
 0x211   :  { %4365 = vmatprep.mubr.bf16.mxu0 %v6035_v12  ;;  %4529 = vmatprep.mubr.bf16.mxu1 %v6035_v12 }
 0x213   :  { %4336 = vmatpush1.bf16.msra.mxu0 %v5476_v13  ;;  %4500 = vmatpush1.bf16.msra.mxu1 %v5478_v14  ;;  %v5524_v13 = vcombine.low %v1536_v63, %v1540_v4  ;;  %v5526_v14 = vcombine.low %v1537_v8, %v1541_v55  ;;  %v1584_v63 = vld [vmem:[#allocation8 + $0xf40] sm:$0xff]  ;;  %v1585_v8 = vld [vmem:[#allocation8 + $0xf48] sm:$0xff] }
 0x214   :  { %4337 = vmatprep.subr.bf16.mxu0 %v5485_v17  ;;  %4501 = vmatprep.subr.bf16.mxu1 %v5487_v18  ;;  %v5533_v17 = vcombine.high %v1544_v5, %v1548_v6  ;;  %v5535_v18 = vcombine.high %v1545_v10, %v1549_v11  ;;  %v1588_v4 = vld [vmem:[#allocation8 + $0xf60] sm:$0xff]  ;;  %v1589_v55 = vld [vmem:[#allocation8 + $0xf68] sm:$0xff] }
 0x217   :  { %4338 = vmatpush1.bf16.msra.mxu0 %v5484_v28  ;;  %4502 = vmatpush1.bf16.msra.mxu1 %v5486_v30  ;;  %v5532_v28 = vcombine.low %v1544_v5, %v1548_v6  ;;  %v5534_v30 = vcombine.low %v1545_v10, %v1549_v11  ;;  %v5575_v5 = vcombine.high %v1585_v8, %v1589_v55  ;;  %v1592_v6 = vld [vmem:[#allocation8 + $0xf80] sm:$0xff]  ;;  %v1593_v11 = vld [vmem:[#allocation8 + $0xf88] sm:$0xff] }
 0x218   :  { %4339 = vmatprep.subr.bf16.mxu0 %v5493_v33  ;;  %4503 = vmatprep.subr.bf16.mxu1 %v5495_v34  ;;  %v5541_v33 = vcombine.high %v1552_v19, %v1556_v20  ;;  %v5543_v34 = vcombine.high %v1553_v21, %v1557_v22  ;;  %v1596_v10 = vld [vmem:[#allocation8 + $0xfa0] sm:$0xff] }
 0x21b   :  { %4340 = vmatpush1.bf16.msra.mxu0 %v5492_v41  ;;  %4504 = vmatpush1.bf16.msra.mxu1 %v5494_v45  ;;  %v5540_v41 = vcombine.low %v1552_v19, %v1556_v20  ;;  %v5542_v45 = vcombine.low %v1553_v21, %v1557_v22  ;;  %v5581_v20 = vcombine.high %v1592_v6, %v1596_v10  ;;  %v1600_v21 = vld [vmem:[#allocation8 + $0xfc0] sm:$0xff] }
 0x21c   :  { %4341 = vmatprep.subr.bf16.mxu0 %v5501_v46  ;;  %4505 = vmatprep.subr.bf16.mxu1 %v5503_v48  ;;  %v5549_v46 = vcombine.high %v1560_v35, %v1564_v37  ;;  %v5551_v48 = vcombine.high %v1561_v38, %v1565_v39  ;;  %v1604_v22 = vld [vmem:[#allocation8 + $0xfe0] sm:$0xff] }
 0x21f   :  { %4342 = vmatpush1.bf16.msra.mxu0 %v5500_v51  ;;  %4506 = vmatpush1.bf16.msra.mxu1 %v5502_v52  ;;  %v5548_v51 = vcombine.low %v1560_v35, %v1564_v37  ;;  %v5550_v52 = vcombine.low %v1561_v38, %v1565_v39  ;;  %v5589_v37 = vcombine.high %v1600_v21, %v1604_v22  ;;  %v1098_v39 = vld [vmem:[#allocation8 + $0x10] sm:$0xff] }
 0x220   :  { %4343 = vmatprep.subr.bf16.mxu0 %v5509_v53  ;;  %4507 = vmatprep.subr.bf16.mxu1 %v5511_v54  ;;  %v5557_v53 = vcombine.high %v1568_v3, %v1572_v49  ;;  %v5559_v54 = vcombine.high %v1569_v24, %v1573_v50 }
 0x223   :  { %4344 = vmatpush1.bf16.msra.mxu0 %v5508_v59  ;;  %4508 = vmatpush1.bf16.msra.mxu1 %v5510_v0  ;;  %v5556_v59 = vcombine.low %v1568_v3, %v1572_v49  ;;  %v5558_v0 = vcombine.low %v1569_v24, %v1573_v50 }
 0x224   :  { %4345 = vmatprep.subr.bf16.mxu0 %v5517_v60  ;;  %4509 = vmatprep.subr.bf16.mxu1 %v5519_v62  ;;  %v5565_v60 = vcombine.high %v1576_v56, %v1580_v57  ;;  %v5567_v62 = vcombine.high %v1577_v58, %v1581_v26 }
 0x227   :  { %4346 = vmatpush1.bf16.msra.mxu0 %v5516_v61  ;;  %4510 = vmatpush1.bf16.msra.mxu1 %v5518_v40  ;;  %v5564_v61 = vcombine.low %v1576_v56, %v1580_v57  ;;  %v5566_v40 = vcombine.low %v1577_v58, %v1581_v26 }
 0x228   :  { %4347 = vmatprep.subr.bf16.mxu0 %v5525_v1  ;;  %4511 = vmatprep.subr.bf16.mxu1 %v5527_v2  ;;  %v6042_v1 = vsub.s32 6, %v5957_v23  ;;  %v5573_v2 = vcombine.high %v1584_v63, %v1588_v4 }
 0x22b   :  { %4348 = vmatpush1.bf16.msra.mxu0 %v5524_v13  ;;  %4512 = vmatpush1.bf16.msra.mxu1 %v5526_v14  ;;  %v1597_v13 = vld [vmem:[#allocation8 + $0xfa8] sm:$0xff]  ;;  %v5572_v14 = vcombine.low %v1584_v63, %v1588_v4 }
 0x22c   :  { %4349 = vmatprep.subr.bf16.mxu0 %v5533_v17  ;;  %4513 = vmatprep.subr.bf16.mxu1 %v5535_v18  ;;  %v5574_v17 = vcombine.low %v1585_v8, %v1589_v55  ;;  %v5665_v18 = vld [vmem:[#allocation7] sm:$0xff]  ;;  %v5583_v23 = vcombine.high %v1593_v11, %v1597_v13 }
 0x22d   :  { %v263_v19 = vrot.slane %v5665_v18, %v6042_v1  ;;  %v1135_v18 = vld [vmem:[#allocation8 + $0x138] sm:$0xff] }
 0x22f   :  { %4350 = vmatpush1.bf16.msra.mxu0 %v5532_v28  ;;  %4514 = vmatpush1.bf16.msra.mxu1 %v5534_v30  ;;  %v1601_v28 = vld [vmem:[#allocation8 + $0xfc8] sm:$0xff]  ;;  %v1074_v35 = vadd.f32 %v6015_v36, %v263_v19  ;;  %v1107_v36 = vld [vmem:[#allocation8 + $0x58] sm:$0xff] }
 0x230   :  { %4351 = vmatprep.subr.bf16.mxu0 %v5541_v33  ;;  %4515 = vmatprep.subr.bf16.mxu1 %v5543_v34  ;;  %v1605_v30 = vld [vmem:[#allocation8 + $0xfe8] sm:$0xff]  ;;  %v5580_v33 = vcombine.low %v1592_v6, %v1596_v10  ;;  %v5582_v34 = vcombine.low %v1593_v11, %v1597_v13 }
 0x231   :  { %v5591_v38 = vcombine.high %v1601_v28, %v1605_v30  ;;  %v5590_v3 = vcombine.low %v1601_v28, %v1605_v30  ;;  %v1086_v49 = vmax.f32 %v1074_v35, 0.0  ;;  %v1142_v28 = vld [vmem:[#allocation8 + $0x170] sm:$0xff]  ;;  %v1139_v30 = vld [vmem:[#allocation8 + $0x158] sm:$0xff] }
 0x233   :  { %4352 = vmatpush1.bf16.msra.mxu0 %v5540_v41  ;;  %4516 = vmatpush1.bf16.msra.mxu1 %v5542_v45  ;;  %v1102_v41 = vld [vmem:[#allocation8 + $0x30] sm:$0xff]  ;;  %v1099_v45 = vld [vmem:[#allocation8 + $0x18] sm:$0xff]  ;;  %v6046_v56 = vpack.c.bf16 %v1086_v49, %v1086_v49 }
 0x234   :  { %4353 = vmatprep.subr.bf16.mxu0 %v5549_v46  ;;  %4517 = vmatprep.subr.bf16.mxu1 %v5551_v48  ;;  %v1103_v46 = vld [vmem:[#allocation8 + $0x38] sm:$0xff]  ;;  %v5588_v48 = vcombine.low %v1600_v21, %v1604_v22  ;;  %v5089_v24 = vcombine.high %v1098_v39, %v1102_v41  ;;  %v1138_v22 = vld [vmem:[#allocation8 + $0x150] sm:$0xff] }
 0x235   :  { %v5091_v50 = vcombine.high %v1099_v45, %v1103_v46  ;;  %v5090_v57 = vcombine.low %v1099_v45, %v1103_v46  ;;  %v1147_v45 = vld [vmem:[#allocation8 + $0x198] sm:$0xff] }
 0x236   :  { %v1151_v46 = vld [vmem:[#allocation8 + $0x1b8] sm:$0xff] }
 0x237   :  { %4354 = vmatpush1.bf16.msra.mxu0 %v5548_v51  ;;  %4518 = vmatpush1.bf16.msra.mxu1 %v5550_v52  ;;  %v1106_v51 = vld [vmem:[#allocation8 + $0x50] sm:$0xff] }
 0x238   :  { %4355 = vmatprep.subr.bf16.mxu0 %v5557_v53  ;;  %4519 = vmatprep.subr.bf16.mxu1 %v5559_v54  ;;  %v1110_v52 = vld [vmem:[#allocation8 + $0x70] sm:$0xff]  ;;  %v1111_v53 = vld [vmem:[#allocation8 + $0x78] sm:$0xff]  ;;  %v5088_v54 = vcombine.low %v1098_v39, %v1102_v41 }
 0x239   :  { %v5097_v58 = vcombine.high %v1106_v51, %v1110_v52  ;;  %v5099_v26 = vcombine.high %v1107_v36, %v1111_v53  ;;  %v5096_v63 = vcombine.low %v1106_v51, %v1110_v52  ;;  %v5098_v4 = vcombine.low %v1107_v36, %v1111_v53  ;;  %v1146_v39 = vld [vmem:[#allocation8 + $0x190] sm:$0xff]  ;;  %v1155_v52 = vld [vmem:[#allocation8 + $0x1d8] sm:$0xff] }
 0x23a   :  { %v1150_v41 = vld [vmem:[#allocation8 + $0x1b0] sm:$0xff]  ;;  %v1159_v36 = vld [vmem:[#allocation8 + $0x1f8] sm:$0xff] }
 0x23b   :  { %4356 = vmatpush1.bf16.msra.mxu0 %v5556_v59  ;;  %4520 = vmatpush1.bf16.msra.mxu1 %v5558_v0  ;;  %v1114_v59 = vld [vmem:[#allocation8 + $0x90] sm:$0xff]  ;;  %v5137_v49 = vcombine.high %v1146_v39, %v1150_v41  ;;  %v5136_v53 = vcombine.low %v1146_v39, %v1150_v41  ;;  %v1195_v41 = vld [vmem:[#allocation8 + $0x318] sm:$0xff] }
 0x23c   :  { %4357 = vmatprep.subr.bf16.mxu0 %v5565_v60  ;;  %4521 = vmatprep.subr.bf16.mxu1 %v5567_v62  ;;  %v1118_v0 = vld [vmem:[#allocation8 + $0xb0] sm:$0xff]  ;;  %v1115_v60 = vld [vmem:[#allocation8 + $0x98] sm:$0xff] }
 0x23d   :  { %v1119_v62 = vld [vmem:[#allocation8 + $0xb8] sm:$0xff]  ;;  %v5105_v8 = vcombine.high %v1114_v59, %v1118_v0  ;;  %v5104_v6 = vcombine.low %v1114_v59, %v1118_v0  ;;  %v1158_v51 = vld [vmem:[#allocation8 + $0x1f0] sm:$0xff] }
 0x23e   :  { %v5107_v55 = vcombine.high %v1115_v60, %v1119_v62  ;;  %v5106_v10 = vcombine.low %v1115_v60, %v1119_v62  ;;  %v1166_v59 = vld [vmem:[#allocation8 + $0x230] sm:$0xff]  ;;  %v1163_v0 = vld [vmem:[#allocation8 + $0x218] sm:$0xff] }
 0x23f   :  { %4358 = vmatpush1.bf16.msra.mxu0 %v5564_v61  ;;  %4522 = vmatpush1.bf16.msra.mxu1 %v5566_v40  ;;  %v1122_v61 = vld [vmem:[#allocation8 + $0xd0] sm:$0xff]  ;;  %v1167_v60 = vld [vmem:[#allocation8 + $0x238] sm:$0xff] }
 0x240   :  { %4359 = vmatprep.subr.bf16.mxu0 %v5573_v2  ;;  %4523 = vmatprep.subr.bf16.mxu1 %v5575_v5  ;;  %v1126_v40 = vld [vmem:[#allocation8 + $0xf0] sm:$0xff]  ;;  %v1123_v2 = vld [vmem:[#allocation8 + $0xd8] sm:$0xff] }
 0x241   :  { %v1127_v5 = vld [vmem:[#allocation8 + $0xf8] sm:$0xff]  ;;  %v5113_v11 = vcombine.high %v1122_v61, %v1126_v40  ;;  %v5112_v19 = vcombine.low %v1122_v61, %v1126_v40  ;;  %v1174_v61 = vld [vmem:[#allocation8 + $0x270] sm:$0xff] }
 0x242   :  { %v5115_v13 = vcombine.high %v1123_v2, %v1127_v5  ;;  %v1171_v40 = vld [vmem:[#allocation8 + $0x258] sm:$0xff]  ;;  %v1198_v39 = vld [vmem:[#allocation8 + $0x330] sm:$0xff] }
 0x243   :  { %4360 = vmatpush1.bf16.msra.mxu0 %v5572_v14  ;;  %4524 = vmatpush1.bf16.msra.mxu1 %v5574_v17  ;;  %v1130_v14 = vld [vmem:[#allocation8 + $0x110] sm:$0xff] }
 0x244   :  { %4361 = vmatprep.subr.bf16.mxu0 %v5581_v20  ;;  %4525 = vmatprep.subr.bf16.mxu1 %v5583_v23  ;;  %v1134_v17 = vld [vmem:[#allocation8 + $0x130] sm:$0xff]  ;;  %v5114_v20 = vcombine.low %v1123_v2, %v1127_v5  ;;  %v1175_v2 = vld [vmem:[#allocation8 + $0x278] sm:$0xff] }
 0x245   :  { %v5121_v23 = vcombine.high %v1130_v14, %v1134_v17 }
 0x247   :  { %4362 = vmatpush1.bf16.msra.mxu0 %v5580_v33  ;;  %4526 = vmatpush1.bf16.msra.mxu1 %v5582_v34  ;;  %v1143_v33 = vld [vmem:[#allocation8 + $0x178] sm:$0xff]  ;;  %v5120_v34 = vcombine.low %v1130_v14, %v1134_v17  ;;  %v1182_v14 = vld [vmem:[#allocation8 + $0x2b0] sm:$0xff] }
 0x248   :  { %4363 = vmatprep.subr.bf16.mxu0 %v5589_v37  ;;  %4527 = vmatprep.subr.bf16.mxu1 %v5591_v38  ;;  %v5129_v37 = vcombine.high %v1138_v22, %v1142_v28  ;;  %v5131_v38 = vcombine.high %v1139_v30, %v1143_v33  ;;  %v1179_v17 = vld [vmem:[#allocation8 + $0x298] sm:$0xff] }
 0x24b   :  { %4364 = vmatpush1.bf16.msra.mxu0 %v5588_v48  ;;  %4528 = vmatpush1.bf16.msra.mxu1 %v5590_v3  ;;  %v5128_v48 = vcombine.low %v1138_v22, %v1142_v28  ;;  %v5130_v3 = vcombine.low %v1139_v30, %v1143_v33  ;;  %v1190_v22 = vld [vmem:[#allocation8 + $0x2f0] sm:$0xff]  ;;  %v1187_v28 = vld [vmem:[#allocation8 + $0x2d8] sm:$0xff] }
 0x24c   :  { %4538 = vmatprep.subr.bf16.mxu0 %v5089_v24  ;;  %4702 = vmatprep.subr.bf16.mxu1 %v5091_v50  ;;  %v5139_v24 = vcombine.high %v1147_v45, %v1151_v46  ;;  %v1154_v50 = vld [vmem:[#allocation8 + $0x1d0] sm:$0xff]  ;;  %v1191_v30 = vld [vmem:[#allocation8 + $0x2f8] sm:$0xff] }
 0x24d   :  { %v5144_v62 = vcombine.low %v1154_v50, %v1158_v51 }
 0x24e   :  { %4366 = vmatmul.mubr.bf16.vlgmr.msra.gmra.mrb[8].mxu0 %v6046_v56  ;;  %4530 = vmatmul.mubr.bf16.vlgmr.msra.gmra.mrb[8].mxu1 %v6046_v56 }
 0x24f   :  { %4539 = vmatpush1.bf16.msra.mxu0 %v5088_v54  ;;  %4570 = vmatprep.mubr.bf16.mxu0 %v5974_v43  ;;  %v5138_v54 = vcombine.low %v1147_v45, %v1151_v46  ;;  %v1199_v45 = vld [vmem:[#allocation8 + $0x338] sm:$0xff] }
 0x250   :  { %4703 = vmatpush1.bf16.msra.mxu1 %v5090_v57  ;;  %4734 = vmatprep.mubr.bf16.mxu1 %v5974_v43  ;;  %v1131_v43 = vld [vmem:[#allocation8 + $0x118] sm:$0xff]  ;;  %v5145_v57 = vcombine.high %v1154_v50, %v1158_v51  ;;  %v1206_v50 = vld [vmem:[#allocation8 + $0x370] sm:$0xff] }
 0x251   :  { %4540 = vmatprep.subr.bf16.mxu0 %v5097_v58  ;;  %4704 = vmatprep.subr.bf16.mxu1 %v5099_v26  ;;  %v5123_v21 = vcombine.high %v1131_v43, %v1135_v18  ;;  %v5122_v35 = vcombine.low %v1131_v43, %v1135_v18  ;;  %v5147_v58 = vcombine.high %v1155_v52, %v1159_v36  ;;  %v1162_v26 = vld [vmem:[#allocation8 + $0x210] sm:$0xff]  ;;  %v1183_v43 = vld [vmem:[#allocation8 + $0x2b8] sm:$0xff] }
 0x252   :  { %v5152_v5 = vcombine.low %v1162_v26, %v1166_v59  ;;  %v1203_v51 = vld [vmem:[#allocation8 + $0x358] sm:$0xff] }
 0x253   :  { %4541 = vmatpush1.bf16.msra.mxu0 %v5096_v63  ;;  %v5146_v63 = vcombine.low %v1155_v52, %v1159_v36  ;;  %v1207_v52 = vld [vmem:[#allocation8 + $0x378] sm:$0xff] }
 0x254   :  { %4705 = vmatpush1.bf16.msra.mxu1 %v5098_v4  ;;  %4542 = vmatprep.subr.bf16.mxu0 %v5105_v8  ;;  %v5153_v4 = vcombine.high %v1162_v26, %v1166_v59  ;;  %v5155_v8 = vcombine.high %v1163_v0, %v1167_v60  ;;  %v1214_v26 = vld [vmem:[#allocation8 + $0x3b0] sm:$0xff]  ;;  %v1211_v59 = vld [vmem:[#allocation8 + $0x398] sm:$0xff] }
 0x255   :  { %4706 = vmatprep.subr.bf16.mxu1 %v5107_v55  ;;  %v1170_v55 = vld [vmem:[#allocation8 + $0x250] sm:$0xff] }
 0x256   :  { %v5160_v18 = vcombine.low %v1170_v55, %v1174_v61 }
 0x257   :  { %4543 = vmatpush1.bf16.msra.mxu0 %v5104_v6  ;;  %v5154_v6 = vcombine.low %v1163_v0, %v1167_v60  ;;  %v1215_v0 = vld [vmem:[#allocation8 + $0x3b8] sm:$0xff] }
 0x258   :  { %4707 = vmatpush1.bf16.msra.mxu1 %v5106_v10  ;;  %4544 = vmatprep.subr.bf16.mxu0 %v5113_v11  ;;  %v5161_v10 = vcombine.high %v1170_v55, %v1174_v61  ;;  %v5163_v11 = vcombine.high %v1171_v40, %v1175_v2  ;;  %v1222_v55 = vld [vmem:[#allocation8 + $0x3f0] sm:$0xff]  ;;  %v1219_v61 = vld [vmem:[#allocation8 + $0x3d8] sm:$0xff] }
 0x259   :  { %4708 = vmatprep.subr.bf16.mxu1 %v5115_v13  ;;  %v1178_v13 = vld [vmem:[#allocation8 + $0x290] sm:$0xff] }
 0x25a   :  { %v5168_v33 = vcombine.low %v1178_v13, %v1182_v14 }
 0x25b   :  { %4545 = vmatpush1.bf16.msra.mxu0 %v5112_v19  ;;  %v5162_v19 = vcombine.low %v1171_v40, %v1175_v2  ;;  %v1223_v40 = vld [vmem:[#allocation8 + $0x3f8] sm:$0xff] }
 0x25c   :  { %4709 = vmatpush1.bf16.msra.mxu1 %v5114_v20  ;;  %4546 = vmatprep.subr.bf16.mxu0 %v5121_v23  ;;  %v5169_v20 = vcombine.high %v1178_v13, %v1182_v14  ;;  %v5171_v23 = vcombine.high %v1179_v17, %v1183_v43  ;;  %v1230_v13 = vld [vmem:[#allocation8 + $0x430] sm:$0xff]  ;;  %v1227_v14 = vld [vmem:[#allocation8 + $0x418] sm:$0xff] }
 0x25d   :  { %4710 = vmatprep.subr.bf16.mxu1 %v5123_v21  ;;  %v1186_v21 = vld [vmem:[#allocation8 + $0x2d0] sm:$0xff] }
 0x25e   :  { %v5176_v46 = vcombine.low %v1186_v21, %v1190_v22 }
 0x25f   :  { %4547 = vmatpush1.bf16.msra.mxu0 %v5120_v34  ;;  %v5170_v34 = vcombine.low %v1179_v17, %v1183_v43  ;;  %v1231_v17 = vld [vmem:[#allocation8 + $0x438] sm:$0xff] }
 0x260   :  { %4711 = vmatpush1.bf16.msra.mxu1 %v5122_v35  ;;  %4548 = vmatprep.subr.bf16.mxu0 %v5129_v37  ;;  %v5177_v35 = vcombine.high %v1186_v21, %v1190_v22  ;;  %v5179_v37 = vcombine.high %v1187_v28, %v1191_v30  ;;  %v1238_v21 = vld [vmem:[#allocation8 + $0x470] sm:$0xff] }
 0x261   :  { %4712 = vmatprep.subr.bf16.mxu1 %v5131_v38  ;;  %v1194_v38 = vld [vmem:[#allocation8 + $0x310] sm:$0xff] }
 0x262   :  { %v5184_v36 = vcombine.low %v1194_v38, %v1198_v39 }
 0x263   :  { %4549 = vmatpush1.bf16.msra.mxu0 %v5128_v48  ;;  %v5178_v48 = vcombine.low %v1187_v28, %v1191_v30  ;;  %v1235_v28 = vld [vmem:[#allocation8 + $0x458] sm:$0xff] }
 0x264   :  { %4713 = vmatpush1.bf16.msra.mxu1 %v5130_v3  ;;  %4550 = vmatprep.subr.bf16.mxu0 %v5137_v49  ;;  %v5185_v3 = vcombine.high %v1194_v38, %v1198_v39  ;;  %v5187_v49 = vcombine.high %v1195_v41, %v1199_v45  ;;  %v1239_v30 = vld [vmem:[#allocation8 + $0x478] sm:$0xff] }
 0x265   :  { %4714 = vmatprep.subr.bf16.mxu1 %v5139_v24  ;;  %v1202_v24 = vld [vmem:[#allocation8 + $0x350] sm:$0xff]  ;;  %v5227_v38 = vcombine.high %v1235_v28, %v1239_v30  ;;  %v1243_v39 = vld [vmem:[#allocation8 + $0x498] sm:$0xff] }
 0x266   :  { %v5192_v60 = vcombine.low %v1202_v24, %v1206_v50 }
 0x267   :  { %4551 = vmatpush1.bf16.msra.mxu0 %v5136_v53  ;;  %v5186_v53 = vcombine.low %v1195_v41, %v1199_v45  ;;  %v1247_v41 = vld [vmem:[#allocation8 + $0x4b8] sm:$0xff] }
 0x268   :  { %4715 = vmatpush1.bf16.msra.mxu1 %v5138_v54  ;;  %4552 = vmatprep.subr.bf16.mxu0 %v5145_v57  ;;  %v5193_v54 = vcombine.high %v1202_v24, %v1206_v50  ;;  %v5195_v57 = vcombine.high %v1203_v51, %v1207_v52  ;;  %v1254_v24 = vld [vmem:[#allocation8 + $0x4f0] sm:$0xff]  ;;  %v1251_v50 = vld [vmem:[#allocation8 + $0x4d8] sm:$0xff] }
 0x269   :  { %4716 = vmatprep.subr.bf16.mxu1 %v5147_v58  ;;  %v1210_v58 = vld [vmem:[#allocation8 + $0x390] sm:$0xff] }
 0x26a   :  { %v5200_v2 = vcombine.low %v1210_v58, %v1214_v26 }
 0x26b   :  { %4553 = vmatpush1.bf16.msra.mxu0 %v5144_v62  ;;  %v5194_v62 = vcombine.low %v1203_v51, %v1207_v52  ;;  %v1255_v51 = vld [vmem:[#allocation8 + $0x4f8] sm:$0xff] }
 0x26c   :  { %4717 = vmatpush1.bf16.msra.mxu1 %v5146_v63  ;;  %4554 = vmatprep.subr.bf16.mxu0 %v5153_v4  ;;  %v5201_v63 = vcombine.high %v1210_v58, %v1214_v26  ;;  %v5203_v4 = vcombine.high %v1211_v59, %v1215_v0  ;;  %v1259_v58 = vld [vmem:[#allocation8 + $0x518] sm:$0xff] }
 0x26d   :  { %4718 = vmatprep.subr.bf16.mxu1 %v5155_v8  ;;  %v1218_v8 = vld [vmem:[#allocation8 + $0x3d0] sm:$0xff]  ;;  %v1263_v26 = vld [vmem:[#allocation8 + $0x538] sm:$0xff] }
 0x26e   :  { %v5208_v43 = vcombine.low %v1218_v8, %v1222_v55 }
 0x26f   :  { %4555 = vmatpush1.bf16.msra.mxu0 %v5152_v5  ;;  %v5202_v5 = vcombine.low %v1211_v59, %v1215_v0  ;;  %v5242_v59 = vcombine.low %v1251_v50, %v1255_v51 }
 0x270   :  { %4719 = vmatpush1.bf16.msra.mxu1 %v5154_v6  ;;  %4556 = vmatprep.subr.bf16.mxu0 %v5161_v10  ;;  %v5209_v6 = vcombine.high %v1218_v8, %v1222_v55  ;;  %v5211_v10 = vcombine.high %v1219_v61, %v1223_v40  ;;  %v1271_v8 = vld [vmem:[#allocation8 + $0x578] sm:$0xff] }
 0x271   :  { %4720 = vmatprep.subr.bf16.mxu1 %v5163_v11  ;;  %v1226_v11 = vld [vmem:[#allocation8 + $0x410] sm:$0xff] }
 0x272   :  { %v5216_v22 = vcombine.low %v1226_v11, %v1230_v13 }
 0x273   :  { %4557 = vmatpush1.bf16.msra.mxu0 %v5160_v18  ;;  %v5210_v18 = vcombine.low %v1219_v61, %v1223_v40  ;;  %v5250_v61 = vcombine.low %v1259_v58, %v1263_v26 }
 0x274   :  { %4721 = vmatpush1.bf16.msra.mxu1 %v5162_v19  ;;  %4558 = vmatprep.subr.bf16.mxu0 %v5169_v20  ;;  %v5217_v19 = vcombine.high %v1226_v11, %v1230_v13  ;;  %v5219_v20 = vcombine.high %v1227_v14, %v1231_v17  ;;  %v1279_v11 = vld [vmem:[#allocation8 + $0x5b8] sm:$0xff] }
 0x275   :  { %4722 = vmatprep.subr.bf16.mxu1 %v5171_v23  ;;  %v1234_v23 = vld [vmem:[#allocation8 + $0x450] sm:$0xff] }
 0x276   :  { %v5224_v45 = vcombine.low %v1234_v23, %v1238_v21 }
 0x277   :  { %4559 = vmatpush1.bf16.msra.mxu0 %v5168_v33  ;;  %v5218_v33 = vcombine.low %v1227_v14, %v1231_v17 }
 0x278   :  { %4723 = vmatpush1.bf16.msra.mxu1 %v5170_v34  ;;  %4560 = vmatprep.subr.bf16.mxu0 %v5177_v35  ;;  %v5225_v34 = vcombine.high %v1234_v23, %v1238_v21  ;;  %v1242_v35 = vld [vmem:[#allocation8 + $0x490] sm:$0xff]  ;;  %v1287_v23 = vld [vmem:[#allocation8 + $0x5f8] sm:$0xff] }
 0x279   :  { %4724 = vmatprep.subr.bf16.mxu1 %v5179_v37  ;;  %v1246_v37 = vld [vmem:[#allocation8 + $0x4b0] sm:$0xff] }
 0x27a   :  { %v5232_v52 = vcombine.low %v1242_v35, %v1246_v37 }
 0x27b   :  { %4561 = vmatpush1.bf16.msra.mxu0 %v5176_v46  ;;  %v5226_v46 = vcombine.low %v1235_v28, %v1239_v30 }
 0x27c   :  { %4725 = vmatpush1.bf16.msra.mxu1 %v5178_v48  ;;  %4562 = vmatprep.subr.bf16.mxu0 %v5185_v3  ;;  %v5233_v48 = vcombine.high %v1242_v35, %v1246_v37  ;;  %v5235_v3 = vcombine.high %v1243_v39, %v1247_v41  ;;  %v1291_v35 = vld [vmem:[#allocation8 + $0x618] sm:$0xff] }
 0x27d   :  { %4726 = vmatprep.subr.bf16.mxu1 %v5187_v49  ;;  %v1250_v49 = vld [vmem:[#allocation8 + $0x4d0] sm:$0xff]  ;;  %v1295_v37 = vld [vmem:[#allocation8 + $0x638] sm:$0xff] }
 0x27f   :  { %4563 = vmatpush1.bf16.msra.mxu0 %v5184_v36  ;;  %v5241_v36 = vcombine.high %v1250_v49, %v1254_v24 }
 0x280   :  { %4727 = vmatpush1.bf16.msra.mxu1 %v5186_v53  ;;  %4564 = vmatprep.subr.bf16.mxu0 %v5193_v54  ;;  %v5243_v53 = vcombine.high %v1251_v50, %v1255_v51  ;;  %v1258_v54 = vld [vmem:[#allocation8 + $0x510] sm:$0xff]  ;;  %v5282_v50 = vcombine.low %v1291_v35, %v1295_v37 }
 0x281   :  { %4728 = vmatprep.subr.bf16.mxu1 %v5195_v57  ;;  %v1262_v57 = vld [vmem:[#allocation8 + $0x530] sm:$0xff] }
 0x282   :  { %v5249_v0 = vcombine.high %v1258_v54, %v1262_v57  ;;  %v5248_v55 = vcombine.low %v1258_v54, %v1262_v57  ;;  %v1311_v54 = vld [vmem:[#allocation8 + $0x6b8] sm:$0xff] }
 0x283   :  { %4565 = vmatpush1.bf16.msra.mxu0 %v5192_v60  ;;  %v5251_v60 = vcombine.high %v1259_v58, %v1263_v26 }
 0x284   :  { %4729 = vmatpush1.bf16.msra.mxu1 %v5194_v62  ;;  %4566 = vmatprep.subr.bf16.mxu0 %v5201_v63  ;;  %v1266_v62 = vld [vmem:[#allocation8 + $0x550] sm:$0xff] }
 0x285   :  { %4730 = vmatprep.subr.bf16.mxu1 %v5203_v4  ;;  %v1270_v63 = vld [vmem:[#allocation8 + $0x570] sm:$0xff]  ;;  %v1267_v4 = vld [vmem:[#allocation8 + $0x558] sm:$0xff] }
 0x286   :  { %v5257_v40 = vcombine.high %v1266_v62, %v1270_v63  ;;  %v5256_v13 = vcombine.low %v1266_v62, %v1270_v63  ;;  %v5258_v14 = vcombine.low %v1267_v4, %v1271_v8  ;;  %v1319_v62 = vld [vmem:[#allocation8 + $0x6f8] sm:$0xff] }
 0x287   :  { %4567 = vmatpush1.bf16.msra.mxu0 %v5200_v2  ;;  %v5259_v2 = vcombine.high %v1267_v4, %v1271_v8 }
 0x288   :  { %4731 = vmatpush1.bf16.msra.mxu1 %v5202_v5  ;;  %4568 = vmatprep.subr.bf16.mxu0 %v5209_v6  ;;  %v1274_v5 = vld [vmem:[#allocation8 + $0x590] sm:$0xff] }
 0x289   :  { %4732 = vmatprep.subr.bf16.mxu1 %v5211_v10  ;;  %v1278_v6 = vld [vmem:[#allocation8 + $0x5b0] sm:$0xff]  ;;  %v1275_v10 = vld [vmem:[#allocation8 + $0x598] sm:$0xff] }
 0x28a   :  { %v5265_v17 = vcombine.high %v1274_v5, %v1278_v6  ;;  %v5264_v21 = vcombine.low %v1274_v5, %v1278_v6  ;;  %v1327_v5 = vld [vmem:[#allocation8 + $0x738] sm:$0xff] }
 0x28b   :  { %4569 = vmatpush1.bf16.msra.mxu0 %v5208_v43  ;;  %v5267_v43 = vcombine.high %v1275_v10, %v1279_v11 }
 0x28c   :  { %4733 = vmatpush1.bf16.msra.mxu1 %v5210_v18  ;;  %4579 = vmatprep.subr.bf16.mxu0 %v5217_v19  ;;  %v1282_v18 = vld [vmem:[#allocation8 + $0x5d0] sm:$0xff] }
 0x28d   :  { %4743 = vmatprep.subr.bf16.mxu1 %v5219_v20  ;;  %v1286_v19 = vld [vmem:[#allocation8 + $0x5f0] sm:$0xff]  ;;  %v1283_v20 = vld [vmem:[#allocation8 + $0x5d8] sm:$0xff] }
 0x28e   :  { %4571 = vmatmul.mubr.bf16.vlgmr.msra.gmra.mrb[12].mxu0 %v5976_v44  ;;  %v5273_v28 = vcombine.high %v1282_v18, %v1286_v19  ;;  %v5275_v30 = vcombine.high %v1283_v20, %v1287_v23 }
 0x28f   :  { %4735 = vmatmul.mubr.bf16.vlgmr.msra.gmra.mrb[12].mxu1 %v5976_v44  ;;  %4580 = vmatpush1.bf16.msra.mxu0 %v5216_v22  ;;  %v5234_v44 = vcombine.low %v1243_v39, %v1247_v41  ;;  %v5266_v22 = vcombine.low %v1275_v10, %v1279_v11  ;;  %v5274_v39 = vcombine.low %v1283_v20, %v1287_v23 }
 0x290   :  { %4611 = vmatprep.mubr.bf16.mxu0 %v5992_v7  ;;  %4744 = vmatpush1.bf16.msra.mxu1 %v5218_v33  ;;  %v1290_v33 = vld [vmem:[#allocation8 + $0x610] sm:$0xff] }
 0x291   :  { %4775 = vmatprep.mubr.bf16.mxu1 %v5992_v7  ;;  %4581 = vmatprep.subr.bf16.mxu0 %v5225_v34  ;;  %v5240_v7 = vcombine.low %v1250_v49, %v1254_v24  ;;  %v1294_v34 = vld [vmem:[#allocation8 + $0x630] sm:$0xff]  ;;  %v1303_v49 = vld [vmem:[#allocation8 + $0x678] sm:$0xff] }
 0x292   :  { %4745 = vmatprep.subr.bf16.mxu1 %v5227_v38  ;;  %v5272_v38 = vcombine.low %v1282_v18, %v1286_v19  ;;  %v5281_v41 = vcombine.high %v1290_v33, %v1294_v34  ;;  %v5280_v24 = vcombine.low %v1290_v33, %v1294_v34  ;;  %v1335_v18 = vld [vmem:[#allocation8 + $0x778] sm:$0xff] }
 0x293   :  { %4582 = vmatpush1.bf16.msra.mxu0 %v5224_v45  ;;  %v5283_v45 = vcombine.high %v1291_v35, %v1295_v37  ;;  %v1343_v33 = vld [vmem:[#allocation8 + $0x7b8] sm:$0xff] }
 0x294   :  { %4746 = vmatpush1.bf16.msra.mxu1 %v5226_v46  ;;  %4583 = vmatprep.subr.bf16.mxu0 %v5233_v48  ;;  %v1298_v46 = vld [vmem:[#allocation8 + $0x650] sm:$0xff] }
 0x295   :  { %4747 = vmatprep.subr.bf16.mxu1 %v5235_v3  ;;  %v1302_v48 = vld [vmem:[#allocation8 + $0x670] sm:$0xff]  ;;  %v1299_v3 = vld [vmem:[#allocation8 + $0x658] sm:$0xff] }
 0x296   :  { %v5289_v51 = vcombine.high %v1298_v46, %v1302_v48  ;;  %v5288_v57 = vcombine.low %v1298_v46, %v1302_v48  ;;  %v5290_v58 = vcombine.low %v1299_v3, %v1303_v49  ;;  %v1351_v46 = vld [vmem:[#allocation8 + $0x7f8] sm:$0xff] }
 0x297   :  { %4584 = vmatpush1.bf16.msra.mxu0 %v5232_v52  ;;  %v5291_v52 = vcombine.high %v1299_v3, %v1303_v49 }
 0x298   :  { %4748 = vmatpush1.bf16.msra.mxu1 %v5234_v44  ;;  %4585 = vmatprep.subr.bf16.mxu0 %v5241_v36  ;;  %v1306_v44 = vld [vmem:[#allocation8 + $0x690] sm:$0xff] }
 0x299   :  { %4749 = vmatprep.subr.bf16.mxu1 %v5243_v53  ;;  %v1310_v36 = vld [vmem:[#allocation8 + $0x6b0] sm:$0xff]  ;;  %v1307_v53 = vld [vmem:[#allocation8 + $0x698] sm:$0xff] }
 0x29a   :  { %v5297_v26 = vcombine.high %v1306_v44, %v1310_v36  ;;  %v5296_v63 = vcombine.low %v1306_v44, %v1310_v36  ;;  %v5298_v4 = vcombine.low %v1307_v53, %v1311_v54  ;;  %v1359_v44 = vld [vmem:[#allocation8 + $0x838] sm:$0xff] }
 0x29b   :  { %4586 = vmatpush1.bf16.msra.mxu0 %v5240_v7  ;;  %v5299_v7 = vcombine.high %v1307_v53, %v1311_v54 }
 0x29c   :  { %4750 = vmatpush1.bf16.msra.mxu1 %v5242_v59  ;;  %4587 = vmatprep.subr.bf16.mxu0 %v5249_v0  ;;  %v1314_v59 = vld [vmem:[#allocation8 + $0x6d0] sm:$0xff] }
 0x29d   :  { %4751 = vmatprep.subr.bf16.mxu1 %v5251_v60  ;;  %v1318_v0 = vld [vmem:[#allocation8 + $0x6f0] sm:$0xff]  ;;  %v1315_v60 = vld [vmem:[#allocation8 + $0x6d8] sm:$0xff] }
 0x29e   :  { %v5305_v8 = vcombine.high %v1314_v59, %v1318_v0  ;;  %v5304_v6 = vcombine.low %v1314_v59, %v1318_v0  ;;  %v5306_v10 = vcombine.low %v1315_v60, %v1319_v62  ;;  %v1363_v59 = vld [vmem:[#allocation8 + $0x858] sm:$0xff] }
 0x29f   :  { %4588 = vmatpush1.bf16.msra.mxu0 %v5248_v55  ;;  %v5307_v55 = vcombine.high %v1315_v60, %v1319_v62  ;;  %v1367_v0 = vld [vmem:[#allocation8 + $0x878] sm:$0xff] }
 0x2a0   :  { %4752 = vmatpush1.bf16.msra.mxu1 %v5250_v61  ;;  %4589 = vmatprep.subr.bf16.mxu0 %v5257_v40  ;;  %v1322_v61 = vld [vmem:[#allocation8 + $0x710] sm:$0xff] }
 0x2a1   :  { %4753 = vmatprep.subr.bf16.mxu1 %v5259_v2  ;;  %v1326_v40 = vld [vmem:[#allocation8 + $0x730] sm:$0xff]  ;;  %v1323_v2 = vld [vmem:[#allocation8 + $0x718] sm:$0xff] }
 0x2a2   :  { %v5313_v11 = vcombine.high %v1322_v61, %v1326_v40  ;;  %v5312_v19 = vcombine.low %v1322_v61, %v1326_v40  ;;  %v5314_v20 = vcombine.low %v1323_v2, %v1327_v5  ;;  %v1375_v61 = vld [vmem:[#allocation8 + $0x8b8] sm:$0xff] }
 0x2a3   :  { %4590 = vmatpush1.bf16.msra.mxu0 %v5256_v13  ;;  %v5315_v13 = vcombine.high %v1323_v2, %v1327_v5  ;;  %v5354_v2 = vcombine.low %v1363_v59, %v1367_v0 }
 0x2a4   :  { %4754 = vmatpush1.bf16.msra.mxu1 %v5258_v14  ;;  %4591 = vmatprep.subr.bf16.mxu0 %v5265_v17  ;;  %v1330_v14 = vld [vmem:[#allocation8 + $0x750] sm:$0xff] }
 0x2a5   :  { %4755 = vmatprep.subr.bf16.mxu1 %v5267_v43  ;;  %v1334_v17 = vld [vmem:[#allocation8 + $0x770] sm:$0xff]  ;;  %v1331_v43 = vld [vmem:[#allocation8 + $0x758] sm:$0xff] }
 0x2a6   :  { %v5321_v23 = vcombine.high %v1330_v14, %v1334_v17  ;;  %v5320_v34 = vcombine.low %v1330_v14, %v1334_v17  ;;  %v5322_v35 = vcombine.low %v1331_v43, %v1335_v18  ;;  %v1383_v14 = vld [vmem:[#allocation8 + $0x8f8] sm:$0xff] }
 0x2a7   :  { %4592 = vmatpush1.bf16.msra.mxu0 %v5264_v21  ;;  %v5323_v21 = vcombine.high %v1331_v43, %v1335_v18 }
 0x2a8   :  { %4756 = vmatpush1.bf16.msra.mxu1 %v5266_v22  ;;  %4593 = vmatprep.subr.bf16.mxu0 %v5273_v28  ;;  %v1338_v22 = vld [vmem:[#allocation8 + $0x790] sm:$0xff] }
 0x2a9   :  { %4757 = vmatprep.subr.bf16.mxu1 %v5275_v30  ;;  %v1342_v28 = vld [vmem:[#allocation8 + $0x7b0] sm:$0xff]  ;;  %v1339_v30 = vld [vmem:[#allocation8 + $0x798] sm:$0xff] }
 0x2aa   :  { %v5329_v37 = vcombine.high %v1338_v22, %v1342_v28  ;;  %v5328_v48 = vcombine.low %v1338_v22, %v1342_v28  ;;  %v5330_v3 = vcombine.low %v1339_v30, %v1343_v33 }
 0x2ab   :  { %4594 = vmatpush1.bf16.msra.mxu0 %v5272_v38  ;;  %v5331_v38 = vcombine.high %v1339_v30, %v1343_v33  ;;  %v1394_v33 = vld [vmem:[#allocation8 + $0x950] sm:$0xff] }
 0x2ac   :  { %4758 = vmatpush1.bf16.msra.mxu1 %v5274_v39  ;;  %4595 = vmatprep.subr.bf16.mxu0 %v5281_v41  ;;  %v1346_v39 = vld [vmem:[#allocation8 + $0x7d0] sm:$0xff] }
 0x2ad   :  { %4759 = vmatprep.subr.bf16.mxu1 %v5283_v45  ;;  %v1350_v41 = vld [vmem:[#allocation8 + $0x7f0] sm:$0xff]  ;;  %v1347_v45 = vld [vmem:[#allocation8 + $0x7d8] sm:$0xff] }
 0x2ae   :  { %v5337_v49 = vcombine.high %v1346_v39, %v1350_v41  ;;  %v5336_v36 = vcombine.low %v1346_v39, %v1350_v41  ;;  %v5338_v53 = vcombine.low %v1347_v45, %v1351_v46 }
 0x2af   :  { %4596 = vmatpush1.bf16.msra.mxu0 %v5280_v24  ;;  %v5339_v24 = vcombine.high %v1347_v45, %v1351_v46  ;;  %v1402_v46 = vld [vmem:[#allocation8 + $0x990] sm:$0xff] }
 0x2b0   :  { %4760 = vmatpush1.bf16.msra.mxu1 %v5282_v50  ;;  %4597 = vmatprep.subr.bf16.mxu0 %v5289_v51  ;;  %v1354_v50 = vld [vmem:[#allocation8 + $0x810] sm:$0xff] }
 0x2b1   :  { %4761 = vmatprep.subr.bf16.mxu1 %v5291_v52  ;;  %v1358_v51 = vld [vmem:[#allocation8 + $0x830] sm:$0xff]  ;;  %v1355_v52 = vld [vmem:[#allocation8 + $0x818] sm:$0xff] }
 0x2b2   :  { %v5345_v54 = vcombine.high %v1354_v50, %v1358_v51  ;;  %v5346_v60 = vcombine.low %v1355_v52, %v1359_v44 }
 0x2b3   :  { %4598 = vmatpush1.bf16.msra.mxu0 %v5288_v57  ;;  %v5347_v57 = vcombine.high %v1355_v52, %v1359_v44  ;;  %v1410_v44 = vld [vmem:[#allocation8 + $0x9d0] sm:$0xff] }
 0x2b4   :  { %4762 = vmatpush1.bf16.msra.mxu1 %v5290_v58  ;;  %4599 = vmatprep.subr.bf16.mxu0 %v5297_v26  ;;  %v1362_v58 = vld [vmem:[#allocation8 + $0x850] sm:$0xff] }
 0x2b5   :  { %4763 = vmatprep.subr.bf16.mxu1 %v5299_v7  ;;  %v1366_v26 = vld [vmem:[#allocation8 + $0x870] sm:$0xff]  ;;  %v5344_v7 = vcombine.low %v1354_v50, %v1358_v51 }
 0x2b6   :  { %v5353_v62 = vcombine.high %v1362_v58, %v1366_v26  ;;  %v5352_v40 = vcombine.low %v1362_v58, %v1366_v26 }
 0x2b7   :  { %4600 = vmatpush1.bf16.msra.mxu0 %v5296_v63  ;;  %v1370_v63 = vld [vmem:[#allocation8 + $0x890] sm:$0xff] }
 0x2b8   :  { %4764 = vmatpush1.bf16.msra.mxu1 %v5298_v4  ;;  %4601 = vmatprep.subr.bf16.mxu0 %v5305_v8  ;;  %v1374_v4 = vld [vmem:[#allocation8 + $0x8b0] sm:$0xff]  ;;  %v5355_v8 = vcombine.high %v1363_v59, %v1367_v0 }
 0x2b9   :  { %4765 = vmatprep.subr.bf16.mxu1 %v5307_v55  ;;  %v1371_v55 = vld [vmem:[#allocation8 + $0x898] sm:$0xff]  ;;  %v5361_v5 = vcombine.high %v1370_v63, %v1374_v4  ;;  %v5360_v17 = vcombine.low %v1370_v63, %v1374_v4  ;;  %v1418_v59 = vld [vmem:[#allocation8 + $0xa10] sm:$0xff] }
 0x2ba   :  { %v1422_v0 = vld [vmem:[#allocation8 + $0xa30] sm:$0xff] }
 0x2bb   :  { %4602 = vmatpush1.bf16.msra.mxu0 %v5304_v6  ;;  %v5363_v6 = vcombine.high %v1371_v55, %v1375_v61 }
 0x2bc   :  { %4766 = vmatpush1.bf16.msra.mxu1 %v5306_v10  ;;  %4603 = vmatprep.subr.bf16.mxu0 %v5313_v11  ;;  %v1378_v10 = vld [vmem:[#allocation8 + $0x8d0] sm:$0xff] }
 0x2bd   :  { %4767 = vmatprep.subr.bf16.mxu1 %v5315_v13  ;;  %v1382_v11 = vld [vmem:[#allocation8 + $0x8f0] sm:$0xff]  ;;  %v1379_v13 = vld [vmem:[#allocation8 + $0x8d8] sm:$0xff] }
 0x2be   :  { %v5369_v43 = vcombine.high %v1378_v10, %v1382_v11  ;;  %v5371_v18 = vcombine.high %v1379_v13, %v1383_v14  ;;  %v5370_v22 = vcombine.low %v1379_v13, %v1383_v14  ;;  %v1434_v14 = vld [vmem:[#allocation8 + $0xa90] sm:$0xff] }
 0x2bf   :  { %4604 = vmatpush1.bf16.msra.mxu0 %v5312_v19  ;;  %v1386_v19 = vld [vmem:[#allocation8 + $0x910] sm:$0xff] }
 0x2c0   :  { %4768 = vmatpush1.bf16.msra.mxu1 %v5314_v20  ;;  %4605 = vmatprep.subr.bf16.mxu0 %v5321_v23  ;;  %v1390_v20 = vld [vmem:[#allocation8 + $0x930] sm:$0xff]  ;;  %v1387_v23 = vld [vmem:[#allocation8 + $0x918] sm:$0xff] }
 0x2c1   :  { %4769 = vmatprep.subr.bf16.mxu1 %v5323_v21  ;;  %v1391_v21 = vld [vmem:[#allocation8 + $0x938] sm:$0xff]  ;;  %v5377_v28 = vcombine.high %v1386_v19, %v1390_v20 }
 0x2c2   :  { %v5379_v30 = vcombine.high %v1387_v23, %v1391_v21  ;;  %v5378_v39 = vcombine.low %v1387_v23, %v1391_v21  ;;  %v1442_v21 = vld [vmem:[#allocation8 + $0xad0] sm:$0xff] }
 0x2c3   :  { %4606 = vmatpush1.bf16.msra.mxu0 %v5320_v34  ;;  %v1398_v34 = vld [vmem:[#allocation8 + $0x970] sm:$0xff] }
 0x2c4   :  { %4770 = vmatpush1.bf16.msra.mxu1 %v5322_v35  ;;  %4607 = vmatprep.subr.bf16.mxu0 %v5329_v37  ;;  %v1395_v35 = vld [vmem:[#allocation8 + $0x958] sm:$0xff]  ;;  %v5385_v41 = vcombine.high %v1394_v33, %v1398_v34 }
 0x2c5   :  { %4771 = vmatprep.subr.bf16.mxu1 %v5331_v38  ;;  %v1399_v37 = vld [vmem:[#allocation8 + $0x978] sm:$0xff]  ;;  %v5376_v38 = vcombine.low %v1386_v19, %v1390_v20 }
 0x2c6   :  { %v5387_v45 = vcombine.high %v1395_v35, %v1399_v37  ;;  %v5386_v50 = vcombine.low %v1395_v35, %v1399_v37  ;;  %v1450_v37 = vld [vmem:[#allocation8 + $0xb10] sm:$0xff] }
 0x2c7   :  { %4608 = vmatpush1.bf16.msra.mxu0 %v5328_v48  ;;  %v1406_v48 = vld [vmem:[#allocation8 + $0x9b0] sm:$0xff] }
 0x2c8   :  { %4772 = vmatpush1.bf16.msra.mxu1 %v5330_v3  ;;  %4609 = vmatprep.subr.bf16.mxu0 %v5337_v49  ;;  %v1403_v3 = vld [vmem:[#allocation8 + $0x998] sm:$0xff]  ;;  %v5393_v51 = vcombine.high %v1402_v46, %v1406_v48 }
 0x2c9   :  { %4773 = vmatprep.subr.bf16.mxu1 %v5339_v24  ;;  %v1407_v49 = vld [vmem:[#allocation8 + $0x9b8] sm:$0xff]  ;;  %v5384_v24 = vcombine.low %v1394_v33, %v1398_v34 }
 0x2ca   :  { %v5395_v52 = vcombine.high %v1403_v3, %v1407_v49  ;;  %v5394_v58 = vcombine.low %v1403_v3, %v1407_v49  ;;  %v1458_v49 = vld [vmem:[#allocation8 + $0xb50] sm:$0xff] }
 0x2cb   :  { %4610 = vmatpush1.bf16.msra.mxu0 %v5336_v36  ;;  %v1414_v36 = vld [vmem:[#allocation8 + $0x9f0] sm:$0xff] }
 0x2cc   :  { %4774 = vmatpush1.bf16.msra.mxu1 %v5338_v53  ;;  %4620 = vmatprep.subr.bf16.mxu0 %v5345_v54  ;;  %v1411_v53 = vld [vmem:[#allocation8 + $0x9d8] sm:$0xff]  ;;  %v5401_v26 = vcombine.high %v1410_v44, %v1414_v36  ;;  %v5400_v63 = vcombine.low %v1410_v44, %v1414_v36 }
 0x2cd   :  { %4784 = vmatprep.subr.bf16.mxu1 %v5347_v57  ;;  %v1415_v54 = vld [vmem:[#allocation8 + $0x9f8] sm:$0xff]  ;;  %v5392_v57 = vcombine.low %v1402_v46, %v1406_v48 }
 0x2ce   :  { %4612 = vmatmul.mubr.bf16.vlgmr.msra.gmra.mrb[12].mxu0 %v6009_v15  ;;  %v5402_v4 = vcombine.low %v1411_v53, %v1415_v54 }
 0x2cf   :  { %4776 = vmatmul.mubr.bf16.vlgmr.msra.gmra.mrb[12].mxu1 %v6009_v15  ;;  %4621 = vmatpush1.bf16.msra.mxu0 %v5344_v7  ;;  %v5362_v15 = vcombine.low %v1371_v55, %v1375_v61  ;;  %v5403_v7 = vcombine.high %v1411_v53, %v1415_v54  ;;  %v1426_v61 = vld [vmem:[#allocation8 + $0xa50] sm:$0xff] }
 0x2d0   :  { %4652 = vmatprep.mubr.bf16.mxu0 %v6011_v29  ;;  %4785 = vmatpush1.bf16.msra.mxu1 %v5346_v60  ;;  %v1419_v60 = vld [vmem:[#allocation8 + $0xa18] sm:$0xff]  ;;  %v1466_v54 = vld [vmem:[#allocation8 + $0xb90] sm:$0xff] }
 0x2d1   :  { %4816 = vmatprep.mubr.bf16.mxu1 %v6011_v29  ;;  %4622 = vmatprep.subr.bf16.mxu0 %v5353_v62  ;;  %v5368_v29 = vcombine.low %v1378_v10, %v1382_v11  ;;  %v1423_v62 = vld [vmem:[#allocation8 + $0xa38] sm:$0xff] }
 0x2d2   :  { %4786 = vmatprep.subr.bf16.mxu1 %v5355_v8  ;;  %v5409_v8 = vcombine.high %v1418_v59, %v1422_v0  ;;  %v5411_v55 = vcombine.high %v1419_v60, %v1423_v62  ;;  %v5410_v10 = vcombine.low %v1419_v60, %v1423_v62  ;;  %v1474_v62 = vld [vmem:[#allocation8 + $0xbd0] sm:$0xff] }
 0x2d3   :  { %4623 = vmatpush1.bf16.msra.mxu0 %v5352_v40  ;;  %v1430_v40 = vld [vmem:[#allocation8 + $0xa70] sm:$0xff] }
 0x2d4   :  { %4787 = vmatpush1.bf16.msra.mxu1 %v5354_v2  ;;  %4624 = vmatprep.subr.bf16.mxu0 %v5361_v5  ;;  %v1427_v2 = vld [vmem:[#allocation8 + $0xa58] sm:$0xff]  ;;  %v5417_v11 = vcombine.high %v1426_v61, %v1430_v40 }
 0x2d5   :  { %4788 = vmatprep.subr.bf16.mxu1 %v5363_v6  ;;  %v1431_v5 = vld [vmem:[#allocation8 + $0xa78] sm:$0xff]  ;;  %v5408_v6 = vcombine.low %v1418_v59, %v1422_v0 }
 0x2d6   :  { %v5419_v13 = vcombine.high %v1427_v2, %v1431_v5  ;;  %v5418_v19 = vcombine.low %v1427_v2, %v1431_v5  ;;  %v1482_v5 = vld [vmem:[#allocation8 + $0xc10] sm:$0xff] }
 0x2d7   :  { %4625 = vmatpush1.bf16.msra.mxu0 %v5360_v17  ;;  %v1438_v17 = vld [vmem:[#allocation8 + $0xab0] sm:$0xff] }
 0x2d8   :  { %4789 = vmatpush1.bf16.msra.mxu1 %v5362_v15  ;;  %4626 = vmatprep.subr.bf16.mxu0 %v5369_v43  ;;  %v1435_v15 = vld [vmem:[#allocation8 + $0xa98] sm:$0xff]  ;;  %v5425_v20 = vcombine.high %v1434_v14, %v1438_v17 }
 0x2d9   :  { %4790 = vmatprep.subr.bf16.mxu1 %v5371_v18  ;;  %v1439_v43 = vld [vmem:[#allocation8 + $0xab8] sm:$0xff]  ;;  %v5416_v18 = vcombine.low %v1426_v61, %v1430_v40 }
 0x2da   :  { %v5427_v23 = vcombine.high %v1435_v15, %v1439_v43  ;;  %v5426_v33 = vcombine.low %v1435_v15, %v1439_v43  ;;  %v1490_v43 = vld [vmem:[#allocation8 + $0xc50] sm:$0xff] }
 0x2db   :  { %4627 = vmatpush1.bf16.msra.mxu0 %v5368_v29  ;;  %v1446_v29 = vld [vmem:[#allocation8 + $0xaf0] sm:$0xff] }
 0x2dc   :  { %4791 = vmatpush1.bf16.msra.mxu1 %v5370_v22  ;;  %4628 = vmatprep.subr.bf16.mxu0 %v5377_v28  ;;  %v1443_v22 = vld [vmem:[#allocation8 + $0xad8] sm:$0xff]  ;;  %v5433_v34 = vcombine.high %v1442_v21, %v1446_v29 }
 0x2dd   :  { %4792 = vmatprep.subr.bf16.mxu1 %v5379_v30  ;;  %v1447_v28 = vld [vmem:[#allocation8 + $0xaf8] sm:$0xff]  ;;  %v5424_v30 = vcombine.low %v1434_v14, %v1438_v17 }
 0x2de   :  { %v5435_v35 = vcombine.high %v1443_v22, %v1447_v28  ;;  %v5434_v46 = vcombine.low %v1443_v22, %v1447_v28  ;;  %v1498_v22 = vld [vmem:[#allocation8 + $0xc90] sm:$0xff] }
 0x2df   :  { %4629 = vmatpush1.bf16.msra.mxu0 %v5376_v38  ;;  %v1454_v38 = vld [vmem:[#allocation8 + $0xb30] sm:$0xff] }
 0x2e0   :  { %4793 = vmatpush1.bf16.msra.mxu1 %v5378_v39  ;;  %4630 = vmatprep.subr.bf16.mxu0 %v5385_v41  ;;  %v1451_v39 = vld [vmem:[#allocation8 + $0xb18] sm:$0xff]  ;;  %v5441_v48 = vcombine.high %v1450_v37, %v1454_v38  ;;  %v1502_v28 = vld [vmem:[#allocation8 + $0xcb0] sm:$0xff] }
 0x2e1   :  { %4794 = vmatprep.subr.bf16.mxu1 %v5387_v45  ;;  %v1455_v41 = vld [vmem:[#allocation8 + $0xb38] sm:$0xff]  ;;  %v5432_v45 = vcombine.low %v1442_v21, %v1446_v29 }
 0x2e2   :  { %v5443_v3 = vcombine.high %v1451_v39, %v1455_v41  ;;  %v5442_v44 = vcombine.low %v1451_v39, %v1455_v41  ;;  %v1506_v41 = vld [vmem:[#allocation8 + $0xcd0] sm:$0xff] }
 0x2e3   :  { %4631 = vmatpush1.bf16.msra.mxu0 %v5384_v24  ;;  %v1462_v24 = vld [vmem:[#allocation8 + $0xb70] sm:$0xff] }
 0x2e4   :  { %4795 = vmatpush1.bf16.msra.mxu1 %v5386_v50  ;;  %4632 = vmatprep.subr.bf16.mxu0 %v5393_v51  ;;  %v1459_v50 = vld [vmem:[#allocation8 + $0xb58] sm:$0xff]  ;;  %v5449_v36 = vcombine.high %v1458_v49, %v1462_v24 }
 0x2e5   :  { %4796 = vmatprep.subr.bf16.mxu1 %v5395_v52  ;;  %v1463_v51 = vld [vmem:[#allocation8 + $0xb78] sm:$0xff]  ;;  %v5440_v52 = vcombine.low %v1450_v37, %v1454_v38  ;;  %v5489_v38 = vcombine.high %v1498_v22, %v1502_v28 }
 0x2e6   :  { %v5451_v53 = vcombine.high %v1459_v50, %v1463_v51  ;;  %v5450_v59 = vcombine.low %v1459_v50, %v1463_v51  ;;  %v1514_v50 = vld [vmem:[#allocation8 + $0xd10] sm:$0xff] }
 0x2e7   :  { %4633 = vmatpush1.bf16.msra.mxu0 %v5392_v57  ;;  %v1470_v57 = vld [vmem:[#allocation8 + $0xbb0] sm:$0xff] }
 0x2e8   :  { %4797 = vmatpush1.bf16.msra.mxu1 %v5394_v58  ;;  %4634 = vmatprep.subr.bf16.mxu0 %v5401_v26  ;;  %v1467_v58 = vld [vmem:[#allocation8 + $0xb98] sm:$0xff]  ;;  %v5457_v0 = vcombine.high %v1466_v54, %v1470_v57  ;;  %v1518_v51 = vld [vmem:[#allocation8 + $0xd30] sm:$0xff] }
 0x2e9   :  { %4798 = vmatprep.subr.bf16.mxu1 %v5403_v7  ;;  %v1471_v26 = vld [vmem:[#allocation8 + $0xbb8] sm:$0xff]  ;;  %v5448_v7 = vcombine.low %v1458_v49, %v1462_v24 }
 0x2ea   :  { %v5459_v60 = vcombine.high %v1467_v58, %v1471_v26  ;;  %v5458_v61 = vcombine.low %v1467_v58, %v1471_v26  ;;  %v1526_v58 = vld [vmem:[#allocation8 + $0xd70] sm:$0xff]  ;;  %v1523_v26 = vld [vmem:[#allocation8 + $0xd58] sm:$0xff] }
 0x2eb   :  { %4635 = vmatpush1.bf16.msra.mxu0 %v5400_v63  ;;  %v1478_v63 = vld [vmem:[#allocation8 + $0xbf0] sm:$0xff] }
 0x2ec   :  { %4799 = vmatpush1.bf16.msra.mxu1 %v5402_v4  ;;  %4636 = vmatprep.subr.bf16.mxu0 %v5409_v8  ;;  %v1475_v4 = vld [vmem:[#allocation8 + $0xbd8] sm:$0xff]  ;;  %v5465_v40 = vcombine.high %v1474_v62, %v1478_v63 }
 0x2ed   :  { %4800 = vmatprep.subr.bf16.mxu1 %v5411_v55  ;;  %v1479_v8 = vld [vmem:[#allocation8 + $0xbf8] sm:$0xff]  ;;  %v5456_v55 = vcombine.low %v1466_v54, %v1470_v57  ;;  %v1522_v57 = vld [vmem:[#allocation8 + $0xd50] sm:$0xff] }
 0x2ee   :  { %v5467_v2 = vcombine.high %v1475_v4, %v1479_v8  ;;  %v5466_v14 = vcombine.low %v1475_v4, %v1479_v8  ;;  %v1530_v4 = vld [vmem:[#allocation8 + $0xd90] sm:$0xff] }
 0x2ef   :  { %4637 = vmatpush1.bf16.msra.mxu0 %v5408_v6  ;;  %v1486_v6 = vld [vmem:[#allocation8 + $0xc30] sm:$0xff] }
 0x2f0   :  { %4801 = vmatpush1.bf16.msra.mxu1 %v5410_v10  ;;  %4638 = vmatprep.subr.bf16.mxu0 %v5417_v11  ;;  %v1483_v10 = vld [vmem:[#allocation8 + $0xc18] sm:$0xff]  ;;  %v5473_v17 = vcombine.high %v1482_v5, %v1486_v6  ;;  %v1534_v8 = vld [vmem:[#allocation8 + $0xdb0] sm:$0xff] }
 0x2f1   :  { %4802 = vmatprep.subr.bf16.mxu1 %v5419_v13  ;;  %v1487_v11 = vld [vmem:[#allocation8 + $0xc38] sm:$0xff]  ;;  %v5464_v13 = vcombine.low %v1474_v62, %v1478_v63  ;;  %v5513_v62 = vcombine.high %v1522_v57, %v1526_v58 }
 0x2f2   :  { %v5475_v15 = vcombine.high %v1483_v10, %v1487_v11  ;;  %v5474_v21 = vcombine.low %v1483_v10, %v1487_v11  ;;  %v5512_v11 = vcombine.low %v1522_v57, %v1526_v58 }
 0x2f3   :  { %4639 = vmatpush1.bf16.msra.mxu0 %v5416_v18  ;;  %v1494_v18 = vld [vmem:[#allocation8 + $0xc70] sm:$0xff] }
 0x2f4   :  { %4803 = vmatpush1.bf16.msra.mxu1 %v5418_v19  ;;  %4640 = vmatprep.subr.bf16.mxu0 %v5425_v20  ;;  %v5472_v19 = vcombine.low %v1482_v5, %v1486_v6  ;;  %v1491_v20 = vld [vmem:[#allocation8 + $0xc58] sm:$0xff]  ;;  %v5481_v29 = vcombine.high %v1490_v43, %v1494_v18  ;;  %v6070_v5 = vld [vmem:[#allocation11] sm:$0xff] }
 0x2f5   :  { %4804 = vmatprep.subr.bf16.mxu1 %v5427_v23  ;;  %v1495_v23 = vld [vmem:[#allocation8 + $0xc78] sm:$0xff] }
 0x2f6   :  { %v5482_v37 = vcombine.low %v1491_v20, %v1495_v23 }
 0x2f7   :  { %4641 = vmatpush1.bf16.msra.mxu0 %v5424_v30  ;;  %v5483_v30 = vcombine.high %v1491_v20, %v1495_v23  ;;  %v4879_v23 = vrot.slane %v6070_v5, %v5960_v25 }
 0x2f8   :  { %4805 = vmatpush1.bf16.msra.mxu1 %v5426_v33  ;;  %4642 = vmatprep.subr.bf16.mxu0 %v5433_v34  ;;  %v1499_v33 = vld [vmem:[#allocation8 + $0xc98] sm:$0xff] }
 0x2f9   :  { %4806 = vmatprep.subr.bf16.mxu1 %v5435_v35  ;;  %v1503_v34 = vld [vmem:[#allocation8 + $0xcb8] sm:$0xff]  ;;  %v5480_v35 = vcombine.low %v1490_v43, %v1494_v18  ;;  %v1538_v18 = vld [vmem:[#allocation8 + $0xdd0] sm:$0xff] }
 0x2fa   :  { %v5491_v39 = vcombine.high %v1499_v33, %v1503_v34 }
 0x2fb   :  { %4643 = vmatpush1.bf16.msra.mxu0 %v5432_v45  ;;  %v1510_v45 = vld [vmem:[#allocation8 + $0xcf0] sm:$0xff] }
 0x2fc   :  { %4807 = vmatpush1.bf16.msra.mxu1 %v5434_v46  ;;  %4644 = vmatprep.subr.bf16.mxu0 %v5441_v48  ;;  %v1507_v46 = vld [vmem:[#allocation8 + $0xcd8] sm:$0xff]  ;;  %v5497_v49 = vcombine.high %v1506_v41, %v1510_v45 }
 0x2fd   :  { %4808 = vmatprep.subr.bf16.mxu1 %v5443_v3  ;;  %v1511_v48 = vld [vmem:[#allocation8 + $0xcf8] sm:$0xff]  ;;  %v5488_v3 = vcombine.low %v1498_v22, %v1502_v28 }
 0x2fe   :  { %v5499_v24 = vcombine.high %v1507_v46, %v1511_v48  ;;  %v1539_v28 = vld [vmem:[#allocation8 + $0xdd8] sm:$0xff] }
 0x2ff   :  { %4645 = vmatpush1.bf16.msra.mxu0 %v5440_v52  ;;  %v1515_v52 = vld [vmem:[#allocation8 + $0xd18] sm:$0xff] }
 0x300   :  { %4809 = vmatpush1.bf16.msra.mxu1 %v5442_v44  ;;  %4646 = vmatprep.subr.bf16.mxu0 %v5449_v36  ;;  %v1519_v44 = vld [vmem:[#allocation8 + $0xd38] sm:$0xff]  ;;  %v5498_v36 = vcombine.low %v1507_v46, %v1511_v48 }
 0x301   :  { %4810 = vmatprep.subr.bf16.mxu1 %v5451_v53  ;;  %v5505_v53 = vcombine.high %v1514_v50, %v1518_v51  ;;  %v5507_v54 = vcombine.high %v1515_v52, %v1519_v44 }
 0x303   :  { %4647 = vmatpush1.bf16.msra.mxu0 %v5448_v7  ;;  %v1527_v7 = vld [vmem:[#allocation8 + $0xd78] sm:$0xff] }
 0x304   :  { %4811 = vmatpush1.bf16.msra.mxu1 %v5450_v59  ;;  %4648 = vmatprep.subr.bf16.mxu0 %v5457_v0  ;;  %v5504_v59 = vcombine.low %v1514_v50, %v1518_v51  ;;  %v6064_v0 = vld [vmem:[#allocation10] sm:$0xff]  ;;  %v5515_v63 = vcombine.high %v1523_v26, %v1527_v7  ;;  %v1550_v50 = vld [vmem:[#allocation8 + $0xe30] sm:$0xff] }
 0x305   :  { %4812 = vmatprep.subr.bf16.mxu1 %v5459_v60  ;;  %v5506_v60 = vcombine.low %v1515_v52, %v1519_v44  ;;  %v1617_v6 = vrot.slane %v6064_v0, %v5965_v27  ;;  %v1625_v10 = vrot.slane %v6064_v0, %v5972_v42  ;;  %v1547_v52 = vld [vmem:[#allocation8 + $0xe18] sm:$0xff] }
 0x306   :  { %v1551_v44 = vld [vmem:[#allocation8 + $0xe38] sm:$0xff] }
 0x307   :  { %4649 = vmatpush1.bf16.msra.mxu0 %v5456_v55  ;;  %v1613_v55 = vrot.slane %v6064_v0, %v5960_v25 }
 0x308   :  { %4813 = vmatpush1.bf16.msra.mxu1 %v5458_v61  ;;  %4650 = vmatprep.subr.bf16.mxu0 %v5465_v40  ;;  %v1621_v61 = vrot.slane %v6064_v0, %v5997_v32  ;;  %v1531_v40 = vld [vmem:[#allocation8 + $0xd98] sm:$0xff] }
 0x309   :  { %4814 = vmatprep.subr.bf16.mxu1 %v5467_v2  ;;  %v1535_v2 = vld [vmem:[#allocation8 + $0xdb8] sm:$0xff] }
 0x30a   :  { %v5523_v43 = vcombine.high %v1531_v40, %v1535_v2  ;;  %v5522_v25 = vcombine.low %v1531_v40, %v1535_v2 }
 0x30b   :  { %4651 = vmatpush1.bf16.msra.mxu0 %v5464_v13  ;;  %v5514_v13 = vcombine.low %v1523_v26, %v1527_v7  ;;  %v5539_v7 = vcombine.high %v1547_v52, %v1551_v44 }
 0x30c   :  { %4815 = vmatpush1.bf16.msra.mxu1 %v5466_v14  ;;  %4661 = vmatprep.subr.bf16.mxu0 %v5473_v17  ;;  %v5521_v14 = vcombine.high %v1530_v4, %v1534_v8 }
 0x30d   :  { %4825 = vmatprep.subr.bf16.mxu1 %v5475_v15 }
 0x30e   :  { %4653 = vmatmul.mubr.bf16.vlgmr.msra.gmra.mrb[12].mxu0 %v6033_v9 }
 0x30f   :  { %4817 = vmatmul.mubr.bf16.vlgmr.msra.gmra.mrb[12].mxu1 %v6033_v9  ;;  %4662 = vmatpush1.bf16.msra.mxu0 %v5472_v19  ;;  %v5490_v9 = vcombine.low %v1499_v33, %v1503_v34  ;;  %v1542_v19 = vld [vmem:[#allocation8 + $0xdf0] sm:$0xff]  ;;  %v4883_v34 = vrot.slane %v6070_v5, %v5965_v27 }
 0x310   :  { %4693 = vmatprep.mubr.bf16.mxu0 %v6035_v12  ;;  %4826 = vmatpush1.bf16.msra.mxu1 %v5474_v21  ;;  %v5529_v48 = vcombine.high %v1538_v18, %v1542_v19  ;;  %v1546_v27 = vld [vmem:[#allocation8 + $0xe10] sm:$0xff] }
 0x311   :  { %4857 = vmatprep.mubr.bf16.mxu1 %v6035_v12  ;;  %4663 = vmatprep.subr.bf16.mxu0 %v5481_v29  ;;  %v5496_v12 = vcombine.low %v1506_v41, %v1510_v45  ;;  %v5537_v58 = vcombine.high %v1546_v27, %v1550_v50 }
 0x312   :  { %4827 = vmatprep.subr.bf16.mxu1 %v5483_v30  ;;  %v1543_v30 = vld [vmem:[#allocation8 + $0xdf8] sm:$0xff] }
 0x313   :  { %4664 = vmatpush1.bf16.msra.mxu0 %v5480_v35  ;;  %v5530_v57 = vcombine.low %v1539_v28, %v1543_v30 }
 0x314   :  { %4828 = vmatpush1.bf16.msra.mxu1 %v5482_v37  ;;  %4665 = vmatprep.subr.bf16.mxu0 %v5489_v38 }
 0x315   :  { %4829 = vmatprep.subr.bf16.mxu1 %v5491_v39  ;;  %v5520_v39 = vcombine.low %v1530_v4, %v1534_v8 }
 0x317   :  { %4666 = vmatpush1.bf16.msra.mxu0 %v5488_v3 }
 0x318   :  { %4830 = vmatpush1.bf16.msra.mxu1 %v5490_v9  ;;  %4667 = vmatprep.subr.bf16.mxu0 %v5497_v49  ;;  %v4887_v9 = vrot.slane %v6070_v5, %v5997_v32 }
 0x319   :  { %4831 = vmatprep.subr.bf16.mxu1 %v5499_v24  ;;  %v5531_v24 = vcombine.high %v1539_v28, %v1543_v30  ;;  %v1578_v30 = vld [vmem:[#allocation8 + $0xf10] sm:$0xff] }
 0x31b   :  { %4668 = vmatpush1.bf16.msra.mxu0 %v5496_v12 }
 0x31c   :  { %4832 = vmatpush1.bf16.msra.mxu1 %v5498_v36  ;;  %4669 = vmatprep.subr.bf16.mxu0 %v5505_v53  ;;  %v4891_v53 = vrot.slane %v6070_v5, %v5972_v42  ;;  %v5538_v42 = vcombine.low %v1547_v52, %v1551_v44  ;;  %v1599_v52 = vld [vmem:[#allocation8 + $0xfb8] sm:$0xff] }
 0x31d   :  { %4833 = vmatprep.subr.bf16.mxu1 %v5507_v54  ;;  %v5528_v54 = vcombine.low %v1538_v18, %v1542_v19  ;;  %v1570_v18 = vld [vmem:[#allocation8 + $0xed0] sm:$0xff] }
 0x31e   :  { %v1574_v19 = vld [vmem:[#allocation8 + $0xef0] sm:$0xff] }
 0x31f   :  { %4670 = vmatpush1.bf16.msra.mxu0 %v5504_v59  ;;  %v1554_v59 = vld [vmem:[#allocation8 + $0xe50] sm:$0xff] }
 0x320   :  { %4834 = vmatpush1.bf16.msra.mxu1 %v5506_v60  ;;  %4671 = vmatprep.subr.bf16.mxu0 %v5513_v62  ;;  %v1558_v60 = vld [vmem:[#allocation8 + $0xe70] sm:$0xff]  ;;  %v1555_v62 = vld [vmem:[#allocation8 + $0xe58] sm:$0xff] }
 0x321   :  { %v4367_v17 = vpop.f32.mrb[8].mxu0  ;;  %v4531_v15 = vpop.f32.mrb[8].mxu1  ;;  %4835 = vmatprep.subr.bf16.mxu1 %v5515_v63  ;;  %v1559_v63 = vld [vmem:[#allocation8 + $0xe78] sm:$0xff] }
 0x322   :  { %v5597_v20 = vadd.f32 %v4367_v17, %v1613_v55  ;;  %v5599_v21 = vadd.f32 %v4531_v15, %v1621_v61  ;;  %v4369_v29 = vpop.f32.mrb[9].mxu0  ;;  %v4533_v22 = vpop.f32.mrb[9].mxu1  ;;  %v5536_v55 = vcombine.low %v1546_v27, %v1550_v50  ;;  %v5545_v61 = vcombine.high %v1554_v59, %v1558_v60  ;;  %v1594_v27 = vld [vmem:[#allocation8 + $0xf90] sm:$0xff] }
 0x323   :  { %v5598_v33 = vadd.f32 %v4369_v29, %v1617_v6  ;;  %v5600_v35 = vadd.f32 %v4533_v22, %v1625_v10  ;;  %v4371_v37 = vpop.f32.mrb[10].mxu0  ;;  %v4535_v38 = vpop.f32.mrb[10].mxu1  ;;  %4672 = vmatpush1.bf16.msra.mxu0 %v5512_v11  ;;  %v5547_v2 = vcombine.high %v1555_v62, %v1559_v63  ;;  %v1562_v6 = vld [vmem:[#allocation8 + $0xe90] sm:$0xff]  ;;  %v1563_v11 = vld [vmem:[#allocation8 + $0xe98] sm:$0xff]  ;;  %v5546_v17 = vcombine.low %v1555_v62, %v1559_v63 }
 0x324   :  { %v4866_v41 = vmax.f32 %v5597_v20, 0.0  ;;  %4836 = vmatpush1.bf16.msra.mxu1 %v5514_v13  ;;  %v4372_v45 = vpop.f32.mrb[11].mxu0  ;;  %v4536_v46 = vpop.f32.mrb[11].mxu1  ;;  %4673 = vmatprep.subr.bf16.mxu0 %v5521_v14  ;;  %v4868_v3 = vmax.f32 %v5599_v21, 0.0  ;;  %v1566_v10 = vld [vmem:[#allocation8 + $0xeb0] sm:$0xff]  ;;  %v1567_v13 = vld [vmem:[#allocation8 + $0xeb8] sm:$0xff]  ;;  %v5544_v14 = vcombine.low %v1554_v59, %v1558_v60  ;;  %v5561_v22 = vcombine.high %v1570_v18, %v1574_v19 }
 0x325   :  { %v4867_v49 = vmax.f32 %v5598_v33, 0.0  ;;  %4837 = vmatprep.subr.bf16.mxu1 %v5523_v43  ;;  %v4869_v36 = vmax.f32 %v5600_v35, 0.0  ;;  %v5553_v15 = vcombine.high %v1562_v6, %v1566_v10  ;;  %v5555_v43 = vcombine.high %v1563_v11, %v1567_v13  ;;  %v1571_v20 = vld [vmem:[#allocation8 + $0xed8] sm:$0xff]  ;;  %v1582_v33 = vld [vmem:[#allocation8 + $0xf30] sm:$0xff] }
 0x326   :  { %v4916_v51 = vmul.f32 %v4879_v23, %v4866_v41  ;;  %v4918_v32 = vmul.f32 %v4887_v9, %v4868_v3  ;;  %v1575_v23 = vld [vmem:[#allocation8 + $0xef8] sm:$0xff]  ;;  %v5552_v21 = vcombine.low %v1562_v6, %v1566_v10  ;;  %v5554_v29 = vcombine.low %v1563_v11, %v1567_v13  ;;  %v1586_v45 = vld [vmem:[#allocation8 + $0xf50] sm:$0xff] }
 0x327   :  { %v4917_v12 = vmul.f32 %v4883_v34, %v4867_v49  ;;  %4674 = vmatpush1.bf16.msra.mxu0 %v5520_v39  ;;  %v4919_v4 = vmul.f32 %v4891_v53, %v4869_v36  ;;  %v5563_v28 = vcombine.high %v1571_v20, %v1575_v23  ;;  %v1579_v34 = vld [vmem:[#allocation8 + $0xf18] sm:$0xff]  ;;  %v5560_v37 = vcombine.low %v1570_v18, %v1574_v19  ;;  %v1590_v46 = vld [vmem:[#allocation8 + $0xf70] sm:$0xff] }
 0x328   :  { %4838 = vmatpush1.bf16.msra.mxu1 %v5522_v25  ;;  %4675 = vmatprep.subr.bf16.mxu0 %v5529_v48  ;;  %v1583_v35 = vld [vmem:[#allocation8 + $0xf38] sm:$0xff]  ;;  %v5562_v38 = vcombine.low %v1571_v20, %v1575_v23  ;;  %v5569_v39 = vcombine.high %v1578_v30, %v1582_v33  ;;  %v5568_v3 = vcombine.low %v1578_v30, %v1582_v33  ;;  %v1598_v50 = vld [vmem:[#allocation8 + $0xfb0] sm:$0xff] }
 0x329   :  { %v4924_v26 = vadd.f32 %v4917_v12, %v4916_v51  ;;  %4839 = vmatprep.subr.bf16.mxu1 %v5531_v24  ;;  %v5571_v41 = vcombine.high %v1579_v34, %v1583_v35  ;;  %v1587_v25 = vld [vmem:[#allocation8 + $0xf58] sm:$0xff]  ;;  %v5570_v9 = vcombine.low %v1579_v34, %v1583_v35  ;;  %v5577_v49 = vcombine.high %v1586_v45, %v1590_v46 }
 0x32a   :  { %v1591_v48 = vld [vmem:[#allocation8 + $0xf78] sm:$0xff]  ;;  %v5576_v44 = vcombine.low %v1586_v45, %v1590_v46  ;;  %v5585_v36 = vcombine.high %v1594_v27, %v1598_v50  ;;  %v4895_v6 = vrot.slane %v6070_v5, %v6022_v16 }
 0x32b   :  { %v4925_v8 = vadd.f32 %v4924_v26, %v4918_v32  ;;  %4676 = vmatpush1.bf16.msra.mxu0 %v5528_v54  ;;  %v5579_v24 = vcombine.high %v1587_v25, %v1591_v48  ;;  %v1595_v51 = vld [vmem:[#allocation8 + $0xf98] sm:$0xff]  ;;  %v5578_v12 = vcombine.low %v1587_v25, %v1591_v48  ;;  %v1602_v54 = vld [vmem:[#allocation8 + $0xfd0] sm:$0xff]  ;;  %v5584_v26 = vcombine.low %v1594_v27, %v1598_v50 }
 0x32c   :  { %4840 = vmatpush1.bf16.msra.mxu1 %v5530_v57  ;;  %4677 = vmatprep.subr.bf16.mxu0 %v5537_v58  ;;  %v5587_v53 = vcombine.high %v1595_v51, %v1599_v52  ;;  %v1606_v57 = vld [vmem:[#allocation8 + $0xff0] sm:$0xff]  ;;  %v1603_v58 = vld [vmem:[#allocation8 + $0xfd8] sm:$0xff] }
 0x32d   :  { %v6084_v40 = vadd.f32 %v4925_v8, %v4919_v4  ;;  %4841 = vmatprep.subr.bf16.mxu1 %v5539_v7  ;;  %v1607_v32 = vld [vmem:[#allocation8 + $0xff8] sm:$0xff]  ;;  %v5586_v7 = vcombine.low %v1595_v51, %v1599_v52  ;;  %v5593_v59 = vcombine.high %v1602_v54, %v1606_v57  ;;  %v5592_v62 = vcombine.low %v1602_v54, %v1606_v57 }
 0x32e   :  { %v5595_v60 = vcombine.high %v1603_v58, %v1607_v32  ;;  %v5594_v63 = vcombine.low %v1603_v58, %v1607_v32  ;;  %v1629_v4 = vrot.slane %v6064_v0, %v6022_v16  ;;  %v1637_v8 = vrot.slane %v6064_v0, %v6042_v1 }
 0x32f   :  { %4678 = vmatpush1.bf16.msra.mxu0 %v5536_v55  ;;  %v1633_v55 = vrot.slane %v6064_v0, %v6002_v47  ;;  %v4903_v16 = vrot.slane %v6070_v5, %v6042_v1 }
 0x330   :  { %4842 = vmatpush1.bf16.msra.mxu1 %v5538_v42  ;;  %4679 = vmatprep.subr.bf16.mxu0 %v5545_v61  ;;  %v1641_v42 = vrot.slane %v6064_v0, %v6025_v31 }
 0x331   :  { %4843 = vmatprep.subr.bf16.mxu1 %v5547_v2 }
 0x333   :  { %4680 = vmatpush1.bf16.msra.mxu0 %v5544_v14  ;;  %v4899_v14 = vrot.slane %v6070_v5, %v6002_v47  ;;  %v4907_v47 = vrot.slane %v6070_v5, %v6025_v31 }
 0x334   :  { %4844 = vmatpush1.bf16.msra.mxu1 %v5546_v17  ;;  %4681 = vmatprep.subr.bf16.mxu0 %v5553_v15 }
 0x335   :  { %4845 = vmatprep.subr.bf16.mxu1 %v5555_v43 }
 0x337   :  { %4682 = vmatpush1.bf16.msra.mxu0 %v5552_v21 }
 0x338   :  { %4846 = vmatpush1.bf16.msra.mxu1 %v5554_v29  ;;  %4683 = vmatprep.subr.bf16.mxu0 %v5561_v22 }
 0x339   :  { %4847 = vmatprep.subr.bf16.mxu1 %v5563_v28 }
 0x33b   :  { %4684 = vmatpush1.bf16.msra.mxu0 %v5560_v37 }
 0x33c   :  { %4848 = vmatpush1.bf16.msra.mxu1 %v5562_v38  ;;  %4685 = vmatprep.subr.bf16.mxu0 %v5569_v39  ;;  %v5596_v39 = vld [vmem:[#allocation2] ss:$0 sm:$0xff] }
 0x33d   :  { %4849 = vmatprep.subr.bf16.mxu1 %v5571_v41 }
 0x33f   :  { %4686 = vmatpush1.bf16.msra.mxu0 %v5568_v3 }
 0x340   :  { %4850 = vmatpush1.bf16.msra.mxu1 %v5570_v9  ;;  %4687 = vmatprep.subr.bf16.mxu0 %v5577_v49 }
 0x341   :  { %4851 = vmatprep.subr.bf16.mxu1 %v5579_v24 }
 0x343   :  { %4688 = vmatpush1.bf16.msra.mxu0 %v5576_v44 }
 0x344   :  { %4852 = vmatpush1.bf16.msra.mxu1 %v5578_v12  ;;  %4689 = vmatprep.subr.bf16.mxu0 %v5585_v36 }
 0x345   :  { %4853 = vmatprep.subr.bf16.mxu1 %v5587_v53 }
 0x347   :  { %4690 = vmatpush1.bf16.msra.mxu0 %v5584_v26 }
 0x348   :  { %4854 = vmatpush1.bf16.msra.mxu1 %v5586_v7  ;;  %4691 = vmatprep.subr.bf16.mxu0 %v5593_v59 }
 0x349   :  { %4855 = vmatprep.subr.bf16.mxu1 %v5595_v60 }
 0x34b   :  { %4692 = vmatpush1.bf16.msra.mxu0 %v5592_v62 }
 0x34c   :  { %4856 = vmatpush1.bf16.msra.mxu1 %v5594_v63 }
 0x34e   :  { %4694 = vmatmul.mubr.bf16.vlgmr.msra.gmra.mrb[12].mxu0 %v6046_v56 }
 0x34f   :  { %4858 = vmatmul.mubr.bf16.vlgmr.msra.gmra.mrb[12].mxu1 %v6046_v56 }
 0x421   :  { %v4695_v61 = vpop.f32.mrb[12].mxu0 }
 0x422   :  { %v5601_v2 = vadd.f32 %v4695_v61, %v1629_v4  ;;  %v4859_v10 = vpop.f32.mrb[12].mxu1  ;;  %v4697_v11 = vpop.f32.mrb[13].mxu0 }
 0x423   :  { %v5603_v56 = vadd.f32 %v4859_v10, %v1637_v8  ;;  %v5602_v13 = vadd.f32 %v4697_v11, %v1633_v55  ;;  %v4861_v17 = vpop.f32.mrb[13].mxu1  ;;  %v4699_v15 = vpop.f32.mrb[14].mxu0 }
 0x424   :  { %v4870_v43 = vmax.f32 %v5601_v2, 0.0  ;;  %v5604_v18 = vadd.f32 %v4861_v17, %v1641_v42  ;;  %v4863_v19 = vpop.f32.mrb[14].mxu1  ;;  %v4700_v20 = vpop.f32.mrb[15].mxu0 }
 0x425   :  { %v4871_v23 = vmax.f32 %v5602_v13, 0.0  ;;  %v4864_v0 = vpop.f32.mrb[15].mxu1  ;;  %v4872_v29 = vmax.f32 %v5603_v56, 0.0 }
 0x426   :  { %v4920_v21 = vmul.f32 %v4895_v6, %v4870_v43  ;;  %v4873_v30 = vmax.f32 %v5604_v18, 0.0 }
 0x427   :  { %v4921_v22 = vmul.f32 %v4899_v14, %v4871_v23  ;;  %v4922_v33 = vmul.f32 %v4903_v16, %v4872_v29 }
 0x428   :  { %v4927_v28 = vadd.f32 %v6084_v40, %v4920_v21  ;;  %v4923_v35 = vmul.f32 %v4907_v47, %v4873_v30 }
 0x42a   :  { %v4928_v34 = vadd.f32 %v4927_v28, %v4921_v22 }
 0x42c   :  { %v4929_v37 = vadd.f32 %v4928_v34, %v4922_v33 }
 0x42e   :  { %v4930_v38 = vadd.f32 %v4929_v37, %v4923_v35 }
 0x430   :  { %4931 = vadd.xlane.f32.xlu0 %v4930_v38 }
 0x4bd   :  { %v4932_v41 = vpop.xlane.xlu0 %4931 }
 0x4be   :  { %v4940_v45 = vadd.f32 %v5596_v39, %v4932_v41 }
 0x4c0   :  { %v4941_v46 = vsub.f32 0.0, %v4940_v45 }
 0x4c2   :  { %v4942_v25 = vmul.f32 1.442695, %v4941_v46 }
 0x4c4   :  { %5661 = vpow2.f32 %v4942_v25 }
 0x4ce   :  { %v5662_v1 = vpop.eup %5661 }
 0x4cf   :  { %v4944_v48 = vadd.f32 1.0, %v5662_v1 }
 0x4d1   :  { %5663 = vrcp.f32 %v4944_v48 }
 0x4db   :  { %v5664_v40 = vpop.eup %5663 }
 0x4dc   :  { %4947 = vst.msk [vmem:[%s6115_s7] sm:$0xff] %vm4946_vm0, %v5664_v40 }
 0x4dd   :  { %4952 = vsyncpa [#allocation4], 1 }
 0x4de   :  { %4953 = vsyncpa [#allocation6], 1 }
 0x4df   :  { %4954 = vsyncpa [#allocation9], 1 }
 0x4e0   :  { %4955 = vsyncpa [#allocation12], 1 }

// kernel: tpu_custom_call.1
= control target key start
LH: loop header
LB: loop body
LE: loop exit
PB: predicated region body
PF: predicated region fallthrough
CT: control target
= control target key end

     0   :  { %s6108_s0 = inlined_call_operand.hbm [shape: f32[8,256], index: 0, kind: input, shape index: {}]   ;;  %s6109_s1 = inlined_call_operand.hbm [shape: bf16[256,1024], index: 1, kind: input, shape index: {}]   ;;  %s6110_s2 = inlined_call_operand.hbm [shape: f32[1,1024], index: 2, kind: input, shape index: {}]   ;;  %s6111_s3 = inlined_call_operand.hbm [shape: bf16[1024,1024], index: 3, kind: input, shape index: {}]   ;;  %s6112_s4 = inlined_call_operand.hbm [shape: f32[1,1024], index: 4, kind: input, shape index: {}]   ;;  %s6113_s5 = inlined_call_operand.hbm [shape: f32[1,1024], index: 5, kind: input, shape index: {}]   ;;  %s6114_s6 = inlined_call_operand.<no memory space> [shape: f32[1,1], index: 6, kind: input, shape index: {}]   ;;  %s6115_s7 = inlined_call_operand.vmem [shape: f32[8,1], index: 7, kind: output, shape index: {}]  }
   0x1   :  { %v12_v0 = vstv %s6114_s6 }
   0x2   :  { %13 = vst [vmem:[#allocation2] sm:$0x1] %v12_v0 }
   0x3   :  { %14 = vsyncpa [#allocation4], 0 }
   0x4   :  { %15 = vsyncpa [#allocation6], 0 }
   0x5   :  { %16 = vsyncpa [#allocation9], 0 }
   0x6   :  { %17 = vsyncpa [#allocation12], 0  ;;  %s5806_s26 = smov [#allocation5]   ;;  %s5666_s30 = scalar_lea.hbm %s6109_s1, 16384 }
   0x7   :  { %s33_s27 = sshll.u32 %s5806_s26, 4  ;;  %p5667_p0 = scmp.ne.s32.totalorder %s6109_s1, %s5666_s30  ;;  %s34_s27 = int_to_ptr.vmem [resolvable:$true] %s33_s27 }
   0x8   :  { %p5670_p1 = scmp.lt.u32.totalorder %s5666_s30, %s6109_s1 }
   0xa   :  { %p5672_p2 = pnand %p5670_p1, %p5667_p0 }
   0xc   :  { %5675 = shalt.err (!%p5672_p2)
}
   0xd   :  { %s5676_s6 = scalar_lea.vmem %s34_s27, 16384  ;;  %p5681_p4 = scmp.lt.s32.totalorder %s34_s27, %s34_s27 }
   0xe   :  { %p5677_p3 = scmp.ne.s32.totalorder %s34_s27, %s5676_s6  ;;  %p5682_p5 = scmp.lt.s32.totalorder %s5676_s6, %s5676_s6 }
  0x10   :  { %p5683_p6 = por %p5682_p5, %p5681_p4 }
  0x12   :  { %p5684_p7 = pnand %p5683_p6, %p5677_p3 }
  0x14   :  { %5687 = shalt.err (!%p5684_p7)
}
  0x15   :  { %s5807_s12 = smov 512   ;;  %s5808_s13 = smov 32  }
  0x16   :  { %39 = dma.hbm_to_vmem [thread:$0]  %s6109_s1, 16384, %s34_s27, [#allocation6], %s5807_s12, %s5807_s12, %s5808_s13  }
  0x17   :  { %s5809_s16 = smov [#allocation8]   ;;  %s5810_s18 = smov [#allocation3]  }
  0x18   :  { %s55_s17 = sshll.u32 %s5809_s16, 4  ;;  %s24_s19 = sshll.u32 %s5810_s18, 4  ;;  %s56_s17 = int_to_ptr.vmem [resolvable:$true] %s55_s17  ;;  %s25_s19 = int_to_ptr.vmem [resolvable:$true] %s24_s19 }
  0x19   :  { %s5688_s22 = scalar_lea.hbm %s6111_s3, 65536 }
  0x1a   :  { %p5689_p8 = scmp.ne.s32.totalorder %s6111_s3, %s5688_s22  ;;  %p5692_p9 = scmp.lt.u32.totalorder %s5688_s22, %s6111_s3 }
  0x1c   :  { %p5694_p10 = pnand %p5692_p9, %p5689_p8 }
  0x1e   :  { %5697 = shalt.err (!%p5694_p10)
}
  0x1f   :  { %s5698_s1 = scalar_lea.vmem %s56_s17, 65536  ;;  %p5703_p12 = scmp.lt.s32.totalorder %s56_s17, %s56_s17 }
  0x20   :  { %p5699_p11 = scmp.ne.s32.totalorder %s56_s17, %s5698_s1  ;;  %p5704_p13 = scmp.lt.s32.totalorder %s5698_s1, %s5698_s1 }
  0x22   :  { %p5705_p0 = por %p5704_p13, %p5703_p12 }
  0x24   :  { %p5706_p1 = pnand %p5705_p0, %p5699_p11 }
  0x26   :  { %5709 = shalt.err (!%p5706_p1)
}
  0x27   :  { %61 = dma.hbm_to_vmem [thread:$0]  %s6111_s3, 65536, %s56_s17, [#allocation9], %s5807_s12, %s5807_s12, %s5808_s13  }
  0x28   :  { %s5710_s8 = scalar_lea.hbm %s6108_s0, 256 }
  0x29   :  { %p5711_p2 = scmp.ne.s32.totalorder %s6108_s0, %s5710_s8  ;;  %p5714_p3 = scmp.lt.u32.totalorder %s5710_s8, %s6108_s0 }
  0x2b   :  { %p5716_p4 = pnand %p5714_p3, %p5711_p2 }
  0x2d   :  { %5719 = shalt.err (!%p5716_p4)
}
  0x2e   :  { %s5720_s14 = scalar_lea.vmem %s25_s19, 256  ;;  %p5725_p6 = scmp.lt.s32.totalorder %s25_s19, %s25_s19 }
  0x2f   :  { %p5721_p5 = scmp.ne.s32.totalorder %s25_s19, %s5720_s14  ;;  %p5726_p7 = scmp.lt.s32.totalorder %s5720_s14, %s5720_s14 }
  0x31   :  { %p5727_p8 = por %p5726_p7, %p5725_p6 }
  0x33   :  { %p5728_p9 = pnand %p5727_p8, %p5721_p5 }
  0x35   :  { %5731 = shalt.err (!%p5728_p9)
}
  0x36   :  { %27 = dma.hbm_to_vmem [thread:$0]  %s6108_s0, 256, %s25_s19, [#allocation4]  }
  0x37   :  { %s5811_s13 = smov [#allocation7]   ;;  %s5812_s16 = smov [#allocation10]  }
  0x38   :  { %s46_s15 = sshll.u32 %s5811_s13, 4  ;;  %s68_s17 = sshll.u32 %s5812_s16, 4  ;;  %s47_s15 = int_to_ptr.vmem [resolvable:$true] %s46_s15  ;;  %s69_s17 = int_to_ptr.vmem [resolvable:$true] %s68_s17 }
  0x39   :  { %s5732_s21 = scalar_lea.hbm %s6110_s2, 128 }
  0x3a   :  { %p5733_p10 = scmp.ne.s32.totalorder %s6110_s2, %s5732_s21  ;;  %p5736_p11 = scmp.lt.u32.totalorder %s5732_s21, %s6110_s2 }
  0x3c   :  { %p5738_p12 = pnand %p5736_p11, %p5733_p10 }
  0x3e   :  { %5741 = shalt.err (!%p5738_p12)
}
  0x3f   :  { %s5742_s0 = scalar_lea.vmem %s47_s15, 128  ;;  %p5747_p0 = scmp.lt.s32.totalorder %s47_s15, %s47_s15 }
  0x40   :  { %p5743_p13 = scmp.ne.s32.totalorder %s47_s15, %s5742_s0  ;;  %p5748_p1 = scmp.lt.s32.totalorder %s5742_s0, %s5742_s0 }
  0x42   :  { %p5749_p2 = por %p5748_p1, %p5747_p0 }
  0x44   :  { %p5750_p3 = pnand %p5749_p2, %p5743_p13 }
  0x46   :  { %5753 = shalt.err (!%p5750_p3)
}
  0x47   :  { %49 = dma.hbm_to_vmem [thread:$0]  %s6110_s2, 128, %s47_s15, [#allocation6]  }
  0x48   :  { %s5754_s28 = scalar_lea.hbm %s6112_s4, 128 }
  0x49   :  { %p5755_p4 = scmp.ne.s32.totalorder %s6112_s4, %s5754_s28  ;;  %p5758_p5 = scmp.lt.u32.totalorder %s5754_s28, %s6112_s4 }
  0x4b   :  { %p5760_p6 = pnand %p5758_p5, %p5755_p4 }
  0x4d   :  { %5763 = shalt.err (!%p5760_p6)
}
  0x4e   :  { %s5764_s10 = scalar_lea.vmem %s69_s17, 128  ;;  %p5769_p8 = scmp.lt.s32.totalorder %s69_s17, %s69_s17 }
  0x4f   :  { %p5765_p7 = scmp.ne.s32.totalorder %s69_s17, %s5764_s10  ;;  %p5770_p9 = scmp.lt.s32.totalorder %s5764_s10, %s5764_s10 }
  0x51   :  { %p5771_p10 = por %p5770_p9, %p5769_p8 }
  0x53   :  { %p5772_p11 = pnand %p5771_p10, %p5765_p7 }
  0x55   :  { %5775 = shalt.err (!%p5772_p11)
}
  0x56   :  { %71 = dma.hbm_to_vmem [thread:$0]  %s6112_s4, 128, %s69_s17, [#allocation9]  }
  0x57   :  { %s5813_s6 = smov [#allocation11]   ;;  %s5776_s13 = scalar_lea.hbm %s6113_s5, 128 }
  0x58   :  { %s78_s14 = sshll.u32 %s5813_s6, 4  ;;  %p5777_p12 = scmp.ne.s32.totalorder %s6113_s5, %s5776_s13  ;;  %s79_s14 = int_to_ptr.vmem [resolvable:$true] %s78_s14 }
  0x59   :  { %p5780_p13 = scmp.lt.u32.totalorder %s5776_s13, %s6113_s5 }
  0x5b   :  { %p5782_p0 = pnand %p5780_p13, %p5777_p12 }
  0x5d   :  { %5785 = shalt.err (!%p5782_p0)
}
  0x5e   :  { %s5786_s21 = scalar_lea.vmem %s79_s14, 128  ;;  %p5791_p2 = scmp.lt.s32.totalorder %s79_s14, %s79_s14 }
  0x5f   :  { %p5787_p1 = scmp.ne.s32.totalorder %s79_s14, %s5786_s21  ;;  %p5792_p3 = scmp.lt.s32.totalorder %s5786_s21, %s5786_s21 }
  0x61   :  { %p5793_p4 = por %p5792_p3, %p5791_p2 }
  0x63   :  { %p5794_p5 = pnand %p5793_p4, %p5787_p1 }
  0x65   :  { %5797 = shalt.err (!%p5794_p5)
}
  0x66   :  { %81 = dma.hbm_to_vmem [thread:$0]  %s6113_s5, 128, %s79_s14, [#allocation12]  }
  0x67   :  { %5798 = dma.done.wait [#allocation4], 256  }
  0x68   :  { %5799 = vsyncadd [#allocation4], 4294967040 }
  0x69   :  { %5800 = dma.done.wait [#allocation6], 16512  }
  0x6a   :  { %5801 = vsyncadd [#allocation6], 4294950784 }
  0x6b   :  { %5802 = dma.done.wait [#allocation9], 65664  }
  0x6c   :  { %5803 = vsyncadd [#allocation9], 4294901632 }
  0x6d   :  { %5804 = dma.done.wait [#allocation12], 128  }
  0x6e   :  { %5805 = vsyncadd [#allocation12], 4294967168  ;;  %v106_v1 = vld [vmem:[#allocation5] sm:$0xff]  ;;  %v107_v18 = vld [vmem:[#allocation5 + $0x8] sm:$0xff]  ;;  %vm4946_vm0 = vcmask 7168  }
  0x6f   :  { %v110_v2 = vld [vmem:[#allocation5 + $0x20] sm:$0xff]  ;;  %v111_v19 = vld [vmem:[#allocation5 + $0x28] sm:$0xff]  ;;  %v103_v20 = vld [vmem:[#allocation3 + $0x8] sm:$0xff] }
  0x70   :  { %v114_v3 = vld [vmem:[#allocation5 + $0x40] sm:$0xff]  ;;  %v4957_v4 = vcombine.high %v106_v1, %v110_v2  ;;  %v4956_v5 = vcombine.low %v106_v1, %v110_v2  ;;  %v4959_v22 = vcombine.high %v107_v18, %v111_v19  ;;  %v4958_v23 = vcombine.low %v107_v18, %v111_v19  ;;  %v115_v25 = vld [vmem:[#allocation5 + $0x48] sm:$0xff] }
  0x71   :  { %v118_v6 = vld [vmem:[#allocation5 + $0x60] sm:$0xff]  ;;  %v5929_v24 = vpack.c.bf16 %v103_v20, %v103_v20  ;;  %v119_v26 = vld [vmem:[#allocation5 + $0x68] sm:$0xff] }
  0x72   :  { %v4965_v7 = vcombine.high %v114_v3, %v118_v6  ;;  %v122_v8 = vld [vmem:[#allocation5 + $0x80] sm:$0xff]  ;;  %916 = vmatprep.subr.bf16.mxu0 %v4957_v4  ;;  %v4964_v10 = vcombine.low %v114_v3, %v118_v6  ;;  %v4967_v28 = vcombine.high %v115_v25, %v119_v26  ;;  %v123_v29 = vld [vmem:[#allocation5 + $0x88] sm:$0xff]  ;;  %957 = vmatprep.subr.bf16.mxu1 %v4959_v22 }
  0x73   :  { %v126_v9 = vld [vmem:[#allocation5 + $0xa0] sm:$0xff]  ;;  %917 = vmatpush1.bf16.msra.mxu0 %v4956_v5  ;;  %v127_v30 = vld [vmem:[#allocation5 + $0xa8] sm:$0xff]  ;;  %948 = vmatprep.mubr.bf16.mxu0 %v5929_v24  ;;  %v4966_v33 = vcombine.low %v115_v25, %v119_v26 }
  0x74   :  { %918 = vmatprep.subr.bf16.mxu0 %v4965_v7  ;;  %v4973_v11 = vcombine.high %v122_v8, %v126_v9  ;;  %v130_v12 = vld [vmem:[#allocation5 + $0xc0] sm:$0xff]  ;;  %v4972_v14 = vcombine.low %v122_v8, %v126_v9  ;;  %958 = vmatpush1.bf16.msra.mxu1 %v4958_v23  ;;  %v4975_v35 = vcombine.high %v123_v29, %v127_v30  ;;  %v131_v37 = vld [vmem:[#allocation5 + $0xc8] sm:$0xff] }
  0x75   :  { %v134_v13 = vld [vmem:[#allocation5 + $0xe0] sm:$0xff]  ;;  %989 = vmatprep.mubr.bf16.mxu1 %v5929_v24  ;;  %959 = vmatprep.subr.bf16.mxu1 %v4967_v28  ;;  %v135_v38 = vld [vmem:[#allocation5 + $0xe8] sm:$0xff]  ;;  %v4974_v41 = vcombine.low %v123_v29, %v127_v30 }
  0x76   :  { %v4981_v15 = vcombine.high %v130_v12, %v134_v13  ;;  %v138_v16 = vld [vmem:[#allocation5 + $0x100] sm:$0xff]  ;;  %v4980_v21 = vcombine.low %v130_v12, %v134_v13  ;;  %v4983_v43 = vcombine.high %v131_v37, %v135_v38  ;;  %v139_v45 = vld [vmem:[#allocation5 + $0x108] sm:$0xff]  ;;  %v4982_v49 = vcombine.low %v131_v37, %v135_v38 }
  0x77   :  { %919 = vmatpush1.bf16.msra.mxu0 %v4964_v10  ;;  %v142_v17 = vld [vmem:[#allocation5 + $0x120] sm:$0xff]  ;;  %v143_v46 = vld [vmem:[#allocation5 + $0x128] sm:$0xff] }
  0x78   :  { %920 = vmatprep.subr.bf16.mxu0 %v4973_v11  ;;  %v4989_v27 = vcombine.high %v138_v16, %v142_v17  ;;  %v146_v31 = vld [vmem:[#allocation5 + $0x140] sm:$0xff]  ;;  %v4988_v34 = vcombine.low %v138_v16, %v142_v17  ;;  %960 = vmatpush1.bf16.msra.mxu1 %v4966_v33  ;;  %v4991_v51 = vcombine.high %v139_v45, %v143_v46  ;;  %v147_v53 = vld [vmem:[#allocation5 + $0x148] sm:$0xff] }
  0x79   :  { %v150_v32 = vld [vmem:[#allocation5 + $0x160] sm:$0xff]  ;;  %961 = vmatprep.subr.bf16.mxu1 %v4975_v35  ;;  %v151_v54 = vld [vmem:[#allocation5 + $0x168] sm:$0xff]  ;;  %v4990_v57 = vcombine.low %v139_v45, %v143_v46 }
  0x7a   :  { %v4997_v36 = vcombine.high %v146_v31, %v150_v32  ;;  %v154_v39 = vld [vmem:[#allocation5 + $0x180] sm:$0xff]  ;;  %v4996_v42 = vcombine.low %v146_v31, %v150_v32  ;;  %v4999_v59 = vcombine.high %v147_v53, %v151_v54  ;;  %v155_v61 = vld [vmem:[#allocation5 + $0x188] sm:$0xff]  ;;  %v4998_v1 = vcombine.low %v147_v53, %v151_v54 }
  0x7b   :  { %921 = vmatpush1.bf16.msra.mxu0 %v4972_v14  ;;  %v158_v40 = vld [vmem:[#allocation5 + $0x1a0] sm:$0xff]  ;;  %v159_v62 = vld [vmem:[#allocation5 + $0x1a8] sm:$0xff] }
  0x7c   :  { %922 = vmatprep.subr.bf16.mxu0 %v4981_v15  ;;  %v5005_v44 = vcombine.high %v154_v39, %v158_v40  ;;  %v162_v47 = vld [vmem:[#allocation5 + $0x1c0] sm:$0xff]  ;;  %962 = vmatpush1.bf16.msra.mxu1 %v4974_v41  ;;  %v5004_v50 = vcombine.low %v154_v39, %v158_v40  ;;  %v5007_v3 = vcombine.high %v155_v61, %v159_v62  ;;  %v163_v5 = vld [vmem:[#allocation5 + $0x1c8] sm:$0xff] }
  0x7d   :  { %v166_v48 = vld [vmem:[#allocation5 + $0x1e0] sm:$0xff]  ;;  %963 = vmatprep.subr.bf16.mxu1 %v4983_v43  ;;  %v167_v6 = vld [vmem:[#allocation5 + $0x1e8] sm:$0xff]  ;;  %v5006_v9 = vcombine.low %v155_v61, %v159_v62 }
  0x7e   :  { %v5013_v52 = vcombine.high %v162_v47, %v166_v48  ;;  %v170_v55 = vld [vmem:[#allocation5 + $0x200] sm:$0xff]  ;;  %v5012_v58 = vcombine.low %v162_v47, %v166_v48  ;;  %v5015_v11 = vcombine.high %v163_v5, %v167_v6  ;;  %v171_v13 = vld [vmem:[#allocation5 + $0x208] sm:$0xff]  ;;  %v5014_v17 = vcombine.low %v163_v5, %v167_v6 }
  0x7f   :  { %923 = vmatpush1.bf16.msra.mxu0 %v4980_v21  ;;  %v174_v56 = vld [vmem:[#allocation5 + $0x220] sm:$0xff]  ;;  %v175_v14 = vld [vmem:[#allocation5 + $0x228] sm:$0xff] }
  0x80   :  { %924 = vmatprep.subr.bf16.mxu0 %v4989_v27  ;;  %964 = vmatpush1.bf16.msra.mxu1 %v4982_v49  ;;  %v5021_v60 = vcombine.high %v170_v55, %v174_v56  ;;  %v178_v63 = vld [vmem:[#allocation5 + $0x240] sm:$0xff]  ;;  %v5020_v2 = vcombine.low %v170_v55, %v174_v56  ;;  %v5023_v19 = vcombine.high %v171_v13, %v175_v14  ;;  %v179_v21 = vld [vmem:[#allocation5 + $0x248] sm:$0xff]  ;;  %v108_v56 = vld [vmem:[#allocation5 + $0x10] sm:$0xff] }
  0x81   :  { %965 = vmatprep.subr.bf16.mxu1 %v4991_v51  ;;  %v182_v0 = vld [vmem:[#allocation5 + $0x260] sm:$0xff]  ;;  %v183_v22 = vld [vmem:[#allocation5 + $0x268] sm:$0xff]  ;;  %v5022_v26 = vcombine.low %v171_v13, %v175_v14 }
  0x82   :  { %v5029_v4 = vcombine.high %v178_v63, %v182_v0  ;;  %v186_v7 = vld [vmem:[#allocation5 + $0x280] sm:$0xff]  ;;  %v5028_v10 = vcombine.low %v178_v63, %v182_v0  ;;  %v5031_v28 = vcombine.high %v179_v21, %v183_v22  ;;  %v187_v30 = vld [vmem:[#allocation5 + $0x288] sm:$0xff] }
  0x83   :  { %925 = vmatpush1.bf16.msra.mxu0 %v4988_v34  ;;  %v190_v8 = vld [vmem:[#allocation5 + $0x2a0] sm:$0xff]  ;;  %v191_v31 = vld [vmem:[#allocation5 + $0x2a8] sm:$0xff]  ;;  %v5030_v34 = vcombine.low %v179_v21, %v183_v22 }
  0x84   :  { %926 = vmatprep.subr.bf16.mxu0 %v4997_v36  ;;  %966 = vmatpush1.bf16.msra.mxu1 %v4990_v57  ;;  %v5037_v12 = vcombine.high %v186_v7, %v190_v8  ;;  %v194_v15 = vld [vmem:[#allocation5 + $0x2c0] sm:$0xff]  ;;  %v5036_v18 = vcombine.low %v186_v7, %v190_v8  ;;  %v5039_v36 = vcombine.high %v187_v30, %v191_v31  ;;  %v195_v38 = vld [vmem:[#allocation5 + $0x2c8] sm:$0xff]  ;;  %v112_v57 = vld [vmem:[#allocation5 + $0x30] sm:$0xff] }
  0x85   :  { %967 = vmatprep.subr.bf16.mxu1 %v4999_v59  ;;  %v198_v16 = vld [vmem:[#allocation5 + $0x2e0] sm:$0xff]  ;;  %v199_v39 = vld [vmem:[#allocation5 + $0x2e8] sm:$0xff]  ;;  %v4961_v0 = vcombine.high %v108_v56, %v112_v57  ;;  %v4960_v6 = vcombine.low %v108_v56, %v112_v57  ;;  %v149_v56 = vld [vmem:[#allocation5 + $0x158] sm:$0xff] }
  0x86   :  { %v5045_v20 = vcombine.high %v194_v15, %v198_v16  ;;  %v202_v23 = vld [vmem:[#allocation5 + $0x300] sm:$0xff]  ;;  %v5044_v27 = vcombine.low %v194_v15, %v198_v16  ;;  %v203_v46 = vld [vmem:[#allocation5 + $0x308] sm:$0xff]  ;;  %v109_v16 = vld [vmem:[#allocation5 + $0x18] sm:$0xff] }
  0x87   :  { %927 = vmatpush1.bf16.msra.mxu0 %v4996_v42  ;;  %v206_v25 = vld [vmem:[#allocation5 + $0x320] sm:$0xff]  ;;  %v5038_v42 = vcombine.low %v187_v30, %v191_v31  ;;  %v207_v47 = vld [vmem:[#allocation5 + $0x328] sm:$0xff]  ;;  %v153_v57 = vld [vmem:[#allocation5 + $0x178] sm:$0xff] }
  0x88   :  { %928 = vmatprep.subr.bf16.mxu0 %v5005_v44  ;;  %968 = vmatpush1.bf16.msra.mxu1 %v4998_v1  ;;  %v5053_v29 = vcombine.high %v202_v23, %v206_v25  ;;  %v210_v32 = vld [vmem:[#allocation5 + $0x340] sm:$0xff]  ;;  %v5052_v35 = vcombine.low %v202_v23, %v206_v25  ;;  %v5047_v44 = vcombine.high %v195_v38, %v199_v39  ;;  %v211_v54 = vld [vmem:[#allocation5 + $0x348] sm:$0xff]  ;;  %v116_v1 = vld [vmem:[#allocation5 + $0x50] sm:$0xff] }
  0x89   :  { %969 = vmatprep.subr.bf16.mxu1 %v5007_v3  ;;  %v214_v33 = vld [vmem:[#allocation5 + $0x360] sm:$0xff]  ;;  %v215_v55 = vld [vmem:[#allocation5 + $0x368] sm:$0xff]  ;;  %v117_v25 = vld [vmem:[#allocation5 + $0x58] sm:$0xff] }
  0x8a   :  { %v5061_v37 = vcombine.high %v210_v32, %v214_v33  ;;  %v218_v40 = vld [vmem:[#allocation5 + $0x380] sm:$0xff]  ;;  %v5060_v43 = vcombine.low %v210_v32, %v214_v33  ;;  %v5063_v61 = vcombine.high %v211_v54, %v215_v55  ;;  %v219_v62 = vld [vmem:[#allocation5 + $0x388] sm:$0xff]  ;;  %v125_v33 = vld [vmem:[#allocation5 + $0x98] sm:$0xff] }
  0x8b   :  { %929 = vmatpush1.bf16.msra.mxu0 %v5004_v50  ;;  %v222_v41 = vld [vmem:[#allocation5 + $0x3a0] sm:$0xff]  ;;  %v5046_v50 = vcombine.low %v195_v38, %v199_v39  ;;  %v223_v63 = vld [vmem:[#allocation5 + $0x3a8] sm:$0xff] }
  0x8c   :  { %930 = vmatprep.subr.bf16.mxu0 %v5013_v52  ;;  %970 = vmatpush1.bf16.msra.mxu1 %v5006_v9  ;;  %v5069_v45 = vcombine.high %v218_v40, %v222_v41  ;;  %v226_v48 = vld [vmem:[#allocation5 + $0x3c0] sm:$0xff]  ;;  %v5068_v51 = vcombine.low %v218_v40, %v222_v41  ;;  %v5055_v52 = vcombine.high %v203_v46, %v207_v47  ;;  %v227_v7 = vld [vmem:[#allocation5 + $0x3c8] sm:$0xff]  ;;  %v133_v41 = vld [vmem:[#allocation5 + $0xd8] sm:$0xff] }
  0x8d   :  { %971 = vmatprep.subr.bf16.mxu1 %v5015_v11  ;;  %v230_v49 = vld [vmem:[#allocation5 + $0x3e0] sm:$0xff]  ;;  %v5071_v5 = vcombine.high %v219_v62, %v223_v63  ;;  %v231_v8 = vld [vmem:[#allocation5 + $0x3e8] sm:$0xff]  ;;  %v128_v11 = vld [vmem:[#allocation5 + $0xb0] sm:$0xff] }
  0x8e   :  { %v5077_v53 = vcombine.high %v226_v48, %v230_v49  ;;  %v5076_v59 = vcombine.low %v226_v48, %v230_v49  ;;  %v5079_v13 = vcombine.high %v227_v7, %v231_v8  ;;  %v141_v49 = vld [vmem:[#allocation5 + $0x118] sm:$0xff] }
  0x8f   :  { %931 = vmatpush1.bf16.msra.mxu0 %v5012_v58  ;;  %v5054_v58 = vcombine.low %v203_v46, %v207_v47 }
  0x90   :  { %932 = vmatprep.subr.bf16.mxu0 %v5021_v60  ;;  %972 = vmatpush1.bf16.msra.mxu1 %v5014_v17  ;;  %v102_v60 = vld [vmem:[#allocation3] sm:$0xff]  ;;  %v113_v17 = vld [vmem:[#allocation5 + $0x38] sm:$0xff] }
  0x91   :  { %973 = vmatprep.subr.bf16.mxu1 %v5023_v19  ;;  %v5933_v3 = vpack.c.bf16 %v102_v60, %v102_v60  ;;  %v136_v19 = vld [vmem:[#allocation5 + $0xf0] sm:$0xff]  ;;  %v4963_v22 = vcombine.high %v109_v16, %v113_v17 }
  0x93   :  { %933 = vmatpush1.bf16.msra.mxu0 %v5020_v2  ;;  %v120_v2 = vld [vmem:[#allocation5 + $0x70] sm:$0xff] }
  0x94   :  { %934 = vmatprep.subr.bf16.mxu0 %v5029_v4  ;;  %974 = vmatpush1.bf16.msra.mxu1 %v5022_v26  ;;  %v5062_v4 = vcombine.low %v211_v54, %v215_v55  ;;  %v4969_v9 = vcombine.high %v116_v1, %v120_v2  ;;  %v4968_v14 = vcombine.low %v116_v1, %v120_v2  ;;  %v121_v26 = vld [vmem:[#allocation5 + $0x78] sm:$0xff]  ;;  %v180_v2 = vld [vmem:[#allocation5 + $0x250] sm:$0xff] }
  0x95   :  { %975 = vmatprep.subr.bf16.mxu1 %v5031_v28  ;;  %v144_v28 = vld [vmem:[#allocation5 + $0x130] sm:$0xff]  ;;  %v4971_v31 = vcombine.high %v117_v25, %v121_v26  ;;  %v161_v1 = vld [vmem:[#allocation5 + $0x1b8] sm:$0xff] }
  0x97   :  { %935 = vmatpush1.bf16.msra.mxu0 %v5028_v10  ;;  %v124_v10 = vld [vmem:[#allocation5 + $0x90] sm:$0xff] }
  0x98   :  { %936 = vmatprep.subr.bf16.mxu0 %v5037_v12  ;;  %976 = vmatpush1.bf16.msra.mxu1 %v5030_v34  ;;  %v5070_v12 = vcombine.low %v219_v62, %v223_v63  ;;  %v4977_v15 = vcombine.high %v124_v10, %v128_v11  ;;  %v4976_v21 = vcombine.low %v124_v10, %v128_v11  ;;  %v129_v34 = vld [vmem:[#allocation5 + $0xb8] sm:$0xff]  ;;  %v188_v11 = vld [vmem:[#allocation5 + $0x290] sm:$0xff] }
  0x99   :  { %977 = vmatprep.subr.bf16.mxu1 %v5039_v36  ;;  %v152_v36 = vld [vmem:[#allocation5 + $0x170] sm:$0xff]  ;;  %v4979_v39 = vcombine.high %v125_v33, %v129_v34  ;;  %v5003_v62 = vcombine.high %v149_v56, %v153_v57  ;;  %v169_v10 = vld [vmem:[#allocation5 + $0x1f8] sm:$0xff] }
  0x9b   :  { %937 = vmatpush1.bf16.msra.mxu0 %v5036_v18  ;;  %v132_v18 = vld [vmem:[#allocation5 + $0xd0] sm:$0xff] }
  0x9c   :  { %938 = vmatprep.subr.bf16.mxu0 %v5045_v20  ;;  %978 = vmatpush1.bf16.msra.mxu1 %v5038_v42  ;;  %v5078_v20 = vcombine.low %v227_v7, %v231_v8  ;;  %v4985_v23 = vcombine.high %v132_v18, %v136_v19  ;;  %v4984_v30 = vcombine.low %v132_v18, %v136_v19  ;;  %v137_v42 = vld [vmem:[#allocation5 + $0xf8] sm:$0xff]  ;;  %v196_v19 = vld [vmem:[#allocation5 + $0x2d0] sm:$0xff] }
  0x9d   :  { %979 = vmatprep.subr.bf16.mxu1 %v5047_v44  ;;  %v160_v44 = vld [vmem:[#allocation5 + $0x1b0] sm:$0xff]  ;;  %v4987_v47 = vcombine.high %v133_v41, %v137_v42  ;;  %v177_v18 = vld [vmem:[#allocation5 + $0x238] sm:$0xff] }
  0x9f   :  { %939 = vmatpush1.bf16.msra.mxu0 %v5044_v27  ;;  %v140_v27 = vld [vmem:[#allocation5 + $0x110] sm:$0xff] }
  0xa0   :  { %940 = vmatprep.subr.bf16.mxu0 %v5053_v29  ;;  %980 = vmatpush1.bf16.msra.mxu1 %v5046_v50  ;;  %v4962_v29 = vcombine.low %v109_v16, %v113_v17  ;;  %v4993_v32 = vcombine.high %v140_v27, %v144_v28  ;;  %v4992_v38 = vcombine.low %v140_v27, %v144_v28  ;;  %v164_v50 = vld [vmem:[#allocation5 + $0x1d0] sm:$0xff]  ;;  %v173_v17 = vld [vmem:[#allocation5 + $0x218] sm:$0xff] }
  0xa1   :  { %981 = vmatprep.subr.bf16.mxu1 %v5055_v52  ;;  %v4986_v52 = vcombine.low %v133_v41, %v137_v42  ;;  %v185_v27 = vld [vmem:[#allocation5 + $0x278] sm:$0xff]  ;;  %v204_v28 = vld [vmem:[#allocation5 + $0x310] sm:$0xff] }
  0xa2   :  { %v197_v42 = vld [vmem:[#allocation5 + $0x2d8] sm:$0xff] }
  0xa3   :  { %941 = vmatpush1.bf16.msra.mxu0 %v5052_v35  ;;  %v148_v35 = vld [vmem:[#allocation5 + $0x150] sm:$0xff] }
  0xa4   :  { %942 = vmatprep.subr.bf16.mxu0 %v5061_v37  ;;  %982 = vmatpush1.bf16.msra.mxu1 %v5054_v58  ;;  %v4970_v37 = vcombine.low %v117_v25, %v121_v26  ;;  %v5001_v40 = vcombine.high %v148_v35, %v152_v36  ;;  %v5000_v46 = vcombine.low %v148_v35, %v152_v36  ;;  %v172_v58 = vld [vmem:[#allocation5 + $0x210] sm:$0xff]  ;;  %v181_v26 = vld [vmem:[#allocation5 + $0x258] sm:$0xff] }
  0xa5   :  { %983 = vmatprep.subr.bf16.mxu1 %v5063_v61  ;;  %v193_v35 = vld [vmem:[#allocation5 + $0x2b8] sm:$0xff]  ;;  %v212_v36 = vld [vmem:[#allocation5 + $0x350] sm:$0xff] }
  0xa7   :  { %943 = vmatpush1.bf16.msra.mxu0 %v5060_v43  ;;  %v156_v43 = vld [vmem:[#allocation5 + $0x190] sm:$0xff] }
  0xa8   :  { %944 = vmatprep.subr.bf16.mxu0 %v5069_v45  ;;  %984 = vmatpush1.bf16.msra.mxu1 %v5062_v4  ;;  %v4978_v45 = vcombine.low %v125_v33, %v129_v34  ;;  %v5009_v48 = vcombine.high %v156_v43, %v160_v44  ;;  %v184_v4 = vld [vmem:[#allocation5 + $0x270] sm:$0xff]  ;;  %v189_v34 = vld [vmem:[#allocation5 + $0x298] sm:$0xff] }
  0xa9   :  { %985 = vmatprep.subr.bf16.mxu1 %v5071_v5  ;;  %v5002_v5 = vcombine.low %v149_v56, %v153_v57  ;;  %v5033_v8 = vcombine.high %v180_v2, %v184_v4  ;;  %v213_v57 = vld [vmem:[#allocation5 + $0x358] sm:$0xff] }
  0xab   :  { %945 = vmatpush1.bf16.msra.mxu0 %v5068_v51  ;;  %v168_v51 = vld [vmem:[#allocation5 + $0x1f0] sm:$0xff] }
  0xac   :  { %946 = vmatprep.subr.bf16.mxu0 %v5077_v53  ;;  %986 = vmatpush1.bf16.msra.mxu1 %v5070_v12  ;;  %v5008_v53 = vcombine.low %v156_v43, %v160_v44  ;;  %v5017_v55 = vcombine.high %v164_v50, %v168_v51  ;;  %v5016_v61 = vcombine.low %v164_v50, %v168_v51  ;;  %v192_v12 = vld [vmem:[#allocation5 + $0x2b0] sm:$0xff]  ;;  %v201_v43 = vld [vmem:[#allocation5 + $0x2f8] sm:$0xff] }
  0xad   :  { %987 = vmatprep.subr.bf16.mxu1 %v5079_v13  ;;  %v5041_v16 = vcombine.high %v188_v11, %v192_v12  ;;  %v220_v44 = vld [vmem:[#allocation5 + $0x390] sm:$0xff]  ;;  %v209_v50 = vld [vmem:[#allocation5 + $0x338] sm:$0xff] }
  0xae   :  { %v228_v51 = vld [vmem:[#allocation5 + $0x3d0] sm:$0xff] }
  0xaf   :  { %947 = vmatpush1.bf16.msra.mxu0 %v5076_v59  ;;  %v176_v59 = vld [vmem:[#allocation5 + $0x230] sm:$0xff] }
  0xb0   :  { %998 = vmatprep.subr.bf16.mxu0 %v4961_v0  ;;  %988 = vmatpush1.bf16.msra.mxu1 %v5078_v20  ;;  %v5025_v63 = vcombine.high %v172_v58, %v176_v59  ;;  %v157_v0 = vld [vmem:[#allocation5 + $0x198] sm:$0xff]  ;;  %v200_v20 = vld [vmem:[#allocation5 + $0x2f0] sm:$0xff] }
  0xb1   :  { %1039 = vmatprep.subr.bf16.mxu1 %v4963_v22  ;;  %v5011_v7 = vcombine.high %v157_v0, %v161_v1  ;;  %v5010_v13 = vcombine.low %v157_v0, %v161_v1  ;;  %v5040_v22 = vcombine.low %v188_v11, %v192_v12  ;;  %v5049_v25 = vcombine.high %v196_v19, %v200_v20  ;;  %v221_v0 = vld [vmem:[#allocation5 + $0x398] sm:$0xff]  ;;  %v1112_v12 = vld [vmem:[#allocation8 + $0x80] sm:$0xff] }
  0xb2   :  { %949 = vmatmul.mubr.bf16.vlgmr.msra.gmra.mrb[0].mxu0 %v5933_v3  ;;  %v225_v1 = vld [vmem:[#allocation5 + $0x3b8] sm:$0xff] }
  0xb3   :  { %999 = vmatpush1.bf16.msra.mxu0 %v4960_v6  ;;  %1030 = vmatprep.mubr.bf16.mxu0 %v5929_v24  ;;  %v5024_v6 = vcombine.low %v172_v58, %v176_v59  ;;  %v217_v58 = vld [vmem:[#allocation5 + $0x378] sm:$0xff]  ;;  %v1096_v59 = vld [vmem:[#allocation8] sm:$0xff] }
  0xb4   :  { %1000 = vmatprep.subr.bf16.mxu0 %v4969_v9  ;;  %990 = vmatmul.mubr.bf16.vlgmr.msra.gmra.mrb[0].mxu1 %v5933_v3  ;;  %v165_v9 = vld [vmem:[#allocation5 + $0x1d8] sm:$0xff] }
  0xb5   :  { %1040 = vmatpush1.bf16.msra.mxu1 %v4962_v29  ;;  %1071 = vmatprep.mubr.bf16.mxu1 %v5929_v24  ;;  %v145_v24 = vld [vmem:[#allocation5 + $0x138] sm:$0xff]  ;;  %v208_v29 = vld [vmem:[#allocation5 + $0x330] sm:$0xff] }
  0xb6   :  { %1041 = vmatprep.subr.bf16.mxu1 %v4971_v31  ;;  %v4995_v54 = vcombine.high %v141_v49, %v145_v24  ;;  %v4994_v60 = vcombine.low %v141_v49, %v145_v24  ;;  %v5048_v31 = vcombine.low %v196_v19, %v200_v20  ;;  %v5057_v33 = vcombine.high %v204_v28, %v208_v29  ;;  %v205_v24 = vld [vmem:[#allocation5 + $0x318] sm:$0xff]  ;;  %v1120_v20 = vld [vmem:[#allocation8 + $0xc0] sm:$0xff] }
  0xb7   :  { %1001 = vmatpush1.bf16.msra.mxu0 %v4968_v14  ;;  %v5032_v14 = vcombine.low %v180_v2, %v184_v4  ;;  %v1104_v4 = vld [vmem:[#allocation8 + $0x40] sm:$0xff] }
  0xb8   :  { %1002 = vmatprep.subr.bf16.mxu0 %v4977_v15  ;;  %v5019_v15 = vcombine.high %v165_v9, %v169_v10 }
  0xb9   :  { %1042 = vmatpush1.bf16.msra.mxu1 %v4970_v37  ;;  %v216_v37 = vld [vmem:[#allocation5 + $0x370] sm:$0xff] }
  0xba   :  { %1043 = vmatprep.subr.bf16.mxu1 %v4979_v39  ;;  %v5056_v39 = vcombine.low %v204_v28, %v208_v29  ;;  %v5065_v41 = vcombine.high %v212_v36, %v216_v37  ;;  %v1128_v29 = vld [vmem:[#allocation8 + $0x100] sm:$0xff] }
  0xbb   :  { %1003 = vmatpush1.bf16.msra.mxu0 %v4976_v21  ;;  %v5018_v21 = vcombine.low %v165_v9, %v169_v10  ;;  %v229_v9 = vld [vmem:[#allocation5 + $0x3d8] sm:$0xff] }
  0xbc   :  { %1004 = vmatprep.subr.bf16.mxu0 %v4985_v23  ;;  %v5027_v23 = vcombine.high %v173_v17, %v177_v18  ;;  %v233_v10 = vld [vmem:[#allocation5 + $0x3f8] sm:$0xff] }
  0xbd   :  { %1044 = vmatpush1.bf16.msra.mxu1 %v4978_v45  ;;  %v224_v45 = vld [vmem:[#allocation5 + $0x3b0] sm:$0xff] }
  0xbe   :  { %1045 = vmatprep.subr.bf16.mxu1 %v4987_v47  ;;  %v5064_v47 = vcombine.low %v212_v36, %v216_v37  ;;  %v5073_v49 = vcombine.high %v220_v44, %v224_v45  ;;  %v1136_v37 = vld [vmem:[#allocation8 + $0x140] sm:$0xff] }
  0xbf   :  { %1005 = vmatpush1.bf16.msra.mxu0 %v4984_v30  ;;  %v5026_v30 = vcombine.low %v173_v17, %v177_v18  ;;  %v1097_v17 = vld [vmem:[#allocation8 + $0x8] sm:$0xff] }
  0xc0   :  { %1006 = vmatprep.subr.bf16.mxu0 %v4993_v32  ;;  %v5035_v32 = vcombine.high %v181_v26, %v185_v27  ;;  %v1101_v18 = vld [vmem:[#allocation8 + $0x28] sm:$0xff] }
  0xc1   :  { %1046 = vmatpush1.bf16.msra.mxu1 %v4986_v52  ;;  %v232_v52 = vld [vmem:[#allocation5 + $0x3f0] sm:$0xff] }
  0xc2   :  { %1047 = vmatprep.subr.bf16.mxu1 %v4995_v54  ;;  %v5072_v54 = vcombine.low %v220_v44, %v224_v45  ;;  %v5081_v56 = vcombine.high %v228_v51, %v232_v52  ;;  %v1144_v45 = vld [vmem:[#allocation8 + $0x180] sm:$0xff] }
  0xc3   :  { %1007 = vmatpush1.bf16.msra.mxu0 %v4992_v38  ;;  %v5034_v38 = vcombine.low %v181_v26, %v185_v27  ;;  %v1105_v26 = vld [vmem:[#allocation8 + $0x48] sm:$0xff] }
  0xc4   :  { %1008 = vmatprep.subr.bf16.mxu0 %v5001_v40  ;;  %v5043_v40 = vcombine.high %v189_v34, %v193_v35  ;;  %v1109_v27 = vld [vmem:[#allocation8 + $0x68] sm:$0xff] }
  0xc5   :  { %1048 = vmatpush1.bf16.msra.mxu1 %v4994_v60  ;;  %v1100_v60 = vld [vmem:[#allocation8 + $0x20] sm:$0xff] }
  0xc6   :  { %1049 = vmatprep.subr.bf16.mxu1 %v5003_v62  ;;  %v5080_v62 = vcombine.low %v228_v51, %v232_v52  ;;  %v5085_v2 = vcombine.high %v1096_v59, %v1100_v60  ;;  %v1152_v51 = vld [vmem:[#allocation8 + $0x1c0] sm:$0xff] }
  0xc7   :  { %1009 = vmatpush1.bf16.msra.mxu0 %v5000_v46  ;;  %v5042_v46 = vcombine.low %v189_v34, %v193_v35  ;;  %v1113_v34 = vld [vmem:[#allocation8 + $0x88] sm:$0xff]  ;;  %v1156_v52 = vld [vmem:[#allocation8 + $0x1e0] sm:$0xff] }
  0xc8   :  { %1010 = vmatprep.subr.bf16.mxu0 %v5009_v48  ;;  %v5051_v48 = vcombine.high %v197_v42, %v201_v43  ;;  %v1117_v35 = vld [vmem:[#allocation8 + $0xa8] sm:$0xff] }
  0xc9   :  { %1050 = vmatpush1.bf16.msra.mxu1 %v5002_v5  ;;  %v1108_v5 = vld [vmem:[#allocation8 + $0x60] sm:$0xff] }
  0xca   :  { %1051 = vmatprep.subr.bf16.mxu1 %v5011_v7  ;;  %v5075_v7 = vcombine.high %v221_v0, %v225_v1  ;;  %v5093_v11 = vcombine.high %v1104_v4, %v1108_v5 }
  0xcb   :  { %1011 = vmatpush1.bf16.msra.mxu0 %v5008_v53  ;;  %v5050_v53 = vcombine.low %v197_v42, %v201_v43  ;;  %v1121_v42 = vld [vmem:[#allocation8 + $0xc8] sm:$0xff] }
  0xcc   :  { %1012 = vmatprep.subr.bf16.mxu0 %v5017_v55  ;;  %v5059_v55 = vcombine.high %v205_v24, %v209_v50  ;;  %v1125_v43 = vld [vmem:[#allocation8 + $0xe8] sm:$0xff] }
  0xcd   :  { %1052 = vmatpush1.bf16.msra.mxu1 %v5010_v13  ;;  %v1116_v13 = vld [vmem:[#allocation8 + $0xa0] sm:$0xff] }
  0xce   :  { %1053 = vmatprep.subr.bf16.mxu1 %v5019_v15  ;;  %v5083_v15 = vcombine.high %v229_v9, %v233_v10  ;;  %v5101_v19 = vcombine.high %v1112_v12, %v1116_v13 }
  0xcf   :  { %1013 = vmatpush1.bf16.msra.mxu0 %v5016_v61  ;;  %v5058_v61 = vcombine.low %v205_v24, %v209_v50  ;;  %v1133_v24 = vld [vmem:[#allocation8 + $0x128] sm:$0xff] }
  0xd0   :  { %1014 = vmatprep.subr.bf16.mxu0 %v5025_v63  ;;  %v5067_v63 = vcombine.high %v213_v57, %v217_v58 }
  0xd1   :  { %1054 = vmatpush1.bf16.msra.mxu1 %v5018_v21  ;;  %v1124_v21 = vld [vmem:[#allocation8 + $0xe0] sm:$0xff] }
  0xd2   :  { %1055 = vmatprep.subr.bf16.mxu1 %v5027_v23  ;;  %v5087_v23 = vcombine.high %v1097_v17, %v1101_v18  ;;  %v5109_v28 = vcombine.high %v1120_v20, %v1124_v21 }
  0xd3   :  { %1015 = vmatpush1.bf16.msra.mxu0 %v5024_v6  ;;  %v5066_v6 = vcombine.low %v213_v57, %v217_v58  ;;  %v1141_v57 = vld [vmem:[#allocation8 + $0x168] sm:$0xff]  ;;  %v5141_v58 = vcombine.high %v1152_v51, %v1156_v52 }
  0xd4   :  { %1016 = vmatprep.subr.bf16.mxu0 %v5033_v8  ;;  %v5084_v8 = vcombine.low %v1096_v59, %v1100_v60  ;;  %v1160_v59 = vld [vmem:[#allocation8 + $0x200] sm:$0xff] }
  0xd5   :  { %1056 = vmatpush1.bf16.msra.mxu1 %v5026_v30  ;;  %v1132_v30 = vld [vmem:[#allocation8 + $0x120] sm:$0xff] }
  0xd6   :  { %1057 = vmatprep.subr.bf16.mxu1 %v5035_v32  ;;  %v5095_v32 = vcombine.high %v1105_v26, %v1109_v27  ;;  %v5117_v36 = vcombine.high %v1128_v29, %v1132_v30  ;;  %v1164_v60 = vld [vmem:[#allocation8 + $0x220] sm:$0xff] }
  0xd7   :  { %1017 = vmatpush1.bf16.msra.mxu0 %v5032_v14  ;;  %v5074_v14 = vcombine.low %v221_v0, %v225_v1  ;;  %v5945_v0 = vld [vmem:[#allocation8 + $0x408] sm:$0xff] }
  0xd8   :  { %1018 = vmatprep.subr.bf16.mxu0 %v5041_v16  ;;  %v5092_v16 = vcombine.low %v1104_v4, %v1108_v5  ;;  %v5947_v4 = vld [vmem:[#allocation8 + $0x428] sm:$0xff] }
  0xd9   :  { %1058 = vmatpush1.bf16.msra.mxu1 %v5034_v38  ;;  %v1140_v38 = vld [vmem:[#allocation8 + $0x160] sm:$0xff]  ;;  %v1145_v5 = vld [vmem:[#allocation8 + $0x188] sm:$0xff] }
  0xda   :  { %1059 = vmatprep.subr.bf16.mxu1 %v5043_v40  ;;  %v5103_v40 = vcombine.high %v1113_v34, %v1117_v35  ;;  %v5125_v44 = vcombine.high %v1136_v37, %v1140_v38 }
  0xdb   :  { %1019 = vmatpush1.bf16.msra.mxu0 %v5040_v22  ;;  %v5082_v22 = vcombine.low %v229_v9, %v233_v10  ;;  %v5214_v9 = vcombine.low %v5945_v0, %v5947_v4  ;;  %v1168_v10 = vld [vmem:[#allocation8 + $0x240] sm:$0xff] }
  0xdc   :  { %1020 = vmatprep.subr.bf16.mxu0 %v5049_v25  ;;  %v5100_v25 = vcombine.low %v1112_v12, %v1116_v13 }
  0xdd   :  { %1060 = vmatpush1.bf16.msra.mxu1 %v5042_v46  ;;  %v1148_v46 = vld [vmem:[#allocation8 + $0x1a0] sm:$0xff] }
  0xde   :  { %1061 = vmatprep.subr.bf16.mxu1 %v5051_v48  ;;  %v5111_v48 = vcombine.high %v1121_v42, %v1125_v43  ;;  %v5133_v50 = vcombine.high %v1144_v45, %v1148_v46 }
  0xdf   :  { %1021 = vmatpush1.bf16.msra.mxu0 %v5048_v31  ;;  %v5086_v31 = vcombine.low %v1097_v17, %v1101_v18  ;;  %v1176_v18 = vld [vmem:[#allocation8 + $0x280] sm:$0xff] }
  0xe0   :  { %1022 = vmatprep.subr.bf16.mxu0 %v5057_v33  ;;  %v5108_v33 = vcombine.low %v1120_v20, %v1124_v21 }
  0xe1   :  { %1062 = vmatpush1.bf16.msra.mxu1 %v5050_v53  ;;  %v5110_v53 = vcombine.low %v1121_v42, %v1125_v43  ;;  %v1200_v43 = vld [vmem:[#allocation8 + $0x340] sm:$0xff] }
  0xe2   :  { %1063 = vmatprep.subr.bf16.mxu1 %v5059_v55  ;;  %v5132_v55 = vcombine.low %v1144_v45, %v1148_v46 }
  0xe3   :  { %1023 = vmatpush1.bf16.msra.mxu0 %v5056_v39  ;;  %v5094_v39 = vcombine.low %v1105_v26, %v1109_v27  ;;  %v1184_v27 = vld [vmem:[#allocation8 + $0x2c0] sm:$0xff] }
  0xe4   :  { %1024 = vmatprep.subr.bf16.mxu0 %v5065_v41  ;;  %v5116_v41 = vcombine.low %v1128_v29, %v1132_v30 }
  0xe5   :  { %1064 = vmatpush1.bf16.msra.mxu1 %v5058_v61 }
  0xe6   :  { %1065 = vmatprep.subr.bf16.mxu1 %v5067_v63  ;;  %v5943_v63 = vld [vmem:[#allocation8 + $0x420] sm:$0xff] }
  0xe7   :  { %1025 = vmatpush1.bf16.msra.mxu0 %v5064_v47  ;;  %v5102_v47 = vcombine.low %v1113_v34, %v1117_v35  ;;  %v1192_v35 = vld [vmem:[#allocation8 + $0x300] sm:$0xff] }
  0xe8   :  { %1026 = vmatprep.subr.bf16.mxu0 %v5073_v49  ;;  %v1129_v49 = vld [vmem:[#allocation8 + $0x108] sm:$0xff] }
  0xe9   :  { %1066 = vmatpush1.bf16.msra.mxu1 %v5066_v6  ;;  %v5118_v61 = vcombine.low %v1129_v49, %v1133_v24  ;;  %v1149_v6 = vld [vmem:[#allocation8 + $0x1a8] sm:$0xff] }
  0xea   :  { %1067 = vmatprep.subr.bf16.mxu1 %v5075_v7  ;;  %v5149_v7 = vcombine.high %v1160_v59, %v1164_v60  ;;  %v5135_v13 = vcombine.high %v1145_v5, %v1149_v6  ;;  %v5134_v20 = vcombine.low %v1145_v5, %v1149_v6 }
  0xeb   :  { %1027 = vmatpush1.bf16.msra.mxu0 %v5072_v54  ;;  %v5119_v54 = vcombine.high %v1129_v49, %v1133_v24  ;;  %v1208_v24 = vld [vmem:[#allocation8 + $0x380] sm:$0xff] }
  0xec   :  { %1028 = vmatprep.subr.bf16.mxu0 %v5081_v56  ;;  %v1137_v56 = vld [vmem:[#allocation8 + $0x148] sm:$0xff] }
  0xed   :  { %1068 = vmatpush1.bf16.msra.mxu1 %v5074_v14  ;;  %v5127_v1 = vcombine.high %v1137_v56, %v1141_v57  ;;  %v5126_v12 = vcombine.low %v1137_v56, %v1141_v57  ;;  %v5148_v14 = vcombine.low %v1160_v59, %v1164_v60  ;;  %v1216_v57 = vld [vmem:[#allocation8 + $0x3c0] sm:$0xff] }
  0xee   :  { %1069 = vmatprep.subr.bf16.mxu1 %v5083_v15  ;;  %v1153_v15 = vld [vmem:[#allocation8 + $0x1c8] sm:$0xff] }
  0xef   :  { %1029 = vmatpush1.bf16.msra.mxu0 %v5080_v62  ;;  %v5941_v62 = vld [vmem:[#allocation8 + $0x400] sm:$0xff] }
  0xf0   :  { %4210 = vmatprep.subr.bf16.mxu0 %v5085_v2  ;;  %v5140_v2 = vcombine.low %v1152_v51, %v1156_v52 }
  0xf1   :  { %1070 = vmatpush1.bf16.msra.mxu1 %v5082_v22 }
  0xf2   :  { %1031 = vmatmul.mubr.bf16.vlgmr.msra.gmra.mrb[4].mxu0 %v5933_v3  ;;  %4374 = vmatprep.subr.bf16.mxu1 %v5087_v23  ;;  %v1161_v23 = vld [vmem:[#allocation8 + $0x208] sm:$0xff] }
  0xf3   :  { %4211 = vmatpush1.bf16.msra.mxu0 %v5084_v8  ;;  %v5212_v8 = vcombine.low %v5941_v62, %v5943_v63 }
  0xf4   :  { %4212 = vmatprep.subr.bf16.mxu0 %v5093_v11  ;;  %1072 = vmatmul.mubr.bf16.vlgmr.msra.gmra.mrb[4].mxu1 %v5933_v3  ;;  %v5124_v3 = vcombine.low %v1136_v37, %v1140_v38  ;;  %v1172_v11 = vld [vmem:[#allocation8 + $0x260] sm:$0xff] }
  0xf5   :  { %4375 = vmatpush1.bf16.msra.mxu1 %v5086_v31  ;;  %v5157_v17 = vcombine.high %v1168_v10, %v1172_v11  ;;  %v5156_v22 = vcombine.low %v1168_v10, %v1172_v11  ;;  %v1209_v11 = vld [vmem:[#allocation8 + $0x388] sm:$0xff] }
  0xf6   :  { %4376 = vmatprep.subr.bf16.mxu1 %v5095_v32  ;;  %v1169_v32 = vld [vmem:[#allocation8 + $0x248] sm:$0xff] }
  0xf7   :  { %4213 = vmatpush1.bf16.msra.mxu0 %v5092_v16  ;;  %v1157_v16 = vld [vmem:[#allocation8 + $0x1e8] sm:$0xff] }
  0xf8   :  { %4214 = vmatprep.subr.bf16.mxu0 %v5101_v19  ;;  %v1180_v19 = vld [vmem:[#allocation8 + $0x2a0] sm:$0xff]  ;;  %v5143_v21 = vcombine.high %v1153_v15, %v1157_v16  ;;  %v5142_v29 = vcombine.low %v1153_v15, %v1157_v16  ;;  %v1217_v16 = vld [vmem:[#allocation8 + $0x3c8] sm:$0xff] }
  0xf9   :  { %4377 = vmatpush1.bf16.msra.mxu1 %v5094_v39  ;;  %v5165_v26 = vcombine.high %v1176_v18, %v1180_v19  ;;  %v5164_v31 = vcombine.low %v1176_v18, %v1180_v19 }
  0xfa   :  { %4378 = vmatprep.subr.bf16.mxu1 %v5103_v40  ;;  %v1177_v40 = vld [vmem:[#allocation8 + $0x288] sm:$0xff] }
  0xfb   :  { %4215 = vmatpush1.bf16.msra.mxu0 %v5100_v25  ;;  %v1165_v25 = vld [vmem:[#allocation8 + $0x228] sm:$0xff] }
  0xfc   :  { %4216 = vmatprep.subr.bf16.mxu0 %v5109_v28  ;;  %v1188_v28 = vld [vmem:[#allocation8 + $0x2e0] sm:$0xff]  ;;  %v5151_v30 = vcombine.high %v1161_v23, %v1165_v25  ;;  %v5150_v37 = vcombine.low %v1161_v23, %v1165_v25 }
  0xfd   :  { %4379 = vmatpush1.bf16.msra.mxu1 %v5102_v47  ;;  %v5173_v34 = vcombine.high %v1184_v27, %v1188_v28  ;;  %v5172_v39 = vcombine.low %v1184_v27, %v1188_v28 }
  0xfe   :  { %4380 = vmatprep.subr.bf16.mxu1 %v5111_v48  ;;  %v1185_v48 = vld [vmem:[#allocation8 + $0x2c8] sm:$0xff] }
  0xff   :  { %4217 = vmatpush1.bf16.msra.mxu0 %v5108_v33  ;;  %v1173_v33 = vld [vmem:[#allocation8 + $0x268] sm:$0xff] }
 0x100   :  { %4218 = vmatprep.subr.bf16.mxu0 %v5117_v36  ;;  %v1196_v36 = vld [vmem:[#allocation8 + $0x320] sm:$0xff]  ;;  %v5159_v38 = vcombine.high %v1169_v32, %v1173_v33  ;;  %v5158_v45 = vcombine.low %v1169_v32, %v1173_v33 }
 0x101   :  { %4381 = vmatpush1.bf16.msra.mxu1 %v5110_v53  ;;  %v5181_v42 = vcombine.high %v1192_v35, %v1196_v36  ;;  %v5180_v47 = vcombine.low %v1192_v35, %v1196_v36 }
 0x102   :  { %4382 = vmatprep.subr.bf16.mxu1 %v5119_v54  ;;  %v1193_v54 = vld [vmem:[#allocation8 + $0x308] sm:$0xff] }
 0x103   :  { %4219 = vmatpush1.bf16.msra.mxu0 %v5116_v41  ;;  %v1181_v41 = vld [vmem:[#allocation8 + $0x2a8] sm:$0xff] }
 0x104   :  { %4220 = vmatprep.subr.bf16.mxu0 %v5125_v44  ;;  %v1204_v44 = vld [vmem:[#allocation8 + $0x360] sm:$0xff]  ;;  %v5167_v46 = vcombine.high %v1177_v40, %v1181_v41  ;;  %v5166_v51 = vcombine.low %v1177_v40, %v1181_v41  ;;  %v1233_v40 = vld [vmem:[#allocation8 + $0x448] sm:$0xff] }
 0x105   :  { %4383 = vmatpush1.bf16.msra.mxu1 %v5118_v61  ;;  %v5189_v49 = vcombine.high %v1200_v43, %v1204_v44  ;;  %v5188_v53 = vcombine.low %v1200_v43, %v1204_v44  ;;  %v1237_v41 = vld [vmem:[#allocation8 + $0x468] sm:$0xff] }
 0x106   :  { %4384 = vmatprep.subr.bf16.mxu1 %v5127_v1  ;;  %v1201_v1 = vld [vmem:[#allocation8 + $0x348] sm:$0xff] }
 0x107   :  { %4221 = vmatpush1.bf16.msra.mxu0 %v5124_v3  ;;  %v1189_v3 = vld [vmem:[#allocation8 + $0x2e8] sm:$0xff] }
 0x108   :  { %4222 = vmatprep.subr.bf16.mxu0 %v5133_v50  ;;  %v1212_v50 = vld [vmem:[#allocation8 + $0x3a0] sm:$0xff]  ;;  %v5175_v52 = vcombine.high %v1185_v48, %v1189_v3  ;;  %v5174_v59 = vcombine.low %v1185_v48, %v1189_v3  ;;  %v1241_v3 = vld [vmem:[#allocation8 + $0x488] sm:$0xff] }
 0x109   :  { %4385 = vmatpush1.bf16.msra.mxu1 %v5126_v12  ;;  %v5197_v56 = vcombine.high %v1208_v24, %v1212_v50  ;;  %v5196_v61 = vcombine.low %v1208_v24, %v1212_v50  ;;  %v1213_v12 = vld [vmem:[#allocation8 + $0x3a8] sm:$0xff]  ;;  %v1244_v48 = vld [vmem:[#allocation8 + $0x4a0] sm:$0xff] }
 0x10a   :  { %4386 = vmatprep.subr.bf16.mxu1 %v5135_v13  ;;  %v5213_v13 = vcombine.high %v5941_v62, %v5943_v63  ;;  %v5199_v15 = vcombine.high %v1209_v11, %v1213_v12  ;;  %v5198_v18 = vcombine.low %v1209_v11, %v1213_v12 }
 0x10b   :  { %4223 = vmatpush1.bf16.msra.mxu0 %v5132_v55  ;;  %v1197_v55 = vld [vmem:[#allocation8 + $0x328] sm:$0xff] }
 0x10c   :  { %4224 = vmatprep.subr.bf16.mxu0 %v5141_v58  ;;  %v1220_v58 = vld [vmem:[#allocation8 + $0x3e0] sm:$0xff]  ;;  %v5183_v60 = vcombine.high %v1193_v54, %v1197_v55  ;;  %v5182_v6 = vcombine.low %v1193_v54, %v1197_v55 }
 0x10d   :  { %4387 = vmatpush1.bf16.msra.mxu1 %v5134_v20  ;;  %v5205_v5 = vcombine.high %v1216_v57, %v1220_v58  ;;  %v5204_v10 = vcombine.low %v1216_v57, %v1220_v58  ;;  %v1248_v54 = vld [vmem:[#allocation8 + $0x4c0] sm:$0xff]  ;;  %v1249_v57 = vld [vmem:[#allocation8 + $0x4c8] sm:$0xff] }
 0x10e   :  { %4388 = vmatprep.subr.bf16.mxu1 %v5143_v21  ;;  %v5215_v21 = vcombine.high %v5945_v0, %v5947_v4  ;;  %v1253_v58 = vld [vmem:[#allocation8 + $0x4e8] sm:$0xff] }
 0x10f   :  { %4225 = vmatpush1.bf16.msra.mxu0 %v5140_v2  ;;  %v1205_v2 = vld [vmem:[#allocation8 + $0x368] sm:$0xff]  ;;  %v5238_v11 = vcombine.low %v1249_v57, %v1253_v58 }
 0x110   :  { %4226 = vmatprep.subr.bf16.mxu0 %v5149_v7  ;;  %v5191_v7 = vcombine.high %v1201_v1, %v1205_v2 }
 0x111   :  { %4389 = vmatpush1.bf16.msra.mxu1 %v5142_v29 }
 0x112   :  { %4390 = vmatprep.subr.bf16.mxu1 %v5151_v30 }
 0x113   :  { %4227 = vmatpush1.bf16.msra.mxu0 %v5148_v14  ;;  %v5190_v14 = vcombine.low %v1201_v1, %v1205_v2  ;;  %v1260_v2 = vld [vmem:[#allocation8 + $0x520] sm:$0xff] }
 0x114   :  { %4228 = vmatprep.subr.bf16.mxu0 %v5157_v17  ;;  %v1221_v17 = vld [vmem:[#allocation8 + $0x3e8] sm:$0xff] }
 0x115   :  { %4391 = vmatpush1.bf16.msra.mxu1 %v5150_v37  ;;  %v5207_v19 = vcombine.high %v1217_v16, %v1221_v17  ;;  %v5206_v20 = vcombine.low %v1217_v16, %v1221_v17  ;;  %v1232_v37 = vld [vmem:[#allocation8 + $0x440] sm:$0xff]  ;;  %v1265_v16 = vld [vmem:[#allocation8 + $0x548] sm:$0xff] }
 0x116   :  { %4392 = vmatprep.subr.bf16.mxu1 %v5159_v38  ;;  %v1269_v17 = vld [vmem:[#allocation8 + $0x568] sm:$0xff] }
 0x117   :  { %4229 = vmatpush1.bf16.msra.mxu0 %v5156_v22  ;;  %v236_v22 = vlaneseq }
 0x118   :  { %4230 = vmatprep.subr.bf16.mxu0 %v5165_v26  ;;  %v5962_v26 = vld [vmem:[#allocation7] sm:$0xff] }
 0x119   :  { %4393 = vmatpush1.bf16.msra.mxu1 %v5158_v45  ;;  %v5957_v23 = vshrl.u32 %v236_v22, 7  ;;  %v1272_v22 = vld [vmem:[#allocation8 + $0x580] sm:$0xff] }
 0x11a   :  { %4394 = vmatprep.subr.bf16.mxu1 %v5167_v46  ;;  %v5223_v46 = vcombine.high %v1233_v40, %v1237_v41 }
 0x11b   :  { %4231 = vmatpush1.bf16.msra.mxu0 %v5164_v31  ;;  %v5960_v25 = vsub.s32 0, %v5957_v23  ;;  %v5965_v27 = vsub.s32 1, %v5957_v23 }
 0x11c   :  { %4232 = vmatprep.subr.bf16.mxu0 %v5173_v34 }
 0x11d   :  { %4395 = vmatpush1.bf16.msra.mxu1 %v5166_v51  ;;  %v239_v28 = vrot.slane %v5962_v26, %v5960_v25  ;;  %v243_v29 = vrot.slane %v5962_v26, %v5965_v27  ;;  %v5222_v51 = vcombine.low %v1233_v40, %v1237_v41 }
 0x11e   :  { %4396 = vmatprep.subr.bf16.mxu1 %v5175_v52 }
 0x11f   :  { %4233 = vmatpush1.bf16.msra.mxu0 %v5172_v39  ;;  %v1236_v39 = vld [vmem:[#allocation8 + $0x460] sm:$0xff] }
 0x120   :  { %4234 = vmatprep.subr.bf16.mxu0 %v5181_v42  ;;  %v5972_v42 = vsub.s32 3, %v5957_v23  ;;  %v5221_v45 = vcombine.high %v1232_v37, %v1236_v39  ;;  %v5220_v50 = vcombine.low %v1232_v37, %v1236_v39  ;;  %v1281_v37 = vld [vmem:[#allocation8 + $0x5c8] sm:$0xff] }
 0x121   :  { %4397 = vmatpush1.bf16.msra.mxu1 %v5174_v59 }
 0x122   :  { %4398 = vmatprep.subr.bf16.mxu1 %v5183_v60  ;;  %v251_v24 = vrot.slane %v5962_v26, %v5972_v42 }
 0x123   :  { %4235 = vmatpush1.bf16.msra.mxu0 %v5180_v47  ;;  %v1240_v47 = vld [vmem:[#allocation8 + $0x480] sm:$0xff] }
 0x124   :  { %4236 = vmatprep.subr.bf16.mxu0 %v5189_v49  ;;  %v1245_v49 = vld [vmem:[#allocation8 + $0x4a8] sm:$0xff]  ;;  %v5229_v52 = vcombine.high %v1240_v47, %v1244_v48  ;;  %v5228_v63 = vcombine.low %v1240_v47, %v1244_v48  ;;  %v1292_v47 = vld [vmem:[#allocation8 + $0x620] sm:$0xff] }
 0x125   :  { %4399 = vmatpush1.bf16.msra.mxu1 %v5182_v6  ;;  %v5230_v0 = vcombine.low %v1241_v3, %v1245_v49  ;;  %v1261_v6 = vld [vmem:[#allocation8 + $0x528] sm:$0xff] }
 0x126   :  { %4400 = vmatprep.subr.bf16.mxu1 %v5191_v7  ;;  %v1289_v48 = vld [vmem:[#allocation8 + $0x608] sm:$0xff] }
 0x127   :  { %4237 = vmatpush1.bf16.msra.mxu0 %v5188_v53  ;;  %v5231_v53 = vcombine.high %v1241_v3, %v1245_v49  ;;  %v1293_v3 = vld [vmem:[#allocation8 + $0x628] sm:$0xff] }
 0x128   :  { %4238 = vmatprep.subr.bf16.mxu0 %v5197_v56  ;;  %v1252_v56 = vld [vmem:[#allocation8 + $0x4e0] sm:$0xff] }
 0x129   :  { %4401 = vmatpush1.bf16.msra.mxu1 %v5190_v14  ;;  %v1264_v14 = vld [vmem:[#allocation8 + $0x540] sm:$0xff] }
 0x12a   :  { %4402 = vmatprep.subr.bf16.mxu1 %v5199_v15  ;;  %v1268_v15 = vld [vmem:[#allocation8 + $0x560] sm:$0xff] }
 0x12b   :  { %4239 = vmatpush1.bf16.msra.mxu0 %v5196_v61  ;;  %v1256_v61 = vld [vmem:[#allocation8 + $0x500] sm:$0xff] }
 0x12c   :  { %4240 = vmatprep.subr.bf16.mxu0 %v5205_v5  ;;  %v1257_v5 = vld [vmem:[#allocation8 + $0x508] sm:$0xff]  ;;  %v5245_v12 = vcombine.high %v1256_v61, %v1260_v2 }
 0x12d   :  { %4403 = vmatpush1.bf16.msra.mxu1 %v5198_v18  ;;  %v5244_v18 = vcombine.low %v1256_v61, %v1260_v2  ;;  %v1312_v2 = vld [vmem:[#allocation8 + $0x6c0] sm:$0xff] }
 0x12e   :  { %4404 = vmatprep.subr.bf16.mxu1 %v5207_v19  ;;  %v5246_v19 = vcombine.low %v1257_v5, %v1261_v6 }
 0x12f   :  { %4241 = vmatpush1.bf16.msra.mxu0 %v5204_v10  ;;  %v5236_v10 = vcombine.low %v1248_v54, %v1252_v56 }
 0x130   :  { %4251 = vmatprep.subr.bf16.mxu0 %v5213_v13  ;;  %v5247_v13 = vcombine.high %v1257_v5, %v1261_v6  ;;  %v1316_v5 = vld [vmem:[#allocation8 + $0x6e0] sm:$0xff]  ;;  %v1313_v6 = vld [vmem:[#allocation8 + $0x6c8] sm:$0xff] }
 0x131   :  { %4405 = vmatpush1.bf16.msra.mxu1 %v5206_v20  ;;  %v5253_v20 = vcombine.high %v1264_v14, %v1268_v15 }
 0x132   :  { %4415 = vmatprep.subr.bf16.mxu1 %v5215_v21  ;;  %v5255_v21 = vcombine.high %v1265_v16, %v1269_v17 }
 0x185   :  { %v950_v30 = vpop.f32.mrb[0].mxu0 }
 0x186   :  { %v951_v31 = vadd.f32 %v950_v30, %v239_v28  ;;  %v952_v32 = vpop.f32.mrb[1].mxu0  ;;  %v1276_v28 = vld [vmem:[#allocation8 + $0x5a0] sm:$0xff]  ;;  %v1277_v30 = vld [vmem:[#allocation8 + $0x5a8] sm:$0xff] }
 0x187   :  { %v953_v33 = vadd.f32 %v952_v32, %v243_v29  ;;  %v954_v34 = vpop.f32.mrb[2].mxu0  ;;  %v5990_v55 = vpop.f32.mrb[0].mxu1  ;;  %v1273_v29 = vld [vmem:[#allocation8 + $0x588] sm:$0xff]  ;;  %v5254_v32 = vcombine.low %v1265_v16, %v1269_v17  ;;  %v5260_v39 = vcombine.low %v1272_v22, %v1276_v28  ;;  %v1324_v16 = vld [vmem:[#allocation8 + $0x720] sm:$0xff] }
 0x188   :  { %v1080_v35 = vmax.f32 %v951_v31, 0.0  ;;  %v955_v36 = vpop.f32.mrb[3].mxu0  ;;  %v993_v59 = vpop.f32.mrb[1].mxu1  ;;  %v5252_v31 = vcombine.low %v1264_v14, %v1268_v15  ;;  %v5263_v34 = vcombine.high %v1273_v29, %v1277_v30  ;;  %v5262_v40 = vcombine.low %v1273_v29, %v1277_v30  ;;  %v1320_v15 = vld [vmem:[#allocation8 + $0x700] sm:$0xff]  ;;  %v1321_v17 = vld [vmem:[#allocation8 + $0x708] sm:$0xff] }
 0x189   :  { %v1081_v38 = vmax.f32 %v953_v33, 0.0  ;;  %v994_v60 = vadd.f32 %v993_v59, %v251_v24  ;;  %v995_v62 = vpop.f32.mrb[2].mxu1  ;;  %v5261_v33 = vcombine.high %v1272_v22, %v1276_v28  ;;  %v1284_v36 = vld [vmem:[#allocation8 + $0x5e0] sm:$0xff]  ;;  %v1329_v30 = vld [vmem:[#allocation8 + $0x748] sm:$0xff] }
 0x18a   :  { %v5976_v44 = vpack.c.bf16 %v1080_v35, %v1080_v35  ;;  %v996_v4 = vpop.f32.mrb[3].mxu1  ;;  %v1280_v35 = vld [vmem:[#allocation8 + $0x5c0] sm:$0xff] }
 0x18b   :  { %v5974_v43 = vpack.c.bf16 %v1081_v38, %v1081_v38  ;;  %v1083_v1 = vmax.f32 %v994_v60, 0.0  ;;  %v1285_v38 = vld [vmem:[#allocation8 + $0x5e8] sm:$0xff]  ;;  %v5269_v41 = vcombine.high %v1280_v35, %v1284_v36  ;;  %v5268_v49 = vcombine.low %v1280_v35, %v1284_v36  ;;  %v1304_v62 = vld [vmem:[#allocation8 + $0x680] sm:$0xff] }
 0x18c   :  { %v5270_v24 = vcombine.low %v1281_v37, %v1285_v38  ;;  %v1309_v4 = vld [vmem:[#allocation8 + $0x6a8] sm:$0xff]  ;;  %v1328_v28 = vld [vmem:[#allocation8 + $0x740] sm:$0xff] }
 0x18d   :  { %4242 = vmatprep.mubr.bf16.mxu0 %v5974_v43  ;;  %4406 = vmatprep.mubr.bf16.mxu1 %v5974_v43  ;;  %v5992_v7 = vpack.c.bf16 %v1083_v1, %v1083_v1  ;;  %v1332_v29 = vld [vmem:[#allocation8 + $0x760] sm:$0xff] }
 0x18e   :  { %4243 = vmatmul.mubr.bf16.vlgmr.msra.gmra.mrb[8].mxu0 %v5976_v44  ;;  %4407 = vmatmul.mubr.bf16.vlgmr.msra.gmra.mrb[8].mxu1 %v5976_v44  ;;  %v5317_v35 = vcombine.high %v1328_v28, %v1332_v29 }
 0x18f   :  { %4252 = vmatpush1.bf16.msra.mxu0 %v5212_v8  ;;  %4416 = vmatpush1.bf16.msra.mxu1 %v5214_v9  ;;  %v5237_v8 = vcombine.high %v1248_v54, %v1252_v56  ;;  %v5239_v9 = vcombine.high %v1249_v57, %v1253_v58  ;;  %v1297_v54 = vld [vmem:[#allocation8 + $0x648] sm:$0xff]  ;;  %v5278_v58 = vcombine.low %v1289_v48, %v1293_v3 }
 0x190   :  { %4253 = vmatprep.subr.bf16.mxu0 %v5221_v45  ;;  %4417 = vmatprep.subr.bf16.mxu1 %v5223_v46  ;;  %v5271_v45 = vcombine.high %v1281_v37, %v1285_v38  ;;  %v1288_v46 = vld [vmem:[#allocation8 + $0x600] sm:$0xff]  ;;  %v1301_v56 = vld [vmem:[#allocation8 + $0x668] sm:$0xff] }
 0x191   :  { %4283 = vmatprep.mubr.bf16.mxu0 %v5992_v7  ;;  %4447 = vmatprep.mubr.bf16.mxu1 %v5992_v7  ;;  %v5276_v57 = vcombine.low %v1288_v46, %v1292_v47  ;;  %v5287_v60 = vcombine.high %v1297_v54, %v1301_v56  ;;  %v1336_v37 = vld [vmem:[#allocation8 + $0x780] sm:$0xff] }
 0x192   :  { %v1340_v38 = vld [vmem:[#allocation8 + $0x7a0] sm:$0xff] }
 0x193   :  { %4254 = vmatpush1.bf16.msra.mxu0 %v5220_v50  ;;  %4418 = vmatpush1.bf16.msra.mxu1 %v5222_v51  ;;  %v5277_v50 = vcombine.high %v1288_v46, %v1292_v47  ;;  %v5279_v51 = vcombine.high %v1289_v48, %v1293_v3  ;;  %v6002_v47 = vsub.s32 5, %v5957_v23  ;;  %v5325_v48 = vcombine.high %v1336_v37, %v1340_v38 }
 0x194   :  { %4255 = vmatprep.subr.bf16.mxu0 %v5229_v52  ;;  %4419 = vmatprep.subr.bf16.mxu1 %v5231_v53  ;;  %v1296_v52 = vld [vmem:[#allocation8 + $0x640] sm:$0xff] }
 0x195   :  { %v1300_v53 = vld [vmem:[#allocation8 + $0x660] sm:$0xff] }
 0x196   :  { %v5285_v59 = vcombine.high %v1296_v52, %v1300_v53 }
 0x197   :  { %4256 = vmatpush1.bf16.msra.mxu0 %v5228_v63  ;;  %4420 = vmatpush1.bf16.msra.mxu1 %v5230_v0  ;;  %v1308_v63 = vld [vmem:[#allocation8 + $0x6a0] sm:$0xff]  ;;  %v1305_v0 = vld [vmem:[#allocation8 + $0x688] sm:$0xff] }
 0x198   :  { %4257 = vmatprep.subr.bf16.mxu0 %v5237_v8  ;;  %4421 = vmatprep.subr.bf16.mxu1 %v5239_v9  ;;  %v5284_v8 = vcombine.low %v1296_v52, %v1300_v53  ;;  %v5286_v9 = vcombine.low %v1297_v54, %v1301_v56  ;;  %v5293_v61 = vcombine.high %v1304_v62, %v1308_v63 }
 0x199   :  { %v5295_v1 = vcombine.high %v1305_v0, %v1309_v4  ;;  %v5324_v53 = vcombine.low %v1336_v37, %v1340_v38  ;;  %v259_v56 = vrot.slane %v5962_v26, %v6002_v47  ;;  %v1380_v37 = vld [vmem:[#allocation8 + $0x8e0] sm:$0xff]  ;;  %v1377_v38 = vld [vmem:[#allocation8 + $0x8c8] sm:$0xff] }
 0x19b   :  { %4258 = vmatpush1.bf16.msra.mxu0 %v5236_v10  ;;  %4422 = vmatpush1.bf16.msra.mxu1 %v5238_v11  ;;  %v1317_v10 = vld [vmem:[#allocation8 + $0x6e8] sm:$0xff]  ;;  %v5292_v11 = vcombine.low %v1304_v62, %v1308_v63 }
 0x19c   :  { %4259 = vmatprep.subr.bf16.mxu0 %v5245_v12  ;;  %4423 = vmatprep.subr.bf16.mxu1 %v5247_v13  ;;  %v5294_v12 = vcombine.low %v1305_v0, %v1309_v4  ;;  %v5301_v13 = vcombine.high %v1312_v2, %v1316_v5  ;;  %v5303_v14 = vcombine.high %v1313_v6, %v1317_v10  ;;  %v1353_v62 = vld [vmem:[#allocation8 + $0x808] sm:$0xff] }
 0x19d   :  { %v1357_v63 = vld [vmem:[#allocation8 + $0x828] sm:$0xff] }
 0x19f   :  { %4260 = vmatpush1.bf16.msra.mxu0 %v5244_v18  ;;  %4424 = vmatpush1.bf16.msra.mxu1 %v5246_v19  ;;  %v1325_v18 = vld [vmem:[#allocation8 + $0x728] sm:$0xff]  ;;  %v5300_v19 = vcombine.low %v1312_v2, %v1316_v5  ;;  %v5343_v5 = vcombine.high %v1353_v62, %v1357_v63 }
 0x1a0   :  { %4261 = vmatprep.subr.bf16.mxu0 %v5253_v20  ;;  %4425 = vmatprep.subr.bf16.mxu1 %v5255_v21  ;;  %v5302_v20 = vcombine.low %v1313_v6, %v1317_v10  ;;  %v5309_v21 = vcombine.high %v1320_v15, %v1324_v16  ;;  %v5311_v22 = vcombine.high %v1321_v17, %v1325_v18  ;;  %v1360_v6 = vld [vmem:[#allocation8 + $0x840] sm:$0xff] }
 0x1a3   :  { %4262 = vmatpush1.bf16.msra.mxu0 %v5252_v31  ;;  %4426 = vmatpush1.bf16.msra.mxu1 %v5254_v32  ;;  %v1333_v31 = vld [vmem:[#allocation8 + $0x768] sm:$0xff]  ;;  %v5997_v32 = vsub.s32 2, %v5957_v23 }
 0x1a4   :  { %4263 = vmatprep.subr.bf16.mxu0 %v5261_v33  ;;  %4427 = vmatprep.subr.bf16.mxu1 %v5263_v34  ;;  %v5308_v33 = vcombine.low %v1320_v15, %v1324_v16  ;;  %v5310_v34 = vcombine.low %v1321_v17, %v1325_v18  ;;  %v5319_v36 = vcombine.high %v1329_v30, %v1333_v31 }
 0x1a5   :  { %v5318_v46 = vcombine.low %v1329_v30, %v1333_v31  ;;  %v5342_v17 = vcombine.low %v1353_v62, %v1357_v63  ;;  %v1397_v62 = vld [vmem:[#allocation8 + $0x968] sm:$0xff] }
 0x1a7   :  { %4264 = vmatpush1.bf16.msra.mxu0 %v5260_v39  ;;  %4428 = vmatpush1.bf16.msra.mxu1 %v5262_v40  ;;  %v1337_v39 = vld [vmem:[#allocation8 + $0x788] sm:$0xff] }
 0x1a8   :  { %4265 = vmatprep.subr.bf16.mxu0 %v5269_v41  ;;  %4429 = vmatprep.subr.bf16.mxu1 %v5271_v45  ;;  %v1341_v40 = vld [vmem:[#allocation8 + $0x7a8] sm:$0xff]  ;;  %v247_v41 = vrot.slane %v5962_v26, %v5997_v32  ;;  %v5316_v45 = vcombine.low %v1328_v28, %v1332_v29 }
 0x1a9   :  { %v5327_v3 = vcombine.high %v1337_v39, %v1341_v40  ;;  %v5326_v54 = vcombine.low %v1337_v39, %v1341_v40  ;;  %v1373_v28 = vld [vmem:[#allocation8 + $0x8a8] sm:$0xff] }
 0x1aa   :  { %v992_v52 = vadd.f32 %v5990_v55, %v247_v41  ;;  %v1381_v39 = vld [vmem:[#allocation8 + $0x8e8] sm:$0xff] }
 0x1ab   :  { %4266 = vmatpush1.bf16.msra.mxu0 %v5268_v49  ;;  %4430 = vmatpush1.bf16.msra.mxu1 %v5270_v24  ;;  %v1344_v49 = vld [vmem:[#allocation8 + $0x7c0] sm:$0xff] }
 0x1ac   :  { %4267 = vmatprep.subr.bf16.mxu0 %v5277_v50  ;;  %4431 = vmatprep.subr.bf16.mxu1 %v5279_v51  ;;  %v1348_v24 = vld [vmem:[#allocation8 + $0x7e0] sm:$0xff]  ;;  %v1345_v50 = vld [vmem:[#allocation8 + $0x7c8] sm:$0xff]  ;;  %v1082_v4 = vmax.f32 %v992_v52, 0.0 }
 0x1ad   :  { %v1349_v51 = vld [vmem:[#allocation8 + $0x7e8] sm:$0xff]  ;;  %v5332_v55 = vcombine.low %v1344_v49, %v1348_v24 }
 0x1ae   :  { %v6009_v15 = vpack.c.bf16 %v1082_v4, %v1082_v4  ;;  %v1389_v52 = vld [vmem:[#allocation8 + $0x928] sm:$0xff] }
 0x1af   :  { %4268 = vmatpush1.bf16.msra.mxu0 %v5276_v57  ;;  %4432 = vmatpush1.bf16.msra.mxu1 %v5278_v58  ;;  %v5333_v57 = vcombine.high %v1344_v49, %v1348_v24  ;;  %v5335_v58 = vcombine.high %v1345_v50, %v1349_v51  ;;  %v5367_v49 = vcombine.high %v1377_v38, %v1381_v39  ;;  %v1384_v24 = vld [vmem:[#allocation8 + $0x900] sm:$0xff] }
 0x1b0   :  { %4269 = vmatprep.subr.bf16.mxu0 %v5285_v59  ;;  %4433 = vmatprep.subr.bf16.mxu1 %v5287_v60  ;;  %v1352_v59 = vld [vmem:[#allocation8 + $0x800] sm:$0xff] }
 0x1b1   :  { %v1356_v60 = vld [vmem:[#allocation8 + $0x820] sm:$0xff] }
 0x1b2   :  { %v5341_v2 = vcombine.high %v1352_v59, %v1356_v60  ;;  %v5340_v16 = vcombine.low %v1352_v59, %v1356_v60  ;;  %v1396_v59 = vld [vmem:[#allocation8 + $0x960] sm:$0xff]  ;;  %v1393_v60 = vld [vmem:[#allocation8 + $0x948] sm:$0xff] }
 0x1b3   :  { %4270 = vmatpush1.bf16.msra.mxu0 %v5284_v8  ;;  %4434 = vmatpush1.bf16.msra.mxu1 %v5286_v9  ;;  %v5334_v9 = vcombine.low %v1345_v50, %v1349_v51  ;;  %v1388_v50 = vld [vmem:[#allocation8 + $0x920] sm:$0xff]  ;;  %v1385_v51 = vld [vmem:[#allocation8 + $0x908] sm:$0xff] }
 0x1b4   :  { %4271 = vmatprep.subr.bf16.mxu0 %v5293_v61  ;;  %4435 = vmatprep.subr.bf16.mxu1 %v5295_v1  ;;  %v5372_v63 = vcombine.low %v1384_v24, %v1388_v50  ;;  %v5374_v4 = vcombine.low %v1385_v51, %v1389_v52 }
 0x1b7   :  { %4272 = vmatpush1.bf16.msra.mxu0 %v5292_v11  ;;  %4436 = vmatpush1.bf16.msra.mxu1 %v5294_v12  ;;  %v1364_v11 = vld [vmem:[#allocation8 + $0x860] sm:$0xff]  ;;  %v1361_v12 = vld [vmem:[#allocation8 + $0x848] sm:$0xff] }
 0x1b8   :  { %4273 = vmatprep.subr.bf16.mxu0 %v5301_v13  ;;  %4437 = vmatprep.subr.bf16.mxu1 %v5303_v14  ;;  %v1365_v13 = vld [vmem:[#allocation8 + $0x868] sm:$0xff]  ;;  %v5349_v18 = vcombine.high %v1360_v6, %v1364_v11  ;;  %v5348_v30 = vcombine.low %v1360_v6, %v1364_v11  ;;  %v5382_v6 = vcombine.low %v1393_v60, %v1397_v62 }
 0x1b9   :  { %v5350_v31 = vcombine.low %v1361_v12, %v1365_v13 }
 0x1bb   :  { %4274 = vmatpush1.bf16.msra.mxu0 %v5300_v19  ;;  %4438 = vmatpush1.bf16.msra.mxu1 %v5302_v20  ;;  %v5351_v19 = vcombine.high %v1361_v12, %v1365_v13  ;;  %v1368_v20 = vld [vmem:[#allocation8 + $0x880] sm:$0xff] }
 0x1bc   :  { %4275 = vmatprep.subr.bf16.mxu0 %v5309_v21  ;;  %4439 = vmatprep.subr.bf16.mxu1 %v5311_v22  ;;  %v1372_v21 = vld [vmem:[#allocation8 + $0x8a0] sm:$0xff]  ;;  %v1369_v22 = vld [vmem:[#allocation8 + $0x888] sm:$0xff] }
 0x1bd   :  { %v1408_v12 = vld [vmem:[#allocation8 + $0x9c0] sm:$0xff] }
 0x1be   :  { %v1412_v13 = vld [vmem:[#allocation8 + $0x9e0] sm:$0xff] }
 0x1bf   :  { %4276 = vmatpush1.bf16.msra.mxu0 %v5308_v33  ;;  %4440 = vmatpush1.bf16.msra.mxu1 %v5310_v34  ;;  %v5357_v33 = vcombine.high %v1368_v20, %v1372_v21  ;;  %v5359_v34 = vcombine.high %v1369_v22, %v1373_v28 }
 0x1c0   :  { %4277 = vmatprep.subr.bf16.mxu0 %v5317_v35  ;;  %4441 = vmatprep.subr.bf16.mxu1 %v5319_v36  ;;  %v1376_v35 = vld [vmem:[#allocation8 + $0x8c0] sm:$0xff] }
 0x1c3   :  { %4278 = vmatpush1.bf16.msra.mxu0 %v5316_v45  ;;  %4442 = vmatpush1.bf16.msra.mxu1 %v5318_v46  ;;  %v5356_v45 = vcombine.low %v1368_v20, %v1372_v21  ;;  %v5358_v46 = vcombine.low %v1369_v22, %v1373_v28  ;;  %v1416_v21 = vld [vmem:[#allocation8 + $0xa00] sm:$0xff]  ;;  %v1417_v28 = vld [vmem:[#allocation8 + $0xa08] sm:$0xff] }
 0x1c4   :  { %4279 = vmatprep.subr.bf16.mxu0 %v5325_v48  ;;  %4443 = vmatprep.subr.bf16.mxu1 %v5327_v3  ;;  %v5365_v3 = vcombine.high %v1376_v35, %v1380_v37  ;;  %v1420_v22 = vld [vmem:[#allocation8 + $0xa20] sm:$0xff] }
 0x1c5   :  { %v6007_v0 = vpop.f32.mrb[4].mxu0 }
 0x1c6   :  { %v1034_v8 = vpop.f32.mrb[5].mxu0 }
 0x1c7   :  { %4280 = vmatpush1.bf16.msra.mxu0 %v5324_v53  ;;  %4444 = vmatpush1.bf16.msra.mxu1 %v5326_v54  ;;  %v1035_v61 = vadd.f32 %v1034_v8, %v259_v56  ;;  %v1036_v1 = vpop.f32.mrb[6].mxu0  ;;  %v6015_v36 = vpop.f32.mrb[4].mxu1  ;;  %v5364_v53 = vcombine.low %v1376_v35, %v1380_v37  ;;  %v5366_v54 = vcombine.low %v1377_v38, %v1381_v39  ;;  %v1424_v37 = vld [vmem:[#allocation8 + $0xa40] sm:$0xff]  ;;  %v1425_v39 = vld [vmem:[#allocation8 + $0xa48] sm:$0xff] }
 0x1c8   :  { %4281 = vmatprep.subr.bf16.mxu0 %v5333_v57  ;;  %4445 = vmatprep.subr.bf16.mxu1 %v5335_v58  ;;  %v1037_v10 = vpop.f32.mrb[7].mxu0  ;;  %v6019_v40 = vpop.f32.mrb[5].mxu1  ;;  %v5373_v56 = vcombine.high %v1384_v24, %v1388_v50  ;;  %v5375_v57 = vcombine.high %v1385_v51, %v1389_v52  ;;  %v1392_v58 = vld [vmem:[#allocation8 + $0x940] sm:$0xff]  ;;  %v1401_v1 = vld [vmem:[#allocation8 + $0x988] sm:$0xff] }
 0x1c9   :  { %v1085_v14 = vmax.f32 %v1035_v61, 0.0  ;;  %v1077_v41 = vpop.f32.mrb[6].mxu1  ;;  %v5381_v8 = vcombine.high %v1392_v58, %v1396_v59  ;;  %v1404_v61 = vld [vmem:[#allocation8 + $0x9a0] sm:$0xff]  ;;  %v1433_v50 = vld [vmem:[#allocation8 + $0xa88] sm:$0xff] }
 0x1ca   :  { %v1078_v48 = vpop.f32.mrb[7].mxu1  ;;  %v1428_v38 = vld [vmem:[#allocation8 + $0xa60] sm:$0xff]  ;;  %v1429_v41 = vld [vmem:[#allocation8 + $0xa68] sm:$0xff] }
 0x1cb   :  { %4282 = vmatpush1.bf16.msra.mxu0 %v5332_v55  ;;  %4446 = vmatpush1.bf16.msra.mxu1 %v5334_v9  ;;  %v6011_v29 = vpack.c.bf16 %v1085_v14, %v1085_v14  ;;  %v5383_v55 = vcombine.high %v1393_v60, %v1397_v62  ;;  %v1400_v9 = vld [vmem:[#allocation8 + $0x980] sm:$0xff]  ;;  %v1409_v14 = vld [vmem:[#allocation8 + $0x9c8] sm:$0xff]  ;;  %v5413_v48 = vcombine.high %v1424_v37, %v1428_v38 }
 0x1cc   :  { %4292 = vmatprep.subr.bf16.mxu0 %v5341_v2  ;;  %4456 = vmatprep.subr.bf16.mxu1 %v5343_v5  ;;  %v1405_v2 = vld [vmem:[#allocation8 + $0x9a8] sm:$0xff]  ;;  %v5380_v5 = vcombine.low %v1392_v58, %v1396_v59  ;;  %v5389_v10 = vcombine.high %v1400_v9, %v1404_v61  ;;  %v1436_v24 = vld [vmem:[#allocation8 + $0xaa0] sm:$0xff]  ;;  %v5412_v52 = vcombine.low %v1424_v37, %v1428_v38 }
 0x1cd   :  { %v5391_v11 = vcombine.high %v1401_v1, %v1405_v2  ;;  %v1437_v51 = vld [vmem:[#allocation8 + $0xaa8] sm:$0xff]  ;;  %v1444_v58 = vld [vmem:[#allocation8 + $0xae0] sm:$0xff] }
 0x1ce   :  { %4284 = vmatmul.mubr.bf16.vlgmr.msra.gmra.mrb[8].mxu0 %v6009_v15  ;;  %4448 = vmatmul.mubr.bf16.vlgmr.msra.gmra.mrb[8].mxu1 %v6009_v15  ;;  %v1441_v59 = vld [vmem:[#allocation8 + $0xac8] sm:$0xff] }
 0x1cf   :  { %4293 = vmatpush1.bf16.msra.mxu0 %v5340_v16  ;;  %4457 = vmatpush1.bf16.msra.mxu1 %v5342_v17  ;;  %v1413_v16 = vld [vmem:[#allocation8 + $0x9e8] sm:$0xff]  ;;  %v5388_v17 = vcombine.low %v1400_v9, %v1404_v61  ;;  %v1452_v9 = vld [vmem:[#allocation8 + $0xb20] sm:$0xff] }
 0x1d0   :  { %4294 = vmatprep.subr.bf16.mxu0 %v5349_v18  ;;  %4458 = vmatprep.subr.bf16.mxu1 %v5351_v19  ;;  %v5390_v18 = vcombine.low %v1401_v1, %v1405_v2  ;;  %v5397_v19 = vcombine.high %v1408_v12, %v1412_v13  ;;  %v5399_v20 = vcombine.high %v1409_v14, %v1413_v16  ;;  %v1445_v60 = vld [vmem:[#allocation8 + $0xae8] sm:$0xff] }
 0x1d1   :  { %4324 = vmatprep.mubr.bf16.mxu0 %v6011_v29  ;;  %4488 = vmatprep.mubr.bf16.mxu1 %v6011_v29  ;;  %v1449_v61 = vld [vmem:[#allocation8 + $0xb08] sm:$0xff] }
 0x1d2   :  { %v1453_v1 = vld [vmem:[#allocation8 + $0xb28] sm:$0xff] }
 0x1d3   :  { %4295 = vmatpush1.bf16.msra.mxu0 %v5348_v30  ;;  %4459 = vmatpush1.bf16.msra.mxu1 %v5350_v31  ;;  %v1421_v30 = vld [vmem:[#allocation8 + $0xa28] sm:$0xff]  ;;  %v5396_v31 = vcombine.low %v1408_v12, %v1412_v13  ;;  %v1460_v12 = vld [vmem:[#allocation8 + $0xb60] sm:$0xff] }
 0x1d4   :  { %4296 = vmatprep.subr.bf16.mxu0 %v5357_v33  ;;  %4460 = vmatprep.subr.bf16.mxu1 %v5359_v34  ;;  %v5398_v33 = vcombine.low %v1409_v14, %v1413_v16  ;;  %v5405_v34 = vcombine.high %v1416_v21, %v1420_v22  ;;  %v5407_v35 = vcombine.high %v1417_v28, %v1421_v30  ;;  %v1457_v13 = vld [vmem:[#allocation8 + $0xb48] sm:$0xff]  ;;  %v6022_v16 = vsub.s32 4, %v5957_v23 }
 0x1d5   :  { %v1461_v14 = vld [vmem:[#allocation8 + $0xb68] sm:$0xff] }
 0x1d7   :  { %4297 = vmatpush1.bf16.msra.mxu0 %v5356_v45  ;;  %4461 = vmatpush1.bf16.msra.mxu1 %v5358_v46  ;;  %v5404_v45 = vcombine.low %v1416_v21, %v1420_v22  ;;  %v5406_v46 = vcombine.low %v1417_v28, %v1421_v30  ;;  %v1464_v21 = vld [vmem:[#allocation8 + $0xb80] sm:$0xff]  ;;  %v1465_v28 = vld [vmem:[#allocation8 + $0xb88] sm:$0xff] }
 0x1d8   :  { %4298 = vmatprep.subr.bf16.mxu0 %v5365_v3  ;;  %4462 = vmatprep.subr.bf16.mxu1 %v5367_v49  ;;  %v5415_v3 = vcombine.high %v1425_v39, %v1429_v41  ;;  %v1432_v49 = vld [vmem:[#allocation8 + $0xa80] sm:$0xff]  ;;  %v1469_v30 = vld [vmem:[#allocation8 + $0xba8] sm:$0xff] }
 0x1d9   :  { %v5420_v62 = vcombine.low %v1432_v49, %v1436_v24  ;;  %v1468_v22 = vld [vmem:[#allocation8 + $0xba0] sm:$0xff]  ;;  %v5455_v38 = vcombine.high %v1465_v28, %v1469_v30 }
 0x1da   :  { %v5453_v37 = vcombine.high %v1464_v21, %v1468_v22 }
 0x1db   :  { %4299 = vmatpush1.bf16.msra.mxu0 %v5364_v53  ;;  %4463 = vmatpush1.bf16.msra.mxu1 %v5366_v54  ;;  %v5414_v53 = vcombine.low %v1425_v39, %v1429_v41  ;;  %v5421_v54 = vcombine.high %v1432_v49, %v1436_v24  ;;  %v1472_v39 = vld [vmem:[#allocation8 + $0xbc0] sm:$0xff]  ;;  %v5452_v49 = vcombine.low %v1464_v21, %v1468_v22  ;;  %v1505_v21 = vld [vmem:[#allocation8 + $0xcc8] sm:$0xff] }
 0x1dc   :  { %4300 = vmatprep.subr.bf16.mxu0 %v5373_v56  ;;  %4464 = vmatprep.subr.bf16.mxu1 %v5375_v57  ;;  %v5423_v56 = vcombine.high %v1433_v50, %v1437_v51  ;;  %v1440_v57 = vld [vmem:[#allocation8 + $0xac0] sm:$0xff]  ;;  %v5454_v24 = vcombine.low %v1465_v28, %v1469_v30  ;;  %v1509_v22 = vld [vmem:[#allocation8 + $0xce8] sm:$0xff] }
 0x1dd   :  { %v5428_v2 = vcombine.low %v1440_v57, %v1444_v58  ;;  %v1476_v41 = vld [vmem:[#allocation8 + $0xbe0] sm:$0xff] }
 0x1df   :  { %4301 = vmatpush1.bf16.msra.mxu0 %v5372_v63  ;;  %4465 = vmatpush1.bf16.msra.mxu1 %v5374_v4  ;;  %v5422_v63 = vcombine.low %v1433_v50, %v1437_v51  ;;  %v5429_v4 = vcombine.high %v1440_v57, %v1444_v58  ;;  %v5461_v50 = vcombine.high %v1472_v39, %v1476_v41 }
 0x1e0   :  { %4302 = vmatprep.subr.bf16.mxu0 %v5381_v8  ;;  %4466 = vmatprep.subr.bf16.mxu1 %v5383_v55  ;;  %v5431_v8 = vcombine.high %v1441_v59, %v1445_v60  ;;  %v1448_v55 = vld [vmem:[#allocation8 + $0xb00] sm:$0xff] }
 0x1e3   :  { %4303 = vmatpush1.bf16.msra.mxu0 %v5380_v5  ;;  %4467 = vmatpush1.bf16.msra.mxu1 %v5382_v6  ;;  %v5430_v5 = vcombine.low %v1441_v59, %v1445_v60  ;;  %v5437_v6 = vcombine.high %v1448_v55, %v1452_v9 }
 0x1e4   :  { %4304 = vmatprep.subr.bf16.mxu0 %v5389_v10  ;;  %4468 = vmatprep.subr.bf16.mxu1 %v5391_v11  ;;  %v5439_v10 = vcombine.high %v1449_v61, %v1453_v1  ;;  %v1456_v11 = vld [vmem:[#allocation8 + $0xb40] sm:$0xff] }
 0x1e7   :  { %4305 = vmatpush1.bf16.msra.mxu0 %v5388_v17  ;;  %4469 = vmatpush1.bf16.msra.mxu1 %v5390_v18  ;;  %v5436_v17 = vcombine.low %v1448_v55, %v1452_v9  ;;  %v5438_v18 = vcombine.low %v1449_v61, %v1453_v1 }
 0x1e8   :  { %4306 = vmatprep.subr.bf16.mxu0 %v5397_v19  ;;  %4470 = vmatprep.subr.bf16.mxu1 %v5399_v20  ;;  %v5445_v19 = vcombine.high %v1456_v11, %v1460_v12  ;;  %v5447_v20 = vcombine.high %v1457_v13, %v1461_v14 }
 0x1eb   :  { %4307 = vmatpush1.bf16.msra.mxu0 %v5396_v31  ;;  %4471 = vmatpush1.bf16.msra.mxu1 %v5398_v33  ;;  %v6025_v31 = vsub.s32 7, %v5957_v23  ;;  %v255_v33 = vrot.slane %v5962_v26, %v6022_v16 }
 0x1ec   :  { %4308 = vmatprep.subr.bf16.mxu0 %v5405_v34  ;;  %4472 = vmatprep.subr.bf16.mxu1 %v5407_v35  ;;  %v5444_v34 = vcombine.low %v1456_v11, %v1460_v12  ;;  %v5446_v35 = vcombine.low %v1457_v13, %v1461_v14  ;;  %v1501_v11 = vld [vmem:[#allocation8 + $0xca8] sm:$0xff] }
 0x1ef   :  { %4309 = vmatpush1.bf16.msra.mxu0 %v5404_v45  ;;  %4473 = vmatpush1.bf16.msra.mxu1 %v5406_v46  ;;  %v1473_v45 = vld [vmem:[#allocation8 + $0xbc8] sm:$0xff] }
 0x1f0   :  { %4310 = vmatprep.subr.bf16.mxu0 %v5413_v48  ;;  %4474 = vmatprep.subr.bf16.mxu1 %v5415_v3  ;;  %v1477_v46 = vld [vmem:[#allocation8 + $0xbe8] sm:$0xff]  ;;  %v267_v48 = vrot.slane %v5962_v26, %v6025_v31  ;;  %v1033_v3 = vadd.f32 %v6007_v0, %v255_v33  ;;  %v5460_v26 = vcombine.low %v1472_v39, %v1476_v41 }
 0x1f1   :  { %v5463_v51 = vcombine.high %v1473_v45, %v1477_v46  ;;  %v5462_v59 = vcombine.low %v1473_v45, %v1477_v46  ;;  %v1517_v39 = vld [vmem:[#allocation8 + $0xd28] sm:$0xff]  ;;  %v5494_v45 = vcombine.low %v1505_v21, %v1509_v22 }
 0x1f2   :  { %v1076_v57 = vadd.f32 %v6019_v40, %v267_v48  ;;  %v1084_v58 = vmax.f32 %v1033_v3, 0.0  ;;  %v1520_v3 = vld [vmem:[#allocation8 + $0xd40] sm:$0xff] }
 0x1f3   :  { %4311 = vmatpush1.bf16.msra.mxu0 %v5412_v52  ;;  %4475 = vmatpush1.bf16.msra.mxu1 %v5414_v53  ;;  %v1480_v52 = vld [vmem:[#allocation8 + $0xc00] sm:$0xff] }
 0x1f4   :  { %4312 = vmatprep.subr.bf16.mxu0 %v5421_v54  ;;  %4476 = vmatprep.subr.bf16.mxu1 %v5423_v56  ;;  %v1484_v53 = vld [vmem:[#allocation8 + $0xc20] sm:$0xff]  ;;  %v1481_v54 = vld [vmem:[#allocation8 + $0xc08] sm:$0xff]  ;;  %v1087_v55 = vmax.f32 %v1076_v57, 0.0  ;;  %v6033_v9 = vpack.c.bf16 %v1084_v58, %v1084_v58 }
 0x1f5   :  { %v1485_v56 = vld [vmem:[#allocation8 + $0xc28] sm:$0xff]  ;;  %v5469_v0 = vcombine.high %v1480_v52, %v1484_v53  ;;  %v5468_v61 = vcombine.low %v1480_v52, %v1484_v53  ;;  %v1532_v57 = vld [vmem:[#allocation8 + $0xda0] sm:$0xff] }
 0x1f6   :  { %v5471_v60 = vcombine.high %v1481_v54, %v1485_v56  ;;  %v5470_v40 = vcombine.low %v1481_v54, %v1485_v56  ;;  %v6035_v12 = vpack.c.bf16 %v1087_v55, %v1087_v55  ;;  %v1528_v56 = vld [vmem:[#allocation8 + $0xd80] sm:$0xff]  ;;  %v1529_v58 = vld [vmem:[#allocation8 + $0xd88] sm:$0xff] }
 0x1f7   :  { %4313 = vmatpush1.bf16.msra.mxu0 %v5420_v62  ;;  %4477 = vmatpush1.bf16.msra.mxu1 %v5422_v63  ;;  %v1488_v62 = vld [vmem:[#allocation8 + $0xc40] sm:$0xff]  ;;  %v1541_v55 = vld [vmem:[#allocation8 + $0xde8] sm:$0xff] }
 0x1f8   :  { %4314 = vmatprep.subr.bf16.mxu0 %v5429_v4  ;;  %4478 = vmatprep.subr.bf16.mxu1 %v5431_v8  ;;  %v1492_v63 = vld [vmem:[#allocation8 + $0xc60] sm:$0xff]  ;;  %v1489_v4 = vld [vmem:[#allocation8 + $0xc48] sm:$0xff] }
 0x1f9   :  { %v1493_v8 = vld [vmem:[#allocation8 + $0xc68] sm:$0xff]  ;;  %v5477_v1 = vcombine.high %v1488_v62, %v1492_v63  ;;  %v5476_v13 = vcombine.low %v1488_v62, %v1492_v63  ;;  %v1536_v63 = vld [vmem:[#allocation8 + $0xdc0] sm:$0xff] }
 0x1fa   :  { %v5478_v14 = vcombine.low %v1489_v4, %v1493_v8 }
 0x1fb   :  { %4315 = vmatpush1.bf16.msra.mxu0 %v5428_v2  ;;  %4479 = vmatpush1.bf16.msra.mxu1 %v5430_v5  ;;  %v5479_v2 = vcombine.high %v1489_v4, %v1493_v8  ;;  %v1496_v5 = vld [vmem:[#allocation8 + $0xc80] sm:$0xff]  ;;  %v1537_v8 = vld [vmem:[#allocation8 + $0xdc8] sm:$0xff] }
 0x1fc   :  { %4316 = vmatprep.subr.bf16.mxu0 %v5437_v6  ;;  %4480 = vmatprep.subr.bf16.mxu1 %v5439_v10  ;;  %v1500_v6 = vld [vmem:[#allocation8 + $0xca0] sm:$0xff]  ;;  %v1497_v10 = vld [vmem:[#allocation8 + $0xc88] sm:$0xff] }
 0x1fd   :  { %v5484_v28 = vcombine.low %v1496_v5, %v1500_v6  ;;  %v5486_v30 = vcombine.low %v1497_v10, %v1501_v11  ;;  %v1540_v4 = vld [vmem:[#allocation8 + $0xde0] sm:$0xff] }
 0x1ff   :  { %4317 = vmatpush1.bf16.msra.mxu0 %v5436_v17  ;;  %4481 = vmatpush1.bf16.msra.mxu1 %v5438_v18  ;;  %v5485_v17 = vcombine.high %v1496_v5, %v1500_v6  ;;  %v5487_v18 = vcombine.high %v1497_v10, %v1501_v11  ;;  %v1544_v5 = vld [vmem:[#allocation8 + $0xe00] sm:$0xff]  ;;  %v1545_v10 = vld [vmem:[#allocation8 + $0xe08] sm:$0xff] }
 0x200   :  { %4318 = vmatprep.subr.bf16.mxu0 %v5445_v19  ;;  %4482 = vmatprep.subr.bf16.mxu1 %v5447_v20  ;;  %v1504_v19 = vld [vmem:[#allocation8 + $0xcc0] sm:$0xff]  ;;  %v1549_v11 = vld [vmem:[#allocation8 + $0xe28] sm:$0xff] }
 0x201   :  { %v1508_v20 = vld [vmem:[#allocation8 + $0xce0] sm:$0xff] }
 0x202   :  { %v5493_v33 = vcombine.high %v1504_v19, %v1508_v20  ;;  %v5492_v41 = vcombine.low %v1504_v19, %v1508_v20  ;;  %v1548_v6 = vld [vmem:[#allocation8 + $0xe20] sm:$0xff] }
 0x203   :  { %4319 = vmatpush1.bf16.msra.mxu0 %v5444_v34  ;;  %4483 = vmatpush1.bf16.msra.mxu1 %v5446_v35  ;;  %v5495_v34 = vcombine.high %v1505_v21, %v1509_v22  ;;  %v1512_v35 = vld [vmem:[#allocation8 + $0xd00] sm:$0xff]  ;;  %v1553_v21 = vld [vmem:[#allocation8 + $0xe48] sm:$0xff] }
 0x204   :  { %4320 = vmatprep.subr.bf16.mxu0 %v5453_v37  ;;  %4484 = vmatprep.subr.bf16.mxu1 %v5455_v38  ;;  %v1516_v37 = vld [vmem:[#allocation8 + $0xd20] sm:$0xff]  ;;  %v1513_v38 = vld [vmem:[#allocation8 + $0xd08] sm:$0xff] }
 0x205   :  { %v5501_v46 = vcombine.high %v1512_v35, %v1516_v37  ;;  %v5503_v48 = vcombine.high %v1513_v38, %v1517_v39  ;;  %v5502_v52 = vcombine.low %v1513_v38, %v1517_v39  ;;  %v1552_v19 = vld [vmem:[#allocation8 + $0xe40] sm:$0xff]  ;;  %v1557_v22 = vld [vmem:[#allocation8 + $0xe68] sm:$0xff] }
 0x206   :  { %v1556_v20 = vld [vmem:[#allocation8 + $0xe60] sm:$0xff]  ;;  %v1561_v38 = vld [vmem:[#allocation8 + $0xe88] sm:$0xff] }
 0x207   :  { %4321 = vmatpush1.bf16.msra.mxu0 %v5452_v49  ;;  %4485 = vmatpush1.bf16.msra.mxu1 %v5454_v24  ;;  %v1524_v49 = vld [vmem:[#allocation8 + $0xd60] sm:$0xff]  ;;  %v1521_v24 = vld [vmem:[#allocation8 + $0xd48] sm:$0xff] }
 0x208   :  { %4322 = vmatprep.subr.bf16.mxu0 %v5461_v50  ;;  %4486 = vmatprep.subr.bf16.mxu1 %v5463_v51  ;;  %v1525_v50 = vld [vmem:[#allocation8 + $0xd68] sm:$0xff]  ;;  %v5500_v51 = vcombine.low %v1512_v35, %v1516_v37  ;;  %v5509_v53 = vcombine.high %v1520_v3, %v1524_v49  ;;  %v1560_v35 = vld [vmem:[#allocation8 + $0xe80] sm:$0xff] }
 0x209   :  { %v5511_v54 = vcombine.high %v1521_v24, %v1525_v50  ;;  %v1564_v37 = vld [vmem:[#allocation8 + $0xea0] sm:$0xff]  ;;  %v1565_v39 = vld [vmem:[#allocation8 + $0xea8] sm:$0xff] }
 0x20b   :  { %4323 = vmatpush1.bf16.msra.mxu0 %v5460_v26  ;;  %4487 = vmatpush1.bf16.msra.mxu1 %v5462_v59  ;;  %v1533_v26 = vld [vmem:[#allocation8 + $0xda8] sm:$0xff]  ;;  %v5508_v59 = vcombine.low %v1520_v3, %v1524_v49  ;;  %v1568_v3 = vld [vmem:[#allocation8 + $0xec0] sm:$0xff] }
 0x20c   :  { %4333 = vmatprep.subr.bf16.mxu0 %v5469_v0  ;;  %4497 = vmatprep.subr.bf16.mxu1 %v5471_v60  ;;  %v5510_v0 = vcombine.low %v1521_v24, %v1525_v50  ;;  %v5517_v60 = vcombine.high %v1528_v56, %v1532_v57  ;;  %v5519_v62 = vcombine.high %v1529_v58, %v1533_v26  ;;  %v1572_v49 = vld [vmem:[#allocation8 + $0xee0] sm:$0xff]  ;;  %v1569_v24 = vld [vmem:[#allocation8 + $0xec8] sm:$0xff] }
 0x20d   :  { %v1573_v50 = vld [vmem:[#allocation8 + $0xee8] sm:$0xff] }
 0x20e   :  { %4325 = vmatmul.mubr.bf16.vlgmr.msra.gmra.mrb[8].mxu0 %v6033_v9  ;;  %4489 = vmatmul.mubr.bf16.vlgmr.msra.gmra.mrb[8].mxu1 %v6033_v9 }
 0x20f   :  { %4334 = vmatpush1.bf16.msra.mxu0 %v5468_v61  ;;  %4498 = vmatpush1.bf16.msra.mxu1 %v5470_v40  ;;  %v5516_v61 = vcombine.low %v1528_v56, %v1532_v57  ;;  %v5518_v40 = vcombine.low %v1529_v58, %v1533_v26  ;;  %v1576_v56 = vld [vmem:[#allocation8 + $0xf00] sm:$0xff]  ;;  %v1577_v58 = vld [vmem:[#allocation8 + $0xf08] sm:$0xff] }
 0x210   :  { %4335 = vmatprep.subr.bf16.mxu0 %v5477_v1  ;;  %4499 = vmatprep.subr.bf16.mxu1 %v5479_v2  ;;  %v5525_v1 = vcombine.high %v1536_v63, %v1540_v4  ;;  %v5527_v2 = vcombine.high %v1537_v8, %v1541_v55  ;;  %v1580_v57 = vld [vmem:[#allocation8 + $0xf20] sm:$0xff]  ;;  %v1581_v26 = vld [vmem:[#allocation8 + $0xf28] sm:$0xff] }
 0x211   :  { %4365 = vmatprep.mubr.bf16.mxu0 %v6035_v12  ;;  %4529 = vmatprep.mubr.bf16.mxu1 %v6035_v12 }
 0x213   :  { %4336 = vmatpush1.bf16.msra.mxu0 %v5476_v13  ;;  %4500 = vmatpush1.bf16.msra.mxu1 %v5478_v14  ;;  %v5524_v13 = vcombine.low %v1536_v63, %v1540_v4  ;;  %v5526_v14 = vcombine.low %v1537_v8, %v1541_v55  ;;  %v1584_v63 = vld [vmem:[#allocation8 + $0xf40] sm:$0xff]  ;;  %v1585_v8 = vld [vmem:[#allocation8 + $0xf48] sm:$0xff] }
 0x214   :  { %4337 = vmatprep.subr.bf16.mxu0 %v5485_v17  ;;  %4501 = vmatprep.subr.bf16.mxu1 %v5487_v18  ;;  %v5533_v17 = vcombine.high %v1544_v5, %v1548_v6  ;;  %v5535_v18 = vcombine.high %v1545_v10, %v1549_v11  ;;  %v1588_v4 = vld [vmem:[#allocation8 + $0xf60] sm:$0xff]  ;;  %v1589_v55 = vld [vmem:[#allocation8 + $0xf68] sm:$0xff] }
 0x217   :  { %4338 = vmatpush1.bf16.msra.mxu0 %v5484_v28  ;;  %4502 = vmatpush1.bf16.msra.mxu1 %v5486_v30  ;;  %v5532_v28 = vcombine.low %v1544_v5, %v1548_v6  ;;  %v5534_v30 = vcombine.low %v1545_v10, %v1549_v11  ;;  %v5575_v5 = vcombine.high %v1585_v8, %v1589_v55  ;;  %v1592_v6 = vld [vmem:[#allocation8 + $0xf80] sm:$0xff]  ;;  %v1593_v11 = vld [vmem:[#allocation8 + $0xf88] sm:$0xff] }
 0x218   :  { %4339 = vmatprep.subr.bf16.mxu0 %v5493_v33  ;;  %4503 = vmatprep.subr.bf16.mxu1 %v5495_v34  ;;  %v5541_v33 = vcombine.high %v1552_v19, %v1556_v20  ;;  %v5543_v34 = vcombine.high %v1553_v21, %v1557_v22  ;;  %v1596_v10 = vld [vmem:[#allocation8 + $0xfa0] sm:$0xff] }
 0x21b   :  { %4340 = vmatpush1.bf16.msra.mxu0 %v5492_v41  ;;  %4504 = vmatpush1.bf16.msra.mxu1 %v5494_v45  ;;  %v5540_v41 = vcombine.low %v1552_v19, %v1556_v20  ;;  %v5542_v45 = vcombine.low %v1553_v21, %v1557_v22  ;;  %v5581_v20 = vcombine.high %v1592_v6, %v1596_v10  ;;  %v1600_v21 = vld [vmem:[#allocation8 + $0xfc0] sm:$0xff] }
 0x21c   :  { %4341 = vmatprep.subr.bf16.mxu0 %v5501_v46  ;;  %4505 = vmatprep.subr.bf16.mxu1 %v5503_v48  ;;  %v5549_v46 = vcombine.high %v1560_v35, %v1564_v37  ;;  %v5551_v48 = vcombine.high %v1561_v38, %v1565_v39  ;;  %v1604_v22 = vld [vmem:[#allocation8 + $0xfe0] sm:$0xff] }
 0x21f   :  { %4342 = vmatpush1.bf16.msra.mxu0 %v5500_v51  ;;  %4506 = vmatpush1.bf16.msra.mxu1 %v5502_v52  ;;  %v5548_v51 = vcombine.low %v1560_v35, %v1564_v37  ;;  %v5550_v52 = vcombine.low %v1561_v38, %v1565_v39  ;;  %v5589_v37 = vcombine.high %v1600_v21, %v1604_v22  ;;  %v1098_v39 = vld [vmem:[#allocation8 + $0x10] sm:$0xff] }
 0x220   :  { %4343 = vmatprep.subr.bf16.mxu0 %v5509_v53  ;;  %4507 = vmatprep.subr.bf16.mxu1 %v5511_v54  ;;  %v5557_v53 = vcombine.high %v1568_v3, %v1572_v49  ;;  %v5559_v54 = vcombine.high %v1569_v24, %v1573_v50 }
 0x223   :  { %4344 = vmatpush1.bf16.msra.mxu0 %v5508_v59  ;;  %4508 = vmatpush1.bf16.msra.mxu1 %v5510_v0  ;;  %v5556_v59 = vcombine.low %v1568_v3, %v1572_v49  ;;  %v5558_v0 = vcombine.low %v1569_v24, %v1573_v50 }
 0x224   :  { %4345 = vmatprep.subr.bf16.mxu0 %v5517_v60  ;;  %4509 = vmatprep.subr.bf16.mxu1 %v5519_v62  ;;  %v5565_v60 = vcombine.high %v1576_v56, %v1580_v57  ;;  %v5567_v62 = vcombine.high %v1577_v58, %v1581_v26 }
 0x227   :  { %4346 = vmatpush1.bf16.msra.mxu0 %v5516_v61  ;;  %4510 = vmatpush1.bf16.msra.mxu1 %v5518_v40  ;;  %v5564_v61 = vcombine.low %v1576_v56, %v1580_v57  ;;  %v5566_v40 = vcombine.low %v1577_v58, %v1581_v26 }
 0x228   :  { %4347 = vmatprep.subr.bf16.mxu0 %v5525_v1  ;;  %4511 = vmatprep.subr.bf16.mxu1 %v5527_v2  ;;  %v6042_v1 = vsub.s32 6, %v5957_v23  ;;  %v5573_v2 = vcombine.high %v1584_v63, %v1588_v4 }
 0x22b   :  { %4348 = vmatpush1.bf16.msra.mxu0 %v5524_v13  ;;  %4512 = vmatpush1.bf16.msra.mxu1 %v5526_v14  ;;  %v1597_v13 = vld [vmem:[#allocation8 + $0xfa8] sm:$0xff]  ;;  %v5572_v14 = vcombine.low %v1584_v63, %v1588_v4 }
 0x22c   :  { %4349 = vmatprep.subr.bf16.mxu0 %v5533_v17  ;;  %4513 = vmatprep.subr.bf16.mxu1 %v5535_v18  ;;  %v5574_v17 = vcombine.low %v1585_v8, %v1589_v55  ;;  %v5665_v18 = vld [vmem:[#allocation7] sm:$0xff]  ;;  %v5583_v23 = vcombine.high %v1593_v11, %v1597_v13 }
 0x22d   :  { %v263_v19 = vrot.slane %v5665_v18, %v6042_v1  ;;  %v1135_v18 = vld [vmem:[#allocation8 + $0x138] sm:$0xff] }
 0x22f   :  { %4350 = vmatpush1.bf16.msra.mxu0 %v5532_v28  ;;  %4514 = vmatpush1.bf16.msra.mxu1 %v5534_v30  ;;  %v1601_v28 = vld [vmem:[#allocation8 + $0xfc8] sm:$0xff]  ;;  %v1074_v35 = vadd.f32 %v6015_v36, %v263_v19  ;;  %v1107_v36 = vld [vmem:[#allocation8 + $0x58] sm:$0xff] }
 0x230   :  { %4351 = vmatprep.subr.bf16.mxu0 %v5541_v33  ;;  %4515 = vmatprep.subr.bf16.mxu1 %v5543_v34  ;;  %v1605_v30 = vld [vmem:[#allocation8 + $0xfe8] sm:$0xff]  ;;  %v5580_v33 = vcombine.low %v1592_v6, %v1596_v10  ;;  %v5582_v34 = vcombine.low %v1593_v11, %v1597_v13 }
 0x231   :  { %v5591_v38 = vcombine.high %v1601_v28, %v1605_v30  ;;  %v5590_v3 = vcombine.low %v1601_v28, %v1605_v30  ;;  %v1086_v49 = vmax.f32 %v1074_v35, 0.0  ;;  %v1142_v28 = vld [vmem:[#allocation8 + $0x170] sm:$0xff]  ;;  %v1139_v30 = vld [vmem:[#allocation8 + $0x158] sm:$0xff] }
 0x233   :  { %4352 = vmatpush1.bf16.msra.mxu0 %v5540_v41  ;;  %4516 = vmatpush1.bf16.msra.mxu1 %v5542_v45  ;;  %v1102_v41 = vld [vmem:[#allocation8 + $0x30] sm:$0xff]  ;;  %v1099_v45 = vld [vmem:[#allocation8 + $0x18] sm:$0xff]  ;;  %v6046_v56 = vpack.c.bf16 %v1086_v49, %v1086_v49 }
 0x234   :  { %4353 = vmatprep.subr.bf16.mxu0 %v5549_v46  ;;  %4517 = vmatprep.subr.bf16.mxu1 %v5551_v48  ;;  %v1103_v46 = vld [vmem:[#allocation8 + $0x38] sm:$0xff]  ;;  %v5588_v48 = vcombine.low %v1600_v21, %v1604_v22  ;;  %v5089_v24 = vcombine.high %v1098_v39, %v1102_v41  ;;  %v1138_v22 = vld [vmem:[#allocation8 + $0x150] sm:$0xff] }
 0x235   :  { %v5091_v50 = vcombine.high %v1099_v45, %v1103_v46  ;;  %v5090_v57 = vcombine.low %v1099_v45, %v1103_v46  ;;  %v1147_v45 = vld [vmem:[#allocation8 + $0x198] sm:$0xff] }
 0x236   :  { %v1151_v46 = vld [vmem:[#allocation8 + $0x1b8] sm:$0xff] }
 0x237   :  { %4354 = vmatpush1.bf16.msra.mxu0 %v5548_v51  ;;  %4518 = vmatpush1.bf16.msra.mxu1 %v5550_v52  ;;  %v1106_v51 = vld [vmem:[#allocation8 + $0x50] sm:$0xff] }
 0x238   :  { %4355 = vmatprep.subr.bf16.mxu0 %v5557_v53  ;;  %4519 = vmatprep.subr.bf16.mxu1 %v5559_v54  ;;  %v1110_v52 = vld [vmem:[#allocation8 + $0x70] sm:$0xff]  ;;  %v1111_v53 = vld [vmem:[#allocation8 + $0x78] sm:$0xff]  ;;  %v5088_v54 = vcombine.low %v1098_v39, %v1102_v41 }
 0x239   :  { %v5097_v58 = vcombine.high %v1106_v51, %v1110_v52  ;;  %v5099_v26 = vcombine.high %v1107_v36, %v1111_v53  ;;  %v5096_v63 = vcombine.low %v1106_v51, %v1110_v52  ;;  %v5098_v4 = vcombine.low %v1107_v36, %v1111_v53  ;;  %v1146_v39 = vld [vmem:[#allocation8 + $0x190] sm:$0xff]  ;;  %v1155_v52 = vld [vmem:[#allocation8 + $0x1d8] sm:$0xff] }
 0x23a   :  { %v1150_v41 = vld [vmem:[#allocation8 + $0x1b0] sm:$0xff]  ;;  %v1159_v36 = vld [vmem:[#allocation8 + $0x1f8] sm:$0xff] }
 0x23b   :  { %4356 = vmatpush1.bf16.msra.mxu0 %v5556_v59  ;;  %4520 = vmatpush1.bf16.msra.mxu1 %v5558_v0  ;;  %v1114_v59 = vld [vmem:[#allocation8 + $0x90] sm:$0xff]  ;;  %v5137_v49 = vcombine.high %v1146_v39, %v1150_v41  ;;  %v5136_v53 = vcombine.low %v1146_v39, %v1150_v41  ;;  %v1195_v41 = vld [vmem:[#allocation8 + $0x318] sm:$0xff] }
 0x23c   :  { %4357 = vmatprep.subr.bf16.mxu0 %v5565_v60  ;;  %4521 = vmatprep.subr.bf16.mxu1 %v5567_v62  ;;  %v1118_v0 = vld [vmem:[#allocation8 + $0xb0] sm:$0xff]  ;;  %v1115_v60 = vld [vmem:[#allocation8 + $0x98] sm:$0xff] }
 0x23d   :  { %v1119_v62 = vld [vmem:[#allocation8 + $0xb8] sm:$0xff]  ;;  %v5105_v8 = vcombine.high %v1114_v59, %v1118_v0  ;;  %v5104_v6 = vcombine.low %v1114_v59, %v1118_v0  ;;  %v1158_v51 = vld [vmem:[#allocation8 + $0x1f0] sm:$0xff] }
 0x23e   :  { %v5107_v55 = vcombine.high %v1115_v60, %v1119_v62  ;;  %v5106_v10 = vcombine.low %v1115_v60, %v1119_v62  ;;  %v1166_v59 = vld [vmem:[#allocation8 + $0x230] sm:$0xff]  ;;  %v1163_v0 = vld [vmem:[#allocation8 + $0x218] sm:$0xff] }
 0x23f   :  { %4358 = vmatpush1.bf16.msra.mxu0 %v5564_v61  ;;  %4522 = vmatpush1.bf16.msra.mxu1 %v5566_v40  ;;  %v1122_v61 = vld [vmem:[#allocation8 + $0xd0] sm:$0xff]  ;;  %v1167_v60 = vld [vmem:[#allocation8 + $0x238] sm:$0xff] }
 0x240   :  { %4359 = vmatprep.subr.bf16.mxu0 %v5573_v2  ;;  %4523 = vmatprep.subr.bf16.mxu1 %v5575_v5  ;;  %v1126_v40 = vld [vmem:[#allocation8 + $0xf0] sm:$0xff]  ;;  %v1123_v2 = vld [vmem:[#allocation8 + $0xd8] sm:$0xff] }
 0x241   :  { %v1127_v5 = vld [vmem:[#allocation8 + $0xf8] sm:$0xff]  ;;  %v5113_v11 = vcombine.high %v1122_v61, %v1126_v40  ;;  %v5112_v19 = vcombine.low %v1122_v61, %v1126_v40  ;;  %v1174_v61 = vld [vmem:[#allocation8 + $0x270] sm:$0xff] }
 0x242   :  { %v5115_v13 = vcombine.high %v1123_v2, %v1127_v5  ;;  %v1171_v40 = vld [vmem:[#allocation8 + $0x258] sm:$0xff]  ;;  %v1198_v39 = vld [vmem:[#allocation8 + $0x330] sm:$0xff] }
 0x243   :  { %4360 = vmatpush1.bf16.msra.mxu0 %v5572_v14  ;;  %4524 = vmatpush1.bf16.msra.mxu1 %v5574_v17  ;;  %v1130_v14 = vld [vmem:[#allocation8 + $0x110] sm:$0xff] }
 0x244   :  { %4361 = vmatprep.subr.bf16.mxu0 %v5581_v20  ;;  %4525 = vmatprep.subr.bf16.mxu1 %v5583_v23  ;;  %v1134_v17 = vld [vmem:[#allocation8 + $0x130] sm:$0xff]  ;;  %v5114_v20 = vcombine.low %v1123_v2, %v1127_v5  ;;  %v1175_v2 = vld [vmem:[#allocation8 + $0x278] sm:$0xff] }
 0x245   :  { %v5121_v23 = vcombine.high %v1130_v14, %v1134_v17 }
 0x247   :  { %4362 = vmatpush1.bf16.msra.mxu0 %v5580_v33  ;;  %4526 = vmatpush1.bf16.msra.mxu1 %v5582_v34  ;;  %v1143_v33 = vld [vmem:[#allocation8 + $0x178] sm:$0xff]  ;;  %v5120_v34 = vcombine.low %v1130_v14, %v1134_v17  ;;  %v1182_v14 = vld [vmem:[#allocation8 + $0x2b0] sm:$0xff] }
 0x248   :  { %4363 = vmatprep.subr.bf16.mxu0 %v5589_v37  ;;  %4527 = vmatprep.subr.bf16.mxu1 %v5591_v38  ;;  %v5129_v37 = vcombine.high %v1138_v22, %v1142_v28  ;;  %v5131_v38 = vcombine.high %v1139_v30, %v1143_v33  ;;  %v1179_v17 = vld [vmem:[#allocation8 + $0x298] sm:$0xff] }
 0x24b   :  { %4364 = vmatpush1.bf16.msra.mxu0 %v5588_v48  ;;  %4528 = vmatpush1.bf16.msra.mxu1 %v5590_v3  ;;  %v5128_v48 = vcombine.low %v1138_v22, %v1142_v28  ;;  %v5130_v3 = vcombine.low %v1139_v30, %v1143_v33  ;;  %v1190_v22 = vld [vmem:[#allocation8 + $0x2f0] sm:$0xff]  ;;  %v1187_v28 = vld [vmem:[#allocation8 + $0x2d8] sm:$0xff] }
 0x24c   :  { %4538 = vmatprep.subr.bf16.mxu0 %v5089_v24  ;;  %4702 = vmatprep.subr.bf16.mxu1 %v5091_v50  ;;  %v5139_v24 = vcombine.high %v1147_v45, %v1151_v46  ;;  %v1154_v50 = vld [vmem:[#allocation8 + $0x1d0] sm:$0xff]  ;;  %v1191_v30 = vld [vmem:[#allocation8 + $0x2f8] sm:$0xff] }
 0x24d   :  { %v5144_v62 = vcombine.low %v1154_v50, %v1158_v51 }
 0x24e   :  { %4366 = vmatmul.mubr.bf16.vlgmr.msra.gmra.mrb[8].mxu0 %v6046_v56  ;;  %4530 = vmatmul.mubr.bf16.vlgmr.msra.gmra.mrb[8].mxu1 %v6046_v56 }
 0x24f   :  { %4539 = vmatpush1.bf16.msra.mxu0 %v5088_v54  ;;  %4570 = vmatprep.mubr.bf16.mxu0 %v5974_v43  ;;  %v5138_v54 = vcombine.low %v1147_v45, %v1151_v46  ;;  %v1199_v45 = vld [vmem:[#allocation8 + $0x338] sm:$0xff] }
 0x250   :  { %4703 = vmatpush1.bf16.msra.mxu1 %v5090_v57  ;;  %4734 = vmatprep.mubr.bf16.mxu1 %v5974_v43  ;;  %v1131_v43 = vld [vmem:[#allocation8 + $0x118] sm:$0xff]  ;;  %v5145_v57 = vcombine.high %v1154_v50, %v1158_v51  ;;  %v1206_v50 = vld [vmem:[#allocation8 + $0x370] sm:$0xff] }
 0x251   :  { %4540 = vmatprep.subr.bf16.mxu0 %v5097_v58  ;;  %4704 = vmatprep.subr.bf16.mxu1 %v5099_v26  ;;  %v5123_v21 = vcombine.high %v1131_v43, %v1135_v18  ;;  %v5122_v35 = vcombine.low %v1131_v43, %v1135_v18  ;;  %v5147_v58 = vcombine.high %v1155_v52, %v1159_v36  ;;  %v1162_v26 = vld [vmem:[#allocation8 + $0x210] sm:$0xff]  ;;  %v1183_v43 = vld [vmem:[#allocation8 + $0x2b8] sm:$0xff] }
 0x252   :  { %v5152_v5 = vcombine.low %v1162_v26, %v1166_v59  ;;  %v1203_v51 = vld [vmem:[#allocation8 + $0x358] sm:$0xff] }
 0x253   :  { %4541 = vmatpush1.bf16.msra.mxu0 %v5096_v63  ;;  %v5146_v63 = vcombine.low %v1155_v52, %v1159_v36  ;;  %v1207_v52 = vld [vmem:[#allocation8 + $0x378] sm:$0xff] }
 0x254   :  { %4705 = vmatpush1.bf16.msra.mxu1 %v5098_v4  ;;  %4542 = vmatprep.subr.bf16.mxu0 %v5105_v8  ;;  %v5153_v4 = vcombine.high %v1162_v26, %v1166_v59  ;;  %v5155_v8 = vcombine.high %v1163_v0, %v1167_v60  ;;  %v1214_v26 = vld [vmem:[#allocation8 + $0x3b0] sm:$0xff]  ;;  %v1211_v59 = vld [vmem:[#allocation8 + $0x398] sm:$0xff] }
 0x255   :  { %4706 = vmatprep.subr.bf16.mxu1 %v5107_v55  ;;  %v1170_v55 = vld [vmem:[#allocation8 + $0x250] sm:$0xff] }
 0x256   :  { %v5160_v18 = vcombine.low %v1170_v55, %v1174_v61 }
 0x257   :  { %4543 = vmatpush1.bf16.msra.mxu0 %v5104_v6  ;;  %v5154_v6 = vcombine.low %v1163_v0, %v1167_v60  ;;  %v1215_v0 = vld [vmem:[#allocation8 + $0x3b8] sm:$0xff] }
 0x258   :  { %4707 = vmatpush1.bf16.msra.mxu1 %v5106_v10  ;;  %4544 = vmatprep.subr.bf16.mxu0 %v5113_v11  ;;  %v5161_v10 = vcombine.high %v1170_v55, %v1174_v61  ;;  %v5163_v11 = vcombine.high %v1171_v40, %v1175_v2  ;;  %v1222_v55 = vld [vmem:[#allocation8 + $0x3f0] sm:$0xff]  ;;  %v1219_v61 = vld [vmem:[#allocation8 + $0x3d8] sm:$0xff] }
 0x259   :  { %4708 = vmatprep.subr.bf16.mxu1 %v5115_v13  ;;  %v1178_v13 = vld [vmem:[#allocation8 + $0x290] sm:$0xff] }
 0x25a   :  { %v5168_v33 = vcombine.low %v1178_v13, %v1182_v14 }
 0x25b   :  { %4545 = vmatpush1.bf16.msra.mxu0 %v5112_v19  ;;  %v5162_v19 = vcombine.low %v1171_v40, %v1175_v2  ;;  %v1223_v40 = vld [vmem:[#allocation8 + $0x3f8] sm:$0xff] }
 0x25c   :  { %4709 = vmatpush1.bf16.msra.mxu1 %v5114_v20  ;;  %4546 = vmatprep.subr.bf16.mxu0 %v5121_v23  ;;  %v5169_v20 = vcombine.high %v1178_v13, %v1182_v14  ;;  %v5171_v23 = vcombine.high %v1179_v17, %v1183_v43  ;;  %v1230_v13 = vld [vmem:[#allocation8 + $0x430] sm:$0xff]  ;;  %v1227_v14 = vld [vmem:[#allocation8 + $0x418] sm:$0xff] }
 0x25d   :  { %4710 = vmatprep.subr.bf16.mxu1 %v5123_v21  ;;  %v1186_v21 = vld [vmem:[#allocation8 + $0x2d0] sm:$0xff] }
 0x25e   :  { %v5176_v46 = vcombine.low %v1186_v21, %v1190_v22 }
 0x25f   :  { %4547 = vmatpush1.bf16.msra.mxu0 %v5120_v34  ;;  %v5170_v34 = vcombine.low %v1179_v17, %v1183_v43  ;;  %v1231_v17 = vld [vmem:[#allocation8 + $0x438] sm:$0xff] }
 0x260   :  { %4711 = vmatpush1.bf16.msra.mxu1 %v5122_v35  ;;  %4548 = vmatprep.subr.bf16.mxu0 %v5129_v37  ;;  %v5177_v35 = vcombine.high %v1186_v21, %v1190_v22  ;;  %v5179_v37 = vcombine.high %v1187_v28, %v1191_v30  ;;  %v1238_v21 = vld [vmem:[#allocation8 + $0x470] sm:$0xff] }
 0x261   :  { %4712 = vmatprep.subr.bf16.mxu1 %v5131_v38  ;;  %v1194_v38 = vld [vmem:[#allocation8 + $0x310] sm:$0xff] }
 0x262   :  { %v5184_v36 = vcombine.low %v1194_v38, %v1198_v39 }
 0x263   :  { %4549 = vmatpush1.bf16.msra.mxu0 %v5128_v48  ;;  %v5178_v48 = vcombine.low %v1187_v28, %v1191_v30  ;;  %v1235_v28 = vld [vmem:[#allocation8 + $0x458] sm:$0xff] }
 0x264   :  { %4713 = vmatpush1.bf16.msra.mxu1 %v5130_v3  ;;  %4550 = vmatprep.subr.bf16.mxu0 %v5137_v49  ;;  %v5185_v3 = vcombine.high %v1194_v38, %v1198_v39  ;;  %v5187_v49 = vcombine.high %v1195_v41, %v1199_v45  ;;  %v1239_v30 = vld [vmem:[#allocation8 + $0x478] sm:$0xff] }
 0x265   :  { %4714 = vmatprep.subr.bf16.mxu1 %v5139_v24  ;;  %v1202_v24 = vld [vmem:[#allocation8 + $0x350] sm:$0xff]  ;;  %v5227_v38 = vcombine.high %v1235_v28, %v1239_v30  ;;  %v1243_v39 = vld [vmem:[#allocation8 + $0x498] sm:$0xff] }
 0x266   :  { %v5192_v60 = vcombine.low %v1202_v24, %v1206_v50 }
 0x267   :  { %4551 = vmatpush1.bf16.msra.mxu0 %v5136_v53  ;;  %v5186_v53 = vcombine.low %v1195_v41, %v1199_v45  ;;  %v1247_v41 = vld [vmem:[#allocation8 + $0x4b8] sm:$0xff] }
 0x268   :  { %4715 = vmatpush1.bf16.msra.mxu1 %v5138_v54  ;;  %4552 = vmatprep.subr.bf16.mxu0 %v5145_v57  ;;  %v5193_v54 = vcombine.high %v1202_v24, %v1206_v50  ;;  %v5195_v57 = vcombine.high %v1203_v51, %v1207_v52  ;;  %v1254_v24 = vld [vmem:[#allocation8 + $0x4f0] sm:$0xff]  ;;  %v1251_v50 = vld [vmem:[#allocation8 + $0x4d8] sm:$0xff] }
 0x269   :  { %4716 = vmatprep.subr.bf16.mxu1 %v5147_v58  ;;  %v1210_v58 = vld [vmem:[#allocation8 + $0x390] sm:$0xff] }
 0x26a   :  { %v5200_v2 = vcombine.low %v1210_v58, %v1214_v26 }
 0x26b   :  { %4553 = vmatpush1.bf16.msra.mxu0 %v5144_v62  ;;  %v5194_v62 = vcombine.low %v1203_v51, %v1207_v52  ;;  %v1255_v51 = vld [vmem:[#allocation8 + $0x4f8] sm:$0xff] }
 0x26c   :  { %4717 = vmatpush1.bf16.msra.mxu1 %v5146_v63  ;;  %4554 = vmatprep.subr.bf16.mxu0 %v5153_v4  ;;  %v5201_v63 = vcombine.high %v1210_v58, %v1214_v26  ;;  %v5203_v4 = vcombine.high %v1211_v59, %v1215_v0  ;;  %v1259_v58 = vld [vmem:[#allocation8 + $0x518] sm:$0xff] }
 0x26d   :  { %4718 = vmatprep.subr.bf16.mxu1 %v5155_v8  ;;  %v1218_v8 = vld [vmem:[#allocation8 + $0x3d0] sm:$0xff]  ;;  %v1263_v26 = vld [vmem:[#allocation8 + $0x538] sm:$0xff] }
 0x26e   :  { %v5208_v43 = vcombine.low %v1218_v8, %v1222_v55 }
 0x26f   :  { %4555 = vmatpush1.bf16.msra.mxu0 %v5152_v5  ;;  %v5202_v5 = vcombine.low %v1211_v59, %v1215_v0  ;;  %v5242_v59 = vcombine.low %v1251_v50, %v1255_v51 }
 0x270   :  { %4719 = vmatpush1.bf16.msra.mxu1 %v5154_v6  ;;  %4556 = vmatprep.subr.bf16.mxu0 %v5161_v10  ;;  %v5209_v6 = vcombine.high %v1218_v8, %v1222_v55  ;;  %v5211_v10 = vcombine.high %v1219_v61, %v1223_v40  ;;  %v1271_v8 = vld [vmem:[#allocation8 + $0x578] sm:$0xff] }
 0x271   :  { %4720 = vmatprep.subr.bf16.mxu1 %v5163_v11  ;;  %v1226_v11 = vld [vmem:[#allocation8 + $0x410] sm:$0xff] }
 0x272   :  { %v5216_v22 = vcombine.low %v1226_v11, %v1230_v13 }
 0x273   :  { %4557 = vmatpush1.bf16.msra.mxu0 %v5160_v18  ;;  %v5210_v18 = vcombine.low %v1219_v61, %v1223_v40  ;;  %v5250_v61 = vcombine.low %v1259_v58, %v1263_v26 }
 0x274   :  { %4721 = vmatpush1.bf16.msra.mxu1 %v5162_v19  ;;  %4558 = vmatprep.subr.bf16.mxu0 %v5169_v20  ;;  %v5217_v19 = vcombine.high %v1226_v11, %v1230_v13  ;;  %v5219_v20 = vcombine.high %v1227_v14, %v1231_v17  ;;  %v1279_v11 = vld [vmem:[#allocation8 + $0x5b8] sm:$0xff] }
 0x275   :  { %4722 = vmatprep.subr.bf16.mxu1 %v5171_v23  ;;  %v1234_v23 = vld [vmem:[#allocation8 + $0x450] sm:$0xff] }
 0x276   :  { %v5224_v45 = vcombine.low %v1234_v23, %v1238_v21 }
 0x277   :  { %4559 = vmatpush1.bf16.msra.mxu0 %v5168_v33  ;;  %v5218_v33 = vcombine.low %v1227_v14, %v1231_v17 }
 0x278   :  { %4723 = vmatpush1.bf16.msra.mxu1 %v5170_v34  ;;  %4560 = vmatprep.subr.bf16.mxu0 %v5177_v35  ;;  %v5225_v34 = vcombine.high %v1234_v23, %v1238_v21  ;;  %v1242_v35 = vld [vmem:[#allocation8 + $0x490] sm:$0xff]  ;;  %v1287_v23 = vld [vmem:[#allocation8 + $0x5f8] sm:$0xff] }
 0x279   :  { %4724 = vmatprep.subr.bf16.mxu1 %v5179_v37  ;;  %v1246_v37 = vld [vmem:[#allocation8 + $0x4b0] sm:$0xff] }
 0x27a   :  { %v5232_v52 = vcombine.low %v1242_v35, %v1246_v37 }
 0x27b   :  { %4561 = vmatpush1.bf16.msra.mxu0 %v5176_v46  ;;  %v5226_v46 = vcombine.low %v1235_v28, %v1239_v30 }
 0x27c   :  { %4725 = vmatpush1.bf16.msra.mxu1 %v5178_v48  ;;  %4562 = vmatprep.subr.bf16.mxu0 %v5185_v3  ;;  %v5233_v48 = vcombine.high %v1242_v35, %v1246_v37  ;;  %v5235_v3 = vcombine.high %v1243_v39, %v1247_v41  ;;  %v1291_v35 = vld [vmem:[#allocation8 + $0x618] sm:$0xff] }
 0x27d   :  { %4726 = vmatprep.subr.bf16.mxu1 %v5187_v49  ;;  %v1250_v49 = vld [vmem:[#allocation8 + $0x4d0] sm:$0xff]  ;;  %v1295_v37 = vld [vmem:[#allocation8 + $0x638] sm:$0xff] }
 0x27f   :  { %4563 = vmatpush1.bf16.msra.mxu0 %v5184_v36  ;;  %v5241_v36 = vcombine.high %v1250_v49, %v1254_v24 }
 0x280   :  { %4727 = vmatpush1.bf16.msra.mxu1 %v5186_v53  ;;  %4564 = vmatprep.subr.bf16.mxu0 %v5193_v54  ;;  %v5243_v53 = vcombine.high %v1251_v50, %v1255_v51  ;;  %v1258_v54 = vld [vmem:[#allocation8 + $0x510] sm:$0xff]  ;;  %v5282_v50 = vcombine.low %v1291_v35, %v1295_v37 }
 0x281   :  { %4728 = vmatprep.subr.bf16.mxu1 %v5195_v57  ;;  %v1262_v57 = vld [vmem:[#allocation8 + $0x530] sm:$0xff] }
 0x282   :  { %v5249_v0 = vcombine.high %v1258_v54, %v1262_v57  ;;  %v5248_v55 = vcombine.low %v1258_v54, %v1262_v57  ;;  %v1311_v54 = vld [vmem:[#allocation8 + $0x6b8] sm:$0xff] }
 0x283   :  { %4565 = vmatpush1.bf16.msra.mxu0 %v5192_v60  ;;  %v5251_v60 = vcombine.high %v1259_v58, %v1263_v26 }
 0x284   :  { %4729 = vmatpush1.bf16.msra.mxu1 %v5194_v62  ;;  %4566 = vmatprep.subr.bf16.mxu0 %v5201_v63  ;;  %v1266_v62 = vld [vmem:[#allocation8 + $0x550] sm:$0xff] }
 0x285   :  { %4730 = vmatprep.subr.bf16.mxu1 %v5203_v4  ;;  %v1270_v63 = vld [vmem:[#allocation8 + $0x570] sm:$0xff]  ;;  %v1267_v4 = vld [vmem:[#allocation8 + $0x558] sm:$0xff] }
 0x286   :  { %v5257_v40 = vcombine.high %v1266_v62, %v1270_v63  ;;  %v5256_v13 = vcombine.low %v1266_v62, %v1270_v63  ;;  %v5258_v14 = vcombine.low %v1267_v4, %v1271_v8  ;;  %v1319_v62 = vld [vmem:[#allocation8 + $0x6f8] sm:$0xff] }
 0x287   :  { %4567 = vmatpush1.bf16.msra.mxu0 %v5200_v2  ;;  %v5259_v2 = vcombine.high %v1267_v4, %v1271_v8 }
 0x288   :  { %4731 = vmatpush1.bf16.msra.mxu1 %v5202_v5  ;;  %4568 = vmatprep.subr.bf16.mxu0 %v5209_v6  ;;  %v1274_v5 = vld [vmem:[#allocation8 + $0x590] sm:$0xff] }
 0x289   :  { %4732 = vmatprep.subr.bf16.mxu1 %v5211_v10  ;;  %v1278_v6 = vld [vmem:[#allocation8 + $0x5b0] sm:$0xff]  ;;  %v1275_v10 = vld [vmem:[#allocation8 + $0x598] sm:$0xff] }
 0x28a   :  { %v5265_v17 = vcombine.high %v1274_v5, %v1278_v6  ;;  %v5264_v21 = vcombine.low %v1274_v5, %v1278_v6  ;;  %v1327_v5 = vld [vmem:[#allocation8 + $0x738] sm:$0xff] }
 0x28b   :  { %4569 = vmatpush1.bf16.msra.mxu0 %v5208_v43  ;;  %v5267_v43 = vcombine.high %v1275_v10, %v1279_v11 }
 0x28c   :  { %4733 = vmatpush1.bf16.msra.mxu1 %v5210_v18  ;;  %4579 = vmatprep.subr.bf16.mxu0 %v5217_v19  ;;  %v1282_v18 = vld [vmem:[#allocation8 + $0x5d0] sm:$0xff] }
 0x28d   :  { %4743 = vmatprep.subr.bf16.mxu1 %v5219_v20  ;;  %v1286_v19 = vld [vmem:[#allocation8 + $0x5f0] sm:$0xff]  ;;  %v1283_v20 = vld [vmem:[#allocation8 + $0x5d8] sm:$0xff] }
 0x28e   :  { %4571 = vmatmul.mubr.bf16.vlgmr.msra.gmra.mrb[12].mxu0 %v5976_v44  ;;  %v5273_v28 = vcombine.high %v1282_v18, %v1286_v19  ;;  %v5275_v30 = vcombine.high %v1283_v20, %v1287_v23 }
 0x28f   :  { %4735 = vmatmul.mubr.bf16.vlgmr.msra.gmra.mrb[12].mxu1 %v5976_v44  ;;  %4580 = vmatpush1.bf16.msra.mxu0 %v5216_v22  ;;  %v5234_v44 = vcombine.low %v1243_v39, %v1247_v41  ;;  %v5266_v22 = vcombine.low %v1275_v10, %v1279_v11  ;;  %v5274_v39 = vcombine.low %v1283_v20, %v1287_v23 }
 0x290   :  { %4611 = vmatprep.mubr.bf16.mxu0 %v5992_v7  ;;  %4744 = vmatpush1.bf16.msra.mxu1 %v5218_v33  ;;  %v1290_v33 = vld [vmem:[#allocation8 + $0x610] sm:$0xff] }
 0x291   :  { %4775 = vmatprep.mubr.bf16.mxu1 %v5992_v7  ;;  %4581 = vmatprep.subr.bf16.mxu0 %v5225_v34  ;;  %v5240_v7 = vcombine.low %v1250_v49, %v1254_v24  ;;  %v1294_v34 = vld [vmem:[#allocation8 + $0x630] sm:$0xff]  ;;  %v1303_v49 = vld [vmem:[#allocation8 + $0x678] sm:$0xff] }
 0x292   :  { %4745 = vmatprep.subr.bf16.mxu1 %v5227_v38  ;;  %v5272_v38 = vcombine.low %v1282_v18, %v1286_v19  ;;  %v5281_v41 = vcombine.high %v1290_v33, %v1294_v34  ;;  %v5280_v24 = vcombine.low %v1290_v33, %v1294_v34  ;;  %v1335_v18 = vld [vmem:[#allocation8 + $0x778] sm:$0xff] }
 0x293   :  { %4582 = vmatpush1.bf16.msra.mxu0 %v5224_v45  ;;  %v5283_v45 = vcombine.high %v1291_v35, %v1295_v37  ;;  %v1343_v33 = vld [vmem:[#allocation8 + $0x7b8] sm:$0xff] }
 0x294   :  { %4746 = vmatpush1.bf16.msra.mxu1 %v5226_v46  ;;  %4583 = vmatprep.subr.bf16.mxu0 %v5233_v48  ;;  %v1298_v46 = vld [vmem:[#allocation8 + $0x650] sm:$0xff] }
 0x295   :  { %4747 = vmatprep.subr.bf16.mxu1 %v5235_v3  ;;  %v1302_v48 = vld [vmem:[#allocation8 + $0x670] sm:$0xff]  ;;  %v1299_v3 = vld [vmem:[#allocation8 + $0x658] sm:$0xff] }
 0x296   :  { %v5289_v51 = vcombine.high %v1298_v46, %v1302_v48  ;;  %v5288_v57 = vcombine.low %v1298_v46, %v1302_v48  ;;  %v5290_v58 = vcombine.low %v1299_v3, %v1303_v49  ;;  %v1351_v46 = vld [vmem:[#allocation8 + $0x7f8] sm:$0xff] }
 0x297   :  { %4584 = vmatpush1.bf16.msra.mxu0 %v5232_v52  ;;  %v5291_v52 = vcombine.high %v1299_v3, %v1303_v49 }
 0x298   :  { %4748 = vmatpush1.bf16.msra.mxu1 %v5234_v44  ;;  %4585 = vmatprep.subr.bf16.mxu0 %v5241_v36  ;;  %v1306_v44 = vld [vmem:[#allocation8 + $0x690] sm:$0xff] }
 0x299   :  { %4749 = vmatprep.subr.bf16.mxu1 %v5243_v53  ;;  %v1310_v36 = vld [vmem:[#allocation8 + $0x6b0] sm:$0xff]  ;;  %v1307_v53 = vld [vmem:[#allocation8 + $0x698] sm:$0xff] }
 0x29a   :  { %v5297_v26 = vcombine.high %v1306_v44, %v1310_v36  ;;  %v5296_v63 = vcombine.low %v1306_v44, %v1310_v36  ;;  %v5298_v4 = vcombine.low %v1307_v53, %v1311_v54  ;;  %v1359_v44 = vld [vmem:[#allocation8 + $0x838] sm:$0xff] }
 0x29b   :  { %4586 = vmatpush1.bf16.msra.mxu0 %v5240_v7  ;;  %v5299_v7 = vcombine.high %v1307_v53, %v1311_v54 }
 0x29c   :  { %4750 = vmatpush1.bf16.msra.mxu1 %v5242_v59  ;;  %4587 = vmatprep.subr.bf16.mxu0 %v5249_v0  ;;  %v1314_v59 = vld [vmem:[#allocation8 + $0x6d0] sm:$0xff] }
 0x29d   :  { %4751 = vmatprep.subr.bf16.mxu1 %v5251_v60  ;;  %v1318_v0 = vld [vmem:[#allocation8 + $0x6f0] sm:$0xff]  ;;  %v1315_v60 = vld [vmem:[#allocation8 + $0x6d8] sm:$0xff] }
 0x29e   :  { %v5305_v8 = vcombine.high %v1314_v59, %v1318_v0  ;;  %v5304_v6 = vcombine.low %v1314_v59, %v1318_v0  ;;  %v5306_v10 = vcombine.low %v1315_v60, %v1319_v62  ;;  %v1363_v59 = vld [vmem:[#allocation8 + $0x858] sm:$0xff] }
 0x29f   :  { %4588 = vmatpush1.bf16.msra.mxu0 %v5248_v55  ;;  %v5307_v55 = vcombine.high %v1315_v60, %v1319_v62  ;;  %v1367_v0 = vld [vmem:[#allocation8 + $0x878] sm:$0xff] }
 0x2a0   :  { %4752 = vmatpush1.bf16.msra.mxu1 %v5250_v61  ;;  %4589 = vmatprep.subr.bf16.mxu0 %v5257_v40  ;;  %v1322_v61 = vld [vmem:[#allocation8 + $0x710] sm:$0xff] }
 0x2a1   :  { %4753 = vmatprep.subr.bf16.mxu1 %v5259_v2  ;;  %v1326_v40 = vld [vmem:[#allocation8 + $0x730] sm:$0xff]  ;;  %v1323_v2 = vld [vmem:[#allocation8 + $0x718] sm:$0xff] }
 0x2a2   :  { %v5313_v11 = vcombine.high %v1322_v61, %v1326_v40  ;;  %v5312_v19 = vcombine.low %v1322_v61, %v1326_v40  ;;  %v5314_v20 = vcombine.low %v1323_v2, %v1327_v5  ;;  %v1375_v61 = vld [vmem:[#allocation8 + $0x8b8] sm:$0xff] }
 0x2a3   :  { %4590 = vmatpush1.bf16.msra.mxu0 %v5256_v13  ;;  %v5315_v13 = vcombine.high %v1323_v2, %v1327_v5  ;;  %v5354_v2 = vcombine.low %v1363_v59, %v1367_v0 }
 0x2a4   :  { %4754 = vmatpush1.bf16.msra.mxu1 %v5258_v14  ;;  %4591 = vmatprep.subr.bf16.mxu0 %v5265_v17  ;;  %v1330_v14 = vld [vmem:[#allocation8 + $0x750] sm:$0xff] }
 0x2a5   :  { %4755 = vmatprep.subr.bf16.mxu1 %v5267_v43  ;;  %v1334_v17 = vld [vmem:[#allocation8 + $0x770] sm:$0xff]  ;;  %v1331_v43 = vld [vmem:[#allocation8 + $0x758] sm:$0xff] }
 0x2a6   :  { %v5321_v23 = vcombine.high %v1330_v14, %v1334_v17  ;;  %v5320_v34 = vcombine.low %v1330_v14, %v1334_v17  ;;  %v5322_v35 = vcombine.low %v1331_v43, %v1335_v18  ;;  %v1383_v14 = vld [vmem:[#allocation8 + $0x8f8] sm:$0xff] }
 0x2a7   :  { %4592 = vmatpush1.bf16.msra.mxu0 %v5264_v21  ;;  %v5323_v21 = vcombine.high %v1331_v43, %v1335_v18 }
 0x2a8   :  { %4756 = vmatpush1.bf16.msra.mxu1 %v5266_v22  ;;  %4593 = vmatprep.subr.bf16.mxu0 %v5273_v28  ;;  %v1338_v22 = vld [vmem:[#allocation8 + $0x790] sm:$0xff] }
 0x2a9   :  { %4757 = vmatprep.subr.bf16.mxu1 %v5275_v30  ;;  %v1342_v28 = vld [vmem:[#allocation8 + $0x7b0] sm:$0xff]  ;;  %v1339_v30 = vld [vmem:[#allocation8 + $0x798] sm:$0xff] }
 0x2aa   :  { %v5329_v37 = vcombine.high %v1338_v22, %v1342_v28  ;;  %v5328_v48 = vcombine.low %v1338_v22, %v1342_v28  ;;  %v5330_v3 = vcombine.low %v1339_v30, %v1343_v33 }
 0x2ab   :  { %4594 = vmatpush1.bf16.msra.mxu0 %v5272_v38  ;;  %v5331_v38 = vcombine.high %v1339_v30, %v1343_v33  ;;  %v1394_v33 = vld [vmem:[#allocation8 + $0x950] sm:$0xff] }
 0x2ac   :  { %4758 = vmatpush1.bf16.msra.mxu1 %v5274_v39  ;;  %4595 = vmatprep.subr.bf16.mxu0 %v5281_v41  ;;  %v1346_v39 = vld [vmem:[#allocation8 + $0x7d0] sm:$0xff] }
 0x2ad   :  { %4759 = vmatprep.subr.bf16.mxu1 %v5283_v45  ;;  %v1350_v41 = vld [vmem:[#allocation8 + $0x7f0] sm:$0xff]  ;;  %v1347_v45 = vld [vmem:[#allocation8 + $0x7d8] sm:$0xff] }
 0x2ae   :  { %v5337_v49 = vcombine.high %v1346_v39, %v1350_v41  ;;  %v5336_v36 = vcombine.low %v1346_v39, %v1350_v41  ;;  %v5338_v53 = vcombine.low %v1347_v45, %v1351_v46 }
 0x2af   :  { %4596 = vmatpush1.bf16.msra.mxu0 %v5280_v24  ;;  %v5339_v24 = vcombine.high %v1347_v45, %v1351_v46  ;;  %v1402_v46 = vld [vmem:[#allocation8 + $0x990] sm:$0xff] }
 0x2b0   :  { %4760 = vmatpush1.bf16.msra.mxu1 %v5282_v50  ;;  %4597 = vmatprep.subr.bf16.mxu0 %v5289_v51  ;;  %v1354_v50 = vld [vmem:[#allocation8 + $0x810] sm:$0xff] }
 0x2b1   :  { %4761 = vmatprep.subr.bf16.mxu1 %v5291_v52  ;;  %v1358_v51 = vld [vmem:[#allocation8 + $0x830] sm:$0xff]  ;;  %v1355_v52 = vld [vmem:[#allocation8 + $0x818] sm:$0xff] }
 0x2b2   :  { %v5345_v54 = vcombine.high %v1354_v50, %v1358_v51  ;;  %v5346_v60 = vcombine.low %v1355_v52, %v1359_v44 }
 0x2b3   :  { %4598 = vmatpush1.bf16.msra.mxu0 %v5288_v57  ;;  %v5347_v57 = vcombine.high %v1355_v52, %v1359_v44  ;;  %v1410_v44 = vld [vmem:[#allocation8 + $0x9d0] sm:$0xff] }
 0x2b4   :  { %4762 = vmatpush1.bf16.msra.mxu1 %v5290_v58  ;;  %4599 = vmatprep.subr.bf16.mxu0 %v5297_v26  ;;  %v1362_v58 = vld [vmem:[#allocation8 + $0x850] sm:$0xff] }
 0x2b5   :  { %4763 = vmatprep.subr.bf16.mxu1 %v5299_v7  ;;  %v1366_v26 = vld [vmem:[#allocation8 + $0x870] sm:$0xff]  ;;  %v5344_v7 = vcombine.low %v1354_v50, %v1358_v51 }
 0x2b6   :  { %v5353_v62 = vcombine.high %v1362_v58, %v1366_v26  ;;  %v5352_v40 = vcombine.low %v1362_v58, %v1366_v26 }
 0x2b7   :  { %4600 = vmatpush1.bf16.msra.mxu0 %v5296_v63  ;;  %v1370_v63 = vld [vmem:[#allocation8 + $0x890] sm:$0xff] }
 0x2b8   :  { %4764 = vmatpush1.bf16.msra.mxu1 %v5298_v4  ;;  %4601 = vmatprep.subr.bf16.mxu0 %v5305_v8  ;;  %v1374_v4 = vld [vmem:[#allocation8 + $0x8b0] sm:$0xff]  ;;  %v5355_v8 = vcombine.high %v1363_v59, %v1367_v0 }
 0x2b9   :  { %4765 = vmatprep.subr.bf16.mxu1 %v5307_v55  ;;  %v1371_v55 = vld [vmem:[#allocation8 + $0x898] sm:$0xff]  ;;  %v5361_v5 = vcombine.high %v1370_v63, %v1374_v4  ;;  %v5360_v17 = vcombine.low %v1370_v63, %v1374_v4  ;;  %v1418_v59 = vld [vmem:[#allocation8 + $0xa10] sm:$0xff] }
 0x2ba   :  { %v1422_v0 = vld [vmem:[#allocation8 + $0xa30] sm:$0xff] }
 0x2bb   :  { %4602 = vmatpush1.bf16.msra.mxu0 %v5304_v6  ;;  %v5363_v6 = vcombine.high %v1371_v55, %v1375_v61 }
 0x2bc   :  { %4766 = vmatpush1.bf16.msra.mxu1 %v5306_v10  ;;  %4603 = vmatprep.subr.bf16.mxu0 %v5313_v11  ;;  %v1378_v10 = vld [vmem:[#allocation8 + $0x8d0] sm:$0xff] }
 0x2bd   :  { %4767 = vmatprep.subr.bf16.mxu1 %v5315_v13  ;;  %v1382_v11 = vld [vmem:[#allocation8 + $0x8f0] sm:$0xff]  ;;  %v1379_v13 = vld [vmem:[#allocation8 + $0x8d8] sm:$0xff] }
 0x2be   :  { %v5369_v43 = vcombine.high %v1378_v10, %v1382_v11  ;;  %v5371_v18 = vcombine.high %v1379_v13, %v1383_v14  ;;  %v5370_v22 = vcombine.low %v1379_v13, %v1383_v14  ;;  %v1434_v14 = vld [vmem:[#allocation8 + $0xa90] sm:$0xff] }
 0x2bf   :  { %4604 = vmatpush1.bf16.msra.mxu0 %v5312_v19  ;;  %v1386_v19 = vld [vmem:[#allocation8 + $0x910] sm:$0xff] }
 0x2c0   :  { %4768 = vmatpush1.bf16.msra.mxu1 %v5314_v20  ;;  %4605 = vmatprep.subr.bf16.mxu0 %v5321_v23  ;;  %v1390_v20 = vld [vmem:[#allocation8 + $0x930] sm:$0xff]  ;;  %v1387_v23 = vld [vmem:[#allocation8 + $0x918] sm:$0xff] }
 0x2c1   :  { %4769 = vmatprep.subr.bf16.mxu1 %v5323_v21  ;;  %v1391_v21 = vld [vmem:[#allocation8 + $0x938] sm:$0xff]  ;;  %v5377_v28 = vcombine.high %v1386_v19, %v1390_v20 }
 0x2c2   :  { %v5379_v30 = vcombine.high %v1387_v23, %v1391_v21  ;;  %v5378_v39 = vcombine.low %v1387_v23, %v1391_v21  ;;  %v1442_v21 = vld [vmem:[#allocation8 + $0xad0] sm:$0xff] }
 0x2c3   :  { %4606 = vmatpush1.bf16.msra.mxu0 %v5320_v34  ;;  %v1398_v34 = vld [vmem:[#allocation8 + $0x970] sm:$0xff] }
 0x2c4   :  { %4770 = vmatpush1.bf16.msra.mxu1 %v5322_v35  ;;  %4607 = vmatprep.subr.bf16.mxu0 %v5329_v37  ;;  %v1395_v35 = vld [vmem:[#allocation8 + $0x958] sm:$0xff]  ;;  %v5385_v41 = vcombine.high %v1394_v33, %v1398_v34 }
 0x2c5   :  { %4771 = vmatprep.subr.bf16.mxu1 %v5331_v38  ;;  %v1399_v37 = vld [vmem:[#allocation8 + $0x978] sm:$0xff]  ;;  %v5376_v38 = vcombine.low %v1386_v19, %v1390_v20 }
 0x2c6   :  { %v5387_v45 = vcombine.high %v1395_v35, %v1399_v37  ;;  %v5386_v50 = vcombine.low %v1395_v35, %v1399_v37  ;;  %v1450_v37 = vld [vmem:[#allocation8 + $0xb10] sm:$0xff] }
 0x2c7   :  { %4608 = vmatpush1.bf16.msra.mxu0 %v5328_v48  ;;  %v1406_v48 = vld [vmem:[#allocation8 + $0x9b0] sm:$0xff] }
 0x2c8   :  { %4772 = vmatpush1.bf16.msra.mxu1 %v5330_v3  ;;  %4609 = vmatprep.subr.bf16.mxu0 %v5337_v49  ;;  %v1403_v3 = vld [vmem:[#allocation8 + $0x998] sm:$0xff]  ;;  %v5393_v51 = vcombine.high %v1402_v46, %v1406_v48 }
 0x2c9   :  { %4773 = vmatprep.subr.bf16.mxu1 %v5339_v24  ;;  %v1407_v49 = vld [vmem:[#allocation8 + $0x9b8] sm:$0xff]  ;;  %v5384_v24 = vcombine.low %v1394_v33, %v1398_v34 }
 0x2ca   :  { %v5395_v52 = vcombine.high %v1403_v3, %v1407_v49  ;;  %v5394_v58 = vcombine.low %v1403_v3, %v1407_v49  ;;  %v1458_v49 = vld [vmem:[#allocation8 + $0xb50] sm:$0xff] }
 0x2cb   :  { %4610 = vmatpush1.bf16.msra.mxu0 %v5336_v36  ;;  %v1414_v36 = vld [vmem:[#allocation8 + $0x9f0] sm:$0xff] }
 0x2cc   :  { %4774 = vmatpush1.bf16.msra.mxu1 %v5338_v53  ;;  %4620 = vmatprep.subr.bf16.mxu0 %v5345_v54  ;;  %v1411_v53 = vld [vmem:[#allocation8 + $0x9d8] sm:$0xff]  ;;  %v5401_v26 = vcombine.high %v1410_v44, %v1414_v36  ;;  %v5400_v63 = vcombine.low %v1410_v44, %v1414_v36 }
 0x2cd   :  { %4784 = vmatprep.subr.bf16.mxu1 %v5347_v57  ;;  %v1415_v54 = vld [vmem:[#allocation8 + $0x9f8] sm:$0xff]  ;;  %v5392_v57 = vcombine.low %v1402_v46, %v1406_v48 }
 0x2ce   :  { %4612 = vmatmul.mubr.bf16.vlgmr.msra.gmra.mrb[12].mxu0 %v6009_v15  ;;  %v5402_v4 = vcombine.low %v1411_v53, %v1415_v54 }
 0x2cf   :  { %4776 = vmatmul.mubr.bf16.vlgmr.msra.gmra.mrb[12].mxu1 %v6009_v15  ;;  %4621 = vmatpush1.bf16.msra.mxu0 %v5344_v7  ;;  %v5362_v15 = vcombine.low %v1371_v55, %v1375_v61  ;;  %v5403_v7 = vcombine.high %v1411_v53, %v1415_v54  ;;  %v1426_v61 = vld [vmem:[#allocation8 + $0xa50] sm:$0xff] }
 0x2d0   :  { %4652 = vmatprep.mubr.bf16.mxu0 %v6011_v29  ;;  %4785 = vmatpush1.bf16.msra.mxu1 %v5346_v60  ;;  %v1419_v60 = vld [vmem:[#allocation8 + $0xa18] sm:$0xff]  ;;  %v1466_v54 = vld [vmem:[#allocation8 + $0xb90] sm:$0xff] }
 0x2d1   :  { %4816 = vmatprep.mubr.bf16.mxu1 %v6011_v29  ;;  %4622 = vmatprep.subr.bf16.mxu0 %v5353_v62  ;;  %v5368_v29 = vcombine.low %v1378_v10, %v1382_v11  ;;  %v1423_v62 = vld [vmem:[#allocation8 + $0xa38] sm:$0xff] }
 0x2d2   :  { %4786 = vmatprep.subr.bf16.mxu1 %v5355_v8  ;;  %v5409_v8 = vcombine.high %v1418_v59, %v1422_v0  ;;  %v5411_v55 = vcombine.high %v1419_v60, %v1423_v62  ;;  %v5410_v10 = vcombine.low %v1419_v60, %v1423_v62  ;;  %v1474_v62 = vld [vmem:[#allocation8 + $0xbd0] sm:$0xff] }
 0x2d3   :  { %4623 = vmatpush1.bf16.msra.mxu0 %v5352_v40  ;;  %v1430_v40 = vld [vmem:[#allocation8 + $0xa70] sm:$0xff] }
 0x2d4   :  { %4787 = vmatpush1.bf16.msra.mxu1 %v5354_v2  ;;  %4624 = vmatprep.subr.bf16.mxu0 %v5361_v5  ;;  %v1427_v2 = vld [vmem:[#allocation8 + $0xa58] sm:$0xff]  ;;  %v5417_v11 = vcombine.high %v1426_v61, %v1430_v40 }
 0x2d5   :  { %4788 = vmatprep.subr.bf16.mxu1 %v5363_v6  ;;  %v1431_v5 = vld [vmem:[#allocation8 + $0xa78] sm:$0xff]  ;;  %v5408_v6 = vcombine.low %v1418_v59, %v1422_v0 }
 0x2d6   :  { %v5419_v13 = vcombine.high %v1427_v2, %v1431_v5  ;;  %v5418_v19 = vcombine.low %v1427_v2, %v1431_v5  ;;  %v1482_v5 = vld [vmem:[#allocation8 + $0xc10] sm:$0xff] }
 0x2d7   :  { %4625 = vmatpush1.bf16.msra.mxu0 %v5360_v17  ;;  %v1438_v17 = vld [vmem:[#allocation8 + $0xab0] sm:$0xff] }
 0x2d8   :  { %4789 = vmatpush1.bf16.msra.mxu1 %v5362_v15  ;;  %4626 = vmatprep.subr.bf16.mxu0 %v5369_v43  ;;  %v1435_v15 = vld [vmem:[#allocation8 + $0xa98] sm:$0xff]  ;;  %v5425_v20 = vcombine.high %v1434_v14, %v1438_v17 }
 0x2d9   :  { %4790 = vmatprep.subr.bf16.mxu1 %v5371_v18  ;;  %v1439_v43 = vld [vmem:[#allocation8 + $0xab8] sm:$0xff]  ;;  %v5416_v18 = vcombine.low %v1426_v61, %v1430_v40 }
 0x2da   :  { %v5427_v23 = vcombine.high %v1435_v15, %v1439_v43  ;;  %v5426_v33 = vcombine.low %v1435_v15, %v1439_v43  ;;  %v1490_v43 = vld [vmem:[#allocation8 + $0xc50] sm:$0xff] }
 0x2db   :  { %4627 = vmatpush1.bf16.msra.mxu0 %v5368_v29  ;;  %v1446_v29 = vld [vmem:[#allocation8 + $0xaf0] sm:$0xff] }
 0x2dc   :  { %4791 = vmatpush1.bf16.msra.mxu1 %v5370_v22  ;;  %4628 = vmatprep.subr.bf16.mxu0 %v5377_v28  ;;  %v1443_v22 = vld [vmem:[#allocation8 + $0xad8] sm:$0xff]  ;;  %v5433_v34 = vcombine.high %v1442_v21, %v1446_v29 }
 0x2dd   :  { %4792 = vmatprep.subr.bf16.mxu1 %v5379_v30  ;;  %v1447_v28 = vld [vmem:[#allocation8 + $0xaf8] sm:$0xff]  ;;  %v5424_v30 = vcombine.low %v1434_v14, %v1438_v17 }
 0x2de   :  { %v5435_v35 = vcombine.high %v1443_v22, %v1447_v28  ;;  %v5434_v46 = vcombine.low %v1443_v22, %v1447_v28  ;;  %v1498_v22 = vld [vmem:[#allocation8 + $0xc90] sm:$0xff] }
 0x2df   :  { %4629 = vmatpush1.bf16.msra.mxu0 %v5376_v38  ;;  %v1454_v38 = vld [vmem:[#allocation8 + $0xb30] sm:$0xff] }
 0x2e0   :  { %4793 = vmatpush1.bf16.msra.mxu1 %v5378_v39  ;;  %4630 = vmatprep.subr.bf16.mxu0 %v5385_v41  ;;  %v1451_v39 = vld [vmem:[#allocation8 + $0xb18] sm:$0xff]  ;;  %v5441_v48 = vcombine.high %v1450_v37, %v1454_v38  ;;  %v1502_v28 = vld [vmem:[#allocation8 + $0xcb0] sm:$0xff] }
 0x2e1   :  { %4794 = vmatprep.subr.bf16.mxu1 %v5387_v45  ;;  %v1455_v41 = vld [vmem:[#allocation8 + $0xb38] sm:$0xff]  ;;  %v5432_v45 = vcombine.low %v1442_v21, %v1446_v29 }
 0x2e2   :  { %v5443_v3 = vcombine.high %v1451_v39, %v1455_v41  ;;  %v5442_v44 = vcombine.low %v1451_v39, %v1455_v41  ;;  %v1506_v41 = vld [vmem:[#allocation8 + $0xcd0] sm:$0xff] }
 0x2e3   :  { %4631 = vmatpush1.bf16.msra.mxu0 %v5384_v24  ;;  %v1462_v24 = vld [vmem:[#allocation8 + $0xb70] sm:$0xff] }
 0x2e4   :  { %4795 = vmatpush1.bf16.msra.mxu1 %v5386_v50  ;;  %4632 = vmatprep.subr.bf16.mxu0 %v5393_v51  ;;  %v1459_v50 = vld [vmem:[#allocation8 + $0xb58] sm:$0xff]  ;;  %v5449_v36 = vcombine.high %v1458_v49, %v1462_v24 }
 0x2e5   :  { %4796 = vmatprep.subr.bf16.mxu1 %v5395_v52  ;;  %v1463_v51 = vld [vmem:[#allocation8 + $0xb78] sm:$0xff]  ;;  %v5440_v52 = vcombine.low %v1450_v37, %v1454_v38  ;;  %v5489_v38 = vcombine.high %v1498_v22, %v1502_v28 }
 0x2e6   :  { %v5451_v53 = vcombine.high %v1459_v50, %v1463_v51  ;;  %v5450_v59 = vcombine.low %v1459_v50, %v1463_v51  ;;  %v1514_v50 = vld [vmem:[#allocation8 + $0xd10] sm:$0xff] }
 0x2e7   :  { %4633 = vmatpush1.bf16.msra.mxu0 %v5392_v57  ;;  %v1470_v57 = vld [vmem:[#allocation8 + $0xbb0] sm:$0xff] }
 0x2e8   :  { %4797 = vmatpush1.bf16.msra.mxu1 %v5394_v58  ;;  %4634 = vmatprep.subr.bf16.mxu0 %v5401_v26  ;;  %v1467_v58 = vld [vmem:[#allocation8 + $0xb98] sm:$0xff]  ;;  %v5457_v0 = vcombine.high %v1466_v54, %v1470_v57  ;;  %v1518_v51 = vld [vmem:[#allocation8 + $0xd30] sm:$0xff] }
 0x2e9   :  { %4798 = vmatprep.subr.bf16.mxu1 %v5403_v7  ;;  %v1471_v26 = vld [vmem:[#allocation8 + $0xbb8] sm:$0xff]  ;;  %v5448_v7 = vcombine.low %v1458_v49, %v1462_v24 }
 0x2ea   :  { %v5459_v60 = vcombine.high %v1467_v58, %v1471_v26  ;;  %v5458_v61 = vcombine.low %v1467_v58, %v1471_v26  ;;  %v1526_v58 = vld [vmem:[#allocation8 + $0xd70] sm:$0xff]  ;;  %v1523_v26 = vld [vmem:[#allocation8 + $0xd58] sm:$0xff] }
 0x2eb   :  { %4635 = vmatpush1.bf16.msra.mxu0 %v5400_v63  ;;  %v1478_v63 = vld [vmem:[#allocation8 + $0xbf0] sm:$0xff] }
 0x2ec   :  { %4799 = vmatpush1.bf16.msra.mxu1 %v5402_v4  ;;  %4636 = vmatprep.subr.bf16.mxu0 %v5409_v8  ;;  %v1475_v4 = vld [vmem:[#allocation8 + $0xbd8] sm:$0xff]  ;;  %v5465_v40 = vcombine.high %v1474_v62, %v1478_v63 }
 0x2ed   :  { %4800 = vmatprep.subr.bf16.mxu1 %v5411_v55  ;;  %v1479_v8 = vld [vmem:[#allocation8 + $0xbf8] sm:$0xff]  ;;  %v5456_v55 = vcombine.low %v1466_v54, %v1470_v57  ;;  %v1522_v57 = vld [vmem:[#allocation8 + $0xd50] sm:$0xff] }
 0x2ee   :  { %v5467_v2 = vcombine.high %v1475_v4, %v1479_v8  ;;  %v5466_v14 = vcombine.low %v1475_v4, %v1479_v8  ;;  %v1530_v4 = vld [vmem:[#allocation8 + $0xd90] sm:$0xff] }
 0x2ef   :  { %4637 = vmatpush1.bf16.msra.mxu0 %v5408_v6  ;;  %v1486_v6 = vld [vmem:[#allocation8 + $0xc30] sm:$0xff] }
 0x2f0   :  { %4801 = vmatpush1.bf16.msra.mxu1 %v5410_v10  ;;  %4638 = vmatprep.subr.bf16.mxu0 %v5417_v11  ;;  %v1483_v10 = vld [vmem:[#allocation8 + $0xc18] sm:$0xff]  ;;  %v5473_v17 = vcombine.high %v1482_v5, %v1486_v6  ;;  %v1534_v8 = vld [vmem:[#allocation8 + $0xdb0] sm:$0xff] }
 0x2f1   :  { %4802 = vmatprep.subr.bf16.mxu1 %v5419_v13  ;;  %v1487_v11 = vld [vmem:[#allocation8 + $0xc38] sm:$0xff]  ;;  %v5464_v13 = vcombine.low %v1474_v62, %v1478_v63  ;;  %v5513_v62 = vcombine.high %v1522_v57, %v1526_v58 }
 0x2f2   :  { %v5475_v15 = vcombine.high %v1483_v10, %v1487_v11  ;;  %v5474_v21 = vcombine.low %v1483_v10, %v1487_v11  ;;  %v5512_v11 = vcombine.low %v1522_v57, %v1526_v58 }
 0x2f3   :  { %4639 = vmatpush1.bf16.msra.mxu0 %v5416_v18  ;;  %v1494_v18 = vld [vmem:[#allocation8 + $0xc70] sm:$0xff] }
 0x2f4   :  { %4803 = vmatpush1.bf16.msra.mxu1 %v5418_v19  ;;  %4640 = vmatprep.subr.bf16.mxu0 %v5425_v20  ;;  %v5472_v19 = vcombine.low %v1482_v5, %v1486_v6  ;;  %v1491_v20 = vld [vmem:[#allocation8 + $0xc58] sm:$0xff]  ;;  %v5481_v29 = vcombine.high %v1490_v43, %v1494_v18  ;;  %v6070_v5 = vld [vmem:[#allocation11] sm:$0xff] }
 0x2f5   :  { %4804 = vmatprep.subr.bf16.mxu1 %v5427_v23  ;;  %v1495_v23 = vld [vmem:[#allocation8 + $0xc78] sm:$0xff] }
 0x2f6   :  { %v5482_v37 = vcombine.low %v1491_v20, %v1495_v23 }
 0x2f7   :  { %4641 = vmatpush1.bf16.msra.mxu0 %v5424_v30  ;;  %v5483_v30 = vcombine.high %v1491_v20, %v1495_v23  ;;  %v4879_v23 = vrot.slane %v6070_v5, %v5960_v25 }
 0x2f8   :  { %4805 = vmatpush1.bf16.msra.mxu1 %v5426_v33  ;;  %4642 = vmatprep.subr.bf16.mxu0 %v5433_v34  ;;  %v1499_v33 = vld [vmem:[#allocation8 + $0xc98] sm:$0xff] }
 0x2f9   :  { %4806 = vmatprep.subr.bf16.mxu1 %v5435_v35  ;;  %v1503_v34 = vld [vmem:[#allocation8 + $0xcb8] sm:$0xff]  ;;  %v5480_v35 = vcombine.low %v1490_v43, %v1494_v18  ;;  %v1538_v18 = vld [vmem:[#allocation8 + $0xdd0] sm:$0xff] }
 0x2fa   :  { %v5491_v39 = vcombine.high %v1499_v33, %v1503_v34 }
 0x2fb   :  { %4643 = vmatpush1.bf16.msra.mxu0 %v5432_v45  ;;  %v1510_v45 = vld [vmem:[#allocation8 + $0xcf0] sm:$0xff] }
 0x2fc   :  { %4807 = vmatpush1.bf16.msra.mxu1 %v5434_v46  ;;  %4644 = vmatprep.subr.bf16.mxu0 %v5441_v48  ;;  %v1507_v46 = vld [vmem:[#allocation8 + $0xcd8] sm:$0xff]  ;;  %v5497_v49 = vcombine.high %v1506_v41, %v1510_v45 }
 0x2fd   :  { %4808 = vmatprep.subr.bf16.mxu1 %v5443_v3  ;;  %v1511_v48 = vld [vmem:[#allocation8 + $0xcf8] sm:$0xff]  ;;  %v5488_v3 = vcombine.low %v1498_v22, %v1502_v28 }
 0x2fe   :  { %v5499_v24 = vcombine.high %v1507_v46, %v1511_v48  ;;  %v1539_v28 = vld [vmem:[#allocation8 + $0xdd8] sm:$0xff] }
 0x2ff   :  { %4645 = vmatpush1.bf16.msra.mxu0 %v5440_v52  ;;  %v1515_v52 = vld [vmem:[#allocation8 + $0xd18] sm:$0xff] }
 0x300   :  { %4809 = vmatpush1.bf16.msra.mxu1 %v5442_v44  ;;  %4646 = vmatprep.subr.bf16.mxu0 %v5449_v36  ;;  %v1519_v44 = vld [vmem:[#allocation8 + $0xd38] sm:$0xff]  ;;  %v5498_v36 = vcombine.low %v1507_v46, %v1511_v48 }
 0x301   :  { %4810 = vmatprep.subr.bf16.mxu1 %v5451_v53  ;;  %v5505_v53 = vcombine.high %v1514_v50, %v1518_v51  ;;  %v5507_v54 = vcombine.high %v1515_v52, %v1519_v44 }
 0x303   :  { %4647 = vmatpush1.bf16.msra.mxu0 %v5448_v7  ;;  %v1527_v7 = vld [vmem:[#allocation8 + $0xd78] sm:$0xff] }
 0x304   :  { %4811 = vmatpush1.bf16.msra.mxu1 %v5450_v59  ;;  %4648 = vmatprep.subr.bf16.mxu0 %v5457_v0  ;;  %v5504_v59 = vcombine.low %v1514_v50, %v1518_v51  ;;  %v6064_v0 = vld [vmem:[#allocation10] sm:$0xff]  ;;  %v5515_v63 = vcombine.high %v1523_v26, %v1527_v7  ;;  %v1550_v50 = vld [vmem:[#allocation8 + $0xe30] sm:$0xff] }
 0x305   :  { %4812 = vmatprep.subr.bf16.mxu1 %v5459_v60  ;;  %v5506_v60 = vcombine.low %v1515_v52, %v1519_v44  ;;  %v1617_v6 = vrot.slane %v6064_v0, %v5965_v27  ;;  %v1625_v10 = vrot.slane %v6064_v0, %v5972_v42  ;;  %v1547_v52 = vld [vmem:[#allocation8 + $0xe18] sm:$0xff] }
 0x306   :  { %v1551_v44 = vld [vmem:[#allocation8 + $0xe38] sm:$0xff] }
 0x307   :  { %4649 = vmatpush1.bf16.msra.mxu0 %v5456_v55  ;;  %v1613_v55 = vrot.slane %v6064_v0, %v5960_v25 }
 0x308   :  { %4813 = vmatpush1.bf16.msra.mxu1 %v5458_v61  ;;  %4650 = vmatprep.subr.bf16.mxu0 %v5465_v40  ;;  %v1621_v61 = vrot.slane %v6064_v0, %v5997_v32  ;;  %v1531_v40 = vld [vmem:[#allocation8 + $0xd98] sm:$0xff] }
 0x309   :  { %4814 = vmatprep.subr.bf16.mxu1 %v5467_v2  ;;  %v1535_v2 = vld [vmem:[#allocation8 + $0xdb8] sm:$0xff] }
 0x30a   :  { %v5523_v43 = vcombine.high %v1531_v40, %v1535_v2  ;;  %v5522_v25 = vcombine.low %v1531_v40, %v1535_v2 }
 0x30b   :  { %4651 = vmatpush1.bf16.msra.mxu0 %v5464_v13  ;;  %v5514_v13 = vcombine.low %v1523_v26, %v1527_v7  ;;  %v5539_v7 = vcombine.high %v1547_v52, %v1551_v44 }
 0x30c   :  { %4815 = vmatpush1.bf16.msra.mxu1 %v5466_v14  ;;  %4661 = vmatprep.subr.bf16.mxu0 %v5473_v17  ;;  %v5521_v14 = vcombine.high %v1530_v4, %v1534_v8 }
 0x30d   :  { %4825 = vmatprep.subr.bf16.mxu1 %v5475_v15 }
 0x30e   :  { %4653 = vmatmul.mubr.bf16.vlgmr.msra.gmra.mrb[12].mxu0 %v6033_v9 }
 0x30f   :  { %4817 = vmatmul.mubr.bf16.vlgmr.msra.gmra.mrb[12].mxu1 %v6033_v9  ;;  %4662 = vmatpush1.bf16.msra.mxu0 %v5472_v19  ;;  %v5490_v9 = vcombine.low %v1499_v33, %v1503_v34  ;;  %v1542_v19 = vld [vmem:[#allocation8 + $0xdf0] sm:$0xff]  ;;  %v4883_v34 = vrot.slane %v6070_v5, %v5965_v27 }
 0x310   :  { %4693 = vmatprep.mubr.bf16.mxu0 %v6035_v12  ;;  %4826 = vmatpush1.bf16.msra.mxu1 %v5474_v21  ;;  %v5529_v48 = vcombine.high %v1538_v18, %v1542_v19  ;;  %v1546_v27 = vld [vmem:[#allocation8 + $0xe10] sm:$0xff] }
 0x311   :  { %4857 = vmatprep.mubr.bf16.mxu1 %v6035_v12  ;;  %4663 = vmatprep.subr.bf16.mxu0 %v5481_v29  ;;  %v5496_v12 = vcombine.low %v1506_v41, %v1510_v45  ;;  %v5537_v58 = vcombine.high %v1546_v27, %v1550_v50 }
 0x312   :  { %4827 = vmatprep.subr.bf16.mxu1 %v5483_v30  ;;  %v1543_v30 = vld [vmem:[#allocation8 + $0xdf8] sm:$0xff] }
 0x313   :  { %4664 = vmatpush1.bf16.msra.mxu0 %v5480_v35  ;;  %v5530_v57 = vcombine.low %v1539_v28, %v1543_v30 }
 0x314   :  { %4828 = vmatpush1.bf16.msra.mxu1 %v5482_v37  ;;  %4665 = vmatprep.subr.bf16.mxu0 %v5489_v38 }
 0x315   :  { %4829 = vmatprep.subr.bf16.mxu1 %v5491_v39  ;;  %v5520_v39 = vcombine.low %v1530_v4, %v1534_v8 }
 0x317   :  { %4666 = vmatpush1.bf16.msra.mxu0 %v5488_v3 }
 0x318   :  { %4830 = vmatpush1.bf16.msra.mxu1 %v5490_v9  ;;  %4667 = vmatprep.subr.bf16.mxu0 %v5497_v49  ;;  %v4887_v9 = vrot.slane %v6070_v5, %v5997_v32 }
 0x319   :  { %4831 = vmatprep.subr.bf16.mxu1 %v5499_v24  ;;  %v5531_v24 = vcombine.high %v1539_v28, %v1543_v30  ;;  %v1578_v30 = vld [vmem:[#allocation8 + $0xf10] sm:$0xff] }
 0x31b   :  { %4668 = vmatpush1.bf16.msra.mxu0 %v5496_v12 }
 0x31c   :  { %4832 = vmatpush1.bf16.msra.mxu1 %v5498_v36  ;;  %4669 = vmatprep.subr.bf16.mxu0 %v5505_v53  ;;  %v4891_v53 = vrot.slane %v6070_v5, %v5972_v42  ;;  %v5538_v42 = vcombine.low %v1547_v52, %v1551_v44  ;;  %v1599_v52 = vld [vmem:[#allocation8 + $0xfb8] sm:$0xff] }
 0x31d   :  { %4833 = vmatprep.subr.bf16.mxu1 %v5507_v54  ;;  %v5528_v54 = vcombine.low %v1538_v18, %v1542_v19  ;;  %v1570_v18 = vld [vmem:[#allocation8 + $0xed0] sm:$0xff] }
 0x31e   :  { %v1574_v19 = vld [vmem:[#allocation8 + $0xef0] sm:$0xff] }
 0x31f   :  { %4670 = vmatpush1.bf16.msra.mxu0 %v5504_v59  ;;  %v1554_v59 = vld [vmem:[#allocation8 + $0xe50] sm:$0xff] }
 0x320   :  { %4834 = vmatpush1.bf16.msra.mxu1 %v5506_v60  ;;  %4671 = vmatprep.subr.bf16.mxu0 %v5513_v62  ;;  %v1558_v60 = vld [vmem:[#allocation8 + $0xe70] sm:$0xff]  ;;  %v1555_v62 = vld [vmem:[#allocation8 + $0xe58] sm:$0xff] }
 0x321   :  { %v4367_v17 = vpop.f32.mrb[8].mxu0  ;;  %v4531_v15 = vpop.f32.mrb[8].mxu1  ;;  %4835 = vmatprep.subr.bf16.mxu1 %v5515_v63  ;;  %v1559_v63 = vld [vmem:[#allocation8 + $0xe78] sm:$0xff] }
 0x322   :  { %v5597_v20 = vadd.f32 %v4367_v17, %v1613_v55  ;;  %v5599_v21 = vadd.f32 %v4531_v15, %v1621_v61  ;;  %v4369_v29 = vpop.f32.mrb[9].mxu0  ;;  %v4533_v22 = vpop.f32.mrb[9].mxu1  ;;  %v5536_v55 = vcombine.low %v1546_v27, %v1550_v50  ;;  %v5545_v61 = vcombine.high %v1554_v59, %v1558_v60  ;;  %v1594_v27 = vld [vmem:[#allocation8 + $0xf90] sm:$0xff] }
 0x323   :  { %v5598_v33 = vadd.f32 %v4369_v29, %v1617_v6  ;;  %v5600_v35 = vadd.f32 %v4533_v22, %v1625_v10  ;;  %v4371_v37 = vpop.f32.mrb[10].mxu0  ;;  %v4535_v38 = vpop.f32.mrb[10].mxu1  ;;  %4672 = vmatpush1.bf16.msra.mxu0 %v5512_v11  ;;  %v5547_v2 = vcombine.high %v1555_v62, %v1559_v63  ;;  %v1562_v6 = vld [vmem:[#allocation8 + $0xe90] sm:$0xff]  ;;  %v1563_v11 = vld [vmem:[#allocation8 + $0xe98] sm:$0xff]  ;;  %v5546_v17 = vcombine.low %v1555_v62, %v1559_v63 }
 0x324   :  { %v4866_v41 = vmax.f32 %v5597_v20, 0.0  ;;  %4836 = vmatpush1.bf16.msra.mxu1 %v5514_v13  ;;  %v4372_v45 = vpop.f32.mrb[11].mxu0  ;;  %v4536_v46 = vpop.f32.mrb[11].mxu1  ;;  %4673 = vmatprep.subr.bf16.mxu0 %v5521_v14  ;;  %v4868_v3 = vmax.f32 %v5599_v21, 0.0  ;;  %v1566_v10 = vld [vmem:[#allocation8 + $0xeb0] sm:$0xff]  ;;  %v1567_v13 = vld [vmem:[#allocation8 + $0xeb8] sm:$0xff]  ;;  %v5544_v14 = vcombine.low %v1554_v59, %v1558_v60  ;;  %v5561_v22 = vcombine.high %v1570_v18, %v1574_v19 }
 0x325   :  { %v4867_v49 = vmax.f32 %v5598_v33, 0.0  ;;  %4837 = vmatprep.subr.bf16.mxu1 %v5523_v43  ;;  %v4869_v36 = vmax.f32 %v5600_v35, 0.0  ;;  %v5553_v15 = vcombine.high %v1562_v6, %v1566_v10  ;;  %v5555_v43 = vcombine.high %v1563_v11, %v1567_v13  ;;  %v1571_v20 = vld [vmem:[#allocation8 + $0xed8] sm:$0xff]  ;;  %v1582_v33 = vld [vmem:[#allocation8 + $0xf30] sm:$0xff] }
 0x326   :  { %v4916_v51 = vmul.f32 %v4879_v23, %v4866_v41  ;;  %v4918_v32 = vmul.f32 %v4887_v9, %v4868_v3  ;;  %v1575_v23 = vld [vmem:[#allocation8 + $0xef8] sm:$0xff]  ;;  %v5552_v21 = vcombine.low %v1562_v6, %v1566_v10  ;;  %v5554_v29 = vcombine.low %v1563_v11, %v1567_v13  ;;  %v1586_v45 = vld [vmem:[#allocation8 + $0xf50] sm:$0xff] }
 0x327   :  { %v4917_v12 = vmul.f32 %v4883_v34, %v4867_v49  ;;  %4674 = vmatpush1.bf16.msra.mxu0 %v5520_v39  ;;  %v4919_v4 = vmul.f32 %v4891_v53, %v4869_v36  ;;  %v5563_v28 = vcombine.high %v1571_v20, %v1575_v23  ;;  %v1579_v34 = vld [vmem:[#allocation8 + $0xf18] sm:$0xff]  ;;  %v5560_v37 = vcombine.low %v1570_v18, %v1574_v19  ;;  %v1590_v46 = vld [vmem:[#allocation8 + $0xf70] sm:$0xff] }
 0x328   :  { %4838 = vmatpush1.bf16.msra.mxu1 %v5522_v25  ;;  %4675 = vmatprep.subr.bf16.mxu0 %v5529_v48  ;;  %v1583_v35 = vld [vmem:[#allocation8 + $0xf38] sm:$0xff]  ;;  %v5562_v38 = vcombine.low %v1571_v20, %v1575_v23  ;;  %v5569_v39 = vcombine.high %v1578_v30, %v1582_v33  ;;  %v5568_v3 = vcombine.low %v1578_v30, %v1582_v33  ;;  %v1598_v50 = vld [vmem:[#allocation8 + $0xfb0] sm:$0xff] }
 0x329   :  { %v4924_v26 = vadd.f32 %v4917_v12, %v4916_v51  ;;  %4839 = vmatprep.subr.bf16.mxu1 %v5531_v24  ;;  %v5571_v41 = vcombine.high %v1579_v34, %v1583_v35  ;;  %v1587_v25 = vld [vmem:[#allocation8 + $0xf58] sm:$0xff]  ;;  %v5570_v9 = vcombine.low %v1579_v34, %v1583_v35  ;;  %v5577_v49 = vcombine.high %v1586_v45, %v1590_v46 }
 0x32a   :  { %v1591_v48 = vld [vmem:[#allocation8 + $0xf78] sm:$0xff]  ;;  %v5576_v44 = vcombine.low %v1586_v45, %v1590_v46  ;;  %v5585_v36 = vcombine.high %v1594_v27, %v1598_v50  ;;  %v4895_v6 = vrot.slane %v6070_v5, %v6022_v16 }
 0x32b   :  { %v4925_v8 = vadd.f32 %v4924_v26, %v4918_v32  ;;  %4676 = vmatpush1.bf16.msra.mxu0 %v5528_v54  ;;  %v5579_v24 = vcombine.high %v1587_v25, %v1591_v48  ;;  %v1595_v51 = vld [vmem:[#allocation8 + $0xf98] sm:$0xff]  ;;  %v5578_v12 = vcombine.low %v1587_v25, %v1591_v48  ;;  %v1602_v54 = vld [vmem:[#allocation8 + $0xfd0] sm:$0xff]  ;;  %v5584_v26 = vcombine.low %v1594_v27, %v1598_v50 }
 0x32c   :  { %4840 = vmatpush1.bf16.msra.mxu1 %v5530_v57  ;;  %4677 = vmatprep.subr.bf16.mxu0 %v5537_v58  ;;  %v5587_v53 = vcombine.high %v1595_v51, %v1599_v52  ;;  %v1606_v57 = vld [vmem:[#allocation8 + $0xff0] sm:$0xff]  ;;  %v1603_v58 = vld [vmem:[#allocation8 + $0xfd8] sm:$0xff] }
 0x32d   :  { %v6084_v40 = vadd.f32 %v4925_v8, %v4919_v4  ;;  %4841 = vmatprep.subr.bf16.mxu1 %v5539_v7  ;;  %v1607_v32 = vld [vmem:[#allocation8 + $0xff8] sm:$0xff]  ;;  %v5586_v7 = vcombine.low %v1595_v51, %v1599_v52  ;;  %v5593_v59 = vcombine.high %v1602_v54, %v1606_v57  ;;  %v5592_v62 = vcombine.low %v1602_v54, %v1606_v57 }
 0x32e   :  { %v5595_v60 = vcombine.high %v1603_v58, %v1607_v32  ;;  %v5594_v63 = vcombine.low %v1603_v58, %v1607_v32  ;;  %v1629_v4 = vrot.slane %v6064_v0, %v6022_v16  ;;  %v1637_v8 = vrot.slane %v6064_v0, %v6042_v1 }
 0x32f   :  { %4678 = vmatpush1.bf16.msra.mxu0 %v5536_v55  ;;  %v1633_v55 = vrot.slane %v6064_v0, %v6002_v47  ;;  %v4903_v16 = vrot.slane %v6070_v5, %v6042_v1 }
 0x330   :  { %4842 = vmatpush1.bf16.msra.mxu1 %v5538_v42  ;;  %4679 = vmatprep.subr.bf16.mxu0 %v5545_v61  ;;  %v1641_v42 = vrot.slane %v6064_v0, %v6025_v31 }
 0x331   :  { %4843 = vmatprep.subr.bf16.mxu1 %v5547_v2 }
 0x333   :  { %4680 = vmatpush1.bf16.msra.mxu0 %v5544_v14  ;;  %v4899_v14 = vrot.slane %v6070_v5, %v6002_v47  ;;  %v4907_v47 = vrot.slane %v6070_v5, %v6025_v31 }
 0x334   :  { %4844 = vmatpush1.bf16.msra.mxu1 %v5546_v17  ;;  %4681 = vmatprep.subr.bf16.mxu0 %v5553_v15 }
 0x335   :  { %4845 = vmatprep.subr.bf16.mxu1 %v5555_v43 }
 0x337   :  { %4682 = vmatpush1.bf16.msra.mxu0 %v5552_v21 }
 0x338   :  { %4846 = vmatpush1.bf16.msra.mxu1 %v5554_v29  ;;  %4683 = vmatprep.subr.bf16.mxu0 %v5561_v22 }
 0x339   :  { %4847 = vmatprep.subr.bf16.mxu1 %v5563_v28 }
 0x33b   :  { %4684 = vmatpush1.bf16.msra.mxu0 %v5560_v37 }
 0x33c   :  { %4848 = vmatpush1.bf16.msra.mxu1 %v5562_v38  ;;  %4685 = vmatprep.subr.bf16.mxu0 %v5569_v39  ;;  %v5596_v39 = vld [vmem:[#allocation2] ss:$0 sm:$0xff] }
 0x33d   :  { %4849 = vmatprep.subr.bf16.mxu1 %v5571_v41 }
 0x33f   :  { %4686 = vmatpush1.bf16.msra.mxu0 %v5568_v3 }
 0x340   :  { %4850 = vmatpush1.bf16.msra.mxu1 %v5570_v9  ;;  %4687 = vmatprep.subr.bf16.mxu0 %v5577_v49 }
 0x341   :  { %4851 = vmatprep.subr.bf16.mxu1 %v5579_v24 }
 0x343   :  { %4688 = vmatpush1.bf16.msra.mxu0 %v5576_v44 }
 0x344   :  { %4852 = vmatpush1.bf16.msra.mxu1 %v5578_v12  ;;  %4689 = vmatprep.subr.bf16.mxu0 %v5585_v36 }
 0x345   :  { %4853 = vmatprep.subr.bf16.mxu1 %v5587_v53 }
 0x347   :  { %4690 = vmatpush1.bf16.msra.mxu0 %v5584_v26 }
 0x348   :  { %4854 = vmatpush1.bf16.msra.mxu1 %v5586_v7  ;;  %4691 = vmatprep.subr.bf16.mxu0 %v5593_v59 }
 0x349   :  { %4855 = vmatprep.subr.bf16.mxu1 %v5595_v60 }
 0x34b   :  { %4692 = vmatpush1.bf16.msra.mxu0 %v5592_v62 }
 0x34c   :  { %4856 = vmatpush1.bf16.msra.mxu1 %v5594_v63 }
 0x34e   :  { %4694 = vmatmul.mubr.bf16.vlgmr.msra.gmra.mrb[12].mxu0 %v6046_v56 }
 0x34f   :  { %4858 = vmatmul.mubr.bf16.vlgmr.msra.gmra.mrb[12].mxu1 %v6046_v56 }
 0x421   :  { %v4695_v61 = vpop.f32.mrb[12].mxu0 }
 0x422   :  { %v5601_v2 = vadd.f32 %v4695_v61, %v1629_v4  ;;  %v4859_v10 = vpop.f32.mrb[12].mxu1  ;;  %v4697_v11 = vpop.f32.mrb[13].mxu0 }
 0x423   :  { %v5603_v56 = vadd.f32 %v4859_v10, %v1637_v8  ;;  %v5602_v13 = vadd.f32 %v4697_v11, %v1633_v55  ;;  %v4861_v17 = vpop.f32.mrb[13].mxu1  ;;  %v4699_v15 = vpop.f32.mrb[14].mxu0 }
 0x424   :  { %v4870_v43 = vmax.f32 %v5601_v2, 0.0  ;;  %v5604_v18 = vadd.f32 %v4861_v17, %v1641_v42  ;;  %v4863_v19 = vpop.f32.mrb[14].mxu1  ;;  %v4700_v20 = vpop.f32.mrb[15].mxu0 }
 0x425   :  { %v4871_v23 = vmax.f32 %v5602_v13, 0.0  ;;  %v4864_v0 = vpop.f32.mrb[15].mxu1  ;;  %v4872_v29 = vmax.f32 %v5603_v56, 0.0 }
 0x426   :  { %v4920_v21 = vmul.f32 %v4895_v6, %v4870_v43  ;;  %v4873_v30 = vmax.f32 %v5604_v18, 0.0 }
 0x427   :  { %v4921_v22 = vmul.f32 %v4899_v14, %v4871_v23  ;;  %v4922_v33 = vmul.f32 %v4903_v16, %v4872_v29 }
 0x428   :  { %v4927_v28 = vadd.f32 %v6084_v40, %v4920_v21  ;;  %v4923_v35 = vmul.f32 %v4907_v47, %v4873_v30 }
 0x42a   :  { %v4928_v34 = vadd.f32 %v4927_v28, %v4921_v22 }
 0x42c   :  { %v4929_v37 = vadd.f32 %v4928_v34, %v4922_v33 }
 0x42e   :  { %v4930_v38 = vadd.f32 %v4929_v37, %v4923_v35 }
 0x430   :  { %4931 = vadd.xlane.f32.xlu0 %v4930_v38 }
 0x4bd   :  { %v4932_v41 = vpop.xlane.xlu0 %4931 }
 0x4be   :  { %v4940_v45 = vadd.f32 %v5596_v39, %v4932_v41 }
 0x4c0   :  { %v4941_v46 = vsub.f32 0.0, %v4940_v45 }
 0x4c2   :  { %v4942_v25 = vmul.f32 1.442695, %v4941_v46 }
 0x4c4   :  { %5661 = vpow2.f32 %v4942_v25 }
 0x4ce   :  { %v5662_v1 = vpop.eup %5661 }
 0x4cf   :  { %v4944_v48 = vadd.f32 1.0, %v5662_v1 }
 0x4d1   :  { %5663 = vrcp.f32 %v4944_v48 }
 0x4db   :  { %v5664_v40 = vpop.eup %5663 }
 0x4dc   :  { %4947 = vst.msk [vmem:[%s6115_s7] sm:$0xff] %vm4946_vm0, %v5664_v40 }
 0x4dd   :  { %4952 = vsyncpa [#allocation4], 1 }
 0x4de   :  { %4953 = vsyncpa [#allocation6], 1 }
 0x4df   :  { %4954 = vsyncpa [#allocation9], 1 }
 0x4e0   :  { %4955 = vsyncpa [#allocation12], 1 }

</bundles_post_ra>
